<compile_context>
chip_gen: v7x
topology: tpu7x:2x2x1
jax: 0.10.0
libtpu: 0.0.40
codegen_flags: <defaults>
</compile_context>

<pallas_src>
import jax
import jax.numpy as jnp
from jax.experimental import pallas as pl
from jax.experimental.pallas import tpu as pltpu

LATENT = 100
LATENT_PAD = 128          # 100 -> 128 (one lane tile, clean MXU K on layer 1)
H1, H2, H3 = 256, 512, 1024
OUT = 784
OUT_PAD = 896             # 784 -> 896 = 7 * 128 (lane-dense output slab)

WEIGHT_ELEMS = LATENT_PAD * H1 + H1 * H2 + H2 * H3 + H3 * OUT_PAD

# Flipped to False the first time pl.Buffered(1) is rejected by the compiler,
# so subsequent calls don't pay a failed-compile attempt.
_SINGLE_BUFFER_OK = True


def _leaky_relu(x, slope=0.2):
    return jnp.where(x > 0, x, slope * x)


def _round_up(n, m):
    return ((n + m - 1) // m) * m


def generator_mlp_kernel(x_ref,
                         w1_ref, b1_ref,
                         w2_ref, b2_ref,
                         w3_ref, b3_ref,
                         w4_ref, b4_ref,
                         o_ref):
    """One batch tile of the 4-layer MLP, fully fused in VMEM.

    x_ref:  (TB, 128)  bf16 (zero-padded latent, cast in the wrapper)
    w*_ref: (in, out)  bf16 resident weight tiles, b*_ref: (1, out) f32 biases
    o_ref:  (TB, 896)  f32 (zero-padded output)
    """
    h = x_ref[...]                                                     # bf16

    h = jnp.dot(h, w1_ref[...], preferred_element_type=jnp.float32) + b1_ref[...]
    h = _leaky_relu(h).astype(jnp.bfloat16)

    h = jnp.dot(h, w2_ref[...], preferred_element_type=jnp.float32) + b2_ref[...]
    h = _leaky_relu(h).astype(jnp.bfloat16)

    h = jnp.dot(h, w3_ref[...], preferred_element_type=jnp.float32) + b3_ref[...]
    h = _leaky_relu(h).astype(jnp.bfloat16)

    h = jnp.dot(h, w4_ref[...], preferred_element_type=jnp.float32) + b4_ref[...]
    o_ref[...] = jnp.tanh(h)


def _vmem_limit_bytes():
    """Per-generation VMEM request: ~half of physical, clamped to [32, 64] MiB."""
    try:
        cap = pltpu.get_tpu_info().vmem_capacity_bytes
    except Exception:
        return 32 << 20
    return int(min(64 << 20, max(32 << 20, cap // 2)))


def _build_generator_call(TB, Bp, vmem_limit, single_buffer_weights):
    if single_buffer_weights:
        resident_kwargs = {"pipeline_mode": pl.Buffered(1)}
    else:
        resident_kwargs = {}

    def resident(shape):
        # Constant block index -> stays in VMEM across all grid steps; single
        # buffer is enough since the block never changes.
        return pl.BlockSpec(shape, lambda i: (0, 0), **resident_kwargs)

    in_specs = [
        pl.BlockSpec((TB, LATENT_PAD), lambda i: (i, 0)),   # x tile (bf16)
        resident((LATENT_PAD, H1)), resident((1, H1)),
        resident((H1, H2)),         resident((1, H2)),
        resident((H2, H3)),         resident((1, H3)),
        resident((H3, OUT_PAD)),    resident((1, OUT_PAD)),
    ]
    out_spec = pl.BlockSpec((TB, OUT_PAD), lambda i: (i, 0))

    flops = 2 * Bp * WEIGHT_ELEMS
    bytes_accessed = (Bp * LATENT_PAD * 2            # bf16 x tiles
                      + Bp * OUT_PAD * 4             # f32 output tiles
                      + WEIGHT_ELEMS * 2             # bf16 weights
                      + (H1 + H2 + H3 + OUT_PAD) * 4)  # f32 biases

    return pl.pallas_call(
        generator_mlp_kernel,
        out_shape=jax.ShapeDtypeStruct((Bp, OUT_PAD), jnp.float32),
        grid=(Bp // TB,),
        in_specs=in_specs,
        out_specs=out_spec,
        compiler_params=pltpu.CompilerParams(
            dimension_semantics=("parallel",),
            vmem_limit_bytes=vmem_limit,
        ),
        cost_estimate=pl.CostEstimate(
            flops=flops,
            transcendentals=Bp * OUT_PAD,            # tanh
            bytes_accessed=bytes_accessed,
        ),
    )


def generator_forward(x, padded_params, *, batch_tile=512):
    """x: any shape with leading batch dim and 100 total features per sample
    (mirrors torch's x.view(x.size(0), 100)).  `padded_params` must come from
    prepare_generator_params (pre-padded, done once).  Returns (B, 784) f32."""
    global _SINGLE_BUFFER_OK

    B = x.shape[0]
    x2 = jnp.reshape(x, (B, LATENT)).astype(jnp.bfloat16)

    # Batch tile: 512 amortizes per-step overhead and MXU fill/drain; tiny
    # batches round up to the 16-row bf16 sublane granule.
    TB = min(batch_tile, _round_up(B, 16))
    # v7x megacore: guarantee >= 2 grid steps when there's enough work so the
    # "parallel" axis feeds both TensorCores (no-op / harmless on v5e & v6e).
    if _round_up(B, TB) // TB < 2 and B >= 32:
        TB = _round_up((B + 1) // 2, 16)
    Bp = _round_up(B, TB)

    # Zero-pad batch rows B->Bp and latent cols 100->128 (W1 has matching zero
    # rows).  Zeros contribute nothing to the affine layers.
    x_pad = jnp.pad(x2, ((0, Bp - B), (0, LATENT_PAD - LATENT)))

    args = (x_pad,) + tuple(padded_params)
    vmem_limit = _vmem_limit_bytes()

    if _SINGLE_BUFFER_OK:
        try:
            out = _build_generator_call(TB, Bp, vmem_limit, True)(*args)
            out = jax.block_until_ready(out)
            return out[:B, :OUT]
        except Exception:
            _SINGLE_BUFFER_OK = False   # fall back to default double-buffering

    out = _build_generator_call(TB, Bp, vmem_limit, False)(*args)
    return out[:B, :OUT]


def init_generator_params(key):
    """Deterministic init matching PyTorch Linear default U[-1/sqrt(in), 1/sqrt(in)].
    Weights stored as (in, out) in bf16; biases as (1, out) in f32."""
    sizes = [(LATENT, H1), (H1, H2), (H2, H3), (H3, OUT)]
    params = []
    for (fan_in, fan_out) in sizes:
        key, kw, kb = jax.random.split(key, 3)
        bound = 1.0 / (fan_in ** 0.5)
        w = jax.random.uniform(kw, (fan_in, fan_out), jnp.float32, -bound, bound)
        b = jax.random.uniform(kb, (1, fan_out), jnp.float32, -bound, bound)
        params += [w.astype(jnp.bfloat16), b]
    return tuple(params)


def prepare_generator_params(params):
    """One-time prep: pad w1 rows 100->128 and w4/b4 cols 784->896 so the
    per-call path never touches the weights.  Call once, reuse the result."""
    (w1, b1, w2, b2, w3, b3, w4, b4) = params
    w1p = jnp.pad(w1, ((0, LATENT_PAD - LATENT), (0, 0)))
    w4p = jnp.pad(w4, ((0, 0), (0, OUT_PAD - OUT)))
    b4p = jnp.pad(b4, ((0, 0), (0, OUT_PAD - OUT)))
    return (w1p, b1, w2, b2, w3, b3, w4p, b4p)


def generator_forward_ref(x, params):
    """Pure-JAX f32 reference (weights de-quantized from bf16) for correctness."""
    B = x.shape[0]
    h = jnp.reshape(x, (B, LATENT)).astype(jnp.float32)
    (w1, b1, w2, b2, w3, b3, w4, b4) = params

    def lin(h, w, b):
        return h @ w.astype(jnp.float32) + b

    h = _leaky_relu(lin(h, w1, b1))
    h = _leaky_relu(lin(h, w2, b2))
    h = _leaky_relu(lin(h, w3, b3))
    return jnp.tanh(lin(h, w4, b4))


if __name__ == "__main__":
    key = jax.random.PRNGKey(0)
    kp, kx = jax.random.split(key)

    params = init_generator_params(kp)
    padded_params = prepare_generator_params(params)   # one-time prep
    padded_params = jax.block_until_ready(padded_params)

    # Small batch of latent vectors, z ~ N(0, 1), shape (B, 100)
    B = 2
    x = jax.random.normal(kx, (B, 100), jnp.float32)

    out = generator_forward(x, padded_params)
    out = jax.block_until_ready(out)

    ref = generator_forward_ref(x, params)
    assert out.shape == (B, 784), out.shape
    # bf16 activations/weights in the kernel vs f32 reference -> loose tolerance.
    assert jnp.allclose(out, ref, atol=3e-2, rtol=3e-2), "mismatch vs reference"

    print("KERNEL_OK")
</pallas_src>

<mosaic_0001>
module attributes {stable_mosaic.version = 11 : i64} {
  func.func @generator_mlp_kernel(%arg0: i32, %arg1: memref<16x128xbf16, #tpu.memory_space<vmem>>, %arg2: memref<128x256xbf16, #tpu.memory_space<vmem>>, %arg3: memref<1x256xf32, #tpu.memory_space<vmem>>, %arg4: memref<256x512xbf16, #tpu.memory_space<vmem>>, %arg5: memref<1x512xf32, #tpu.memory_space<vmem>>, %arg6: memref<512x1024xbf16, #tpu.memory_space<vmem>>, %arg7: memref<1x1024xf32, #tpu.memory_space<vmem>>, %arg8: memref<1024x896xbf16, #tpu.memory_space<vmem>>, %arg9: memref<1x896xf32, #tpu.memory_space<vmem>>, %arg10: memref<16x896xf32, #tpu.memory_space<vmem>>) attributes {dimension_semantics = [#tpu.dimension_semantics<parallel>], iteration_bounds = array<i64: 1>, scalar_prefetch = 0 : i64, scratch_operands = 0 : i64, tpu.core_type = #tpu.core_type<tc>, window_params = [{transform_indices = @transform_0, window_bounds = array<i64: 16, 128>}, {pipeline_mode = #tpu.pipeline_mode<synchronous>, transform_indices = @transform_1, window_bounds = array<i64: 128, 256>}, {pipeline_mode = #tpu.pipeline_mode<synchronous>, transform_indices = @transform_2, window_bounds = array<i64: 1, 256>}, {pipeline_mode = #tpu.pipeline_mode<synchronous>, transform_indices = @transform_3, window_bounds = array<i64: 256, 512>}, {pipeline_mode = #tpu.pipeline_mode<synchronous>, transform_indices = @transform_4, window_bounds = array<i64: 1, 512>}, {pipeline_mode = #tpu.pipeline_mode<synchronous>, transform_indices = @transform_5, window_bounds = array<i64: 512, 1024>}, {pipeline_mode = #tpu.pipeline_mode<synchronous>, transform_indices = @transform_6, window_bounds = array<i64: 1, 1024>}, {pipeline_mode = #tpu.pipeline_mode<synchronous>, transform_indices = @transform_7, window_bounds = array<i64: 1024, 896>}, {pipeline_mode = #tpu.pipeline_mode<synchronous>, transform_indices = @transform_8, window_bounds = array<i64: 1, 896>}, {transform_indices = @transform_9, window_bounds = array<i64: 16, 896>}]} {
    %c0 = arith.constant 0 : index
    %c0_0 = arith.constant 0 : index
    %0 = vector.load %arg1[%c0, %c0_0] : memref<16x128xbf16, #tpu.memory_space<vmem>>, vector<16x128xbf16>
    %c0_1 = arith.constant 0 : index
    %c0_2 = arith.constant 0 : index
    %1 = vector.load %arg2[%c0_1, %c0_2] : memref<128x256xbf16, #tpu.memory_space<vmem>>, vector<128x256xbf16>
    %cst = arith.constant dense<0.000000e+00> : vector<16x256xf32>
    %2 = tpu.matmul %0, %1, %cst {dimension_numbers = #tpu.dot_dimension_numbers<[1], [0], [0], [1], [0, 0, 1, 1], [], []>} : vector<16x128xbf16>, vector<128x256xbf16>, vector<16x256xf32> -> vector<16x256xf32>
    %c0_3 = arith.constant 0 : index
    %c0_4 = arith.constant 0 : index
    %3 = vector.load %arg3[%c0_3, %c0_4] : memref<1x256xf32, #tpu.memory_space<vmem>>, vector<1x256xf32>
    %4 = vector.broadcast %3 : vector<1x256xf32> to vector<16x256xf32>
    %5 = arith.addf %2, %4 : vector<16x256xf32>
    %cst_5 = arith.constant 0.000000e+00 : f32
    %6 = vector.broadcast %cst_5 : f32 to vector<16x256xf32>
    %7 = arith.cmpf ogt, %5, %6 : vector<16x256xf32>
    %cst_6 = arith.constant 2.000000e-01 : f32
    %8 = vector.broadcast %cst_6 : f32 to vector<16x256xf32>
    %9 = arith.mulf %8, %5 : vector<16x256xf32>
    %10 = arith.select %7, %5, %9 : vector<16x256xi1>, vector<16x256xf32>
    %11 = arith.truncf %10 : vector<16x256xf32> to vector<16x256xbf16>
    %c0_7 = arith.constant 0 : index
    %c0_8 = arith.constant 0 : index
    %12 = vector.load %arg4[%c0_7, %c0_8] : memref<256x512xbf16, #tpu.memory_space<vmem>>, vector<256x512xbf16>
    %cst_9 = arith.constant dense<0.000000e+00> : vector<16x512xf32>
    %13 = tpu.matmul %11, %12, %cst_9 {dimension_numbers = #tpu.dot_dimension_numbers<[1], [0], [0], [1], [0, 0, 1, 1], [], []>} : vector<16x256xbf16>, vector<256x512xbf16>, vector<16x512xf32> -> vector<16x512xf32>
    %c0_10 = arith.constant 0 : index
    %c0_11 = arith.constant 0 : index
    %14 = vector.load %arg5[%c0_10, %c0_11] : memref<1x512xf32, #tpu.memory_space<vmem>>, vector<1x512xf32>
    %15 = vector.broadcast %14 : vector<1x512xf32> to vector<16x512xf32>
    %16 = arith.addf %13, %15 : vector<16x512xf32>
    %cst_12 = arith.constant 0.000000e+00 : f32
    %17 = vector.broadcast %cst_12 : f32 to vector<16x512xf32>
    %18 = arith.cmpf ogt, %16, %17 : vector<16x512xf32>
    %cst_13 = arith.constant 2.000000e-01 : f32
    %19 = vector.broadcast %cst_13 : f32 to vector<16x512xf32>
    %20 = arith.mulf %19, %16 : vector<16x512xf32>
    %21 = arith.select %18, %16, %20 : vector<16x512xi1>, vector<16x512xf32>
    %22 = arith.truncf %21 : vector<16x512xf32> to vector<16x512xbf16>
    %c0_14 = arith.constant 0 : index
    %c0_15 = arith.constant 0 : index
    %23 = vector.load %arg6[%c0_14, %c0_15] : memref<512x1024xbf16, #tpu.memory_space<vmem>>, vector<512x1024xbf16>
    %cst_16 = arith.constant dense<0.000000e+00> : vector<16x1024xf32>
    %24 = tpu.matmul %22, %23, %cst_16 {dimension_numbers = #tpu.dot_dimension_numbers<[1], [0], [0], [1], [0, 0, 1, 1], [], []>} : vector<16x512xbf16>, vector<512x1024xbf16>, vector<16x1024xf32> -> vector<16x1024xf32>
    %c0_17 = arith.constant 0 : index
    %c0_18 = arith.constant 0 : index
    %25 = vector.load %arg7[%c0_17, %c0_18] : memref<1x1024xf32, #tpu.memory_space<vmem>>, vector<1x1024xf32>
    %26 = vector.broadcast %25 : vector<1x1024xf32> to vector<16x1024xf32>
    %27 = arith.addf %24, %26 : vector<16x1024xf32>
    %cst_19 = arith.constant 0.000000e+00 : f32
    %28 = vector.broadcast %cst_19 : f32 to vector<16x1024xf32>
    %29 = arith.cmpf ogt, %27, %28 : vector<16x1024xf32>
    %cst_20 = arith.constant 2.000000e-01 : f32
    %30 = vector.broadcast %cst_20 : f32 to vector<16x1024xf32>
    %31 = arith.mulf %30, %27 : vector<16x1024xf32>
    %32 = arith.select %29, %27, %31 : vector<16x1024xi1>, vector<16x1024xf32>
    %33 = arith.truncf %32 : vector<16x1024xf32> to vector<16x1024xbf16>
    %c0_21 = arith.constant 0 : index
    %c0_22 = arith.constant 0 : index
    %34 = vector.load %arg8[%c0_21, %c0_22] : memref<1024x896xbf16, #tpu.memory_space<vmem>>, vector<1024x896xbf16>
    %cst_23 = arith.constant dense<0.000000e+00> : vector<16x896xf32>
    %35 = tpu.matmul %33, %34, %cst_23 {dimension_numbers = #tpu.dot_dimension_numbers<[1], [0], [0], [1], [0, 0, 1, 1], [], []>} : vector<16x1024xbf16>, vector<1024x896xbf16>, vector<16x896xf32> -> vector<16x896xf32>
    %c0_24 = arith.constant 0 : index
    %c0_25 = arith.constant 0 : index
    %36 = vector.load %arg9[%c0_24, %c0_25] : memref<1x896xf32, #tpu.memory_space<vmem>>, vector<1x896xf32>
    %37 = vector.broadcast %36 : vector<1x896xf32> to vector<16x896xf32>
    %38 = arith.addf %35, %37 : vector<16x896xf32>
    %39 = math.tanh %38 : vector<16x896xf32>
    %c0_26 = arith.constant 0 : index
    %c0_27 = arith.constant 0 : index
    %40 = vector.load %arg10[%c0_26, %c0_27] : memref<16x896xf32, #tpu.memory_space<vmem>>, vector<16x896xf32>
    tpu.vector_store %arg10[%c0_26, %c0_27], %39 {strides = array<i32>} : memref<16x896xf32, #tpu.memory_space<vmem>>, vector<16x896xf32>,
    return
  }
  func.func @transform_0(%arg0: i32) -> (i32, i32) {
    %c0_i32 = arith.constant 0 : i32
    %c0_i32_0 = arith.constant 0 : i32
    return %arg0, %c0_i32 : i32, i32
  }
  func.func @transform_1(%arg0: i32) -> (i32, i32) {
    %c0_i32 = arith.constant 0 : i32
    %c0_i32_0 = arith.constant 0 : i32
    %c0_i32_1 = arith.constant 0 : i32
    return %c0_i32, %c0_i32_0 : i32, i32
  }
  func.func @transform_2(%arg0: i32) -> (i32, i32) {
    %c0_i32 = arith.constant 0 : i32
    %c0_i32_0 = arith.constant 0 : i32
    %c0_i32_1 = arith.constant 0 : i32
    return %c0_i32, %c0_i32_0 : i32, i32
  }
  func.func @transform_3(%arg0: i32) -> (i32, i32) {
    %c0_i32 = arith.constant 0 : i32
    %c0_i32_0 = arith.constant 0 : i32
    %c0_i32_1 = arith.constant 0 : i32
    return %c0_i32, %c0_i32_0 : i32, i32
  }
  func.func @transform_4(%arg0: i32) -> (i32, i32) {
    %c0_i32 = arith.constant 0 : i32
    %c0_i32_0 = arith.constant 0 : i32
    %c0_i32_1 = arith.constant 0 : i32
    return %c0_i32, %c0_i32_0 : i32, i32
  }
  func.func @transform_5(%arg0: i32) -> (i32, i32) {
    %c0_i32 = arith.constant 0 : i32
    %c0_i32_0 = arith.constant 0 : i32
    %c0_i32_1 = arith.constant 0 : i32
    return %c0_i32, %c0_i32_0 : i32, i32
  }
  func.func @transform_6(%arg0: i32) -> (i32, i32) {
    %c0_i32 = arith.constant 0 : i32
    %c0_i32_0 = arith.constant 0 : i32
    %c0_i32_1 = arith.constant 0 : i32
    return %c0_i32, %c0_i32_0 : i32, i32
  }
  func.func @transform_7(%arg0: i32) -> (i32, i32) {
    %c0_i32 = arith.constant 0 : i32
    %c0_i32_0 = arith.constant 0 : i32
    %c0_i32_1 = arith.constant 0 : i32
    return %c0_i32, %c0_i32_0 : i32, i32
  }
  func.func @transform_8(%arg0: i32) -> (i32, i32) {
    %c0_i32 = arith.constant 0 : i32
    %c0_i32_0 = arith.constant 0 : i32
    %c0_i32_1 = arith.constant 0 : i32
    return %c0_i32, %c0_i32_0 : i32, i32
  }
  func.func @transform_9(%arg0: i32) -> (i32, i32) {
    %c0_i32 = arith.constant 0 : i32
    %c0_i32_0 = arith.constant 0 : i32
    return %arg0, %c0_i32 : i32, i32
  }
}

module attributes {stable_mosaic.version = 11 : i64} {
  func.func @generator_mlp_kernel(%arg0: i32, %arg1: memref<16x128xbf16, #tpu.memory_space<vmem>>, %arg2: memref<128x256xbf16, #tpu.memory_space<vmem>>, %arg3: memref<1x256xf32, #tpu.memory_space<vmem>>, %arg4: memref<256x512xbf16, #tpu.memory_space<vmem>>, %arg5: memref<1x512xf32, #tpu.memory_space<vmem>>, %arg6: memref<512x1024xbf16, #tpu.memory_space<vmem>>, %arg7: memref<1x1024xf32, #tpu.memory_space<vmem>>, %arg8: memref<1024x896xbf16, #tpu.memory_space<vmem>>, %arg9: memref<1x896xf32, #tpu.memory_space<vmem>>, %arg10: memref<16x896xf32, #tpu.memory_space<vmem>>) attributes {dimension_semantics = [#tpu.dimension_semantics<parallel>], iteration_bounds = array<i64: 1>, scalar_prefetch = 0 : i64, scratch_operands = 0 : i64, tpu.core_type = #tpu.core_type<tc>, window_params = [{transform_indices = @transform_0, window_bounds = array<i64: 16, 128>}, {pipeline_mode = #tpu.pipeline_mode<synchronous>, transform_indices = @transform_1, window_bounds = array<i64: 128, 256>}, {pipeline_mode = #tpu.pipeline_mode<synchronous>, transform_indices = @transform_2, window_bounds = array<i64: 1, 256>}, {pipeline_mode = #tpu.pipeline_mode<synchronous>, transform_indices = @transform_3, window_bounds = array<i64: 256, 512>}, {pipeline_mode = #tpu.pipeline_mode<synchronous>, transform_indices = @transform_4, window_bounds = array<i64: 1, 512>}, {pipeline_mode = #tpu.pipeline_mode<synchronous>, transform_indices = @transform_5, window_bounds = array<i64: 512, 1024>}, {pipeline_mode = #tpu.pipeline_mode<synchronous>, transform_indices = @transform_6, window_bounds = array<i64: 1, 1024>}, {pipeline_mode = #tpu.pipeline_mode<synchronous>, transform_indices = @transform_7, window_bounds = array<i64: 1024, 896>}, {pipeline_mode = #tpu.pipeline_mode<synchronous>, transform_indices = @transform_8, window_bounds = array<i64: 1, 896>}, {transform_indices = @transform_9, window_bounds = array<i64: 16, 896>}]} {
    %c0 = arith.constant 0 : index
    %c0_0 = arith.constant 0 : index
    %0 = vector.load %arg1[%c0, %c0_0] : memref<16x128xbf16, #tpu.memory_space<vmem>>, vector<16x128xbf16>
    %c0_1 = arith.constant 0 : index
    %c0_2 = arith.constant 0 : index
    %1 = vector.load %arg2[%c0_1, %c0_2] : memref<128x256xbf16, #tpu.memory_space<vmem>>, vector<128x256xbf16>
    %cst = arith.constant dense<0.000000e+00> : vector<16x256xf32>
    %2 = tpu.matmul %0, %1, %cst {dimension_numbers = #tpu.dot_dimension_numbers<[1], [0], [0], [1], [0, 0, 1, 1], [], []>} : vector<16x128xbf16>, vector<128x256xbf16>, vector<16x256xf32> -> vector<16x256xf32>
    %c0_3 = arith.constant 0 : index
    %c0_4 = arith.constant 0 : index
    %3 = vector.load %arg3[%c0_3, %c0_4] : memref<1x256xf32, #tpu.memory_space<vmem>>, vector<1x256xf32>
    %4 = vector.broadcast %3 : vector<1x256xf32> to vector<16x256xf32>
    %5 = arith.addf %2, %4 : vector<16x256xf32>
    %cst_5 = arith.constant 0.000000e+00 : f32
    %6 = vector.broadcast %cst_5 : f32 to vector<16x256xf32>
    %7 = arith.cmpf ogt, %5, %6 : vector<16x256xf32>
    %cst_6 = arith.constant 2.000000e-01 : f32
    %8 = vector.broadcast %cst_6 : f32 to vector<16x256xf32>
    %9 = arith.mulf %8, %5 : vector<16x256xf32>
    %10 = arith.select %7, %5, %9 : vector<16x256xi1>, vector<16x256xf32>
    %11 = arith.truncf %10 : vector<16x256xf32> to vector<16x256xbf16>
    %c0_7 = arith.constant 0 : index
    %c0_8 = arith.constant 0 : index
    %12 = vector.load %arg4[%c0_7, %c0_8] : memref<256x512xbf16, #tpu.memory_space<vmem>>, vector<256x512xbf16>
    %cst_9 = arith.constant dense<0.000000e+00> : vector<16x512xf32>
    %13 = tpu.matmul %11, %12, %cst_9 {dimension_numbers = #tpu.dot_dimension_numbers<[1], [0], [0], [1], [0, 0, 1, 1], [], []>} : vector<16x256xbf16>, vector<256x512xbf16>, vector<16x512xf32> -> vector<16x512xf32>
    %c0_10 = arith.constant 0 : index
    %c0_11 = arith.constant 0 : index
    %14 = vector.load %arg5[%c0_10, %c0_11] : memref<1x512xf32, #tpu.memory_space<vmem>>, vector<1x512xf32>
    %15 = vector.broadcast %14 : vector<1x512xf32> to vector<16x512xf32>
    %16 = arith.addf %13, %15 : vector<16x512xf32>
    %cst_12 = arith.constant 0.000000e+00 : f32
    %17 = vector.broadcast %cst_12 : f32 to vector<16x512xf32>
    %18 = arith.cmpf ogt, %16, %17 : vector<16x512xf32>
    %cst_13 = arith.constant 2.000000e-01 : f32
    %19 = vector.broadcast %cst_13 : f32 to vector<16x512xf32>
    %20 = arith.mulf %19, %16 : vector<16x512xf32>
    %21 = arith.select %18, %16, %20 : vector<16x512xi1>, vector<16x512xf32>
    %22 = arith.truncf %21 : vector<16x512xf32> to vector<16x512xbf16>
    %c0_14 = arith.constant 0 : index
    %c0_15 = arith.constant 0 : index
    %23 = vector.load %arg6[%c0_14, %c0_15] : memref<512x1024xbf16, #tpu.memory_space<vmem>>, vector<512x1024xbf16>
    %cst_16 = arith.constant dense<0.000000e+00> : vector<16x1024xf32>
    %24 = tpu.matmul %22, %23, %cst_16 {dimension_numbers = #tpu.dot_dimension_numbers<[1], [0], [0], [1], [0, 0, 1, 1], [], []>} : vector<16x512xbf16>, vector<512x1024xbf16>, vector<16x1024xf32> -> vector<16x1024xf32>
    %c0_17 = arith.constant 0 : index
    %c0_18 = arith.constant 0 : index
    %25 = vector.load %arg7[%c0_17, %c0_18] : memref<1x1024xf32, #tpu.memory_space<vmem>>, vector<1x1024xf32>
    %26 = vector.broadcast %25 : vector<1x1024xf32> to vector<16x1024xf32>
    %27 = arith.addf %24, %26 : vector<16x1024xf32>
    %cst_19 = arith.constant 0.000000e+00 : f32
    %28 = vector.broadcast %cst_19 : f32 to vector<16x1024xf32>
    %29 = arith.cmpf ogt, %27, %28 : vector<16x1024xf32>
    %cst_20 = arith.constant 2.000000e-01 : f32
    %30 = vector.broadcast %cst_20 : f32 to vector<16x1024xf32>
    %31 = arith.mulf %30, %27 : vector<16x1024xf32>
    %32 = arith.select %29, %27, %31 : vector<16x1024xi1>, vector<16x1024xf32>
    %33 = arith.truncf %32 : vector<16x1024xf32> to vector<16x1024xbf16>
    %c0_21 = arith.constant 0 : index
    %c0_22 = arith.constant 0 : index
    %34 = vector.load %arg8[%c0_21, %c0_22] : memref<1024x896xbf16, #tpu.memory_space<vmem>>, vector<1024x896xbf16>
    %cst_23 = arith.constant dense<0.000000e+00> : vector<16x896xf32>
    %35 = tpu.matmul %33, %34, %cst_23 {dimension_numbers = #tpu.dot_dimension_numbers<[1], [0], [0], [1], [0, 0, 1, 1], [], []>} : vector<16x1024xbf16>, vector<1024x896xbf16>, vector<16x896xf32> -> vector<16x896xf32>
    %c0_24 = arith.constant 0 : index
    %c0_25 = arith.constant 0 : index
    %36 = vector.load %arg9[%c0_24, %c0_25] : memref<1x896xf32, #tpu.memory_space<vmem>>, vector<1x896xf32>
    %37 = vector.broadcast %36 : vector<1x896xf32> to vector<16x896xf32>
    %38 = arith.addf %35, %37 : vector<16x896xf32>
    %39 = math.tanh %38 : vector<16x896xf32>
    %c0_26 = arith.constant 0 : index
    %c0_27 = arith.constant 0 : index
    %40 = vector.load %arg10[%c0_26, %c0_27] : memref<16x896xf32, #tpu.memory_space<vmem>>, vector<16x896xf32>
    tpu.vector_store %arg10[%c0_26, %c0_27], %39 {strides = array<i32>} : memref<16x896xf32, #tpu.memory_space<vmem>>, vector<16x896xf32>,
    return
  }
  func.func @transform_0(%arg0: i32) -> (i32, i32) {
    %c0_i32 = arith.constant 0 : i32
    %c0_i32_0 = arith.constant 0 : i32
    return %arg0, %c0_i32 : i32, i32
  }
  func.func @transform_1(%arg0: i32) -> (i32, i32) {
    %c0_i32 = arith.constant 0 : i32
    %c0_i32_0 = arith.constant 0 : i32
    %c0_i32_1 = arith.constant 0 : i32
    return %c0_i32, %c0_i32_0 : i32, i32
  }
  func.func @transform_2(%arg0: i32) -> (i32, i32) {
    %c0_i32 = arith.constant 0 : i32
    %c0_i32_0 = arith.constant 0 : i32
    %c0_i32_1 = arith.constant 0 : i32
    return %c0_i32, %c0_i32_0 : i32, i32
  }
  func.func @transform_3(%arg0: i32) -> (i32, i32) {
    %c0_i32 = arith.constant 0 : i32
    %c0_i32_0 = arith.constant 0 : i32
    %c0_i32_1 = arith.constant 0 : i32
    return %c0_i32, %c0_i32_0 : i32, i32
  }
  func.func @transform_4(%arg0: i32) -> (i32, i32) {
    %c0_i32 = arith.constant 0 : i32
    %c0_i32_0 = arith.constant 0 : i32
    %c0_i32_1 = arith.constant 0 : i32
    return %c0_i32, %c0_i32_0 : i32, i32
  }
  func.func @transform_5(%arg0: i32) -> (i32, i32) {
    %c0_i32 = arith.constant 0 : i32
    %c0_i32_0 = arith.constant 0 : i32
    %c0_i32_1 = arith.constant 0 : i32
    return %c0_i32, %c0_i32_0 : i32, i32
  }
  func.func @transform_6(%arg0: i32) -> (i32, i32) {
    %c0_i32 = arith.constant 0 : i32
    %c0_i32_0 = arith.constant 0 : i32
    %c0_i32_1 = arith.constant 0 : i32
    return %c0_i32, %c0_i32_0 : i32, i32
  }
  func.func @transform_7(%arg0: i32) -> (i32, i32) {
    %c0_i32 = arith.constant 0 : i32
    %c0_i32_0 = arith.constant 0 : i32
    %c0_i32_1 = arith.constant 0 : i32
    return %c0_i32, %c0_i32_0 : i32, i32
  }
  func.func @transform_8(%arg0: i32) -> (i32, i32) {
    %c0_i32 = arith.constant 0 : i32
    %c0_i32_0 = arith.constant 0 : i32
    %c0_i32_1 = arith.constant 0 : i32
    return %c0_i32, %c0_i32_0 : i32, i32
  }
  func.func @transform_9(%arg0: i32) -> (i32, i32) {
    %c0_i32 = arith.constant 0 : i32
    %c0_i32_0 = arith.constant 0 : i32
    return %arg0, %c0_i32 : i32, i32
  }
}

</mosaic_0001>

<bundles_post_ra>
// kernel: tpu_custom_call.1
= control target key start
LH: loop header
LB: loop body
LE: loop exit
PB: predicated region body
PF: predicated region fallthrough
CT: control target
= control target key end

     0   :  { %14 = vsyncpa [#allocation3], 0  ;;  %s8773_s0 = inlined_call_operand.hbm [shape: bf16[16,128], index: 0, kind: input, shape index: {}]   ;;  %s8774_s1 = inlined_call_operand.hbm [shape: bf16[128,256], index: 1, kind: input, shape index: {}]   ;;  %s8775_s2 = inlined_call_operand.hbm [shape: f32[1,256], index: 2, kind: input, shape index: {}]   ;;  %s8776_s3 = inlined_call_operand.hbm [shape: bf16[256,512], index: 3, kind: input, shape index: {}]   ;;  %s8777_s4 = inlined_call_operand.hbm [shape: f32[1,512], index: 4, kind: input, shape index: {}]   ;;  %s8778_s5 = inlined_call_operand.hbm [shape: bf16[512,1024], index: 5, kind: input, shape index: {}]   ;;  %s8779_s6 = inlined_call_operand.hbm [shape: f32[1,1024], index: 6, kind: input, shape index: {}]   ;;  %s8780_s7 = inlined_call_operand.hbm [shape: bf16[1024,896], index: 7, kind: input, shape index: {}]   ;;  %s8781_s8 = inlined_call_operand.hbm [shape: f32[1,896], index: 8, kind: input, shape index: {}]   ;;  %s8782_s9 = inlined_call_operand.hbm [shape: f32[16,896], index: 9, kind: output, shape index: {}]  }
   0x1   :  { %15 = vsyncpa [#allocation6], 0 }
   0x2   :  { %16 = vsyncpa [#allocation9], 0 }
   0x3   :  { %17 = vsyncpa [#allocation12], 0 }
   0x4   :  { %18 = vsyncpa [#allocation15], 0 }
   0x5   :  { %19 = vsyncpa [#allocation4], 0  ;;  %s8398_s30 = smov [#allocation5]   ;;  %s8166_s13 = scalar_lea.hbm %s8774_s1, 2048 }
   0x6   :  { %s37_s10 = sshll.u32 %s8398_s30, 4  ;;  %p8167_p0 = scmp.ne.s32.totalorder %s8774_s1, %s8166_s13  ;;  %s38_s10 = int_to_ptr.vmem [resolvable:$true] %s37_s10 }
   0x7   :  { %p8170_p1 = scmp.lt.u32.totalorder %s8166_s13, %s8774_s1 }
   0x9   :  { %p8172_p2 = pnand %p8170_p1, %p8167_p0 }
   0xb   :  { %8175 = shalt.err (!%p8172_p2)
}
   0xc   :  { %s8176_s18 = scalar_lea.vmem %s38_s10, 2048  ;;  %p8181_p4 = scmp.lt.s32.totalorder %s38_s10, %s38_s10 }
   0xd   :  { %p8177_p3 = scmp.ne.s32.totalorder %s38_s10, %s8176_s18  ;;  %p8182_p5 = scmp.lt.s32.totalorder %s8176_s18, %s8176_s18 }
   0xf   :  { %p8183_p6 = por %p8182_p5, %p8181_p4 }
  0x11   :  { %p8184_p7 = pnand %p8183_p6, %p8177_p3 }
  0x13   :  { %8187 = shalt.err (!%p8184_p7)
}
  0x14   :  { %s8399_s19 = smov 128   ;;  %s8400_s20 = smov 8  }
  0x15   :  { %43 = dma.hbm_to_vmem [thread:$0]  %s8774_s1, 2048, %s38_s10, [#allocation6], %s8399_s19, %s8399_s19, %s8400_s20  }
  0x16   :  { %s8401_s23 = smov [#allocation8]   ;;  %s8188_s27 = scalar_lea.hbm %s8776_s3, 8192 }
  0x17   :  { %s59_s24 = sshll.u32 %s8401_s23, 4  ;;  %p8189_p8 = scmp.ne.s32.totalorder %s8776_s3, %s8188_s27  ;;  %s60_s24 = int_to_ptr.vmem [resolvable:$true] %s59_s24 }
  0x18   :  { %p8192_p9 = scmp.lt.u32.totalorder %s8188_s27, %s8776_s3 }
  0x1a   :  { %p8194_p10 = pnand %p8192_p9, %p8189_p8 }
  0x1c   :  { %8197 = shalt.err (!%p8194_p10)
}
  0x1d   :  { %s8198_s12 = scalar_lea.vmem %s60_s24, 8192  ;;  %p8203_p12 = scmp.lt.s32.totalorder %s60_s24, %s60_s24 }
  0x1e   :  { %p8199_p11 = scmp.ne.s32.totalorder %s60_s24, %s8198_s12  ;;  %p8204_p13 = scmp.lt.s32.totalorder %s8198_s12, %s8198_s12 }
  0x20   :  { %p8205_p0 = por %p8204_p13, %p8203_p12 }
  0x22   :  { %p8206_p1 = pnand %p8205_p0, %p8199_p11 }
  0x24   :  { %8209 = shalt.err (!%p8206_p1)
}
  0x25   :  { %s8402_s1 = smov 256   ;;  %s8403_s10 = smov 16  }
  0x26   :  { %65 = dma.hbm_to_vmem [thread:$0]  %s8776_s3, 8192, %s60_s24, [#allocation9], %s8402_s1, %s8402_s1, %s8403_s10  }
  0x27   :  { %s8404_s15 = smov [#allocation11]   ;;  %s8210_s19 = scalar_lea.hbm %s8778_s5, 32768 }
  0x28   :  { %s81_s16 = sshll.u32 %s8404_s15, 4  ;;  %p8211_p2 = scmp.ne.s32.totalorder %s8778_s5, %s8210_s19  ;;  %s82_s16 = int_to_ptr.vmem [resolvable:$true] %s81_s16 }
  0x29   :  { %p8214_p3 = scmp.lt.u32.totalorder %s8210_s19, %s8778_s5 }
  0x2b   :  { %p8216_p4 = pnand %p8214_p3, %p8211_p2 }
  0x2d   :  { %8219 = shalt.err (!%p8216_p4)
}
  0x2e   :  { %s8220_s25 = scalar_lea.vmem %s82_s16, 32768  ;;  %p8225_p6 = scmp.lt.s32.totalorder %s82_s16, %s82_s16 }
  0x2f   :  { %p8221_p5 = scmp.ne.s32.totalorder %s82_s16, %s8220_s25  ;;  %p8226_p7 = scmp.lt.s32.totalorder %s8220_s25, %s8220_s25 }
  0x31   :  { %p8227_p8 = por %p8226_p7, %p8225_p6 }
  0x33   :  { %p8228_p9 = pnand %p8227_p8, %p8221_p5 }
  0x35   :  { %8231 = shalt.err (!%p8228_p9)
}
  0x36   :  { %s8405_s3 = smov 512   ;;  %s8406_s24 = smov 32  }
  0x37   :  { %87 = dma.hbm_to_vmem [thread:$0]  %s8778_s5, 32768, %s82_s16, [#allocation12], %s8405_s3, %s8405_s3, %s8406_s24  }
  0x38   :  { %s8407_s28 = smov [#allocation14]   ;;  %s8232_s12 = scalar_lea.hbm %s8780_s7, 57344 }
  0x39   :  { %s103_s29 = sshll.u32 %s8407_s28, 4  ;;  %p8233_p10 = scmp.ne.s32.totalorder %s8780_s7, %s8232_s12  ;;  %s104_s29 = int_to_ptr.vmem [resolvable:$true] %s103_s29 }
  0x3a   :  { %p8236_p11 = scmp.lt.u32.totalorder %s8232_s12, %s8780_s7 }
  0x3c   :  { %p8238_p12 = pnand %p8236_p11, %p8233_p10 }
  0x3e   :  { %8241 = shalt.err (!%p8238_p12)
}
  0x3f   :  { %s8242_s15 = scalar_lea.vmem %s104_s29, 57344  ;;  %p8247_p0 = scmp.lt.s32.totalorder %s104_s29, %s104_s29 }
  0x40   :  { %p8243_p13 = scmp.ne.s32.totalorder %s104_s29, %s8242_s15  ;;  %p8248_p1 = scmp.lt.s32.totalorder %s8242_s15, %s8242_s15 }
  0x42   :  { %p8249_p2 = por %p8248_p1, %p8247_p0 }
  0x44   :  { %p8250_p3 = pnand %p8249_p2, %p8243_p13 }
  0x46   :  { %8253 = shalt.err (!%p8250_p3)
}
  0x47   :  { %s8408_s5 = smov 448   ;;  %s8409_s16 = smov 28  }
  0x48   :  { %109 = dma.hbm_to_vmem [thread:$0]  %s8780_s7, 57344, %s104_s29, [#allocation15], %s8408_s5, %s8408_s5, %s8409_s16  }
  0x49   :  { %s8410_s19 = smov [#allocation2]   ;;  %s8254_s23 = scalar_lea.hbm %s8773_s0, 128 }
  0x4a   :  { %s25_s20 = sshll.u32 %s8410_s19, 4  ;;  %p8255_p4 = scmp.ne.s32.totalorder %s8773_s0, %s8254_s23  ;;  %s26_s20 = int_to_ptr.vmem [resolvable:$true] %s25_s20 }
  0x4b   :  { %p8258_p5 = scmp.lt.u32.totalorder %s8254_s23, %s8773_s0 }
  0x4d   :  { %p8260_p6 = pnand %p8258_p5, %p8255_p4 }
  0x4f   :  { %8263 = shalt.err (!%p8260_p6)
}
  0x50   :  { %s8264_s27 = scalar_lea.vmem %s26_s20, 128  ;;  %p8269_p8 = scmp.lt.s32.totalorder %s26_s20, %s26_s20 }
  0x51   :  { %p8265_p7 = scmp.ne.s32.totalorder %s26_s20, %s8264_s27  ;;  %p8270_p9 = scmp.lt.s32.totalorder %s8264_s27, %s8264_s27 }
  0x53   :  { %p8271_p10 = por %p8270_p9, %p8269_p8 }
  0x55   :  { %p8272_p11 = pnand %p8271_p10, %p8265_p7 }
  0x57   :  { %8275 = shalt.err (!%p8272_p11)
}
  0x58   :  { %s8411_s7 = smov 64   ;;  %s8412_s28 = smov 4  }
  0x59   :  { %31 = dma.hbm_to_vmem [thread:$0]  %s8773_s0, 128, %s26_s20, [#allocation3], %s8411_s7, %s8411_s7, %s8412_s28  }
  0x5a   :  { %s8413_s11 = smov [#allocation7]   ;;  %s8414_s1 = smov [#allocation10]  }
  0x5b   :  { %s50_s12 = sshll.u32 %s8413_s11, 4  ;;  %s72_s10 = sshll.u32 %s8414_s1, 4  ;;  %s51_s12 = int_to_ptr.vmem [resolvable:$true] %s50_s12  ;;  %s73_s10 = int_to_ptr.vmem [resolvable:$true] %s72_s10 }
  0x5c   :  { %s8276_s15 = scalar_lea.hbm %s8775_s2, 32 }
  0x5d   :  { %p8277_p12 = scmp.ne.s32.totalorder %s8775_s2, %s8276_s15  ;;  %p8280_p13 = scmp.lt.u32.totalorder %s8276_s15, %s8775_s2 }
  0x5f   :  { %p8282_p0 = pnand %p8280_p13, %p8277_p12 }
  0x61   :  { %8285 = shalt.err (!%p8282_p0)
}
  0x62   :  { %s8286_s0 = scalar_lea.vmem %s51_s12, 32  ;;  %p8291_p2 = scmp.lt.s32.totalorder %s51_s12, %s51_s12 }
  0x63   :  { %p8287_p1 = scmp.ne.s32.totalorder %s51_s12, %s8286_s0  ;;  %p8292_p3 = scmp.lt.s32.totalorder %s8286_s0, %s8286_s0 }
  0x65   :  { %p8293_p4 = por %p8292_p3, %p8291_p2 }
  0x67   :  { %p8294_p5 = pnand %p8293_p4, %p8287_p1 }
  0x69   :  { %8297 = shalt.err (!%p8294_p5)
}
  0x6a   :  { %53 = dma.hbm_to_vmem [thread:$0]  %s8775_s2, 32, %s51_s12, [#allocation6]  }
  0x6b   :  { %s8298_s23 = scalar_lea.hbm %s8777_s4, 64 }
  0x6c   :  { %p8299_p6 = scmp.ne.s32.totalorder %s8777_s4, %s8298_s23  ;;  %p8302_p7 = scmp.lt.u32.totalorder %s8298_s23, %s8777_s4 }
  0x6e   :  { %p8304_p8 = pnand %p8302_p7, %p8299_p6 }
  0x70   :  { %8307 = shalt.err (!%p8304_p8)
}
  0x71   :  { %s8308_s27 = scalar_lea.vmem %s73_s10, 64  ;;  %p8313_p10 = scmp.lt.s32.totalorder %s73_s10, %s73_s10 }
  0x72   :  { %p8309_p9 = scmp.ne.s32.totalorder %s73_s10, %s8308_s27  ;;  %p8314_p11 = scmp.lt.s32.totalorder %s8308_s27, %s8308_s27 }
  0x74   :  { %p8315_p12 = por %p8314_p11, %p8313_p10 }
  0x76   :  { %p8316_p13 = pnand %p8315_p12, %p8309_p9 }
  0x78   :  { %8319 = shalt.err (!%p8316_p13)
}
  0x79   :  { %75 = dma.hbm_to_vmem [thread:$0]  %s8777_s4, 64, %s73_s10, [#allocation9]  }
  0x7a   :  { %s8415_s28 = smov [#allocation13]   ;;  %s8416_s30 = smov [#allocation16]  }
  0x7b   :  { %s94_s29 = sshll.u32 %s8415_s28, 4  ;;  %s116_s11 = sshll.u32 %s8416_s30, 4  ;;  %s95_s29 = int_to_ptr.vmem [resolvable:$true] %s94_s29  ;;  %s117_s11 = int_to_ptr.vmem [resolvable:$true] %s116_s11 }
  0x7c   :  { %s8320_s13 = scalar_lea.hbm %s8779_s6, 128 }
  0x7d   :  { %p8321_p0 = scmp.ne.s32.totalorder %s8779_s6, %s8320_s13  ;;  %p8324_p1 = scmp.lt.u32.totalorder %s8320_s13, %s8779_s6 }
  0x7f   :  { %p8326_p2 = pnand %p8324_p1, %p8321_p0 }
  0x81   :  { %8329 = shalt.err (!%p8326_p2)
}
  0x82   :  { %s8330_s4 = scalar_lea.vmem %s95_s29, 128  ;;  %p8335_p4 = scmp.lt.s32.totalorder %s95_s29, %s95_s29 }
  0x83   :  { %p8331_p3 = scmp.ne.s32.totalorder %s95_s29, %s8330_s4  ;;  %p8336_p5 = scmp.lt.s32.totalorder %s8330_s4, %s8330_s4 }
  0x85   :  { %p8337_p6 = por %p8336_p5, %p8335_p4 }
  0x87   :  { %p8338_p7 = pnand %p8337_p6, %p8331_p3 }
  0x89   :  { %8341 = shalt.err (!%p8338_p7)
}
  0x8a   :  { %97 = dma.hbm_to_vmem [thread:$0]  %s8779_s6, 128, %s95_s29, [#allocation12]  }
  0x8b   :  { %s8342_s19 = scalar_lea.hbm %s8781_s8, 112 }
  0x8c   :  { %p8343_p8 = scmp.ne.s32.totalorder %s8781_s8, %s8342_s19  ;;  %p8346_p9 = scmp.lt.u32.totalorder %s8342_s19, %s8781_s8 }
  0x8e   :  { %p8348_p10 = pnand %p8346_p9, %p8343_p8 }
  0x90   :  { %8351 = shalt.err (!%p8348_p10)
}
  0x91   :  { %s8352_s25 = scalar_lea.vmem %s117_s11, 112  ;;  %s8356_s3 = scalar_lea.vmem %s117_s11, 128 }
  0x92   :  { %p8353_p11 = scmp.ne.s32.totalorder %s117_s11, %s8352_s25  ;;  %p8357_p12 = scmp.lt.s32.totalorder %s117_s11, %s117_s11 }
  0x93   :  { %p8358_p13 = scmp.lt.s32.totalorder %s8356_s3, %s8352_s25 }
  0x95   :  { %p8359_p0 = por %p8358_p13, %p8357_p12 }
  0x97   :  { %p8360_p1 = pnand %p8359_p0, %p8353_p11 }
  0x99   :  { %8363 = shalt.err (!%p8360_p1)
}
  0x9a   :  { %119 = dma.hbm_to_vmem [thread:$0]  %s8781_s8, 112, %s117_s11, [#allocation15]  }
  0x9b   :  { %8386 = dma.done.wait [#allocation3], 128  }
  0x9c   :  { %8387 = vsyncadd [#allocation3], 4294967168 }
  0x9d   :  { %8388 = dma.done.wait [#allocation6], 2080  }
  0x9e   :  { %8389 = vsyncadd [#allocation6], 4294965216 }
  0x9f   :  { %8390 = dma.done.wait [#allocation9], 8256  }
  0xa0   :  { %8391 = vsyncadd [#allocation9], 4294959040 }
  0xa1   :  { %8392 = dma.done.wait [#allocation12], 32896  }
  0xa2   :  { %8393 = vsyncadd [#allocation12], 4294934400 }
  0xa3   :  { %8394 = dma.done.wait [#allocation15], 57456  }
  0xa4   :  { %8395 = vsyncadd [#allocation15], 4294909840  ;;  %v8417_v0 = vmov 0   ;;  %v7377_v1 = vld [vmem:[#allocation5 + $0x4] ss:$8 sps:$4 sm:$0xff]   ;;  %v7401_v18 = vld [vmem:[#allocation2] sm:$0xff]  }
  0xa5   :  { %296 = vmatprep.mubr.bf16.mxu0 %v8417_v0  ;;  %v7379_v2 = vld [vmem:[#allocation5] ss:$8 sps:$4 sm:$0xff]   ;;  %264 = vmatprep.subr.bf16.mxu0 %v7377_v1  ;;  %v7380_v3 = vld [vmem:[#allocation5 + $0x14] ss:$8 sps:$4 sm:$0xff]   ;;  %v7382_v4 = vld [vmem:[#allocation5 + $0x10] ss:$8 sps:$4 sm:$0xff]  }
  0xa6   :  { %265 = vmatpush1.bf16.msra.mxu0 %v7379_v2  ;;  %v7383_v5 = vld [vmem:[#allocation5 + $0x24] ss:$8 sps:$4 sm:$0xff]   ;;  %v7385_v6 = vld [vmem:[#allocation5 + $0x20] ss:$8 sps:$4 sm:$0xff]   ;;  %v7386_v7 = vld [vmem:[#allocation5 + $0x34] ss:$8 sps:$4 sm:$0xff]  }
  0xa7   :  { %266 = vmatprep.subr.bf16.mxu0 %v7380_v3  ;;  %v7388_v8 = vld [vmem:[#allocation5 + $0x30] ss:$8 sps:$4 sm:$0xff]   ;;  %v7389_v9 = vld [vmem:[#allocation5 + $0x44] ss:$8 sps:$4 sm:$0xff]   ;;  %v7391_v10 = vld [vmem:[#allocation5 + $0x40] ss:$8 sps:$4 sm:$0xff]  }
  0xa8   :  { %v7392_v11 = vld [vmem:[#allocation5 + $0x54] ss:$8 sps:$4 sm:$0xff]   ;;  %v7394_v12 = vld [vmem:[#allocation5 + $0x50] ss:$8 sps:$4 sm:$0xff]   ;;  %v7395_v13 = vld [vmem:[#allocation5 + $0x64] ss:$8 sps:$4 sm:$0xff]  }
  0xa9   :  { %v7397_v14 = vld [vmem:[#allocation5 + $0x60] ss:$8 sps:$4 sm:$0xff]   ;;  %v7398_v15 = vld [vmem:[#allocation5 + $0x74] ss:$8 sps:$4 sm:$0xff]   ;;  %v7400_v16 = vld [vmem:[#allocation5 + $0x70] ss:$8 sps:$4 sm:$0xff]  }
  0xaa   :  { %267 = vmatpush1.bf16.msra.mxu0 %v7382_v4  ;;  %v7404_v17 = vld [vmem:[#allocation8 + $0x4] ss:$16 sps:$4 sm:$0xff]   ;;  %v7402_v19 = vld [vmem:[#allocation8] ss:$16 sps:$4 sm:$0xff]   ;;  %v7452_v50 = vld [vmem:[#allocation8 + $0xc] ss:$16 sps:$4 sm:$0xff]  }
  0xab   :  { %268 = vmatprep.subr.bf16.mxu0 %v7383_v5  ;;  %v7407_v20 = vld [vmem:[#allocation8 + $0x24] ss:$16 sps:$4 sm:$0xff]   ;;  %v7405_v21 = vld [vmem:[#allocation8 + $0x20] ss:$16 sps:$4 sm:$0xff]   ;;  %s8418_s8 = smov [#allocation17]  }
  0xac   :  { %v7410_v22 = vld [vmem:[#allocation8 + $0x44] ss:$16 sps:$4 sm:$0xff]   ;;  %v7408_v23 = vld [vmem:[#allocation8 + $0x40] ss:$16 sps:$4 sm:$0xff]   ;;  %s6385_s26 = sshll.u32 %s8418_s8, 4  ;;  %s6386_s26 = int_to_ptr.vmem [resolvable:$true] %s6385_s26 }
  0xad   :  { %v7413_v24 = vld [vmem:[#allocation8 + $0x64] ss:$16 sps:$4 sm:$0xff]   ;;  %v7411_v25 = vld [vmem:[#allocation8 + $0x60] ss:$16 sps:$4 sm:$0xff]   ;;  %s8364_s27 = scalar_lea.vmem %s6386_s26, 1792  ;;  %p8369_p3 = scmp.lt.s32.totalorder %s6386_s26, %s6386_s26 }
  0xae   :  { %269 = vmatpush1.bf16.msra.mxu0 %v7385_v6  ;;  %v7416_v26 = vld [vmem:[#allocation8 + $0x84] ss:$16 sps:$4 sm:$0xff]   ;;  %v7414_v27 = vld [vmem:[#allocation8 + $0x80] ss:$16 sps:$4 sm:$0xff]   ;;  %p8365_p2 = scmp.ne.s32.totalorder %s6386_s26, %s8364_s27  ;;  %p8370_p4 = scmp.lt.s32.totalorder %s8364_s27, %s8364_s27 }
  0xaf   :  { %270 = vmatprep.subr.bf16.mxu0 %v7386_v7  ;;  %v7419_v28 = vld [vmem:[#allocation8 + $0xa4] ss:$16 sps:$4 sm:$0xff]   ;;  %v7417_v29 = vld [vmem:[#allocation8 + $0xa0] ss:$16 sps:$4 sm:$0xff]  }
  0xb0   :  { %v7422_v30 = vld [vmem:[#allocation8 + $0xc4] ss:$16 sps:$4 sm:$0xff]   ;;  %v7420_v31 = vld [vmem:[#allocation8 + $0xc0] ss:$16 sps:$4 sm:$0xff]   ;;  %p8371_p5 = por %p8370_p4, %p8369_p3 }
  0xb1   :  { %v7425_v32 = vld [vmem:[#allocation8 + $0xe4] ss:$16 sps:$4 sm:$0xff]   ;;  %v7423_v33 = vld [vmem:[#allocation8 + $0xe0] ss:$16 sps:$4 sm:$0xff]  }
  0xb2   :  { %271 = vmatpush1.bf16.msra.mxu0 %v7388_v8  ;;  %v7428_v34 = vld [vmem:[#allocation8 + $0x104] ss:$16 sps:$4 sm:$0xff]   ;;  %v7426_v35 = vld [vmem:[#allocation8 + $0x100] ss:$16 sps:$4 sm:$0xff]   ;;  %p8372_p6 = pnand %p8371_p5, %p8365_p2 }
  0xb3   :  { %272 = vmatprep.subr.bf16.mxu0 %v7389_v9  ;;  %v7431_v36 = vld [vmem:[#allocation8 + $0x124] ss:$16 sps:$4 sm:$0xff]   ;;  %v7429_v37 = vld [vmem:[#allocation8 + $0x120] ss:$16 sps:$4 sm:$0xff]  }
  0xb4   :  { %v7434_v38 = vld [vmem:[#allocation8 + $0x144] ss:$16 sps:$4 sm:$0xff]   ;;  %v7432_v39 = vld [vmem:[#allocation8 + $0x140] ss:$16 sps:$4 sm:$0xff]  }
  0xb5   :  { %v7437_v40 = vld [vmem:[#allocation8 + $0x164] ss:$16 sps:$4 sm:$0xff]   ;;  %v7435_v41 = vld [vmem:[#allocation8 + $0x160] ss:$16 sps:$4 sm:$0xff]  }
  0xb6   :  { %273 = vmatpush1.bf16.msra.mxu0 %v7391_v10  ;;  %v7440_v42 = vld [vmem:[#allocation8 + $0x184] ss:$16 sps:$4 sm:$0xff]   ;;  %v7438_v43 = vld [vmem:[#allocation8 + $0x180] ss:$16 sps:$4 sm:$0xff]  }
  0xb7   :  { %274 = vmatprep.subr.bf16.mxu0 %v7392_v11  ;;  %v7443_v44 = vld [vmem:[#allocation8 + $0x1a4] ss:$16 sps:$4 sm:$0xff]   ;;  %v7441_v45 = vld [vmem:[#allocation8 + $0x1a0] ss:$16 sps:$4 sm:$0xff]  }
  0xb8   :  { %v7446_v46 = vld [vmem:[#allocation8 + $0x1c4] ss:$16 sps:$4 sm:$0xff]   ;;  %v7444_v47 = vld [vmem:[#allocation8 + $0x1c0] ss:$16 sps:$4 sm:$0xff]  }
  0xb9   :  { %v7449_v48 = vld [vmem:[#allocation8 + $0x1e4] ss:$16 sps:$4 sm:$0xff]   ;;  %v7447_v49 = vld [vmem:[#allocation8 + $0x1e0] ss:$16 sps:$4 sm:$0xff]  }
  0xba   :  { %275 = vmatpush1.bf16.msra.mxu0 %v7394_v12  ;;  %v841_v51 = vld [vmem:[#allocation11] sm:$0xff] }
  0xbb   :  { %276 = vmatprep.subr.bf16.mxu0 %v7395_v13  ;;  %v845_v52 = vld [vmem:[#allocation11 + $0x20] sm:$0xff] }
  0xbc   :  { %v6483_v53 = vcombine.high %v841_v51, %v845_v52  ;;  %v6482_v54 = vcombine.low %v841_v51, %v845_v52  ;;  %v849_v55 = vld [vmem:[#allocation11 + $0x40] sm:$0xff] }
  0xbd   :  { %v853_v56 = vld [vmem:[#allocation11 + $0x60] sm:$0xff] }
  0xbe   :  { %277 = vmatpush1.bf16.msra.mxu0 %v7397_v14  ;;  %v6491_v57 = vcombine.high %v849_v55, %v853_v56  ;;  %2419 = vmatprep.subr.bf16.mxu1 %v6483_v53  ;;  %v6490_v58 = vcombine.low %v849_v55, %v853_v56  ;;  %v857_v59 = vld [vmem:[#allocation11 + $0x80] sm:$0xff] }
  0xbf   :  { %278 = vmatprep.subr.bf16.mxu0 %v7398_v15  ;;  %2420 = vmatpush1.bf16.msra.mxu1 %v6482_v54  ;;  %v861_v60 = vld [vmem:[#allocation11 + $0xa0] sm:$0xff] }
  0xc0   :  { %2421 = vmatprep.subr.bf16.mxu1 %v6491_v57  ;;  %v6499_v61 = vcombine.high %v857_v59, %v861_v60  ;;  %v6498_v62 = vcombine.low %v857_v59, %v861_v60  ;;  %v865_v63 = vld [vmem:[#allocation11 + $0xc0] sm:$0xff] }
  0xc1   :  { %v869_v0 = vld [vmem:[#allocation11 + $0xe0] sm:$0xff] }
  0xc2   :  { %279 = vmatpush1.bf16.msra.mxu0 %v7400_v16  ;;  %v6507_v1 = vcombine.high %v865_v63, %v869_v0  ;;  %v6506_v2 = vcombine.low %v865_v63, %v869_v0  ;;  %v873_v3 = vld [vmem:[#allocation11 + $0x100] sm:$0xff] }
  0xc3   :  { %727 = vmatprep.subr.bf16.mxu0 %v7404_v17  ;;  %2422 = vmatpush1.bf16.msra.mxu1 %v6490_v58  ;;  %v877_v4 = vld [vmem:[#allocation11 + $0x120] sm:$0xff] }
  0xc4   :  { %2423 = vmatprep.subr.bf16.mxu1 %v6499_v61  ;;  %v6515_v5 = vcombine.high %v873_v3, %v877_v4  ;;  %v6514_v6 = vcombine.low %v873_v3, %v877_v4  ;;  %v881_v7 = vld [vmem:[#allocation11 + $0x140] sm:$0xff]  ;;  %v7455_v4 = vld [vmem:[#allocation8 + $0x2c] ss:$16 sps:$4 sm:$0xff]  }
  0xc5   :  { %297 = vmatmul.mubr.bf16.vlgmr.msra.gmra.mrb[0].mxu0 %v7401_v18  ;;  %v885_v8 = vld [vmem:[#allocation11 + $0x160] sm:$0xff] }
  0xc6   :  { %728 = vmatpush1.bf16.msra.mxu0 %v7402_v19  ;;  %v6523_v9 = vcombine.high %v881_v7, %v885_v8  ;;  %v6522_v10 = vcombine.low %v881_v7, %v885_v8  ;;  %v889_v11 = vld [vmem:[#allocation11 + $0x180] sm:$0xff]  ;;  %v7461_v8 = vld [vmem:[#allocation8 + $0x6c] ss:$16 sps:$4 sm:$0xff]  }
  0xc7   :  { %729 = vmatprep.subr.bf16.mxu0 %v7407_v20  ;;  %2424 = vmatpush1.bf16.msra.mxu1 %v6498_v62  ;;  %v893_v12 = vld [vmem:[#allocation11 + $0x1a0] sm:$0xff] }
  0xc8   :  { %2425 = vmatprep.subr.bf16.mxu1 %v6507_v1  ;;  %v6531_v13 = vcombine.high %v889_v11, %v893_v12  ;;  %v6530_v14 = vcombine.low %v889_v11, %v893_v12  ;;  %v897_v15 = vld [vmem:[#allocation11 + $0x1c0] sm:$0xff]  ;;  %v7467_v12 = vld [vmem:[#allocation8 + $0xac] ss:$16 sps:$4 sm:$0xff]  }
  0xc9   :  { %v901_v16 = vld [vmem:[#allocation11 + $0x1e0] sm:$0xff] }
  0xca   :  { %730 = vmatpush1.bf16.msra.mxu0 %v7405_v21  ;;  %v6539_v17 = vcombine.high %v897_v15, %v901_v16  ;;  %v6538_v18 = vcombine.low %v897_v15, %v901_v16  ;;  %v905_v19 = vld [vmem:[#allocation11 + $0x200] sm:$0xff]  ;;  %v7473_v16 = vld [vmem:[#allocation8 + $0xec] ss:$16 sps:$4 sm:$0xff]  }
  0xcb   :  { %731 = vmatprep.subr.bf16.mxu0 %v7410_v22  ;;  %2426 = vmatpush1.bf16.msra.mxu1 %v6506_v2  ;;  %v909_v20 = vld [vmem:[#allocation11 + $0x220] sm:$0xff] }
  0xcc   :  { %2427 = vmatprep.subr.bf16.mxu1 %v6515_v5  ;;  %v6547_v21 = vcombine.high %v905_v19, %v909_v20  ;;  %v6546_v22 = vcombine.low %v905_v19, %v909_v20  ;;  %v7450_v3 = vld [vmem:[#allocation8 + $0x8] ss:$16 sps:$4 sm:$0xff]   ;;  %v7479_v20 = vld [vmem:[#allocation8 + $0x12c] ss:$16 sps:$4 sm:$0xff]  }
  0xcd   :  { %v7453_v5 = vld [vmem:[#allocation8 + $0x28] ss:$16 sps:$4 sm:$0xff]  }
  0xce   :  { %732 = vmatpush1.bf16.msra.mxu0 %v7408_v23  ;;  %v913_v23 = vld [vmem:[#allocation11 + $0x240] sm:$0xff] }
  0xcf   :  { %733 = vmatprep.subr.bf16.mxu0 %v7413_v24  ;;  %2428 = vmatpush1.bf16.msra.mxu1 %v6514_v6  ;;  %v917_v24 = vld [vmem:[#allocation11 + $0x260] sm:$0xff]  ;;  %v7458_v6 = vld [vmem:[#allocation8 + $0x4c] ss:$16 sps:$4 sm:$0xff]  }
  0xd0   :  { %2429 = vmatprep.subr.bf16.mxu1 %v6523_v9  ;;  %v7456_v7 = vld [vmem:[#allocation8 + $0x48] ss:$16 sps:$4 sm:$0xff]  }
  0xd1   :  { %v7459_v9 = vld [vmem:[#allocation8 + $0x68] ss:$16 sps:$4 sm:$0xff]  }
  0xd2   :  { %734 = vmatpush1.bf16.msra.mxu0 %v7411_v25  ;;  %v6555_v25 = vcombine.high %v913_v23, %v917_v24  ;;  %v7462_v11 = vld [vmem:[#allocation8 + $0x88] ss:$16 sps:$4 sm:$0xff]  }
  0xd3   :  { %735 = vmatprep.subr.bf16.mxu0 %v7416_v26  ;;  %2430 = vmatpush1.bf16.msra.mxu1 %v6522_v10  ;;  %v6554_v26 = vcombine.low %v913_v23, %v917_v24  ;;  %v7464_v10 = vld [vmem:[#allocation8 + $0x8c] ss:$16 sps:$4 sm:$0xff]   ;;  %v7468_v15 = vld [vmem:[#allocation8 + $0xc8] ss:$16 sps:$4 sm:$0xff]  }
  0xd4   :  { %2431 = vmatprep.subr.bf16.mxu1 %v6531_v13  ;;  %v7465_v13 = vld [vmem:[#allocation8 + $0xa8] ss:$16 sps:$4 sm:$0xff]   ;;  %v7485_v24 = vld [vmem:[#allocation8 + $0x16c] ss:$16 sps:$4 sm:$0xff]  }
  0xd5   :  { %v7474_v19 = vld [vmem:[#allocation8 + $0x108] ss:$16 sps:$4 sm:$0xff]  }
  0xd6   :  { %736 = vmatpush1.bf16.msra.mxu0 %v7414_v27  ;;  %v168_v27 = vlaneseq  ;;  %v7480_v23 = vld [vmem:[#allocation8 + $0x148] ss:$16 sps:$4 sm:$0xff]  }
  0xd7   :  { %737 = vmatprep.subr.bf16.mxu0 %v7419_v28  ;;  %2432 = vmatpush1.bf16.msra.mxu1 %v6530_v14  ;;  %v921_v28 = vld [vmem:[#allocation11 + $0x280] sm:$0xff]  ;;  %v7470_v14 = vld [vmem:[#allocation8 + $0xcc] ss:$16 sps:$4 sm:$0xff]  }
  0xd8   :  { %2433 = vmatprep.subr.bf16.mxu1 %v6539_v17  ;;  %v7471_v17 = vld [vmem:[#allocation8 + $0xe8] ss:$16 sps:$4 sm:$0xff]  }
  0xda   :  { %738 = vmatpush1.bf16.msra.mxu0 %v7417_v29  ;;  %v925_v29 = vld [vmem:[#allocation11 + $0x2a0] sm:$0xff] }
  0xdb   :  { %739 = vmatprep.subr.bf16.mxu0 %v7422_v30  ;;  %2434 = vmatpush1.bf16.msra.mxu1 %v6538_v18  ;;  %v6563_v30 = vcombine.high %v921_v28, %v925_v29  ;;  %v7476_v18 = vld [vmem:[#allocation8 + $0x10c] ss:$16 sps:$4 sm:$0xff]  }
  0xdc   :  { %2435 = vmatprep.subr.bf16.mxu1 %v6547_v21  ;;  %v7477_v21 = vld [vmem:[#allocation8 + $0x128] ss:$16 sps:$4 sm:$0xff]  }
  0xde   :  { %740 = vmatpush1.bf16.msra.mxu0 %v7420_v31  ;;  %v6562_v31 = vcombine.low %v921_v28, %v925_v29  ;;  %v7491_v28 = vld [vmem:[#allocation8 + $0x1ac] ss:$16 sps:$4 sm:$0xff]   ;;  %v7489_v29 = vld [vmem:[#allocation8 + $0x1a8] ss:$16 sps:$4 sm:$0xff]  }
  0xdf   :  { %741 = vmatprep.subr.bf16.mxu0 %v7425_v32  ;;  %2436 = vmatpush1.bf16.msra.mxu1 %v6546_v22  ;;  %v8579_v32 = vshrl.u32 %v168_v27, 7  ;;  %v7482_v22 = vld [vmem:[#allocation8 + $0x14c] ss:$16 sps:$4 sm:$0xff]   ;;  %v7486_v27 = vld [vmem:[#allocation8 + $0x188] ss:$16 sps:$4 sm:$0xff]  }
  0xe0   :  { %2437 = vmatprep.subr.bf16.mxu1 %v6555_v25  ;;  %v7483_v25 = vld [vmem:[#allocation8 + $0x168] ss:$16 sps:$4 sm:$0xff]  }
  0xe2   :  { %742 = vmatpush1.bf16.msra.mxu0 %v7423_v33  ;;  %v929_v33 = vld [vmem:[#allocation11 + $0x2c0] sm:$0xff] }
  0xe3   :  { %743 = vmatprep.subr.bf16.mxu0 %v7428_v34  ;;  %2438 = vmatpush1.bf16.msra.mxu1 %v6554_v26  ;;  %v933_v34 = vld [vmem:[#allocation11 + $0x2e0] sm:$0xff]  ;;  %v7488_v26 = vld [vmem:[#allocation8 + $0x18c] ss:$16 sps:$4 sm:$0xff]  }
  0xe4   :  { %2439 = vmatprep.subr.bf16.mxu1 %v6563_v30  ;;  %v7494_v30 = vld [vmem:[#allocation8 + $0x1cc] ss:$16 sps:$4 sm:$0xff]  }
  0xe6   :  { %744 = vmatpush1.bf16.msra.mxu0 %v7426_v35  ;;  %v6571_v35 = vcombine.high %v929_v33, %v933_v34 }
  0xe7   :  { %745 = vmatprep.subr.bf16.mxu0 %v7431_v36  ;;  %2440 = vmatpush1.bf16.msra.mxu1 %v6562_v31  ;;  %v6570_v36 = vcombine.low %v929_v33, %v933_v34  ;;  %v7492_v31 = vld [vmem:[#allocation8 + $0x1c8] ss:$16 sps:$4 sm:$0xff]   ;;  %v7497_v33 = vld [vmem:[#allocation8 + $0x1ec] ss:$16 sps:$4 sm:$0xff]  }
  0xe8   :  { %2441 = vmatprep.subr.bf16.mxu1 %v6571_v35  ;;  %v842_v34 = vld [vmem:[#allocation11 + $0x8] sm:$0xff] }
  0xe9   :  { %v846_v35 = vld [vmem:[#allocation11 + $0x28] sm:$0xff] }
  0xea   :  { %746 = vmatpush1.bf16.msra.mxu0 %v7429_v37  ;;  %v8582_v37 = vsub.s32 0, %v8579_v32 }
  0xeb   :  { %747 = vmatprep.subr.bf16.mxu0 %v7434_v38  ;;  %v937_v38 = vld [vmem:[#allocation11 + $0x300] sm:$0xff]  ;;  %2442 = vmatpush1.bf16.msra.mxu1 %v6570_v36 }
  0xec   :  { %v7495_v36 = vld [vmem:[#allocation8 + $0x1e8] ss:$16 sps:$4 sm:$0xff]  }
  0xee   :  { %748 = vmatpush1.bf16.msra.mxu0 %v7432_v39  ;;  %v941_v39 = vld [vmem:[#allocation11 + $0x320] sm:$0xff] }
  0xef   :  { %749 = vmatprep.subr.bf16.mxu0 %v7437_v40  ;;  %v166_v40 = vld [vmem:[#allocation7] sm:$0x3] }
  0xf2   :  { %750 = vmatpush1.bf16.msra.mxu0 %v7435_v41  ;;  %v8585_v41 = vsub.s32 1, %v8579_v32 }
  0xf3   :  { %751 = vmatprep.subr.bf16.mxu0 %v7440_v42  ;;  %v6579_v42 = vcombine.high %v937_v38, %v941_v39 }
  0xf5   :  { %2443 = vmatprep.subr.bf16.mxu1 %v6579_v42  ;;  %v6484_v42 = vcombine.low %v842_v34, %v846_v35 }
  0xf6   :  { %752 = vmatpush1.bf16.msra.mxu0 %v7438_v43  ;;  %v6578_v43 = vcombine.low %v937_v38, %v941_v39  ;;  %v6485_v38 = vcombine.high %v842_v34, %v846_v35  ;;  %v850_v39 = vld [vmem:[#allocation11 + $0x48] sm:$0xff] }
  0xf7   :  { %753 = vmatprep.subr.bf16.mxu0 %v7443_v44  ;;  %v171_v44 = vrot.slane %v166_v40, %v8582_v37  ;;  %v934_v34 = vld [vmem:[#allocation11 + $0x2e8] sm:$0xff] }
  0xf8   :  { %2444 = vmatpush1.bf16.msra.mxu1 %v6578_v43 }
  0xfa   :  { %754 = vmatpush1.bf16.msra.mxu0 %v7441_v45  ;;  %v8588_v45 = vld [vmem:[#allocation11 + $0x340] sm:$0xff] }
  0xfb   :  { %755 = vmatprep.subr.bf16.mxu0 %v7446_v46  ;;  %v8590_v46 = vld [vmem:[#allocation11 + $0x360] sm:$0xff] }
  0xfe   :  { %756 = vmatpush1.bf16.msra.mxu0 %v7444_v47  ;;  %v175_v47 = vrot.slane %v166_v40, %v8585_v41  ;;  %v854_v40 = vld [vmem:[#allocation11 + $0x68] sm:$0xff] }
  0xff   :  { %757 = vmatprep.subr.bf16.mxu0 %v7449_v48  ;;  %v6587_v48 = vcombine.high %v8588_v45, %v8590_v46  ;;  %v6493_v43 = vcombine.high %v850_v39, %v854_v40 }
 0x101   :  { %2445 = vmatprep.subr.bf16.mxu1 %v6587_v48  ;;  %v6492_v48 = vcombine.low %v850_v39, %v854_v40  ;;  %v942_v39 = vld [vmem:[#allocation11 + $0x328] sm:$0xff] }
 0x102   :  { %758 = vmatpush1.bf16.msra.mxu0 %v7447_v49 }
 0x103   :  { %770 = vmatprep.subr.bf16.mxu0 %v7452_v50 }
 0x198   :  { %v298_v49 = vpop.f32.mrb[0].mxu0 }
 0x199   :  { %v299_v50 = vadd.f32 %v298_v49, %v171_v44  ;;  %v300_v51 = vpop.f32.mrb[1].mxu0 }
 0x19a   :  { %v301_v52 = vadd.f32 %v300_v51, %v175_v47  ;;  %v302_v53 = vpop.f32.mrb[2].mxu0  ;;  %v870_v51 = vld [vmem:[#allocation11 + $0xe8] sm:$0xff] }
 0x19b   :  { %v311_v54 = vmul.f32 0.2, %v299_v50  ;;  %v303_v55 = vadd.f32 %v302_v53, %v171_v44  ;;  %v304_v56 = vpop.f32.mrb[3].mxu0  ;;  %vm307_vm0 = vcmp.gt.f32.partialorder %v299_v50, 0.0  ;;  %v858_v44 = vld [vmem:[#allocation11 + $0x88] sm:$0xff] }
 0x19c   :  { %v312_v57 = vmul.f32 0.2, %v301_v52  ;;  %v305_v58 = vadd.f32 %v304_v56, %v175_v47  ;;  %vm308_vm1 = vcmp.gt.f32.partialorder %v301_v52, 0.0  ;;  %v862_v47 = vld [vmem:[#allocation11 + $0xa8] sm:$0xff] }
 0x19d   :  { %vm309_vm2 = vcmp.gt.f32.partialorder %v303_v55, 0.0  ;;  %v313_v59 = vmul.f32 0.2, %v303_v55  ;;  %v315_v61 = vsel %vm307_vm0, %v299_v50, %v311_v54  ;;  %v6501_v49 = vcombine.high %v858_v44, %v862_v47  ;;  %v866_v50 = vld [vmem:[#allocation11 + $0xc8] sm:$0xff] }
 0x19e   :  { %vm310_vm3 = vcmp.gt.f32.partialorder %v305_v58, 0.0  ;;  %v314_v60 = vmul.f32 0.2, %v305_v58  ;;  %v316_v0 = vsel %vm308_vm1, %v301_v52, %v312_v57  ;;  %v6500_v52 = vcombine.low %v858_v44, %v862_v47  ;;  %v874_v54 = vld [vmem:[#allocation11 + $0x108] sm:$0xff] }
 0x19f   :  { %v317_v62 = vsel %vm309_vm2, %v303_v55, %v313_v59  ;;  %v6509_v53 = vcombine.high %v866_v50, %v870_v51  ;;  %v878_v55 = vld [vmem:[#allocation11 + $0x128] sm:$0xff]  ;;  %v6508_v56 = vcombine.low %v866_v50, %v870_v51 }
 0x1a0   :  { %v8595_v63 = vpack.c.bf16 %v317_v62, %v315_v61  ;;  %v318_v1 = vsel %vm310_vm3, %v305_v58, %v314_v60  ;;  %v6517_v57 = vcombine.high %v874_v54, %v878_v55  ;;  %v882_v58 = vld [vmem:[#allocation11 + $0x148] sm:$0xff]  ;;  %v6516_v60 = vcombine.low %v874_v54, %v878_v55 }
 0x1a1   :  { %v320_v2 = vpack.c.bf16 %v318_v1, %v316_v0  ;;  %v886_v59 = vld [vmem:[#allocation11 + $0x168] sm:$0xff] }
 0x1a2   :  { %v6525_v61 = vcombine.high %v882_v58, %v886_v59  ;;  %v890_v62 = vld [vmem:[#allocation11 + $0x188] sm:$0xff]  ;;  %v6524_v0 = vcombine.low %v882_v58, %v886_v59  ;;  %v8617_v59 = vld [vmem:[#allocation10] sm:$0xf] }
 0x1a3   :  { %759 = vmatprep.mubr.bf16.mxu0 %v320_v2  ;;  %v950_v44 = vld [vmem:[#allocation11 + $0x368] sm:$0xff] }
 0x1a4   :  { %760 = vmatmul.mubr.bf16.vlgmr.msra.gmra.mrb[4].mxu0 %v8595_v63  ;;  %v958_v50 = vld [vmem:[#allocation11 + $0x3a8] sm:$0xff] }
 0x1a5   :  { %771 = vmatpush1.bf16.msra.mxu0 %v7450_v3  ;;  %802 = vmatprep.mubr.bf16.mxu0 %v320_v2  ;;  %v6586_v2 = vcombine.low %v8588_v45, %v8590_v46  ;;  %v898_v3 = vld [vmem:[#allocation11 + $0x1c8] sm:$0xff] }
 0x1a6   :  { %772 = vmatprep.subr.bf16.mxu0 %v7455_v4  ;;  %v902_v4 = vld [vmem:[#allocation11 + $0x1e8] sm:$0xff] }
 0x1a7   :  { %2446 = vmatpush1.bf16.msra.mxu1 %v6586_v2  ;;  %v966_v54 = vld [vmem:[#allocation11 + $0x3e8] sm:$0xff] }
 0x1a9   :  { %773 = vmatpush1.bf16.msra.mxu0 %v7453_v5  ;;  %v953_v5 = vld [vmem:[#allocation11 + $0x380] sm:$0xff] }
 0x1aa   :  { %774 = vmatprep.subr.bf16.mxu0 %v7458_v6  ;;  %v957_v6 = vld [vmem:[#allocation11 + $0x3a0] sm:$0xff] }
 0x1ad   :  { %775 = vmatpush1.bf16.msra.mxu0 %v7456_v7 }
 0x1ae   :  { %776 = vmatprep.subr.bf16.mxu0 %v7461_v8  ;;  %v6595_v8 = vcombine.high %v953_v5, %v957_v6 }
 0x1b0   :  { %2447 = vmatprep.subr.bf16.mxu1 %v6595_v8 }
 0x1b1   :  { %777 = vmatpush1.bf16.msra.mxu0 %v7459_v9  ;;  %v6541_v9 = vcombine.high %v898_v3, %v902_v4 }
 0x1b2   :  { %778 = vmatprep.subr.bf16.mxu0 %v7464_v10  ;;  %v6594_v10 = vcombine.low %v953_v5, %v957_v6 }
 0x1b4   :  { %2448 = vmatpush1.bf16.msra.mxu1 %v6594_v10  ;;  %v977_v10 = vld [vmem:[#allocation11 + $0x440] sm:$0xff] }
 0x1b5   :  { %779 = vmatpush1.bf16.msra.mxu0 %v7462_v11  ;;  %v906_v11 = vld [vmem:[#allocation11 + $0x208] sm:$0xff] }
 0x1b6   :  { %780 = vmatprep.subr.bf16.mxu0 %v7467_v12  ;;  %v910_v12 = vld [vmem:[#allocation11 + $0x228] sm:$0xff] }
 0x1b7   :  { %v6549_v46 = vcombine.high %v906_v11, %v910_v12 }
 0x1b9   :  { %781 = vmatpush1.bf16.msra.mxu0 %v7465_v13  ;;  %v961_v13 = vld [vmem:[#allocation11 + $0x3c0] sm:$0xff] }
 0x1ba   :  { %782 = vmatprep.subr.bf16.mxu0 %v7470_v14  ;;  %v965_v14 = vld [vmem:[#allocation11 + $0x3e0] sm:$0xff] }
 0x1bb   :  { %v6603_v45 = vcombine.high %v961_v13, %v965_v14 }
 0x1bd   :  { %783 = vmatpush1.bf16.msra.mxu0 %v7468_v15  ;;  %v6540_v15 = vcombine.low %v898_v3, %v902_v4  ;;  %2449 = vmatprep.subr.bf16.mxu1 %v6603_v45 }
 0x1be   :  { %784 = vmatprep.subr.bf16.mxu0 %v7473_v16  ;;  %v6602_v16 = vcombine.low %v961_v13, %v965_v14  ;;  %v981_v13 = vld [vmem:[#allocation11 + $0x460] sm:$0xff]  ;;  %v978_v14 = vld [vmem:[#allocation11 + $0x448] sm:$0xff] }
 0x1c0   :  { %2450 = vmatpush1.bf16.msra.mxu1 %v6602_v16 }
 0x1c1   :  { %785 = vmatpush1.bf16.msra.mxu0 %v7471_v17  ;;  %v914_v17 = vld [vmem:[#allocation11 + $0x248] sm:$0xff] }
 0x1c2   :  { %786 = vmatprep.subr.bf16.mxu0 %v7476_v18  ;;  %v918_v18 = vld [vmem:[#allocation11 + $0x268] sm:$0xff] }
 0x1c5   :  { %787 = vmatpush1.bf16.msra.mxu0 %v7474_v19  ;;  %v8601_v19 = vld [vmem:[#allocation11 + $0x400] sm:$0xff] }
 0x1c6   :  { %788 = vmatprep.subr.bf16.mxu0 %v7479_v20  ;;  %v8603_v20 = vld [vmem:[#allocation11 + $0x420] sm:$0xff] }
 0x1c9   :  { %789 = vmatpush1.bf16.msra.mxu0 %v7477_v21  ;;  %v8605_v21 = vld [vmem:[#allocation11 + $0x408] sm:$0xff] }
 0x1ca   :  { %790 = vmatprep.subr.bf16.mxu0 %v7482_v22  ;;  %v6548_v22 = vcombine.low %v906_v11, %v910_v12 }
 0x1cd   :  { %791 = vmatpush1.bf16.msra.mxu0 %v7480_v23  ;;  %v6611_v23 = vcombine.high %v8601_v19, %v8603_v20 }
 0x1ce   :  { %792 = vmatprep.subr.bf16.mxu0 %v7485_v24  ;;  %v8609_v24 = vld [vmem:[#allocation11 + $0x428] sm:$0xff] }
 0x1cf   :  { %2462 = vmatprep.subr.bf16.mxu1 %v6611_v23  ;;  %v6613_v58 = vcombine.high %v8605_v21, %v8609_v24  ;;  %v985_v23 = vld [vmem:[#allocation11 + $0x480] sm:$0xff] }
 0x1d1   :  { %793 = vmatpush1.bf16.msra.mxu0 %v7483_v25  ;;  %v6557_v25 = vcombine.high %v914_v17, %v918_v18 }
 0x1d2   :  { %794 = vmatprep.subr.bf16.mxu0 %v7488_v26  ;;  %v6610_v26 = vcombine.low %v8601_v19, %v8603_v20 }
 0x1d5   :  { %795 = vmatpush1.bf16.msra.mxu0 %v7486_v27  ;;  %v6612_v27 = vcombine.low %v8605_v21, %v8609_v24  ;;  %v1001_v21 = vld [vmem:[#allocation11 + $0x500] sm:$0xff] }
 0x1d6   :  { %796 = vmatprep.subr.bf16.mxu0 %v7491_v28  ;;  %v922_v28 = vld [vmem:[#allocation11 + $0x288] sm:$0xff]  ;;  %v1005_v24 = vld [vmem:[#allocation11 + $0x520] sm:$0xff] }
 0x1d9   :  { %797 = vmatpush1.bf16.msra.mxu0 %v7489_v29  ;;  %v926_v29 = vld [vmem:[#allocation11 + $0x2a8] sm:$0xff] }
 0x1da   :  { %798 = vmatprep.subr.bf16.mxu0 %v7494_v30  ;;  %v6556_v30 = vcombine.low %v914_v17, %v918_v18  ;;  %v6564_v35 = vcombine.low %v922_v28, %v926_v29  ;;  %v6619_v18 = vcombine.high %v977_v10, %v981_v13 }
 0x1dd   :  { %799 = vmatpush1.bf16.msra.mxu0 %v7492_v31  ;;  %v6565_v31 = vcombine.high %v922_v28, %v926_v29  ;;  %v986_v28 = vld [vmem:[#allocation11 + $0x488] sm:$0xff] }
 0x1de   :  { %800 = vmatprep.subr.bf16.mxu0 %v7497_v33  ;;  %v930_v33 = vld [vmem:[#allocation11 + $0x2c8] sm:$0xff] }
 0x1df   :  { %v6572_v40 = vcombine.low %v930_v33, %v934_v34  ;;  %v990_v29 = vld [vmem:[#allocation11 + $0x4a8] sm:$0xff] }
 0x1e1   :  { %801 = vmatpush1.bf16.msra.mxu0 %v7495_v36  ;;  %v6573_v36 = vcombine.high %v930_v33, %v934_v34  ;;  %v6629_v34 = vcombine.high %v986_v28, %v990_v29 }
 0x1e2   :  { %2505 = vmatprep.subr.bf16.mxu0 %v6485_v38  ;;  %v938_v38 = vld [vmem:[#allocation11 + $0x308] sm:$0xff] }
 0x1e3   :  { %v6580_v47 = vcombine.low %v938_v38, %v942_v39 }
 0x1e4   :  { %803 = vmatmul.mubr.bf16.vlgmr.msra.gmra.mrb[8].mxu0 %v8595_v63  ;;  %v894_v63 = vld [vmem:[#allocation11 + $0x1a8] sm:$0xff] }
 0x1e5   :  { %2506 = vmatpush1.bf16.msra.mxu0 %v6484_v42  ;;  %v6533_v1 = vcombine.high %v890_v62, %v894_v63  ;;  %v6532_v7 = vcombine.low %v890_v62, %v894_v63  ;;  %v6581_v42 = vcombine.high %v938_v38, %v942_v39  ;;  %v994_v38 = vld [vmem:[#allocation11 + $0x4c8] sm:$0xff] }
 0x1e6   :  { %2507 = vmatprep.subr.bf16.mxu0 %v6493_v43  ;;  %v946_v43 = vld [vmem:[#allocation11 + $0x348] sm:$0xff] }
 0x1e7   :  { %v6588_v51 = vcombine.low %v946_v43, %v950_v44  ;;  %v998_v39 = vld [vmem:[#allocation11 + $0x4e8] sm:$0xff] }
 0x1e8   :  { %v6637_v20 = vcombine.high %v994_v38, %v998_v39 }
 0x1e9   :  { %2508 = vmatpush1.bf16.msra.mxu0 %v6492_v48  ;;  %v6589_v48 = vcombine.high %v946_v43, %v950_v44  ;;  %v6636_v44 = vcombine.low %v994_v38, %v998_v39 }
 0x1ea   :  { %2509 = vmatprep.subr.bf16.mxu0 %v6501_v49  ;;  %v954_v49 = vld [vmem:[#allocation11 + $0x388] sm:$0xff] }
 0x1eb   :  { %v6596_v55 = vcombine.low %v954_v49, %v958_v50 }
 0x1ed   :  { %2510 = vmatpush1.bf16.msra.mxu0 %v6500_v52  ;;  %v6597_v52 = vcombine.high %v954_v49, %v958_v50  ;;  %v1009_v49 = vld [vmem:[#allocation11 + $0x540] sm:$0xff] }
 0x1ee   :  { %2511 = vmatprep.subr.bf16.mxu0 %v6509_v53  ;;  %v962_v53 = vld [vmem:[#allocation11 + $0x3c8] sm:$0xff]  ;;  %v1013_v50 = vld [vmem:[#allocation11 + $0x560] sm:$0xff] }
 0x1f1   :  { %2512 = vmatpush1.bf16.msra.mxu0 %v6508_v56  ;;  %v6605_v56 = vcombine.high %v962_v53, %v966_v54 }
 0x1f2   :  { %2513 = vmatprep.subr.bf16.mxu0 %v6517_v57  ;;  %v6604_v57 = vcombine.low %v962_v53, %v966_v54  ;;  %v6642_v53 = vcombine.low %v1001_v21, %v1005_v24 }
 0x1f5   :  { %2514 = vmatpush1.bf16.msra.mxu0 %v6516_v60  ;;  %v390_v60 = vrot.slane %v8617_v59, %v8582_v37 }
 0x1f6   :  { %2515 = vmatprep.subr.bf16.mxu0 %v6525_v61  ;;  %v394_v61 = vrot.slane %v8617_v59, %v8585_v41 }
 0x1f9   :  { %2516 = vmatpush1.bf16.msra.mxu0 %v6524_v0 }
 0x1fa   :  { %2517 = vmatprep.subr.bf16.mxu0 %v6533_v1 }
 0x1fd   :  { %2518 = vmatpush1.bf16.msra.mxu0 %v6532_v7 }
 0x1fe   :  { %2519 = vmatprep.subr.bf16.mxu0 %v6541_v9 }
 0x201   :  { %2520 = vmatpush1.bf16.msra.mxu0 %v6540_v15  ;;  %v982_v15 = vld [vmem:[#allocation11 + $0x468] sm:$0xff] }
 0x202   :  { %2521 = vmatprep.subr.bf16.mxu0 %v6549_v46 }
 0x205   :  { %2522 = vmatpush1.bf16.msra.mxu0 %v6548_v22  ;;  %v6621_v22 = vcombine.high %v978_v14, %v982_v15 }
 0x206   :  { %2523 = vmatprep.subr.bf16.mxu0 %v6557_v25  ;;  %v989_v25 = vld [vmem:[#allocation11 + $0x4a0] sm:$0xff] }
 0x207   :  { %v6627_v33 = vcombine.high %v985_v23, %v989_v25 }
 0x209   :  { %2524 = vmatpush1.bf16.msra.mxu0 %v6556_v30  ;;  %v6618_v30 = vcombine.low %v977_v10, %v981_v13  ;;  %v1033_v10 = vld [vmem:[#allocation11 + $0x600] sm:$0xff]  ;;  %v1038_v13 = vld [vmem:[#allocation11 + $0x628] sm:$0xff] }
 0x20a   :  { %2525 = vmatprep.subr.bf16.mxu0 %v6565_v31  ;;  %v6620_v31 = vcombine.low %v978_v14, %v982_v15 }
 0x20d   :  { %2526 = vmatpush1.bf16.msra.mxu0 %v6564_v35  ;;  %v993_v35 = vld [vmem:[#allocation11 + $0x4c0] sm:$0xff] }
 0x20e   :  { %2527 = vmatprep.subr.bf16.mxu0 %v6573_v36  ;;  %v997_v36 = vld [vmem:[#allocation11 + $0x4e0] sm:$0xff] }
 0x20f   :  { %v6635_v19 = vcombine.high %v993_v35, %v997_v36  ;;  %v6634_v43 = vcombine.low %v993_v35, %v997_v36  ;;  %v1050_v35 = vld [vmem:[#allocation11 + $0x688] sm:$0xff] }
 0x210   :  { %v1054_v36 = vld [vmem:[#allocation11 + $0x6a8] sm:$0xff] }
 0x211   :  { %2528 = vmatpush1.bf16.msra.mxu0 %v6572_v40  ;;  %v6626_v40 = vcombine.low %v985_v23, %v989_v25  ;;  %v1042_v23 = vld [vmem:[#allocation11 + $0x648] sm:$0xff] }
 0x212   :  { %2529 = vmatprep.subr.bf16.mxu0 %v6581_v42  ;;  %v6628_v42 = vcombine.low %v986_v28, %v990_v29  ;;  %v1046_v25 = vld [vmem:[#allocation11 + $0x668] sm:$0xff] }
 0x213   :  { %v6684_v39 = vcombine.low %v1042_v23, %v1046_v25 }
 0x215   :  { %2530 = vmatpush1.bf16.msra.mxu0 %v6580_v47  ;;  %v6643_v47 = vcombine.high %v1001_v21, %v1005_v24  ;;  %v1058_v21 = vld [vmem:[#allocation11 + $0x6c8] sm:$0xff] }
 0x216   :  { %2531 = vmatprep.subr.bf16.mxu0 %v6589_v48  ;;  %v1062_v24 = vld [vmem:[#allocation11 + $0x6e8] sm:$0xff] }
 0x219   :  { %2532 = vmatpush1.bf16.msra.mxu0 %v6588_v51  ;;  %v1010_v51 = vld [vmem:[#allocation11 + $0x548] sm:$0xff] }
 0x21a   :  { %2533 = vmatprep.subr.bf16.mxu0 %v6597_v52  ;;  %v1014_v52 = vld [vmem:[#allocation11 + $0x568] sm:$0xff] }
 0x21d   :  { %2534 = vmatpush1.bf16.msra.mxu0 %v6596_v55  ;;  %v6651_v55 = vcombine.high %v1009_v49, %v1013_v50 }
 0x21e   :  { %2535 = vmatprep.subr.bf16.mxu0 %v6605_v56  ;;  %v6653_v56 = vcombine.high %v1010_v51, %v1014_v52 }
 0x221   :  { %2536 = vmatpush1.bf16.msra.mxu0 %v6604_v57  ;;  %v1017_v57 = vld [vmem:[#allocation11 + $0x580] sm:$0xff] }
 0x222   :  { %2548 = vmatprep.subr.bf16.mxu0 %v6613_v58  ;;  %v1021_v58 = vld [vmem:[#allocation11 + $0x5a0] sm:$0xff] }
 0x277   :  { %v761_v62 = vpop.f32.mrb[4].mxu0 }
 0x278   :  { %v762_v63 = vadd.f32 %v761_v62, %v390_v60  ;;  %v763_v0 = vpop.f32.mrb[5].mxu0  ;;  %v6650_v62 = vcombine.low %v1009_v49, %v1013_v50  ;;  %v1066_v49 = vld [vmem:[#allocation11 + $0x708] sm:$0xff] }
 0x279   :  { %v764_v1 = vadd.f32 %v763_v0, %v394_v61  ;;  %v765_v2 = vpop.f32.mrb[6].mxu0  ;;  %v6659_v0 = vcombine.high %v1017_v57, %v1021_v58  ;;  %v1070_v50 = vld [vmem:[#allocation11 + $0x728] sm:$0xff] }
 0x27a   :  { %v821_v3 = vmul.f32 0.2, %v762_v63  ;;  %v766_v4 = vadd.f32 %v765_v2, %v390_v60  ;;  %v767_v5 = vpop.f32.mrb[7].mxu0  ;;  %vm813_vm4 = vcmp.gt.f32.partialorder %v762_v63, 0.0  ;;  %v1018_v60 = vld [vmem:[#allocation11 + $0x588] sm:$0xff]  ;;  %v1025_v2 = vld [vmem:[#allocation11 + $0x5c0] sm:$0xff] }
 0x27b   :  { %v822_v6 = vmul.f32 0.2, %v764_v1  ;;  %v768_v7 = vadd.f32 %v767_v5, %v394_v61  ;;  %vm814_vm5 = vcmp.gt.f32.partialorder %v764_v1, 0.0  ;;  %v1022_v61 = vld [vmem:[#allocation11 + $0x5a8] sm:$0xff] }
 0x27c   :  { %vm817_vm6 = vcmp.gt.f32.partialorder %v766_v4, 0.0  ;;  %v825_v8 = vmul.f32 0.2, %v766_v4  ;;  %v829_v11 = vsel %vm813_vm4, %v762_v63, %v821_v3  ;;  %v6652_v63 = vcombine.low %v1010_v51, %v1014_v52  ;;  %v1029_v3 = vld [vmem:[#allocation11 + $0x5e0] sm:$0xff]  ;;  %v1030_v5 = vld [vmem:[#allocation11 + $0x5e8] sm:$0xff] }
 0x27d   :  { %vm818_vm7 = vcmp.gt.f32.partialorder %v768_v7, 0.0  ;;  %v826_v9 = vmul.f32 0.2, %v768_v7  ;;  %v830_v45 = vsel %vm814_vm5, %v764_v1, %v822_v6  ;;  %v6661_v1 = vcombine.high %v1018_v60, %v1022_v61 }
 0x27e   :  { %v833_v12 = vsel %vm817_vm6, %v766_v4, %v825_v8  ;;  %v1026_v4 = vld [vmem:[#allocation11 + $0x5c8] sm:$0xff]  ;;  %v6658_v6 = vcombine.low %v1017_v57, %v1021_v58  ;;  %v6667_v8 = vcombine.high %v1025_v2, %v1029_v3  ;;  %v6666_v14 = vcombine.low %v1025_v2, %v1029_v3  ;;  %v1081_v2 = vld [vmem:[#allocation11 + $0x780] sm:$0xff] }
 0x27f   :  { %v8623_v46 = vpack.c.bf16 %v833_v12, %v829_v11  ;;  %v834_v16 = vsel %vm818_vm7, %v768_v7, %v826_v9  ;;  %v6660_v7 = vcombine.low %v1018_v60, %v1022_v61  ;;  %v6669_v9 = vcombine.high %v1026_v4, %v1030_v5  ;;  %v1037_v11 = vld [vmem:[#allocation11 + $0x620] sm:$0xff]  ;;  %v1034_v12 = vld [vmem:[#allocation11 + $0x608] sm:$0xff] }
 0x280   :  { %v8625_v17 = vpack.c.bf16 %v834_v16, %v830_v45  ;;  %v6668_v15 = vcombine.low %v1026_v4, %v1030_v5  ;;  %v6675_v45 = vcombine.high %v1033_v10, %v1037_v11  ;;  %v6677_v16 = vcombine.high %v1034_v12, %v1038_v13  ;;  %v1074_v57 = vld [vmem:[#allocation11 + $0x748] sm:$0xff]  ;;  %v1085_v3 = vld [vmem:[#allocation11 + $0x7a0] sm:$0xff] }
 0x281   :  { %v6674_v28 = vcombine.low %v1033_v10, %v1037_v11  ;;  %v6676_v29 = vcombine.low %v1034_v12, %v1038_v13  ;;  %v6700_v52 = vcombine.low %v1058_v21, %v1062_v24  ;;  %v1078_v58 = vld [vmem:[#allocation11 + $0x768] sm:$0xff]  ;;  %v6708_v61 = vcombine.low %v1066_v49, %v1070_v50  ;;  %v1089_v12 = vld [vmem:[#allocation11 + $0x7c0] sm:$0xff] }
 0x282   :  { %2451 = vmatprep.mubr.bf16.mxu1 %v8625_v17  ;;  %2537 = vmatprep.mubr.bf16.mxu0 %v8625_v17  ;;  %v1082_v4 = vld [vmem:[#allocation11 + $0x788] sm:$0xff]  ;;  %v6723_v10 = vcombine.high %v1081_v2, %v1085_v3  ;;  %v1093_v13 = vld [vmem:[#allocation11 + $0x7e0] sm:$0xff] }
 0x283   :  { %2452 = vmatmul.mubr.bf16.vlgmr.msra.gmra.mrb[0].mxu1 %v8623_v46  ;;  %2538 = vmatmul.mubr.bf16.vlgmr.msra.gmra.mrb[12].mxu0 %v8623_v46  ;;  %v1086_v5 = vld [vmem:[#allocation11 + $0x7a8] sm:$0xff] }
 0x284   :  { %2463 = vmatpush1.bf16.msra.mxu1 %v6610_v26  ;;  %2549 = vmatpush1.bf16.msra.mxu0 %v6612_v27  ;;  %v1002_v26 = vld [vmem:[#allocation11 + $0x508] sm:$0xff]  ;;  %v6725_v11 = vcombine.high %v1082_v4, %v1086_v5 }
 0x285   :  { %2464 = vmatprep.subr.bf16.mxu1 %v6619_v18  ;;  %2550 = vmatprep.subr.bf16.mxu0 %v6621_v22  ;;  %v1006_v27 = vld [vmem:[#allocation11 + $0x528] sm:$0xff]  ;;  %v1041_v18 = vld [vmem:[#allocation11 + $0x640] sm:$0xff] }
 0x286   :  { %v6645_v48 = vcombine.high %v1002_v26, %v1006_v27  ;;  %v6644_v54 = vcombine.low %v1002_v26, %v1006_v27  ;;  %v1045_v22 = vld [vmem:[#allocation11 + $0x660] sm:$0xff]  ;;  %v6692_v27 = vcombine.low %v1050_v35, %v1054_v36 }
 0x287   :  { %v6682_v38 = vcombine.low %v1041_v18, %v1045_v22 }
 0x288   :  { %2465 = vmatpush1.bf16.msra.mxu1 %v6618_v30  ;;  %2551 = vmatpush1.bf16.msra.mxu0 %v6620_v31  ;;  %v6683_v30 = vcombine.high %v1041_v18, %v1045_v22  ;;  %v6685_v31 = vcombine.high %v1042_v23, %v1046_v25  ;;  %v6722_v22 = vcombine.low %v1081_v2, %v1085_v3 }
 0x289   :  { %2466 = vmatprep.subr.bf16.mxu1 %v6627_v33  ;;  %2552 = vmatprep.subr.bf16.mxu0 %v6629_v34  ;;  %v1049_v33 = vld [vmem:[#allocation11 + $0x680] sm:$0xff]  ;;  %v6724_v23 = vcombine.low %v1082_v4, %v1086_v5  ;;  %v867_v5 = vld [vmem:[#allocation11 + $0xd0] sm:$0xff] }
 0x28a   :  { %v1053_v34 = vld [vmem:[#allocation11 + $0x6a0] sm:$0xff] }
 0x28b   :  { %v6690_v26 = vcombine.low %v1049_v33, %v1053_v34 }
 0x28c   :  { %2467 = vmatpush1.bf16.msra.mxu1 %v6626_v40  ;;  %2553 = vmatpush1.bf16.msra.mxu0 %v6628_v42  ;;  %v6691_v40 = vcombine.high %v1049_v33, %v1053_v34  ;;  %v6693_v42 = vcombine.high %v1050_v35, %v1054_v36  ;;  %v847_v35 = vld [vmem:[#allocation11 + $0x30] sm:$0xff]  ;;  %v844_v36 = vld [vmem:[#allocation11 + $0x18] sm:$0xff] }
 0x28d   :  { %2468 = vmatprep.subr.bf16.mxu1 %v6635_v19  ;;  %2554 = vmatprep.subr.bf16.mxu0 %v6637_v20  ;;  %v1057_v19 = vld [vmem:[#allocation11 + $0x6c0] sm:$0xff] }
 0x28e   :  { %v1061_v20 = vld [vmem:[#allocation11 + $0x6e0] sm:$0xff] }
 0x28f   :  { %v6698_v51 = vcombine.low %v1057_v19, %v1061_v20 }
 0x290   :  { %2469 = vmatpush1.bf16.msra.mxu1 %v6634_v43  ;;  %2555 = vmatpush1.bf16.msra.mxu0 %v6636_v44  ;;  %v6699_v43 = vcombine.high %v1057_v19, %v1061_v20  ;;  %v6701_v44 = vcombine.high %v1058_v21, %v1062_v24 }
 0x291   :  { %2470 = vmatprep.subr.bf16.mxu1 %v6643_v47  ;;  %2556 = vmatprep.subr.bf16.mxu0 %v6645_v48  ;;  %v1065_v47 = vld [vmem:[#allocation11 + $0x700] sm:$0xff] }
 0x292   :  { %v1069_v48 = vld [vmem:[#allocation11 + $0x720] sm:$0xff] }
 0x293   :  { %v6706_v60 = vcombine.low %v1065_v47, %v1069_v48 }
 0x294   :  { %2471 = vmatpush1.bf16.msra.mxu1 %v6642_v53  ;;  %2557 = vmatpush1.bf16.msra.mxu0 %v6644_v54  ;;  %v6707_v53 = vcombine.high %v1065_v47, %v1069_v48  ;;  %v6709_v54 = vcombine.high %v1066_v49, %v1070_v50  ;;  %v855_v50 = vld [vmem:[#allocation11 + $0x70] sm:$0xff] }
 0x295   :  { %2472 = vmatprep.subr.bf16.mxu1 %v6651_v55  ;;  %2558 = vmatprep.subr.bf16.mxu0 %v6653_v56  ;;  %v1073_v55 = vld [vmem:[#allocation11 + $0x740] sm:$0xff] }
 0x296   :  { %v1077_v56 = vld [vmem:[#allocation11 + $0x760] sm:$0xff] }
 0x298   :  { %2473 = vmatpush1.bf16.msra.mxu1 %v6650_v62  ;;  %2559 = vmatpush1.bf16.msra.mxu0 %v6652_v63  ;;  %v8638_v62 = vsub.s32 2, %v8579_v32  ;;  %v6715_v63 = vcombine.high %v1073_v55, %v1077_v56 }
 0x299   :  { %2474 = vmatprep.subr.bf16.mxu1 %v6659_v0  ;;  %2560 = vmatprep.subr.bf16.mxu0 %v6661_v1  ;;  %v6717_v0 = vcombine.high %v1074_v57, %v1078_v58  ;;  %v8641_v1 = vsub.s32 3, %v8579_v32 }
 0x29c   :  { %2475 = vmatpush1.bf16.msra.mxu1 %v6658_v6  ;;  %2561 = vmatpush1.bf16.msra.mxu0 %v6660_v7  ;;  %v398_v6 = vrot.slane %v8617_v59, %v8638_v62  ;;  %v6714_v7 = vcombine.low %v1073_v55, %v1077_v56 }
 0x29d   :  { %2476 = vmatprep.subr.bf16.mxu1 %v6667_v8  ;;  %2562 = vmatprep.subr.bf16.mxu0 %v6669_v9  ;;  %v6716_v8 = vcombine.low %v1074_v57, %v1078_v58  ;;  %v402_v9 = vrot.slane %v8617_v59, %v8641_v1  ;;  %v843_v59 = vld [vmem:[#allocation11 + $0x10] sm:$0xff] }
 0x29e   :  { %v6487_v24 = vcombine.high %v843_v59, %v847_v35  ;;  %v859_v58 = vld [vmem:[#allocation11 + $0x90] sm:$0xff] }
 0x2a0   :  { %2477 = vmatpush1.bf16.msra.mxu1 %v6666_v14  ;;  %2563 = vmatpush1.bf16.msra.mxu0 %v6668_v15  ;;  %v1090_v14 = vld [vmem:[#allocation11 + $0x7c8] sm:$0xff] }
 0x2a1   :  { %2478 = vmatprep.subr.bf16.mxu1 %v6675_v45  ;;  %2564 = vmatprep.subr.bf16.mxu0 %v6677_v16  ;;  %v1094_v15 = vld [vmem:[#allocation11 + $0x7e8] sm:$0xff] }
 0x2a2   :  { %v6732_v20 = vcombine.low %v1090_v14, %v1094_v15 }
 0x2a4   :  { %2479 = vmatpush1.bf16.msra.mxu1 %v6674_v28  ;;  %2565 = vmatpush1.bf16.msra.mxu0 %v6676_v29  ;;  %v6731_v29 = vcombine.high %v1089_v12, %v1093_v13 }
 0x2a5   :  { %2480 = vmatprep.subr.bf16.mxu1 %v6683_v30  ;;  %2566 = vmatprep.subr.bf16.mxu0 %v6685_v31  ;;  %v6733_v30 = vcombine.high %v1090_v14, %v1094_v15  ;;  %v879_v14 = vld [vmem:[#allocation11 + $0x130] sm:$0xff]  ;;  %v880_v15 = vld [vmem:[#allocation11 + $0x138] sm:$0xff] }
 0x2a8   :  { %2481 = vmatpush1.bf16.msra.mxu1 %v6682_v38  ;;  %2567 = vmatpush1.bf16.msra.mxu0 %v6684_v39  ;;  %v848_v38 = vld [vmem:[#allocation11 + $0x38] sm:$0xff] }
 0x2a9   :  { %2482 = vmatprep.subr.bf16.mxu1 %v6691_v40  ;;  %2568 = vmatprep.subr.bf16.mxu0 %v6693_v42  ;;  %v6730_v42 = vcombine.low %v1089_v12, %v1093_v13  ;;  %v6488_v55 = vcombine.low %v844_v36, %v848_v38  ;;  %v875_v13 = vld [vmem:[#allocation11 + $0x110] sm:$0xff] }
 0x2ac   :  { %2483 = vmatpush1.bf16.msra.mxu1 %v6690_v26  ;;  %2569 = vmatpush1.bf16.msra.mxu0 %v6692_v27  ;;  %v6489_v26 = vcombine.high %v844_v36, %v848_v38  ;;  %v892_v36 = vld [vmem:[#allocation11 + $0x198] sm:$0xff] }
 0x2ad   :  { %2484 = vmatprep.subr.bf16.mxu1 %v6699_v43  ;;  %2570 = vmatprep.subr.bf16.mxu0 %v6701_v44  ;;  %v851_v44 = vld [vmem:[#allocation11 + $0x50] sm:$0xff]  ;;  %v896_v38 = vld [vmem:[#allocation11 + $0x1b8] sm:$0xff] }
 0x2ae   :  { %v6495_v56 = vcombine.high %v851_v44, %v855_v50 }
 0x2b0   :  { %2485 = vmatpush1.bf16.msra.mxu1 %v6698_v51  ;;  %2571 = vmatpush1.bf16.msra.mxu0 %v6700_v52  ;;  %v852_v51 = vld [vmem:[#allocation11 + $0x58] sm:$0xff] }
 0x2b1   :  { %2486 = vmatprep.subr.bf16.mxu1 %v6707_v53  ;;  %2572 = vmatprep.subr.bf16.mxu0 %v6709_v54  ;;  %v856_v52 = vld [vmem:[#allocation11 + $0x78] sm:$0xff]  ;;  %v6486_v54 = vcombine.low %v843_v59, %v847_v35  ;;  %v895_v35 = vld [vmem:[#allocation11 + $0x1b0] sm:$0xff] }
 0x2b2   :  { %v6497_v57 = vcombine.high %v852_v51, %v856_v52  ;;  %v6496_v2 = vcombine.low %v852_v51, %v856_v52  ;;  %v908_v51 = vld [vmem:[#allocation11 + $0x218] sm:$0xff] }
 0x2b3   :  { %v912_v52 = vld [vmem:[#allocation11 + $0x238] sm:$0xff] }
 0x2b4   :  { %2487 = vmatpush1.bf16.msra.mxu1 %v6706_v60  ;;  %2573 = vmatpush1.bf16.msra.mxu0 %v6708_v61  ;;  %v863_v60 = vld [vmem:[#allocation11 + $0xb0] sm:$0xff]  ;;  %v860_v61 = vld [vmem:[#allocation11 + $0x98] sm:$0xff] }
 0x2b5   :  { %2488 = vmatprep.subr.bf16.mxu1 %v6715_v63  ;;  %2574 = vmatprep.subr.bf16.mxu0 %v6717_v0  ;;  %v864_v63 = vld [vmem:[#allocation11 + $0xb8] sm:$0xff]  ;;  %v6494_v0 = vcombine.low %v851_v44, %v855_v50  ;;  %v6503_v3 = vcombine.high %v859_v58, %v863_v60  ;;  %v911_v50 = vld [vmem:[#allocation11 + $0x230] sm:$0xff] }
 0x2b6   :  { %v6505_v4 = vcombine.high %v860_v61, %v864_v63 }
 0x2b7   :  { %v804_v45 = vpop.f32.mrb[8].mxu0 }
 0x2b8   :  { %v805_v16 = vadd.f32 %v804_v45, %v398_v6  ;;  %v806_v18 = vpop.f32.mrb[9].mxu0  ;;  %2489 = vmatpush1.bf16.msra.mxu1 %v6714_v7  ;;  %2575 = vmatpush1.bf16.msra.mxu0 %v6716_v8  ;;  %v868_v7 = vld [vmem:[#allocation11 + $0xd8] sm:$0xff] }
 0x2b9   :  { %v807_v25 = vadd.f32 %v806_v18, %v402_v9  ;;  %v808_v28 = vpop.f32.mrb[10].mxu0  ;;  %2490 = vmatprep.subr.bf16.mxu1 %v6723_v10  ;;  %2576 = vmatprep.subr.bf16.mxu0 %v6725_v11  ;;  %v872_v8 = vld [vmem:[#allocation11 + $0xf8] sm:$0xff]  ;;  %v6504_v10 = vcombine.low %v860_v61, %v864_v63  ;;  %v6519_v18 = vcombine.high %v875_v13, %v879_v14 }
 0x2ba   :  { %v823_v31 = vmul.f32 0.2, %v805_v16  ;;  %v809_v33 = vadd.f32 %v808_v28, %v398_v6  ;;  %v810_v34 = vpop.f32.mrb[11].mxu0  ;;  %vm815_vm8 = vcmp.gt.f32.partialorder %v805_v16, 0.0  ;;  %v871_v6 = vld [vmem:[#allocation11 + $0xf0] sm:$0xff]  ;;  %v6513_v12 = vcombine.high %v868_v7, %v872_v8  ;;  %v884_v28 = vld [vmem:[#allocation11 + $0x158] sm:$0xff] }
 0x2bb   :  { %v824_v39 = vmul.f32 0.2, %v807_v25  ;;  %v811_v40 = vadd.f32 %v810_v34, %v402_v9  ;;  %vm816_vm9 = vcmp.gt.f32.partialorder %v807_v25, 0.0  ;;  %v6502_v9 = vcombine.low %v859_v58, %v863_v60  ;;  %v891_v34 = vld [vmem:[#allocation11 + $0x190] sm:$0xff]  ;;  %v916_v61 = vld [vmem:[#allocation11 + $0x258] sm:$0xff] }
 0x2bc   :  { %vm819_vm10 = vcmp.gt.f32.partialorder %v809_v33, 0.0  ;;  %v827_v19 = vmul.f32 0.2, %v809_v33  ;;  %2491 = vmatpush1.bf16.msra.mxu1 %v6722_v22  ;;  %2577 = vmatpush1.bf16.msra.mxu0 %v6724_v23  ;;  %v831_v27 = vsel %vm815_vm8, %v805_v16, %v823_v31  ;;  %v6511_v11 = vcombine.high %v867_v5, %v871_v6  ;;  %v883_v23 = vld [vmem:[#allocation11 + $0x150] sm:$0xff]  ;;  %v920_v63 = vld [vmem:[#allocation11 + $0x278] sm:$0xff] }
 0x2bd   :  { %vm820_vm11 = vcmp.gt.f32.partialorder %v811_v40, 0.0  ;;  %v828_v21 = vmul.f32 0.2, %v811_v40  ;;  %2492 = vmatprep.subr.bf16.mxu1 %v6731_v29  ;;  %2578 = vmatprep.subr.bf16.mxu0 %v6733_v30  ;;  %v832_v47 = vsel %vm816_vm9, %v807_v25, %v824_v39  ;;  %v6510_v45 = vcombine.low %v867_v5, %v871_v6  ;;  %v887_v25 = vld [vmem:[#allocation11 + $0x170] sm:$0xff]  ;;  %v888_v29 = vld [vmem:[#allocation11 + $0x178] sm:$0xff] }
 0x2be   :  { %v835_v43 = vsel %vm819_vm10, %v809_v33, %v827_v19  ;;  %v6512_v16 = vcombine.low %v868_v7, %v872_v8  ;;  %v6518_v30 = vcombine.low %v875_v13, %v879_v14  ;;  %v6527_v31 = vcombine.high %v883_v23, %v887_v25  ;;  %v915_v58 = vld [vmem:[#allocation11 + $0x250] sm:$0xff]  ;;  %v924_v7 = vld [vmem:[#allocation11 + $0x298] sm:$0xff] }
 0x2bf   :  { %v8648_v48 = vpack.c.bf16 %v835_v43, %v831_v27  ;;  %v836_v49 = vsel %vm820_vm11, %v811_v40, %v828_v21  ;;  %v6529_v33 = vcombine.high %v884_v28, %v888_v29  ;;  %v6526_v39 = vcombine.low %v883_v23, %v887_v25  ;;  %v903_v21 = vld [vmem:[#allocation11 + $0x1f0] sm:$0xff]  ;;  %v928_v8 = vld [vmem:[#allocation11 + $0x2b8] sm:$0xff] }
 0x2c0   :  { %v8650_v53 = vpack.c.bf16 %v836_v49, %v832_v47  ;;  %2493 = vmatpush1.bf16.msra.mxu1 %v6730_v42  ;;  %2579 = vmatpush1.bf16.msra.mxu0 %v6732_v20  ;;  %v6528_v40 = vcombine.low %v884_v28, %v888_v29  ;;  %v6535_v42 = vcombine.high %v891_v34, %v895_v35  ;;  %v899_v20 = vld [vmem:[#allocation11 + $0x1d0] sm:$0xff]  ;;  %v940_v28 = vld [vmem:[#allocation11 + $0x318] sm:$0xff] }
 0x2c1   :  { %2591 = vmatprep.subr.bf16.mxu1 %v6487_v24  ;;  %2677 = vmatprep.subr.bf16.mxu0 %v6489_v26  ;;  %v6537_v19 = vcombine.high %v892_v36, %v896_v38  ;;  %v900_v24 = vld [vmem:[#allocation11 + $0x1d8] sm:$0xff]  ;;  %v6534_v27 = vcombine.low %v891_v34, %v895_v35  ;;  %v6536_v43 = vcombine.low %v892_v36, %v896_v38  ;;  %v907_v49 = vld [vmem:[#allocation11 + $0x210] sm:$0xff] }
 0x2c2   :  { %2494 = vmatprep.mubr.bf16.mxu1 %v8650_v53  ;;  %2580 = vmatprep.mubr.bf16.mxu0 %v8650_v53  ;;  %v904_v26 = vld [vmem:[#allocation11 + $0x1f8] sm:$0xff]  ;;  %v6543_v44 = vcombine.high %v899_v20, %v903_v21  ;;  %v919_v60 = vld [vmem:[#allocation11 + $0x270] sm:$0xff] }
 0x2c3   :  { %2495 = vmatmul.mubr.bf16.vlgmr.msra.gmra.mrb[0].mxu1 %v8648_v48  ;;  %2581 = vmatmul.mubr.bf16.vlgmr.msra.gmra.mrb[12].mxu0 %v8648_v48  ;;  %v6545_v47 = vcombine.high %v900_v24, %v904_v26  ;;  %v923_v5 = vld [vmem:[#allocation11 + $0x290] sm:$0xff]  ;;  %v944_v29 = vld [vmem:[#allocation11 + $0x338] sm:$0xff] }
 0x2c4   :  { %2592 = vmatpush1.bf16.msra.mxu1 %v6486_v54  ;;  %2623 = vmatprep.mubr.bf16.mxu1 %v8625_v17  ;;  %v6542_v54 = vcombine.low %v899_v20, %v903_v21  ;;  %v927_v6 = vld [vmem:[#allocation11 + $0x2b0] sm:$0xff]  ;;  %v948_v36 = vld [vmem:[#allocation11 + $0x358] sm:$0xff] }
 0x2c5   :  { %2678 = vmatpush1.bf16.msra.mxu0 %v6488_v55  ;;  %2709 = vmatprep.mubr.bf16.mxu0 %v8625_v17  ;;  %v876_v17 = vld [vmem:[#allocation11 + $0x118] sm:$0xff]  ;;  %v6544_v55 = vcombine.low %v900_v24, %v904_v26  ;;  %v931_v13 = vld [vmem:[#allocation11 + $0x2d0] sm:$0xff] }
 0x2c6   :  { %2593 = vmatprep.subr.bf16.mxu1 %v6495_v56  ;;  %2679 = vmatprep.subr.bf16.mxu0 %v6497_v57  ;;  %v6521_v22 = vcombine.high %v876_v17, %v880_v15  ;;  %v6520_v59 = vcombine.low %v876_v17, %v880_v15  ;;  %v6551_v56 = vcombine.high %v907_v49, %v911_v50  ;;  %v935_v14 = vld [vmem:[#allocation11 + $0x2f0] sm:$0xff]  ;;  %v932_v17 = vld [vmem:[#allocation11 + $0x2d8] sm:$0xff] }
 0x2c7   :  { %v6553_v57 = vcombine.high %v908_v51, %v912_v52  ;;  %v936_v15 = vld [vmem:[#allocation11 + $0x2f8] sm:$0xff]  ;;  %v939_v23 = vld [vmem:[#allocation11 + $0x310] sm:$0xff] }
 0x2c8   :  { %2594 = vmatpush1.bf16.msra.mxu1 %v6494_v0  ;;  %v6550_v0 = vcombine.low %v907_v49, %v911_v50  ;;  %v943_v25 = vld [vmem:[#allocation11 + $0x330] sm:$0xff]  ;;  %v952_v38 = vld [vmem:[#allocation11 + $0x378] sm:$0xff] }
 0x2c9   :  { %2680 = vmatpush1.bf16.msra.mxu0 %v6496_v2  ;;  %2595 = vmatprep.subr.bf16.mxu1 %v6503_v3  ;;  %v6552_v2 = vcombine.low %v908_v51, %v912_v52  ;;  %v6559_v3 = vcombine.high %v915_v58, %v919_v60  ;;  %v947_v34 = vld [vmem:[#allocation11 + $0x350] sm:$0xff]  ;;  %v956_v24 = vld [vmem:[#allocation11 + $0x398] sm:$0xff] }
 0x2ca   :  { %2681 = vmatprep.subr.bf16.mxu0 %v6505_v4  ;;  %v6561_v4 = vcombine.high %v916_v61, %v920_v63  ;;  %v951_v35 = vld [vmem:[#allocation11 + $0x370] sm:$0xff]  ;;  %v960_v26 = vld [vmem:[#allocation11 + $0x3b8] sm:$0xff] }
 0x2cb   :  { %v955_v20 = vld [vmem:[#allocation11 + $0x390] sm:$0xff]  ;;  %v964_v51 = vld [vmem:[#allocation11 + $0x3d8] sm:$0xff] }
 0x2cc   :  { %2596 = vmatpush1.bf16.msra.mxu1 %v6502_v9  ;;  %v6558_v9 = vcombine.low %v915_v58, %v919_v60  ;;  %v959_v21 = vld [vmem:[#allocation11 + $0x3b0] sm:$0xff]  ;;  %v968_v52 = vld [vmem:[#allocation11 + $0x3f8] sm:$0xff] }
 0x2cd   :  { %2682 = vmatpush1.bf16.msra.mxu0 %v6504_v10  ;;  %2597 = vmatprep.subr.bf16.mxu1 %v6511_v11  ;;  %v6560_v10 = vcombine.low %v916_v61, %v920_v63  ;;  %v6567_v11 = vcombine.high %v923_v5, %v927_v6  ;;  %v963_v49 = vld [vmem:[#allocation11 + $0x3d0] sm:$0xff]  ;;  %v972_v61 = vld [vmem:[#allocation11 + $0x418] sm:$0xff] }
 0x2ce   :  { %2683 = vmatprep.subr.bf16.mxu0 %v6513_v12  ;;  %v6569_v12 = vcombine.high %v924_v7, %v928_v8  ;;  %v967_v50 = vld [vmem:[#allocation11 + $0x3f0] sm:$0xff]  ;;  %v976_v63 = vld [vmem:[#allocation11 + $0x438] sm:$0xff] }
 0x2cf   :  { %v971_v58 = vld [vmem:[#allocation11 + $0x410] sm:$0xff] }
 0x2d0   :  { %2598 = vmatpush1.bf16.msra.mxu1 %v6510_v45  ;;  %v6566_v45 = vcombine.low %v923_v5, %v927_v6  ;;  %v975_v60 = vld [vmem:[#allocation11 + $0x430] sm:$0xff] }
 0x2d1   :  { %2684 = vmatpush1.bf16.msra.mxu0 %v6512_v16  ;;  %2599 = vmatprep.subr.bf16.mxu1 %v6519_v18  ;;  %v6568_v16 = vcombine.low %v924_v7, %v928_v8  ;;  %v6575_v18 = vcombine.high %v931_v13, %v935_v14  ;;  %v979_v5 = vld [vmem:[#allocation11 + $0x450] sm:$0xff]  ;;  %v6614_v7 = vcombine.low %v971_v58, %v975_v60  ;;  %v980_v8 = vld [vmem:[#allocation11 + $0x458] sm:$0xff] }
 0x2d2   :  { %2685 = vmatprep.subr.bf16.mxu0 %v6521_v22  ;;  %v6577_v22 = vcombine.high %v932_v17, %v936_v15  ;;  %v983_v6 = vld [vmem:[#allocation11 + $0x470] sm:$0xff] }
 0x2d4   :  { %2600 = vmatpush1.bf16.msra.mxu1 %v6518_v30  ;;  %v6574_v30 = vcombine.low %v931_v13, %v935_v14  ;;  %v991_v13 = vld [vmem:[#allocation11 + $0x4b0] sm:$0xff] }
 0x2d5   :  { %2686 = vmatpush1.bf16.msra.mxu0 %v6520_v59  ;;  %2601 = vmatprep.subr.bf16.mxu1 %v6527_v31  ;;  %v6576_v59 = vcombine.low %v932_v17, %v936_v15  ;;  %v6583_v31 = vcombine.high %v939_v23, %v943_v25  ;;  %v988_v17 = vld [vmem:[#allocation11 + $0x498] sm:$0xff] }
 0x2d6   :  { %2687 = vmatprep.subr.bf16.mxu0 %v6529_v33  ;;  %v6585_v33 = vcombine.high %v940_v28, %v944_v29  ;;  %v992_v15 = vld [vmem:[#allocation11 + $0x4b8] sm:$0xff] }
 0x2d8   :  { %2602 = vmatpush1.bf16.msra.mxu1 %v6526_v39  ;;  %v6582_v39 = vcombine.low %v939_v23, %v943_v25  ;;  %v995_v23 = vld [vmem:[#allocation11 + $0x4d0] sm:$0xff] }
 0x2d9   :  { %2688 = vmatpush1.bf16.msra.mxu0 %v6528_v40  ;;  %2603 = vmatprep.subr.bf16.mxu1 %v6535_v42  ;;  %v6584_v40 = vcombine.low %v940_v28, %v944_v29  ;;  %v6591_v42 = vcombine.high %v947_v34, %v951_v35  ;;  %v999_v25 = vld [vmem:[#allocation11 + $0x4f0] sm:$0xff]  ;;  %v996_v28 = vld [vmem:[#allocation11 + $0x4d8] sm:$0xff] }
 0x2da   :  { %2689 = vmatprep.subr.bf16.mxu0 %v6537_v19  ;;  %v6593_v19 = vcombine.high %v948_v36, %v952_v38  ;;  %v1000_v29 = vld [vmem:[#allocation11 + $0x4f8] sm:$0xff] }
 0x2dc   :  { %2604 = vmatpush1.bf16.msra.mxu1 %v6534_v27  ;;  %v6590_v27 = vcombine.low %v947_v34, %v951_v35  ;;  %v1007_v34 = vld [vmem:[#allocation11 + $0x530] sm:$0xff]  ;;  %v1004_v35 = vld [vmem:[#allocation11 + $0x518] sm:$0xff] }
 0x2dd   :  { %2690 = vmatpush1.bf16.msra.mxu0 %v6536_v43  ;;  %2605 = vmatprep.subr.bf16.mxu1 %v6543_v44  ;;  %v6592_v43 = vcombine.low %v948_v36, %v952_v38  ;;  %v6599_v44 = vcombine.high %v955_v20, %v959_v21  ;;  %v1008_v36 = vld [vmem:[#allocation11 + $0x538] sm:$0xff]  ;;  %v6640_v38 = vcombine.low %v996_v28, %v1000_v29 }
 0x2de   :  { %2691 = vmatprep.subr.bf16.mxu0 %v6545_v47  ;;  %v6601_v47 = vcombine.high %v956_v24, %v960_v26 }
 0x2e0   :  { %2606 = vmatpush1.bf16.msra.mxu1 %v6542_v54  ;;  %v6598_v54 = vcombine.low %v955_v20, %v959_v21  ;;  %v1012_v20 = vld [vmem:[#allocation11 + $0x558] sm:$0xff] }
 0x2e1   :  { %2692 = vmatpush1.bf16.msra.mxu0 %v6544_v55  ;;  %2607 = vmatprep.subr.bf16.mxu1 %v6551_v56  ;;  %v6600_v55 = vcombine.low %v956_v24, %v960_v26  ;;  %v6607_v56 = vcombine.high %v963_v49, %v967_v50  ;;  %v1016_v21 = vld [vmem:[#allocation11 + $0x578] sm:$0xff]  ;;  %v6648_v26 = vcombine.low %v1004_v35, %v1008_v36 }
 0x2e2   :  { %2693 = vmatprep.subr.bf16.mxu0 %v6553_v57  ;;  %v6609_v57 = vcombine.high %v964_v51, %v968_v52 }
 0x2e4   :  { %2608 = vmatpush1.bf16.msra.mxu1 %v6550_v0  ;;  %v6606_v0 = vcombine.low %v963_v49, %v967_v50  ;;  %v1020_v49 = vld [vmem:[#allocation11 + $0x598] sm:$0xff] }
 0x2e5   :  { %2694 = vmatpush1.bf16.msra.mxu0 %v6552_v2  ;;  %2609 = vmatprep.subr.bf16.mxu1 %v6559_v3  ;;  %v6608_v2 = vcombine.low %v964_v51, %v968_v52  ;;  %v6615_v3 = vcombine.high %v971_v58, %v975_v60  ;;  %v1024_v50 = vld [vmem:[#allocation11 + $0x5b8] sm:$0xff]  ;;  %v6656_v52 = vcombine.low %v1012_v20, %v1016_v21 }
 0x2e6   :  { %2695 = vmatprep.subr.bf16.mxu0 %v6561_v4  ;;  %v6617_v4 = vcombine.high %v972_v61, %v976_v63  ;;  %v1028_v58 = vld [vmem:[#allocation11 + $0x5d8] sm:$0xff] }
 0x2e7   :  { %v1032_v60 = vld [vmem:[#allocation11 + $0x5f8] sm:$0xff] }
 0x2e8   :  { %2610 = vmatpush1.bf16.msra.mxu1 %v6558_v9  ;;  %v984_v9 = vld [vmem:[#allocation11 + $0x478] sm:$0xff] }
 0x2e9   :  { %2696 = vmatpush1.bf16.msra.mxu0 %v6560_v10  ;;  %2611 = vmatprep.subr.bf16.mxu1 %v6567_v11  ;;  %v6616_v10 = vcombine.low %v972_v61, %v976_v63  ;;  %v6623_v11 = vcombine.high %v979_v5, %v983_v6  ;;  %v6625_v14 = vcombine.high %v980_v8, %v984_v9 }
 0x2ea   :  { %2697 = vmatprep.subr.bf16.mxu0 %v6569_v12  ;;  %v987_v12 = vld [vmem:[#allocation11 + $0x490] sm:$0xff]  ;;  %v6664_v63 = vcombine.low %v1020_v49, %v1024_v50 }
 0x2ec   :  { %2612 = vmatpush1.bf16.msra.mxu1 %v6566_v45  ;;  %v6622_v45 = vcombine.low %v979_v5, %v983_v6  ;;  %v1036_v5 = vld [vmem:[#allocation11 + $0x618] sm:$0xff] }
 0x2ed   :  { %2698 = vmatpush1.bf16.msra.mxu0 %v6568_v16  ;;  %2613 = vmatprep.subr.bf16.mxu1 %v6575_v18  ;;  %v6624_v16 = vcombine.low %v980_v8, %v984_v9  ;;  %v6631_v18 = vcombine.high %v987_v12, %v991_v13  ;;  %v1040_v6 = vld [vmem:[#allocation11 + $0x638] sm:$0xff]  ;;  %v6672_v8 = vcombine.low %v1028_v58, %v1032_v60 }
 0x2ee   :  { %2699 = vmatprep.subr.bf16.mxu0 %v6577_v22  ;;  %v6633_v22 = vcombine.high %v988_v17, %v992_v15 }
 0x2f0   :  { %2614 = vmatpush1.bf16.msra.mxu1 %v6574_v30  ;;  %v6630_v30 = vcombine.low %v987_v12, %v991_v13  ;;  %v1047_v12 = vld [vmem:[#allocation11 + $0x670] sm:$0xff]  ;;  %v1044_v13 = vld [vmem:[#allocation11 + $0x658] sm:$0xff] }
 0x2f1   :  { %2700 = vmatpush1.bf16.msra.mxu0 %v6576_v59  ;;  %2615 = vmatprep.subr.bf16.mxu1 %v6583_v31  ;;  %v6639_v59 = vcombine.high %v995_v23, %v999_v25  ;;  %v6641_v31 = vcombine.high %v996_v28, %v1000_v29 }
 0x2f2   :  { %2701 = vmatprep.subr.bf16.mxu0 %v6585_v33  ;;  %v1003_v33 = vld [vmem:[#allocation11 + $0x510] sm:$0xff] }
 0x2f3   :  { %v6646_v24 = vcombine.low %v1003_v33, %v1007_v34 }
 0x2f4   :  { %2616 = vmatpush1.bf16.msra.mxu1 %v6582_v39  ;;  %v6647_v39 = vcombine.high %v1003_v33, %v1007_v34  ;;  %v1060_v33 = vld [vmem:[#allocation11 + $0x6d8] sm:$0xff] }
 0x2f5   :  { %2702 = vmatpush1.bf16.msra.mxu0 %v6584_v40  ;;  %2617 = vmatprep.subr.bf16.mxu1 %v6591_v42  ;;  %v6649_v40 = vcombine.high %v1004_v35, %v1008_v36  ;;  %v1011_v42 = vld [vmem:[#allocation11 + $0x550] sm:$0xff]  ;;  %v1064_v34 = vld [vmem:[#allocation11 + $0x6f8] sm:$0xff] }
 0x2f6   :  { %2703 = vmatprep.subr.bf16.mxu0 %v6593_v19  ;;  %v1015_v19 = vld [vmem:[#allocation11 + $0x570] sm:$0xff] }
 0x2f7   :  { %v6654_v51 = vcombine.low %v1011_v42, %v1015_v19 }
 0x2f8   :  { %2618 = vmatpush1.bf16.msra.mxu1 %v6590_v27  ;;  %v6655_v27 = vcombine.high %v1011_v42, %v1015_v19  ;;  %v1068_v42 = vld [vmem:[#allocation11 + $0x718] sm:$0xff] }
 0x2f9   :  { %2704 = vmatpush1.bf16.msra.mxu0 %v6592_v43  ;;  %2619 = vmatprep.subr.bf16.mxu1 %v6599_v44  ;;  %v6657_v43 = vcombine.high %v1012_v20, %v1016_v21  ;;  %v1019_v44 = vld [vmem:[#allocation11 + $0x590] sm:$0xff]  ;;  %v1072_v19 = vld [vmem:[#allocation11 + $0x738] sm:$0xff]  ;;  %v6704_v21 = vcombine.low %v1060_v33, %v1064_v34 }
 0x2fa   :  { %2705 = vmatprep.subr.bf16.mxu0 %v6601_v47  ;;  %v1023_v47 = vld [vmem:[#allocation11 + $0x5b0] sm:$0xff] }
 0x2fb   :  { %v6662_v61 = vcombine.low %v1019_v44, %v1023_v47 }
 0x2fc   :  { %2620 = vmatpush1.bf16.msra.mxu1 %v6598_v54  ;;  %v6663_v54 = vcombine.high %v1019_v44, %v1023_v47  ;;  %v1076_v44 = vld [vmem:[#allocation11 + $0x758] sm:$0xff] }
 0x2fd   :  { %2706 = vmatpush1.bf16.msra.mxu0 %v6600_v55  ;;  %2621 = vmatprep.subr.bf16.mxu1 %v6607_v56  ;;  %v6665_v55 = vcombine.high %v1020_v49, %v1024_v50  ;;  %v1027_v56 = vld [vmem:[#allocation11 + $0x5d0] sm:$0xff]  ;;  %v1080_v47 = vld [vmem:[#allocation11 + $0x778] sm:$0xff]  ;;  %v6712_v50 = vcombine.low %v1068_v42, %v1072_v19 }
 0x2fe   :  { %2707 = vmatprep.subr.bf16.mxu0 %v6609_v57  ;;  %v1031_v57 = vld [vmem:[#allocation11 + $0x5f0] sm:$0xff] }
 0x300   :  { %2622 = vmatpush1.bf16.msra.mxu1 %v6606_v0  ;;  %v6671_v0 = vcombine.high %v1027_v56, %v1031_v57 }
 0x301   :  { %2708 = vmatpush1.bf16.msra.mxu0 %v6608_v2  ;;  %2634 = vmatprep.subr.bf16.mxu1 %v6615_v3  ;;  %v6673_v2 = vcombine.high %v1028_v58, %v1032_v60  ;;  %v1035_v3 = vld [vmem:[#allocation11 + $0x610] sm:$0xff]  ;;  %v6720_v60 = vcombine.low %v1076_v44, %v1080_v47 }
 0x302   :  { %2720 = vmatprep.subr.bf16.mxu0 %v6617_v4  ;;  %v1039_v4 = vld [vmem:[#allocation11 + $0x630] sm:$0xff] }
 0x303   :  { %2624 = vmatmul.mubr.bf16.vlgmr.msra.gmra.mrb[4].mxu1 %v8623_v46  ;;  %v6679_v9 = vcombine.high %v1035_v3, %v1039_v4 }
 0x304   :  { %2710 = vmatmul.mubr.bf16.vlgmr.msra.gmra.mrb[16].mxu0 %v8623_v46  ;;  %2635 = vmatpush1.bf16.msra.mxu1 %v6614_v7  ;;  %v6632_v46 = vcombine.low %v988_v17, %v992_v15  ;;  %v6670_v7 = vcombine.low %v1027_v56, %v1031_v57  ;;  %v6678_v17 = vcombine.low %v1035_v3, %v1039_v4  ;;  %v1084_v56 = vld [vmem:[#allocation11 + $0x798] sm:$0xff] }
 0x305   :  { %2666 = vmatprep.mubr.bf16.mxu1 %v8650_v53  ;;  %2721 = vmatpush1.bf16.msra.mxu0 %v6616_v10  ;;  %v6681_v10 = vcombine.high %v1036_v5, %v1040_v6  ;;  %v6680_v15 = vcombine.low %v1036_v5, %v1040_v6  ;;  %v1088_v57 = vld [vmem:[#allocation11 + $0x7b8] sm:$0xff] }
 0x306   :  { %2752 = vmatprep.mubr.bf16.mxu0 %v8650_v53  ;;  %2636 = vmatprep.subr.bf16.mxu1 %v6623_v11  ;;  %v6638_v53 = vcombine.low %v995_v23, %v999_v25  ;;  %v1043_v11 = vld [vmem:[#allocation11 + $0x650] sm:$0xff]  ;;  %v1052_v23 = vld [vmem:[#allocation11 + $0x698] sm:$0xff]  ;;  %v6728_v6 = vcombine.low %v1084_v56, %v1088_v57 }
 0x307   :  { %2722 = vmatprep.subr.bf16.mxu0 %v6625_v14  ;;  %v1048_v14 = vld [vmem:[#allocation11 + $0x678] sm:$0xff]  ;;  %v6686_v28 = vcombine.low %v1043_v11, %v1047_v12 }
 0x308   :  { %2637 = vmatpush1.bf16.msra.mxu1 %v6622_v45  ;;  %v6687_v45 = vcombine.high %v1043_v11, %v1047_v12  ;;  %v1056_v25 = vld [vmem:[#allocation11 + $0x6b8] sm:$0xff]  ;;  %v6688_v29 = vcombine.low %v1044_v13, %v1048_v14  ;;  %v7500_v11 = vld [vmem:[#allocation14 + $0x4] ss:$28 sps:$4 sm:$0xff]   ;;  %v7503_v12 = vld [vmem:[#allocation14 + $0xc] ss:$28 sps:$4 sm:$0xff]  }
 0x309   :  { %2723 = vmatpush1.bf16.msra.mxu0 %v6624_v16  ;;  %2638 = vmatprep.subr.bf16.mxu1 %v6631_v18  ;;  %v6689_v16 = vcombine.high %v1044_v13, %v1048_v14  ;;  %v1051_v18 = vld [vmem:[#allocation11 + $0x690] sm:$0xff]  ;;  %v6696_v36 = vcombine.low %v1052_v23, %v1056_v25  ;;  %v1092_v3 = vld [vmem:[#allocation11 + $0x7d8] sm:$0xff]  ;;  %v7498_v13 = vld [vmem:[#allocation14] ss:$28 sps:$4 sm:$0xff]  }
 0x30a   :  { %2724 = vmatprep.subr.bf16.mxu0 %v6633_v22  ;;  %v1055_v22 = vld [vmem:[#allocation11 + $0x6b0] sm:$0xff]  ;;  %v1096_v4 = vld [vmem:[#allocation11 + $0x7f8] sm:$0xff] }
 0x30b   :  { %v6694_v35 = vcombine.low %v1051_v18, %v1055_v22  ;;  %v7501_v14 = vld [vmem:[#allocation14 + $0x8] ss:$28 sps:$4 sm:$0xff]  }
 0x30c   :  { %2639 = vmatpush1.bf16.msra.mxu1 %v6630_v30  ;;  %v6695_v30 = vcombine.high %v1051_v18, %v1055_v22  ;;  %v7512_v18 = vld [vmem:[#allocation14 + $0x74] ss:$28 sps:$4 sm:$0xff]   ;;  %v7515_v22 = vld [vmem:[#allocation14 + $0x7c] ss:$28 sps:$4 sm:$0xff]  }
 0x30d   :  { %2725 = vmatpush1.bf16.msra.mxu0 %v6632_v46  ;;  %2640 = vmatprep.subr.bf16.mxu1 %v6639_v59  ;;  %v6697_v46 = vcombine.high %v1052_v23, %v1056_v25  ;;  %v1059_v59 = vld [vmem:[#allocation11 + $0x6d0] sm:$0xff]  ;;  %v7513_v25 = vld [vmem:[#allocation14 + $0x78] ss:$28 sps:$4 sm:$0xff]  }
 0x30e   :  { %2726 = vmatprep.subr.bf16.mxu0 %v6641_v31  ;;  %v1063_v31 = vld [vmem:[#allocation11 + $0x6f0] sm:$0xff] }
 0x30f   :  { %v6702_v20 = vcombine.low %v1059_v59, %v1063_v31  ;;  %v7510_v23 = vld [vmem:[#allocation14 + $0x70] ss:$28 sps:$4 sm:$0xff]  }
 0x310   :  { %2641 = vmatpush1.bf16.msra.mxu1 %v6638_v53  ;;  %v6703_v53 = vcombine.high %v1059_v59, %v1063_v31  ;;  %v7527_v59 = vld [vmem:[#allocation14 + $0xec] ss:$28 sps:$4 sm:$0xff]   ;;  %v7522_v31 = vld [vmem:[#allocation14 + $0xe0] ss:$28 sps:$4 sm:$0xff]  }
 0x311   :  { %2727 = vmatpush1.bf16.msra.mxu0 %v6640_v38  ;;  %2642 = vmatprep.subr.bf16.mxu1 %v6647_v39  ;;  %v6705_v38 = vcombine.high %v1060_v33, %v1064_v34  ;;  %v1067_v39 = vld [vmem:[#allocation11 + $0x710] sm:$0xff]  ;;  %v7530_v34 = vld [vmem:[#allocation14 + $0x11c] ss:$28 sps:$4 sm:$0xff]  }
 0x312   :  { %2728 = vmatprep.subr.bf16.mxu0 %v6649_v40  ;;  %v1071_v40 = vld [vmem:[#allocation11 + $0x730] sm:$0xff] }
 0x313   :  { %v6710_v49 = vcombine.low %v1067_v39, %v1071_v40  ;;  %v7525_v33 = vld [vmem:[#allocation14 + $0xe8] ss:$28 sps:$4 sm:$0xff]  }
 0x314   :  { %2643 = vmatpush1.bf16.msra.mxu1 %v6646_v24  ;;  %v6711_v24 = vcombine.high %v1067_v39, %v1071_v40  ;;  %v7539_v39 = vld [vmem:[#allocation14 + $0x15c] ss:$28 sps:$4 sm:$0xff]   ;;  %v7534_v40 = vld [vmem:[#allocation14 + $0x150] ss:$28 sps:$4 sm:$0xff]  }
 0x315   :  { %2729 = vmatpush1.bf16.msra.mxu0 %v6648_v26  ;;  %2644 = vmatprep.subr.bf16.mxu1 %v6655_v27  ;;  %v6713_v26 = vcombine.high %v1068_v42, %v1072_v19  ;;  %v1075_v27 = vld [vmem:[#allocation11 + $0x750] sm:$0xff]  ;;  %v7537_v42 = vld [vmem:[#allocation14 + $0x158] ss:$28 sps:$4 sm:$0xff]  }
 0x316   :  { %2730 = vmatprep.subr.bf16.mxu0 %v6657_v43  ;;  %v1079_v43 = vld [vmem:[#allocation11 + $0x770] sm:$0xff] }
 0x317   :  { %v6718_v58 = vcombine.low %v1075_v27, %v1079_v43  ;;  %v7542_v19 = vld [vmem:[#allocation14 + $0x18c] ss:$28 sps:$4 sm:$0xff]  }
 0x318   :  { %2645 = vmatpush1.bf16.msra.mxu1 %v6654_v51  ;;  %v6719_v51 = vcombine.high %v1075_v27, %v1079_v43  ;;  %v7551_v27 = vld [vmem:[#allocation14 + $0x1cc] ss:$28 sps:$4 sm:$0xff]   ;;  %v7546_v43 = vld [vmem:[#allocation14 + $0x1c0] ss:$28 sps:$4 sm:$0xff]  }
 0x319   :  { %2731 = vmatpush1.bf16.msra.mxu0 %v6656_v52  ;;  %2646 = vmatprep.subr.bf16.mxu1 %v6663_v54  ;;  %v6721_v52 = vcombine.high %v1076_v44, %v1080_v47  ;;  %v1083_v54 = vld [vmem:[#allocation11 + $0x790] sm:$0xff]  ;;  %v7554_v47 = vld [vmem:[#allocation14 + $0x1fc] ss:$28 sps:$4 sm:$0xff]  }
 0x31a   :  { %2732 = vmatprep.subr.bf16.mxu0 %v6665_v55  ;;  %v1087_v55 = vld [vmem:[#allocation11 + $0x7b0] sm:$0xff] }
 0x31b   :  { %v6726_v5 = vcombine.low %v1083_v54, %v1087_v55  ;;  %v7549_v44 = vld [vmem:[#allocation14 + $0x1c8] ss:$28 sps:$4 sm:$0xff]  }
 0x31c   :  { %2647 = vmatpush1.bf16.msra.mxu1 %v6662_v61  ;;  %v6727_v61 = vcombine.high %v1083_v54, %v1087_v55  ;;  %v7563_v54 = vld [vmem:[#allocation14 + $0x23c] ss:$28 sps:$4 sm:$0xff]   ;;  %v7558_v55 = vld [vmem:[#allocation14 + $0x230] ss:$28 sps:$4 sm:$0xff]  }
 0x31d   :  { %2733 = vmatpush1.bf16.msra.mxu0 %v6664_v63  ;;  %2648 = vmatprep.subr.bf16.mxu1 %v6671_v0  ;;  %v6729_v63 = vcombine.high %v1084_v56, %v1088_v57  ;;  %v1091_v0 = vld [vmem:[#allocation11 + $0x7d0] sm:$0xff]  ;;  %v7561_v56 = vld [vmem:[#allocation14 + $0x238] ss:$28 sps:$4 sm:$0xff]  }
 0x31e   :  { %2734 = vmatprep.subr.bf16.mxu0 %v6673_v2  ;;  %v1095_v2 = vld [vmem:[#allocation11 + $0x7f0] sm:$0xff] }
 0x31f   :  { %v7566_v57 = vld [vmem:[#allocation14 + $0x26c] ss:$28 sps:$4 sm:$0xff]  }
 0x320   :  { %2649 = vmatpush1.bf16.msra.mxu1 %v6670_v7  ;;  %v6735_v7 = vcombine.high %v1091_v0, %v1095_v2 }
 0x321   :  { %2735 = vmatpush1.bf16.msra.mxu0 %v6672_v8  ;;  %2650 = vmatprep.subr.bf16.mxu1 %v6679_v9  ;;  %v6737_v8 = vcombine.high %v1092_v3, %v1096_v4  ;;  %v6734_v9 = vcombine.low %v1091_v0, %v1095_v2  ;;  %v7575_v0 = vld [vmem:[#allocation14 + $0x2ac] ss:$28 sps:$4 sm:$0xff]   ;;  %v7570_v2 = vld [vmem:[#allocation14 + $0x2a0] ss:$28 sps:$4 sm:$0xff]  }
 0x322   :  { %2736 = vmatprep.subr.bf16.mxu0 %v6681_v10  ;;  %v6736_v10 = vcombine.low %v1092_v3, %v1096_v4  ;;  %v7573_v3 = vld [vmem:[#allocation14 + $0x2a8] ss:$28 sps:$4 sm:$0xff]   ;;  %v7578_v4 = vld [vmem:[#allocation14 + $0x2dc] ss:$28 sps:$4 sm:$0xff]  }
 0x324   :  { %2651 = vmatpush1.bf16.msra.mxu1 %v6678_v17  ;;  %v7506_v17 = vld [vmem:[#allocation14 + $0x3c] ss:$28 sps:$4 sm:$0xff]  }
 0x325   :  { %2737 = vmatpush1.bf16.msra.mxu0 %v6680_v15  ;;  %2652 = vmatprep.subr.bf16.mxu1 %v6687_v45  ;;  %v7509_v15 = vld [vmem:[#allocation14 + $0x44] ss:$28 sps:$4 sm:$0xff]   ;;  %v7504_v45 = vld [vmem:[#allocation14 + $0x38] ss:$28 sps:$4 sm:$0xff]  }
 0x326   :  { %2738 = vmatprep.subr.bf16.mxu0 %v6689_v16  ;;  %v7507_v16 = vld [vmem:[#allocation14 + $0x40] ss:$28 sps:$4 sm:$0xff]  }
 0x328   :  { %2653 = vmatpush1.bf16.msra.mxu1 %v6686_v28  ;;  %v7518_v28 = vld [vmem:[#allocation14 + $0xac] ss:$28 sps:$4 sm:$0xff]  }
 0x329   :  { %2739 = vmatpush1.bf16.msra.mxu0 %v6688_v29  ;;  %2654 = vmatprep.subr.bf16.mxu1 %v6695_v30  ;;  %v7521_v29 = vld [vmem:[#allocation14 + $0xb4] ss:$28 sps:$4 sm:$0xff]   ;;  %v7516_v30 = vld [vmem:[#allocation14 + $0xa8] ss:$28 sps:$4 sm:$0xff]  }
 0x32a   :  { %2740 = vmatprep.subr.bf16.mxu0 %v6697_v46  ;;  %v7524_v46 = vld [vmem:[#allocation14 + $0xe4] ss:$28 sps:$4 sm:$0xff]  }
 0x32c   :  { %2655 = vmatpush1.bf16.msra.mxu1 %v6694_v35  ;;  %v7533_v35 = vld [vmem:[#allocation14 + $0x124] ss:$28 sps:$4 sm:$0xff]  }
 0x32d   :  { %2741 = vmatpush1.bf16.msra.mxu0 %v6696_v36  ;;  %2656 = vmatprep.subr.bf16.mxu1 %v6703_v53  ;;  %v7528_v36 = vld [vmem:[#allocation14 + $0x118] ss:$28 sps:$4 sm:$0xff]   ;;  %v7531_v53 = vld [vmem:[#allocation14 + $0x120] ss:$28 sps:$4 sm:$0xff]  }
 0x32e   :  { %2742 = vmatprep.subr.bf16.mxu0 %v6705_v38  ;;  %v7536_v38 = vld [vmem:[#allocation14 + $0x154] ss:$28 sps:$4 sm:$0xff]  }
 0x330   :  { %2657 = vmatpush1.bf16.msra.mxu1 %v6702_v20  ;;  %v7545_v20 = vld [vmem:[#allocation14 + $0x194] ss:$28 sps:$4 sm:$0xff]  }
 0x331   :  { %2743 = vmatpush1.bf16.msra.mxu0 %v6704_v21  ;;  %2658 = vmatprep.subr.bf16.mxu1 %v6711_v24  ;;  %v7540_v21 = vld [vmem:[#allocation14 + $0x188] ss:$28 sps:$4 sm:$0xff]   ;;  %v7543_v24 = vld [vmem:[#allocation14 + $0x190] ss:$28 sps:$4 sm:$0xff]  }
 0x332   :  { %2744 = vmatprep.subr.bf16.mxu0 %v6713_v26  ;;  %v7548_v26 = vld [vmem:[#allocation14 + $0x1c4] ss:$28 sps:$4 sm:$0xff]  }
 0x334   :  { %2659 = vmatpush1.bf16.msra.mxu1 %v6710_v49  ;;  %v7557_v49 = vld [vmem:[#allocation14 + $0x204] ss:$28 sps:$4 sm:$0xff]  }
 0x335   :  { %2745 = vmatpush1.bf16.msra.mxu0 %v6712_v50  ;;  %2660 = vmatprep.subr.bf16.mxu1 %v6719_v51  ;;  %v7552_v50 = vld [vmem:[#allocation14 + $0x1f8] ss:$28 sps:$4 sm:$0xff]   ;;  %v7555_v51 = vld [vmem:[#allocation14 + $0x200] ss:$28 sps:$4 sm:$0xff]  }
 0x336   :  { %2746 = vmatprep.subr.bf16.mxu0 %v6721_v52  ;;  %v7560_v52 = vld [vmem:[#allocation14 + $0x234] ss:$28 sps:$4 sm:$0xff]  }
 0x338   :  { %2661 = vmatpush1.bf16.msra.mxu1 %v6718_v58  ;;  %v7569_v58 = vld [vmem:[#allocation14 + $0x274] ss:$28 sps:$4 sm:$0xff]  }
 0x339   :  { %2747 = vmatpush1.bf16.msra.mxu0 %v6720_v60  ;;  %2662 = vmatprep.subr.bf16.mxu1 %v6727_v61  ;;  %v7564_v60 = vld [vmem:[#allocation14 + $0x268] ss:$28 sps:$4 sm:$0xff]   ;;  %v7567_v61 = vld [vmem:[#allocation14 + $0x270] ss:$28 sps:$4 sm:$0xff]  }
 0x33a   :  { %2748 = vmatprep.subr.bf16.mxu0 %v6729_v63  ;;  %v7572_v63 = vld [vmem:[#allocation14 + $0x2a4] ss:$28 sps:$4 sm:$0xff]  }
 0x33c   :  { %2663 = vmatpush1.bf16.msra.mxu1 %v6726_v5  ;;  %v7581_v5 = vld [vmem:[#allocation14 + $0x2e4] ss:$28 sps:$4 sm:$0xff]  }
 0x33d   :  { %2749 = vmatpush1.bf16.msra.mxu0 %v6728_v6  ;;  %2664 = vmatprep.subr.bf16.mxu1 %v6735_v7  ;;  %v7576_v6 = vld [vmem:[#allocation14 + $0x2d8] ss:$28 sps:$4 sm:$0xff]   ;;  %v7579_v7 = vld [vmem:[#allocation14 + $0x2e0] ss:$28 sps:$4 sm:$0xff]  }
 0x33e   :  { %2750 = vmatprep.subr.bf16.mxu0 %v6737_v8  ;;  %v7584_v8 = vld [vmem:[#allocation14 + $0x314] ss:$28 sps:$4 sm:$0xff]  }
 0x340   :  { %2665 = vmatpush1.bf16.msra.mxu1 %v6734_v9  ;;  %v7587_v9 = vld [vmem:[#allocation14 + $0x31c] ss:$28 sps:$4 sm:$0xff]  }
 0x341   :  { %2751 = vmatpush1.bf16.msra.mxu0 %v6736_v10  ;;  %5672 = vmatprep.subr.bf16.mxu1 %v7500_v11  ;;  %v7582_v10 = vld [vmem:[#allocation14 + $0x310] ss:$28 sps:$4 sm:$0xff]   ;;  %v7585_v11 = vld [vmem:[#allocation14 + $0x318] ss:$28 sps:$4 sm:$0xff]  }
 0x342   :  { %5844 = vmatprep.subr.bf16.mxu0 %v7503_v12  ;;  %v7590_v12 = vld [vmem:[#allocation14 + $0x34c] ss:$28 sps:$4 sm:$0xff]  }
 0x343   :  { %2667 = vmatmul.mubr.bf16.vlgmr.msra.gmra.mrb[4].mxu1 %v8648_v48 }
 0x344   :  { %2753 = vmatmul.mubr.bf16.vlgmr.msra.gmra.mrb[16].mxu0 %v8648_v48  ;;  %5673 = vmatpush1.bf16.msra.mxu1 %v7498_v13  ;;  %v7519_v48 = vld [vmem:[#allocation14 + $0xb0] ss:$28 sps:$4 sm:$0xff]  }
 0x345   :  { %5845 = vmatpush1.bf16.msra.mxu0 %v7501_v14  ;;  %5674 = vmatprep.subr.bf16.mxu1 %v7506_v17  ;;  %v7593_v13 = vld [vmem:[#allocation14 + $0x354] ss:$28 sps:$4 sm:$0xff]   ;;  %v7588_v14 = vld [vmem:[#allocation14 + $0x348] ss:$28 sps:$4 sm:$0xff]  }
 0x346   :  { %5846 = vmatprep.subr.bf16.mxu0 %v7509_v15  ;;  %v7591_v17 = vld [vmem:[#allocation14 + $0x350] ss:$28 sps:$4 sm:$0xff]   ;;  %v7596_v15 = vld [vmem:[#allocation14 + $0x384] ss:$28 sps:$4 sm:$0xff]  }
 0x348   :  { %5675 = vmatpush1.bf16.msra.mxu1 %v7504_v45  ;;  %v7599_v45 = vld [vmem:[#allocation14 + $0x38c] ss:$28 sps:$4 sm:$0xff]  }
 0x349   :  { %5847 = vmatpush1.bf16.msra.mxu0 %v7507_v16  ;;  %5676 = vmatprep.subr.bf16.mxu1 %v7512_v18  ;;  %v8664_v16 = vld [vmem:[#allocation13] sm:$0xff] }
 0x34a   :  { %5848 = vmatprep.subr.bf16.mxu0 %v7515_v22  ;;  %v1102_v18 = vrot.slane %v8664_v16, %v8582_v37  ;;  %v1110_v22 = vrot.slane %v8664_v16, %v8638_v62 }
 0x34c   :  { %5677 = vmatpush1.bf16.msra.mxu1 %v7510_v23  ;;  %v1106_v23 = vrot.slane %v8664_v16, %v8585_v41 }
 0x34d   :  { %5849 = vmatpush1.bf16.msra.mxu0 %v7513_v25  ;;  %5678 = vmatprep.subr.bf16.mxu1 %v7518_v28  ;;  %v1114_v25 = vrot.slane %v8664_v16, %v8641_v1 }
 0x34e   :  { %5850 = vmatprep.subr.bf16.mxu0 %v7521_v29 }
 0x350   :  { %5679 = vmatpush1.bf16.msra.mxu1 %v7516_v30 }
 0x351   :  { %5851 = vmatpush1.bf16.msra.mxu0 %v7519_v48  ;;  %5680 = vmatprep.subr.bf16.mxu1 %v7524_v46 }
 0x352   :  { %5852 = vmatprep.subr.bf16.mxu0 %v7527_v59 }
 0x354   :  { %5681 = vmatpush1.bf16.msra.mxu1 %v7522_v31 }
 0x355   :  { %5853 = vmatpush1.bf16.msra.mxu0 %v7525_v33  ;;  %5682 = vmatprep.subr.bf16.mxu1 %v7530_v34 }
 0x356   :  { %5854 = vmatprep.subr.bf16.mxu0 %v7533_v35 }
 0x358   :  { %5683 = vmatpush1.bf16.msra.mxu1 %v7528_v36 }
 0x359   :  { %5855 = vmatpush1.bf16.msra.mxu0 %v7531_v53  ;;  %5684 = vmatprep.subr.bf16.mxu1 %v7536_v38 }
 0x35a   :  { %5856 = vmatprep.subr.bf16.mxu0 %v7539_v39 }
 0x35c   :  { %5685 = vmatpush1.bf16.msra.mxu1 %v7534_v40 }
 0x35d   :  { %5857 = vmatpush1.bf16.msra.mxu0 %v7537_v42  ;;  %5686 = vmatprep.subr.bf16.mxu1 %v7542_v19 }
 0x35e   :  { %5858 = vmatprep.subr.bf16.mxu0 %v7545_v20 }
 0x360   :  { %5687 = vmatpush1.bf16.msra.mxu1 %v7540_v21 }
 0x361   :  { %5859 = vmatpush1.bf16.msra.mxu0 %v7543_v24  ;;  %5688 = vmatprep.subr.bf16.mxu1 %v7548_v26 }
 0x362   :  { %5860 = vmatprep.subr.bf16.mxu0 %v7551_v27 }
 0x364   :  { %5689 = vmatpush1.bf16.msra.mxu1 %v7546_v43 }
 0x365   :  { %5861 = vmatpush1.bf16.msra.mxu0 %v7549_v44  ;;  %5690 = vmatprep.subr.bf16.mxu1 %v7554_v47 }
 0x366   :  { %5862 = vmatprep.subr.bf16.mxu0 %v7557_v49 }
 0x368   :  { %5691 = vmatpush1.bf16.msra.mxu1 %v7552_v50 }
 0x369   :  { %5863 = vmatpush1.bf16.msra.mxu0 %v7555_v51  ;;  %5692 = vmatprep.subr.bf16.mxu1 %v7560_v52 }
 0x36a   :  { %5864 = vmatprep.subr.bf16.mxu0 %v7563_v54 }
 0x36c   :  { %5693 = vmatpush1.bf16.msra.mxu1 %v7558_v55 }
 0x36d   :  { %5865 = vmatpush1.bf16.msra.mxu0 %v7561_v56  ;;  %5694 = vmatprep.subr.bf16.mxu1 %v7566_v57 }
 0x36e   :  { %5866 = vmatprep.subr.bf16.mxu0 %v7569_v58 }
 0x370   :  { %5695 = vmatpush1.bf16.msra.mxu1 %v7564_v60 }
 0x371   :  { %5867 = vmatpush1.bf16.msra.mxu0 %v7567_v61  ;;  %5696 = vmatprep.subr.bf16.mxu1 %v7572_v63  ;;  %v7594_v63 = vld [vmem:[#allocation14 + $0x380] ss:$28 sps:$4 sm:$0xff]  }
 0x372   :  { %5868 = vmatprep.subr.bf16.mxu0 %v7575_v0  ;;  %v7597_v0 = vld [vmem:[#allocation14 + $0x388] ss:$28 sps:$4 sm:$0xff]  }
 0x374   :  { %5697 = vmatpush1.bf16.msra.mxu1 %v7570_v2  ;;  %v7602_v2 = vld [vmem:[#allocation14 + $0x3bc] ss:$28 sps:$4 sm:$0xff]  }
 0x375   :  { %5869 = vmatpush1.bf16.msra.mxu0 %v7573_v3  ;;  %5698 = vmatprep.subr.bf16.mxu1 %v7578_v4  ;;  %v7605_v3 = vld [vmem:[#allocation14 + $0x3c4] ss:$28 sps:$4 sm:$0xff]   ;;  %v7600_v4 = vld [vmem:[#allocation14 + $0x3b8] ss:$28 sps:$4 sm:$0xff]  }
 0x376   :  { %5870 = vmatprep.subr.bf16.mxu0 %v7581_v5  ;;  %v7603_v5 = vld [vmem:[#allocation14 + $0x3c0] ss:$28 sps:$4 sm:$0xff]  }
 0x378   :  { %5699 = vmatpush1.bf16.msra.mxu1 %v7576_v6  ;;  %v7608_v6 = vld [vmem:[#allocation14 + $0x3f4] ss:$28 sps:$4 sm:$0xff]  }
 0x379   :  { %5871 = vmatpush1.bf16.msra.mxu0 %v7579_v7  ;;  %5700 = vmatprep.subr.bf16.mxu1 %v7584_v8  ;;  %v7611_v7 = vld [vmem:[#allocation14 + $0x3fc] ss:$28 sps:$4 sm:$0xff]   ;;  %v7606_v8 = vld [vmem:[#allocation14 + $0x3f0] ss:$28 sps:$4 sm:$0xff]  }
 0x37a   :  { %5872 = vmatprep.subr.bf16.mxu0 %v7587_v9  ;;  %v7609_v9 = vld [vmem:[#allocation14 + $0x3f8] ss:$28 sps:$4 sm:$0xff]  }
 0x37c   :  { %5701 = vmatpush1.bf16.msra.mxu1 %v7582_v10  ;;  %v7614_v10 = vld [vmem:[#allocation14 + $0x42c] ss:$28 sps:$4 sm:$0xff]  }
 0x37d   :  { %5873 = vmatpush1.bf16.msra.mxu0 %v7585_v11  ;;  %5702 = vmatprep.subr.bf16.mxu1 %v7590_v12  ;;  %v7617_v11 = vld [vmem:[#allocation14 + $0x434] ss:$28 sps:$4 sm:$0xff]   ;;  %v7612_v12 = vld [vmem:[#allocation14 + $0x428] ss:$28 sps:$4 sm:$0xff]  }
 0x37e   :  { %5874 = vmatprep.subr.bf16.mxu0 %v7593_v13  ;;  %v7615_v13 = vld [vmem:[#allocation14 + $0x430] ss:$28 sps:$4 sm:$0xff]  }
 0x380   :  { %5703 = vmatpush1.bf16.msra.mxu1 %v7588_v14  ;;  %v7620_v14 = vld [vmem:[#allocation14 + $0x464] ss:$28 sps:$4 sm:$0xff]  }
 0x381   :  { %5875 = vmatpush1.bf16.msra.mxu0 %v7591_v17  ;;  %5715 = vmatprep.subr.bf16.mxu1 %v7596_v15  ;;  %v7623_v17 = vld [vmem:[#allocation14 + $0x46c] ss:$28 sps:$4 sm:$0xff]   ;;  %v7618_v15 = vld [vmem:[#allocation14 + $0x460] ss:$28 sps:$4 sm:$0xff]  }
 0x382   :  { %5887 = vmatprep.subr.bf16.mxu0 %v7599_v45  ;;  %v7621_v45 = vld [vmem:[#allocation14 + $0x468] ss:$28 sps:$4 sm:$0xff]  }
 0x396   :  { %v2496_v28 = vpop.f32.mrb[0].mxu1  ;;  %v2582_v29 = vpop.f32.mrb[12].mxu0 }
 0x397   :  { %v7274_v30 = vadd.f32 %v2496_v28, %v1102_v18  ;;  %v7278_v48 = vadd.f32 %v2582_v29, %v1110_v22  ;;  %v2498_v46 = vpop.f32.mrb[1].mxu1  ;;  %v2584_v59 = vpop.f32.mrb[13].mxu0  ;;  %v7632_v28 = vld [vmem:[#allocation14 + $0x4d4] ss:$28 sps:$4 sm:$0xff]   ;;  %v7635_v29 = vld [vmem:[#allocation14 + $0x4dc] ss:$28 sps:$4 sm:$0xff]  }
 0x398   :  { %v7275_v31 = vadd.f32 %v2498_v46, %v1106_v23  ;;  %v7279_v33 = vadd.f32 %v2584_v59, %v1114_v25  ;;  %v2500_v34 = vpop.f32.mrb[2].mxu1  ;;  %v2586_v35 = vpop.f32.mrb[14].mxu0  ;;  %v7638_v46 = vld [vmem:[#allocation14 + $0x50c] ss:$28 sps:$4 sm:$0xff]   ;;  %v7641_v59 = vld [vmem:[#allocation14 + $0x514] ss:$28 sps:$4 sm:$0xff]  }
 0x399   :  { %vm2763_vm12 = vcmp.gt.f32.partialorder %v7274_v30, 0.0  ;;  %v2779_v36 = vmul.f32 0.2, %v7274_v30  ;;  %vm2765_vm13 = vcmp.gt.f32.partialorder %v7278_v48, 0.0  ;;  %v2781_v53 = vmul.f32 0.2, %v7278_v48 }
 0x39a   :  { %vm2764_vm14 = vcmp.gt.f32.partialorder %v7275_v31, 0.0  ;;  %v2780_v38 = vmul.f32 0.2, %v7275_v31  ;;  %vm2766_vm15 = vcmp.gt.f32.partialorder %v7279_v33, 0.0  ;;  %v2782_v39 = vmul.f32 0.2, %v7279_v33 }
 0x39b   :  { %v7276_v40 = vadd.f32 %v2500_v34, %v1102_v18  ;;  %v7280_v42 = vadd.f32 %v2586_v35, %v1110_v22  ;;  %v2502_v19 = vpop.f32.mrb[3].mxu1  ;;  %v2588_v20 = vpop.f32.mrb[15].mxu0  ;;  %v2795_v21 = vsel %vm2763_vm12, %v7274_v30, %v2779_v36  ;;  %v2797_v24 = vsel %vm2765_vm13, %v7278_v48, %v2781_v53  ;;  %v7626_v18 = vld [vmem:[#allocation14 + $0x49c] ss:$28 sps:$4 sm:$0xff]   ;;  %v7629_v22 = vld [vmem:[#allocation14 + $0x4a4] ss:$28 sps:$4 sm:$0xff]  }
 0x39c   :  { %v7277_v26 = vadd.f32 %v2502_v19, %v1106_v23  ;;  %v7281_v27 = vadd.f32 %v2588_v20, %v1114_v25  ;;  %v2796_v50 = vsel %vm2764_vm14, %v7275_v31, %v2780_v38  ;;  %v2798_v51 = vsel %vm2766_vm15, %v7279_v33, %v2782_v39  ;;  %v7624_v23 = vld [vmem:[#allocation14 + $0x498] ss:$28 sps:$4 sm:$0xff]   ;;  %v7627_v25 = vld [vmem:[#allocation14 + $0x4a0] ss:$28 sps:$4 sm:$0xff]   ;;  %v7630_v30 = vld [vmem:[#allocation14 + $0x4d0] ss:$28 sps:$4 sm:$0xff]  }
 0x39d   :  { %vm2771_vm0 = vcmp.gt.f32.partialorder %v7276_v40, 0.0  ;;  %v2787_v43 = vmul.f32 0.2, %v7276_v40  ;;  %vm2773_vm1 = vcmp.gt.f32.partialorder %v7280_v42, 0.0  ;;  %v2789_v44 = vmul.f32 0.2, %v7280_v42 }
 0x39e   :  { %vm2772_vm2 = vcmp.gt.f32.partialorder %v7277_v26, 0.0  ;;  %v2788_v47 = vmul.f32 0.2, %v7277_v26  ;;  %vm2774_vm3 = vcmp.gt.f32.partialorder %v7281_v27, 0.0  ;;  %v2790_v49 = vmul.f32 0.2, %v7281_v27 }
 0x39f   :  { %v2803_v52 = vsel %vm2771_vm0, %v7276_v40, %v2787_v43  ;;  %v2805_v54 = vsel %vm2773_vm1, %v7280_v42, %v2789_v44  ;;  %v7633_v48 = vld [vmem:[#allocation14 + $0x4d8] ss:$28 sps:$4 sm:$0xff]   ;;  %v7636_v31 = vld [vmem:[#allocation14 + $0x508] ss:$28 sps:$4 sm:$0xff]   ;;  %v7639_v33 = vld [vmem:[#allocation14 + $0x510] ss:$28 sps:$4 sm:$0xff]  }
 0x3a0   :  { %v8676_v55 = vpack.c.bf16 %v2803_v52, %v2795_v21  ;;  %v8678_v56 = vpack.c.bf16 %v2805_v54, %v2797_v24  ;;  %v2804_v57 = vsel %vm2772_vm2, %v7277_v26, %v2788_v47  ;;  %v2806_v58 = vsel %vm2774_vm3, %v7281_v27, %v2790_v49  ;;  %v7644_v34 = vld [vmem:[#allocation14 + $0x544] ss:$28 sps:$4 sm:$0xff]   ;;  %v7647_v35 = vld [vmem:[#allocation14 + $0x54c] ss:$28 sps:$4 sm:$0xff]   ;;  %v7650_v38 = vld [vmem:[#allocation14 + $0x57c] ss:$28 sps:$4 sm:$0xff]  }
 0x3a1   :  { %v8680_v60 = vpack.c.bf16 %v2804_v57, %v2796_v50  ;;  %v8682_v61 = vpack.c.bf16 %v2806_v58, %v2798_v51  ;;  %v7642_v36 = vld [vmem:[#allocation14 + $0x540] ss:$28 sps:$4 sm:$0xff]   ;;  %v7645_v53 = vld [vmem:[#allocation14 + $0x548] ss:$28 sps:$4 sm:$0xff]   ;;  %v7648_v40 = vld [vmem:[#allocation14 + $0x578] ss:$28 sps:$4 sm:$0xff]  }
 0x3a2   :  { %v7653_v39 = vld [vmem:[#allocation14 + $0x584] ss:$28 sps:$4 sm:$0xff]   ;;  %v7656_v19 = vld [vmem:[#allocation14 + $0x5b4] ss:$28 sps:$4 sm:$0xff]   ;;  %v7659_v20 = vld [vmem:[#allocation14 + $0x5bc] ss:$28 sps:$4 sm:$0xff]  }
 0x3a3   :  { %5704 = vmatprep.mubr.bf16.mxu1 %v8680_v60  ;;  %5876 = vmatprep.mubr.bf16.mxu0 %v8680_v60  ;;  %v7651_v42 = vld [vmem:[#allocation14 + $0x580] ss:$28 sps:$4 sm:$0xff]   ;;  %v7654_v21 = vld [vmem:[#allocation14 + $0x5b0] ss:$28 sps:$4 sm:$0xff]   ;;  %v7657_v24 = vld [vmem:[#allocation14 + $0x5b8] ss:$28 sps:$4 sm:$0xff]  }
 0x3a4   :  { %5705 = vmatmul.mubr.bf16.vlgmr.msra.gmra.mrb[8].mxu1 %v8676_v55  ;;  %5877 = vmatmul.mubr.bf16.vlgmr.msra.gmra.mrb[20].mxu0 %v8676_v55  ;;  %v7662_v26 = vld [vmem:[#allocation14 + $0x5ec] ss:$28 sps:$4 sm:$0xff]   ;;  %v7665_v27 = vld [vmem:[#allocation14 + $0x5f4] ss:$28 sps:$4 sm:$0xff]   ;;  %v7668_v47 = vld [vmem:[#allocation14 + $0x624] ss:$28 sps:$4 sm:$0xff]  }
 0x3a5   :  { %5716 = vmatpush1.bf16.msra.mxu1 %v7594_v63  ;;  %5888 = vmatpush1.bf16.msra.mxu0 %v7597_v0  ;;  %v7660_v43 = vld [vmem:[#allocation14 + $0x5e8] ss:$28 sps:$4 sm:$0xff]   ;;  %v7663_v44 = vld [vmem:[#allocation14 + $0x5f0] ss:$28 sps:$4 sm:$0xff]   ;;  %v7666_v50 = vld [vmem:[#allocation14 + $0x620] ss:$28 sps:$4 sm:$0xff]  }
 0x3a6   :  { %5747 = vmatprep.mubr.bf16.mxu1 %v8682_v61  ;;  %5919 = vmatprep.mubr.bf16.mxu0 %v8682_v61  ;;  %v7671_v49 = vld [vmem:[#allocation14 + $0x62c] ss:$28 sps:$4 sm:$0xff]   ;;  %v7674_v52 = vld [vmem:[#allocation14 + $0x65c] ss:$28 sps:$4 sm:$0xff]   ;;  %v7677_v54 = vld [vmem:[#allocation14 + $0x664] ss:$28 sps:$4 sm:$0xff]  }
 0x3a7   :  { %5717 = vmatprep.subr.bf16.mxu1 %v7602_v2  ;;  %5889 = vmatprep.subr.bf16.mxu0 %v7605_v3  ;;  %v7669_v51 = vld [vmem:[#allocation14 + $0x628] ss:$28 sps:$4 sm:$0xff]   ;;  %v7672_v57 = vld [vmem:[#allocation14 + $0x658] ss:$28 sps:$4 sm:$0xff]   ;;  %v7675_v58 = vld [vmem:[#allocation14 + $0x660] ss:$28 sps:$4 sm:$0xff]  }
 0x3a8   :  { %v7680_v63 = vld [vmem:[#allocation14 + $0x694] ss:$28 sps:$4 sm:$0xff]   ;;  %v7683_v0 = vld [vmem:[#allocation14 + $0x69c] ss:$28 sps:$4 sm:$0xff]  }
 0x3a9   :  { %5718 = vmatpush1.bf16.msra.mxu1 %v7600_v4  ;;  %5890 = vmatpush1.bf16.msra.mxu0 %v7603_v5  ;;  %v7678_v2 = vld [vmem:[#allocation14 + $0x690] ss:$28 sps:$4 sm:$0xff]   ;;  %v7681_v3 = vld [vmem:[#allocation14 + $0x698] ss:$28 sps:$4 sm:$0xff]  }
 0x3aa   :  { %5719 = vmatprep.subr.bf16.mxu1 %v7608_v6  ;;  %5891 = vmatprep.subr.bf16.mxu0 %v7611_v7  ;;  %v7686_v4 = vld [vmem:[#allocation14 + $0x6cc] ss:$28 sps:$4 sm:$0xff]   ;;  %v7689_v5 = vld [vmem:[#allocation14 + $0x6d4] ss:$28 sps:$4 sm:$0xff]  }
 0x3ab   :  { %v7684_v6 = vld [vmem:[#allocation14 + $0x6c8] ss:$28 sps:$4 sm:$0xff]   ;;  %v7687_v7 = vld [vmem:[#allocation14 + $0x6d0] ss:$28 sps:$4 sm:$0xff]  }
 0x3ad   :  { %5720 = vmatpush1.bf16.msra.mxu1 %v7606_v8  ;;  %5892 = vmatpush1.bf16.msra.mxu0 %v7609_v9  ;;  %v7692_v8 = vld [vmem:[#allocation14 + $0x704] ss:$28 sps:$4 sm:$0xff]   ;;  %v7695_v9 = vld [vmem:[#allocation14 + $0x70c] ss:$28 sps:$4 sm:$0xff]  }
 0x3ae   :  { %5721 = vmatprep.subr.bf16.mxu1 %v7614_v10  ;;  %5893 = vmatprep.subr.bf16.mxu0 %v7617_v11  ;;  %v7690_v10 = vld [vmem:[#allocation14 + $0x700] ss:$28 sps:$4 sm:$0xff]   ;;  %v7693_v11 = vld [vmem:[#allocation14 + $0x708] ss:$28 sps:$4 sm:$0xff]  }
 0x3b1   :  { %5722 = vmatpush1.bf16.msra.mxu1 %v7612_v12  ;;  %5894 = vmatpush1.bf16.msra.mxu0 %v7615_v13  ;;  %v7698_v12 = vld [vmem:[#allocation14 + $0x73c] ss:$28 sps:$4 sm:$0xff]   ;;  %v7701_v13 = vld [vmem:[#allocation14 + $0x744] ss:$28 sps:$4 sm:$0xff]  }
 0x3b2   :  { %5723 = vmatprep.subr.bf16.mxu1 %v7620_v14  ;;  %5895 = vmatprep.subr.bf16.mxu0 %v7623_v17  ;;  %v7696_v14 = vld [vmem:[#allocation14 + $0x738] ss:$28 sps:$4 sm:$0xff]   ;;  %v7699_v17 = vld [vmem:[#allocation14 + $0x740] ss:$28 sps:$4 sm:$0xff]  }
 0x3b5   :  { %5724 = vmatpush1.bf16.msra.mxu1 %v7618_v15  ;;  %5896 = vmatpush1.bf16.msra.mxu0 %v7621_v45  ;;  %v7704_v15 = vld [vmem:[#allocation14 + $0x774] ss:$28 sps:$4 sm:$0xff]   ;;  %v7707_v45 = vld [vmem:[#allocation14 + $0x77c] ss:$28 sps:$4 sm:$0xff]  }
 0x3b6   :  { %5725 = vmatprep.subr.bf16.mxu1 %v7626_v18  ;;  %5897 = vmatprep.subr.bf16.mxu0 %v7629_v22  ;;  %v7702_v18 = vld [vmem:[#allocation14 + $0x770] ss:$28 sps:$4 sm:$0xff]   ;;  %v7705_v22 = vld [vmem:[#allocation14 + $0x778] ss:$28 sps:$4 sm:$0xff]  }
 0x3b9   :  { %5726 = vmatpush1.bf16.msra.mxu1 %v7624_v23  ;;  %5898 = vmatpush1.bf16.msra.mxu0 %v7627_v25  ;;  %v7710_v23 = vld [vmem:[#allocation14 + $0x7ac] ss:$28 sps:$4 sm:$0xff]   ;;  %v7713_v25 = vld [vmem:[#allocation14 + $0x7b4] ss:$28 sps:$4 sm:$0xff]  }
 0x3ba   :  { %5727 = vmatprep.subr.bf16.mxu1 %v7632_v28  ;;  %5899 = vmatprep.subr.bf16.mxu0 %v7635_v29  ;;  %v7708_v28 = vld [vmem:[#allocation14 + $0x7a8] ss:$28 sps:$4 sm:$0xff]   ;;  %v7711_v29 = vld [vmem:[#allocation14 + $0x7b0] ss:$28 sps:$4 sm:$0xff]  }
 0x3bd   :  { %5728 = vmatpush1.bf16.msra.mxu1 %v7630_v30  ;;  %5900 = vmatpush1.bf16.msra.mxu0 %v7633_v48  ;;  %v7716_v30 = vld [vmem:[#allocation14 + $0x7e4] ss:$28 sps:$4 sm:$0xff]   ;;  %v7719_v48 = vld [vmem:[#allocation14 + $0x7ec] ss:$28 sps:$4 sm:$0xff]  }
 0x3be   :  { %5729 = vmatprep.subr.bf16.mxu1 %v7638_v46  ;;  %5901 = vmatprep.subr.bf16.mxu0 %v7641_v59  ;;  %v7714_v46 = vld [vmem:[#allocation14 + $0x7e0] ss:$28 sps:$4 sm:$0xff]   ;;  %v7717_v59 = vld [vmem:[#allocation14 + $0x7e8] ss:$28 sps:$4 sm:$0xff]  }
 0x3c1   :  { %5730 = vmatpush1.bf16.msra.mxu1 %v7636_v31  ;;  %5902 = vmatpush1.bf16.msra.mxu0 %v7639_v33  ;;  %v7722_v31 = vld [vmem:[#allocation14 + $0x81c] ss:$28 sps:$4 sm:$0xff]   ;;  %v7725_v33 = vld [vmem:[#allocation14 + $0x824] ss:$28 sps:$4 sm:$0xff]  }
 0x3c2   :  { %5731 = vmatprep.subr.bf16.mxu1 %v7644_v34  ;;  %5903 = vmatprep.subr.bf16.mxu0 %v7647_v35  ;;  %v7720_v34 = vld [vmem:[#allocation14 + $0x818] ss:$28 sps:$4 sm:$0xff]   ;;  %v7723_v35 = vld [vmem:[#allocation14 + $0x820] ss:$28 sps:$4 sm:$0xff]  }
 0x3c5   :  { %5732 = vmatpush1.bf16.msra.mxu1 %v7642_v36  ;;  %5904 = vmatpush1.bf16.msra.mxu0 %v7645_v53  ;;  %v7728_v36 = vld [vmem:[#allocation14 + $0x854] ss:$28 sps:$4 sm:$0xff]   ;;  %v7731_v53 = vld [vmem:[#allocation14 + $0x85c] ss:$28 sps:$4 sm:$0xff]  }
 0x3c6   :  { %5733 = vmatprep.subr.bf16.mxu1 %v7650_v38  ;;  %5905 = vmatprep.subr.bf16.mxu0 %v7653_v39  ;;  %v7726_v38 = vld [vmem:[#allocation14 + $0x850] ss:$28 sps:$4 sm:$0xff]   ;;  %v7729_v39 = vld [vmem:[#allocation14 + $0x858] ss:$28 sps:$4 sm:$0xff]  }
 0x3c9   :  { %5734 = vmatpush1.bf16.msra.mxu1 %v7648_v40  ;;  %5906 = vmatpush1.bf16.msra.mxu0 %v7651_v42  ;;  %v7734_v40 = vld [vmem:[#allocation14 + $0x88c] ss:$28 sps:$4 sm:$0xff]   ;;  %v7737_v42 = vld [vmem:[#allocation14 + $0x894] ss:$28 sps:$4 sm:$0xff]  }
 0x3ca   :  { %5735 = vmatprep.subr.bf16.mxu1 %v7656_v19  ;;  %5907 = vmatprep.subr.bf16.mxu0 %v7659_v20  ;;  %v7732_v19 = vld [vmem:[#allocation14 + $0x888] ss:$28 sps:$4 sm:$0xff]   ;;  %v7735_v20 = vld [vmem:[#allocation14 + $0x890] ss:$28 sps:$4 sm:$0xff]  }
 0x3cd   :  { %5736 = vmatpush1.bf16.msra.mxu1 %v7654_v21  ;;  %5908 = vmatpush1.bf16.msra.mxu0 %v7657_v24  ;;  %v7740_v21 = vld [vmem:[#allocation14 + $0x8c4] ss:$28 sps:$4 sm:$0xff]   ;;  %v7743_v24 = vld [vmem:[#allocation14 + $0x8cc] ss:$28 sps:$4 sm:$0xff]  }
 0x3ce   :  { %5737 = vmatprep.subr.bf16.mxu1 %v7662_v26  ;;  %5909 = vmatprep.subr.bf16.mxu0 %v7665_v27  ;;  %v7738_v26 = vld [vmem:[#allocation14 + $0x8c0] ss:$28 sps:$4 sm:$0xff]   ;;  %v7741_v27 = vld [vmem:[#allocation14 + $0x8c8] ss:$28 sps:$4 sm:$0xff]  }
 0x3d1   :  { %5738 = vmatpush1.bf16.msra.mxu1 %v7660_v43  ;;  %5910 = vmatpush1.bf16.msra.mxu0 %v7663_v44  ;;  %v7746_v43 = vld [vmem:[#allocation14 + $0x8fc] ss:$28 sps:$4 sm:$0xff]   ;;  %v7749_v44 = vld [vmem:[#allocation14 + $0x904] ss:$28 sps:$4 sm:$0xff]  }
 0x3d2   :  { %5739 = vmatprep.subr.bf16.mxu1 %v7668_v47  ;;  %5911 = vmatprep.subr.bf16.mxu0 %v7671_v49  ;;  %v7744_v47 = vld [vmem:[#allocation14 + $0x8f8] ss:$28 sps:$4 sm:$0xff]   ;;  %v7747_v49 = vld [vmem:[#allocation14 + $0x900] ss:$28 sps:$4 sm:$0xff]  }
 0x3d5   :  { %5740 = vmatpush1.bf16.msra.mxu1 %v7666_v50  ;;  %5912 = vmatpush1.bf16.msra.mxu0 %v7669_v51  ;;  %v7752_v50 = vld [vmem:[#allocation14 + $0x934] ss:$28 sps:$4 sm:$0xff]   ;;  %v7755_v51 = vld [vmem:[#allocation14 + $0x93c] ss:$28 sps:$4 sm:$0xff]  }
 0x3d6   :  { %5741 = vmatprep.subr.bf16.mxu1 %v7674_v52  ;;  %5913 = vmatprep.subr.bf16.mxu0 %v7677_v54  ;;  %v7750_v52 = vld [vmem:[#allocation14 + $0x930] ss:$28 sps:$4 sm:$0xff]   ;;  %v7753_v54 = vld [vmem:[#allocation14 + $0x938] ss:$28 sps:$4 sm:$0xff]  }
 0x3d9   :  { %5742 = vmatpush1.bf16.msra.mxu1 %v7672_v57  ;;  %5914 = vmatpush1.bf16.msra.mxu0 %v7675_v58  ;;  %v7758_v57 = vld [vmem:[#allocation14 + $0x96c] ss:$28 sps:$4 sm:$0xff]   ;;  %v7761_v58 = vld [vmem:[#allocation14 + $0x974] ss:$28 sps:$4 sm:$0xff]  }
 0x3da   :  { %5743 = vmatprep.subr.bf16.mxu1 %v7680_v63  ;;  %5915 = vmatprep.subr.bf16.mxu0 %v7683_v0  ;;  %v7756_v63 = vld [vmem:[#allocation14 + $0x968] ss:$28 sps:$4 sm:$0xff]   ;;  %v7759_v0 = vld [vmem:[#allocation14 + $0x970] ss:$28 sps:$4 sm:$0xff]  }
 0x3dd   :  { %5744 = vmatpush1.bf16.msra.mxu1 %v7678_v2  ;;  %5916 = vmatpush1.bf16.msra.mxu0 %v7681_v3  ;;  %v7764_v2 = vld [vmem:[#allocation14 + $0x9a4] ss:$28 sps:$4 sm:$0xff]   ;;  %v7767_v3 = vld [vmem:[#allocation14 + $0x9ac] ss:$28 sps:$4 sm:$0xff]  }
 0x3de   :  { %5745 = vmatprep.subr.bf16.mxu1 %v7686_v4  ;;  %5917 = vmatprep.subr.bf16.mxu0 %v7689_v5  ;;  %v1117_v4 = vsub.s32 4, %v8579_v32  ;;  %v1125_v5 = vsub.s32 6, %v8579_v32 }
 0x3e1   :  { %5746 = vmatpush1.bf16.msra.mxu1 %v7684_v6  ;;  %5918 = vmatpush1.bf16.msra.mxu0 %v7687_v7  ;;  %v1121_v6 = vsub.s32 5, %v8579_v32  ;;  %v7762_v7 = vld [vmem:[#allocation14 + $0x9a0] ss:$28 sps:$4 sm:$0xff]  }
 0x3e2   :  { %5758 = vmatprep.subr.bf16.mxu1 %v7692_v8  ;;  %5930 = vmatprep.subr.bf16.mxu0 %v7695_v9  ;;  %v7765_v8 = vld [vmem:[#allocation14 + $0x9a8] ss:$28 sps:$4 sm:$0xff]   ;;  %v1129_v9 = vsub.s32 7, %v8579_v32 }
 0x3e4   :  { %5748 = vmatmul.mubr.bf16.vlgmr.msra.gmra.mrb[8].mxu1 %v8678_v56  ;;  %5920 = vmatmul.mubr.bf16.vlgmr.msra.gmra.mrb[20].mxu0 %v8678_v56 }
 0x3e5   :  { %5759 = vmatpush1.bf16.msra.mxu1 %v7690_v10  ;;  %5931 = vmatpush1.bf16.msra.mxu0 %v7693_v11  ;;  %v7770_v10 = vld [vmem:[#allocation14 + $0x9dc] ss:$28 sps:$4 sm:$0xff]   ;;  %v7773_v11 = vld [vmem:[#allocation14 + $0x9e4] ss:$28 sps:$4 sm:$0xff]  }
 0x3e6   :  { %5760 = vmatprep.subr.bf16.mxu1 %v7698_v12  ;;  %5932 = vmatprep.subr.bf16.mxu0 %v7701_v13  ;;  %v1118_v12 = vrot.slane %v8664_v16, %v1117_v4  ;;  %v1126_v13 = vrot.slane %v8664_v16, %v1125_v5 }
 0x3e9   :  { %5761 = vmatpush1.bf16.msra.mxu1 %v7696_v14  ;;  %5933 = vmatpush1.bf16.msra.mxu0 %v7699_v17  ;;  %v1122_v14 = vrot.slane %v8664_v16, %v1121_v6  ;;  %v7768_v17 = vld [vmem:[#allocation14 + $0x9d8] ss:$28 sps:$4 sm:$0xff]  }
 0x3ea   :  { %5762 = vmatprep.subr.bf16.mxu1 %v7704_v15  ;;  %5934 = vmatprep.subr.bf16.mxu0 %v7707_v45  ;;  %v7771_v15 = vld [vmem:[#allocation14 + $0x9e0] ss:$28 sps:$4 sm:$0xff]   ;;  %v1130_v45 = vrot.slane %v8664_v16, %v1129_v9 }
 0x3ed   :  { %5763 = vmatpush1.bf16.msra.mxu1 %v7702_v18  ;;  %5935 = vmatpush1.bf16.msra.mxu0 %v7705_v22  ;;  %v7776_v22 = vld [vmem:[#allocation14 + $0xa14] ss:$28 sps:$4 sm:$0xff]  }
 0x3ee   :  { %5764 = vmatprep.subr.bf16.mxu1 %v7710_v23  ;;  %5936 = vmatprep.subr.bf16.mxu0 %v7713_v25  ;;  %v7779_v23 = vld [vmem:[#allocation14 + $0xa1c] ss:$28 sps:$4 sm:$0xff]  }
 0x3f1   :  { %5765 = vmatpush1.bf16.msra.mxu1 %v7708_v28  ;;  %5937 = vmatpush1.bf16.msra.mxu0 %v7711_v29 }
 0x3f2   :  { %5766 = vmatprep.subr.bf16.mxu1 %v7716_v30  ;;  %5938 = vmatprep.subr.bf16.mxu0 %v7719_v48 }
 0x3f5   :  { %5767 = vmatpush1.bf16.msra.mxu1 %v7714_v46  ;;  %5939 = vmatpush1.bf16.msra.mxu0 %v7717_v59 }
 0x3f6   :  { %5768 = vmatprep.subr.bf16.mxu1 %v7722_v31  ;;  %5940 = vmatprep.subr.bf16.mxu0 %v7725_v33  ;;  %v7774_v31 = vld [vmem:[#allocation14 + $0xa10] ss:$28 sps:$4 sm:$0xff]  }
 0x3f9   :  { %5769 = vmatpush1.bf16.msra.mxu1 %v7720_v34  ;;  %5941 = vmatpush1.bf16.msra.mxu0 %v7723_v35 }
 0x3fa   :  { %5770 = vmatprep.subr.bf16.mxu1 %v7728_v36  ;;  %5942 = vmatprep.subr.bf16.mxu0 %v7731_v53  ;;  %v7777_v53 = vld [vmem:[#allocation14 + $0xa18] ss:$28 sps:$4 sm:$0xff]  }
 0x3fd   :  { %5771 = vmatpush1.bf16.msra.mxu1 %v7726_v38  ;;  %5943 = vmatpush1.bf16.msra.mxu0 %v7729_v39  ;;  %v7782_v38 = vld [vmem:[#allocation14 + $0xa4c] ss:$28 sps:$4 sm:$0xff]   ;;  %v7785_v39 = vld [vmem:[#allocation14 + $0xa54] ss:$28 sps:$4 sm:$0xff]  }
 0x3fe   :  { %5772 = vmatprep.subr.bf16.mxu1 %v7734_v40  ;;  %5944 = vmatprep.subr.bf16.mxu0 %v7737_v42 }
 0x401   :  { %5773 = vmatpush1.bf16.msra.mxu1 %v7732_v19  ;;  %5945 = vmatpush1.bf16.msra.mxu0 %v7735_v20  ;;  %v7780_v19 = vld [vmem:[#allocation14 + $0xa48] ss:$28 sps:$4 sm:$0xff]   ;;  %v7783_v20 = vld [vmem:[#allocation14 + $0xa50] ss:$28 sps:$4 sm:$0xff]  }
 0x402   :  { %5774 = vmatprep.subr.bf16.mxu1 %v7740_v21  ;;  %5946 = vmatprep.subr.bf16.mxu0 %v7743_v24 }
 0x405   :  { %5775 = vmatpush1.bf16.msra.mxu1 %v7738_v26  ;;  %5947 = vmatpush1.bf16.msra.mxu0 %v7741_v27 }
 0x406   :  { %5776 = vmatprep.subr.bf16.mxu1 %v7746_v43  ;;  %5948 = vmatprep.subr.bf16.mxu0 %v7749_v44 }
 0x409   :  { %5777 = vmatpush1.bf16.msra.mxu1 %v7744_v47  ;;  %5949 = vmatpush1.bf16.msra.mxu0 %v7747_v49  ;;  %v7788_v47 = vld [vmem:[#allocation14 + $0xa84] ss:$28 sps:$4 sm:$0xff]   ;;  %v7791_v49 = vld [vmem:[#allocation14 + $0xa8c] ss:$28 sps:$4 sm:$0xff]  }
 0x40a   :  { %5778 = vmatprep.subr.bf16.mxu1 %v7752_v50  ;;  %5950 = vmatprep.subr.bf16.mxu0 %v7755_v51 }
 0x40d   :  { %5779 = vmatpush1.bf16.msra.mxu1 %v7750_v52  ;;  %5951 = vmatpush1.bf16.msra.mxu0 %v7753_v54 }
 0x40e   :  { %5780 = vmatprep.subr.bf16.mxu1 %v7758_v57  ;;  %5952 = vmatprep.subr.bf16.mxu0 %v7761_v58 }
 0x411   :  { %5781 = vmatpush1.bf16.msra.mxu1 %v7756_v63  ;;  %5953 = vmatpush1.bf16.msra.mxu0 %v7759_v0 }
 0x412   :  { %5782 = vmatprep.subr.bf16.mxu1 %v7764_v2  ;;  %5954 = vmatprep.subr.bf16.mxu0 %v7767_v3 }
 0x415   :  { %5783 = vmatpush1.bf16.msra.mxu1 %v7762_v7  ;;  %5955 = vmatpush1.bf16.msra.mxu0 %v7765_v8 }
 0x416   :  { %5784 = vmatprep.subr.bf16.mxu1 %v7770_v10  ;;  %5956 = vmatprep.subr.bf16.mxu0 %v7773_v11  ;;  %v2668_v18 = vpop.f32.mrb[4].mxu1  ;;  %v7786_v11 = vld [vmem:[#allocation14 + $0xa80] ss:$28 sps:$4 sm:$0xff]  }
 0x417   :  { %v7282_v25 = vadd.f32 %v2668_v18, %v1118_v12  ;;  %v2754_v28 = vpop.f32.mrb[16].mxu0  ;;  %v2670_v29 = vpop.f32.mrb[5].mxu1  ;;  %v7800_v18 = vld [vmem:[#allocation14 + $0xaf4] ss:$28 sps:$4 sm:$0xff]  }
 0x418   :  { %v7286_v30 = vadd.f32 %v2754_v28, %v1126_v13  ;;  %v7283_v48 = vadd.f32 %v2670_v29, %v1122_v14  ;;  %v2756_v46 = vpop.f32.mrb[17].mxu0  ;;  %v2672_v59 = vpop.f32.mrb[6].mxu1  ;;  %v7806_v28 = vld [vmem:[#allocation14 + $0xb2c] ss:$28 sps:$4 sm:$0xff]   ;;  %v7809_v29 = vld [vmem:[#allocation14 + $0xb34] ss:$28 sps:$4 sm:$0xff]  }
 0x419   :  { %v2783_v33 = vmul.f32 0.2, %v7282_v25  ;;  %5785 = vmatpush1.bf16.msra.mxu1 %v7768_v17  ;;  %5957 = vmatpush1.bf16.msra.mxu0 %v7771_v15  ;;  %v7287_v34 = vadd.f32 %v2756_v46, %v1130_v45  ;;  %v7284_v35 = vadd.f32 %v2672_v59, %v1118_v12  ;;  %v2758_v36 = vpop.f32.mrb[18].mxu0  ;;  %v2674_v16 = vpop.f32.mrb[7].mxu1  ;;  %vm2767_vm4 = vcmp.gt.f32.partialorder %v7282_v25, 0.0 }
 0x41a   :  { %5786 = vmatprep.subr.bf16.mxu1 %v7776_v22  ;;  %5958 = vmatprep.subr.bf16.mxu0 %v7779_v23  ;;  %vm2769_vm5 = vcmp.gt.f32.partialorder %v7286_v30, 0.0  ;;  %v2785_v40 = vmul.f32 0.2, %v7286_v30  ;;  %v2760_v42 = vpop.f32.mrb[19].mxu0  ;;  %vm2768_vm7 = vcmp.gt.f32.partialorder %v7283_v48, 0.0  ;;  %v7288_v26 = vadd.f32 %v2758_v36, %v1126_v13 }
 0x41b   :  { %vm2775_vm6 = vcmp.gt.f32.partialorder %v7284_v35, 0.0  ;;  %v2784_v21 = vmul.f32 0.2, %v7283_v48  ;;  %v2791_v24 = vmul.f32 0.2, %v7284_v35  ;;  %v2799_v27 = vsel %vm2767_vm4, %v7282_v25, %v2783_v33 }
 0x41c   :  { %vm2770_vm8 = vcmp.gt.f32.partialorder %v7287_v34, 0.0  ;;  %v7285_v43 = vadd.f32 %v2674_v16, %v1122_v14  ;;  %v7289_v44 = vadd.f32 %v2760_v42, %v1130_v45  ;;  %v2786_v50 = vmul.f32 0.2, %v7287_v34  ;;  %v7789_v12 = vld [vmem:[#allocation14 + $0xa88] ss:$28 sps:$4 sm:$0xff]  }
 0x41d   :  { %5787 = vmatpush1.bf16.msra.mxu1 %v7774_v31  ;;  %5959 = vmatpush1.bf16.msra.mxu0 %v7777_v53  ;;  %v2807_v51 = vsel %vm2775_vm6, %v7284_v35, %v2791_v24  ;;  %vm2777_vm9 = vcmp.gt.f32.partialorder %v7288_v26, 0.0  ;;  %v2793_v52 = vmul.f32 0.2, %v7288_v26  ;;  %v2801_v58 = vsel %vm2769_vm5, %v7286_v30, %v2785_v40  ;;  %v7794_v14 = vld [vmem:[#allocation14 + $0xabc] ss:$28 sps:$4 sm:$0xff]  }
 0x41e   :  { %5788 = vmatprep.subr.bf16.mxu1 %v7782_v38  ;;  %5960 = vmatprep.subr.bf16.mxu0 %v7785_v39  ;;  %v8707_v54 = vpack.c.bf16 %v2807_v51, %v2799_v27  ;;  %vm2776_vm10 = vcmp.gt.f32.partialorder %v7285_v43, 0.0  ;;  %v2792_v57 = vmul.f32 0.2, %v7285_v43  ;;  %vm2778_vm11 = vcmp.gt.f32.partialorder %v7289_v44, 0.0  ;;  %v7797_v17 = vld [vmem:[#allocation14 + $0xac4] ss:$28 sps:$4 sm:$0xff]  }
 0x41f   :  { %v2809_v63 = vsel %vm2777_vm9, %v7288_v26, %v2793_v52  ;;  %v2794_v0 = vmul.f32 0.2, %v7289_v44  ;;  %v2800_v2 = vsel %vm2768_vm7, %v7283_v48, %v2784_v21  ;;  %v2802_v8 = vsel %vm2770_vm8, %v7287_v34, %v2786_v50  ;;  %v7792_v15 = vld [vmem:[#allocation14 + $0xab8] ss:$28 sps:$4 sm:$0xff]   ;;  %v7795_v45 = vld [vmem:[#allocation14 + $0xac0] ss:$28 sps:$4 sm:$0xff]  }
 0x420   :  { %v8711_v3 = vpack.c.bf16 %v2809_v63, %v2801_v58  ;;  %v2808_v7 = vsel %vm2776_vm10, %v7285_v43, %v2792_v57  ;;  %v7803_v22 = vld [vmem:[#allocation14 + $0xafc] ss:$28 sps:$4 sm:$0xff]   ;;  %v7798_v23 = vld [vmem:[#allocation14 + $0xaf0] ss:$28 sps:$4 sm:$0xff]   ;;  %v7804_v30 = vld [vmem:[#allocation14 + $0xb28] ss:$28 sps:$4 sm:$0xff]  }
 0x421   :  { %5789 = vmatpush1.bf16.msra.mxu1 %v7780_v19  ;;  %5961 = vmatpush1.bf16.msra.mxu0 %v7783_v20  ;;  %v8714_v9 = vpack.c.bf16 %v2808_v7, %v2800_v2  ;;  %v2810_v10 = vsel %vm2778_vm11, %v7289_v44, %v2794_v0  ;;  %v7801_v25 = vld [vmem:[#allocation14 + $0xaf8] ss:$28 sps:$4 sm:$0xff]   ;;  %v7807_v48 = vld [vmem:[#allocation14 + $0xb30] ss:$28 sps:$4 sm:$0xff]   ;;  %v7812_v46 = vld [vmem:[#allocation14 + $0xb64] ss:$28 sps:$4 sm:$0xff]  }
 0x422   :  { %5801 = vmatprep.subr.bf16.mxu1 %v7788_v47  ;;  %5973 = vmatprep.subr.bf16.mxu0 %v7791_v49  ;;  %v8716_v13 = vpack.c.bf16 %v2810_v10, %v2802_v8  ;;  %v7815_v59 = vld [vmem:[#allocation14 + $0xb6c] ss:$28 sps:$4 sm:$0xff]   ;;  %v7810_v31 = vld [vmem:[#allocation14 + $0xb60] ss:$28 sps:$4 sm:$0xff]   ;;  %v7816_v36 = vld [vmem:[#allocation14 + $0xb98] ss:$28 sps:$4 sm:$0xff]  }
 0x423   :  { %5790 = vmatprep.mubr.bf16.mxu1 %v8714_v9  ;;  %5962 = vmatprep.mubr.bf16.mxu0 %v8714_v9  ;;  %v7813_v33 = vld [vmem:[#allocation14 + $0xb68] ss:$28 sps:$4 sm:$0xff]   ;;  %v7818_v34 = vld [vmem:[#allocation14 + $0xb9c] ss:$28 sps:$4 sm:$0xff]   ;;  %v7824_v53 = vld [vmem:[#allocation14 + $0xbd4] ss:$28 sps:$4 sm:$0xff]  }
 0x424   :  { %5791 = vmatmul.mubr.bf16.vlgmr.msra.gmra.mrb[8].mxu1 %v8707_v54  ;;  %5963 = vmatmul.mubr.bf16.vlgmr.msra.gmra.mrb[20].mxu0 %v8707_v54  ;;  %v7821_v35 = vld [vmem:[#allocation14 + $0xba4] ss:$28 sps:$4 sm:$0xff]   ;;  %v7827_v38 = vld [vmem:[#allocation14 + $0xbdc] ss:$28 sps:$4 sm:$0xff]   ;;  %v7822_v39 = vld [vmem:[#allocation14 + $0xbd0] ss:$28 sps:$4 sm:$0xff]  }
 0x425   :  { %5802 = vmatpush1.bf16.msra.mxu1 %v7786_v11  ;;  %5974 = vmatpush1.bf16.msra.mxu0 %v7789_v12  ;;  %v7819_v16 = vld [vmem:[#allocation14 + $0xba0] ss:$28 sps:$4 sm:$0xff]   ;;  %v7825_v40 = vld [vmem:[#allocation14 + $0xbd8] ss:$28 sps:$4 sm:$0xff]   ;;  %v7830_v42 = vld [vmem:[#allocation14 + $0xc0c] ss:$28 sps:$4 sm:$0xff]  }
 0x426   :  { %5833 = vmatprep.mubr.bf16.mxu1 %v8716_v13  ;;  %6005 = vmatprep.mubr.bf16.mxu0 %v8716_v13  ;;  %v7833_v19 = vld [vmem:[#allocation14 + $0xc14] ss:$28 sps:$4 sm:$0xff]   ;;  %v7828_v20 = vld [vmem:[#allocation14 + $0xc08] ss:$28 sps:$4 sm:$0xff]   ;;  %v7834_v27 = vld [vmem:[#allocation14 + $0xc40] ss:$28 sps:$4 sm:$0xff]  }
 0x427   :  { %5803 = vmatprep.subr.bf16.mxu1 %v7794_v14  ;;  %5975 = vmatprep.subr.bf16.mxu0 %v7797_v17  ;;  %v7831_v21 = vld [vmem:[#allocation14 + $0xc10] ss:$28 sps:$4 sm:$0xff]   ;;  %v7836_v24 = vld [vmem:[#allocation14 + $0xc44] ss:$28 sps:$4 sm:$0xff]   ;;  %v7842_v44 = vld [vmem:[#allocation14 + $0xc7c] ss:$28 sps:$4 sm:$0xff]  }
 0x428   :  { %v7839_v26 = vld [vmem:[#allocation14 + $0xc4c] ss:$28 sps:$4 sm:$0xff]   ;;  %v7845_v47 = vld [vmem:[#allocation14 + $0xc84] ss:$28 sps:$4 sm:$0xff]   ;;  %v7840_v49 = vld [vmem:[#allocation14 + $0xc78] ss:$28 sps:$4 sm:$0xff]  }
 0x429   :  { %5804 = vmatpush1.bf16.msra.mxu1 %v7792_v15  ;;  %5976 = vmatpush1.bf16.msra.mxu0 %v7795_v45  ;;  %v7837_v43 = vld [vmem:[#allocation14 + $0xc48] ss:$28 sps:$4 sm:$0xff]   ;;  %v7843_v50 = vld [vmem:[#allocation14 + $0xc80] ss:$28 sps:$4 sm:$0xff]   ;;  %v7848_v51 = vld [vmem:[#allocation14 + $0xcb4] ss:$28 sps:$4 sm:$0xff]  }
 0x42a   :  { %5805 = vmatprep.subr.bf16.mxu1 %v7800_v18  ;;  %5977 = vmatprep.subr.bf16.mxu0 %v7803_v22  ;;  %v7851_v52 = vld [vmem:[#allocation14 + $0xcbc] ss:$28 sps:$4 sm:$0xff]   ;;  %v7846_v57 = vld [vmem:[#allocation14 + $0xcb0] ss:$28 sps:$4 sm:$0xff]   ;;  %v7852_v2 = vld [vmem:[#allocation14 + $0xce8] ss:$28 sps:$4 sm:$0xff]  }
 0x42b   :  { %v7849_v58 = vld [vmem:[#allocation14 + $0xcb8] ss:$28 sps:$4 sm:$0xff]   ;;  %v7854_v63 = vld [vmem:[#allocation14 + $0xcec] ss:$28 sps:$4 sm:$0xff]   ;;  %v7860_v8 = vld [vmem:[#allocation14 + $0xd24] ss:$28 sps:$4 sm:$0xff]  }
 0x42c   :  { %v7857_v0 = vld [vmem:[#allocation14 + $0xcf4] ss:$28 sps:$4 sm:$0xff]   ;;  %v7863_v10 = vld [vmem:[#allocation14 + $0xd2c] ss:$28 sps:$4 sm:$0xff]   ;;  %v7858_v11 = vld [vmem:[#allocation14 + $0xd20] ss:$28 sps:$4 sm:$0xff]  }
 0x42d   :  { %5806 = vmatpush1.bf16.msra.mxu1 %v7798_v23  ;;  %5978 = vmatpush1.bf16.msra.mxu0 %v7801_v25  ;;  %v7855_v7 = vld [vmem:[#allocation14 + $0xcf0] ss:$28 sps:$4 sm:$0xff]   ;;  %v7861_v12 = vld [vmem:[#allocation14 + $0xd28] ss:$28 sps:$4 sm:$0xff]   ;;  %v7866_v14 = vld [vmem:[#allocation14 + $0xd5c] ss:$28 sps:$4 sm:$0xff]  }
 0x42e   :  { %5807 = vmatprep.subr.bf16.mxu1 %v7806_v28  ;;  %5979 = vmatprep.subr.bf16.mxu0 %v7809_v29  ;;  %v7869_v17 = vld [vmem:[#allocation14 + $0xd64] ss:$28 sps:$4 sm:$0xff]   ;;  %v7864_v15 = vld [vmem:[#allocation14 + $0xd58] ss:$28 sps:$4 sm:$0xff]   ;;  %v7870_v23 = vld [vmem:[#allocation14 + $0xd90] ss:$28 sps:$4 sm:$0xff]  }
 0x42f   :  { %v7867_v45 = vld [vmem:[#allocation14 + $0xd60] ss:$28 sps:$4 sm:$0xff]   ;;  %v7872_v18 = vld [vmem:[#allocation14 + $0xd94] ss:$28 sps:$4 sm:$0xff]   ;;  %v7878_v28 = vld [vmem:[#allocation14 + $0xdcc] ss:$28 sps:$4 sm:$0xff]  }
 0x430   :  { %v7875_v22 = vld [vmem:[#allocation14 + $0xd9c] ss:$28 sps:$4 sm:$0xff]   ;;  %v7881_v29 = vld [vmem:[#allocation14 + $0xdd4] ss:$28 sps:$4 sm:$0xff]  }
 0x431   :  { %5808 = vmatpush1.bf16.msra.mxu1 %v7804_v30  ;;  %5980 = vmatpush1.bf16.msra.mxu0 %v7807_v48  ;;  %v7873_v25 = vld [vmem:[#allocation14 + $0xd98] ss:$28 sps:$4 sm:$0xff]   ;;  %v7876_v30 = vld [vmem:[#allocation14 + $0xdc8] ss:$28 sps:$4 sm:$0xff]   ;;  %v7879_v48 = vld [vmem:[#allocation14 + $0xdd0] ss:$28 sps:$4 sm:$0xff]  }
 0x432   :  { %5809 = vmatprep.subr.bf16.mxu1 %v7812_v46  ;;  %5981 = vmatprep.subr.bf16.mxu0 %v7815_v59  ;;  %v7884_v46 = vld [vmem:[#allocation14 + $0x14] ss:$28 sps:$4 sm:$0xff]  }
 0x433   :  { %v7885_v59 = vld [vmem:[#allocation14 + $0x1d8] ss:$28 sps:$4 sm:$0xff]  }
 0x435   :  { %5810 = vmatpush1.bf16.msra.mxu1 %v7810_v31  ;;  %5982 = vmatpush1.bf16.msra.mxu0 %v7813_v33  ;;  %v7882_v31 = vld [vmem:[#allocation14 + $0x10] ss:$28 sps:$4 sm:$0xff]   ;;  %v7886_v33 = vld [vmem:[#allocation14 + $0x18] ss:$28 sps:$4 sm:$0xff]  }
 0x436   :  { %5811 = vmatprep.subr.bf16.mxu1 %v7818_v34  ;;  %5983 = vmatprep.subr.bf16.mxu0 %v7821_v35  ;;  %v7889_v34 = vld [vmem:[#allocation14 + $0x4c] ss:$28 sps:$4 sm:$0xff]  }
 0x437   :  { %v7890_v35 = vld [vmem:[#allocation14 + $0x210] ss:$28 sps:$4 sm:$0xff]  }
 0x439   :  { %5812 = vmatpush1.bf16.msra.mxu1 %v7816_v36  ;;  %5984 = vmatpush1.bf16.msra.mxu0 %v7819_v16  ;;  %v7887_v36 = vld [vmem:[#allocation14 + $0x48] ss:$28 sps:$4 sm:$0xff]   ;;  %v7891_v16 = vld [vmem:[#allocation14 + $0x50] ss:$28 sps:$4 sm:$0xff]  }
 0x43a   :  { %5813 = vmatprep.subr.bf16.mxu1 %v7824_v53  ;;  %5985 = vmatprep.subr.bf16.mxu0 %v7827_v38  ;;  %v7894_v53 = vld [vmem:[#allocation14 + $0x84] ss:$28 sps:$4 sm:$0xff]  }
 0x43b   :  { %v7895_v38 = vld [vmem:[#allocation14 + $0x248] ss:$28 sps:$4 sm:$0xff]  }
 0x43d   :  { %5814 = vmatpush1.bf16.msra.mxu1 %v7822_v39  ;;  %5986 = vmatpush1.bf16.msra.mxu0 %v7825_v40  ;;  %v7892_v39 = vld [vmem:[#allocation14 + $0x80] ss:$28 sps:$4 sm:$0xff]   ;;  %v7896_v40 = vld [vmem:[#allocation14 + $0x88] ss:$28 sps:$4 sm:$0xff]  }
 0x43e   :  { %5815 = vmatprep.subr.bf16.mxu1 %v7830_v42  ;;  %5987 = vmatprep.subr.bf16.mxu0 %v7833_v19  ;;  %v7899_v42 = vld [vmem:[#allocation14 + $0xbc] ss:$28 sps:$4 sm:$0xff]  }
 0x43f   :  { %v7900_v19 = vld [vmem:[#allocation14 + $0x280] ss:$28 sps:$4 sm:$0xff]  }
 0x441   :  { %5816 = vmatpush1.bf16.msra.mxu1 %v7828_v20  ;;  %5988 = vmatpush1.bf16.msra.mxu0 %v7831_v21  ;;  %v7897_v20 = vld [vmem:[#allocation14 + $0xb8] ss:$28 sps:$4 sm:$0xff]   ;;  %v7901_v21 = vld [vmem:[#allocation14 + $0xc0] ss:$28 sps:$4 sm:$0xff]  }
 0x442   :  { %5817 = vmatprep.subr.bf16.mxu1 %v7836_v24  ;;  %5989 = vmatprep.subr.bf16.mxu0 %v7839_v26  ;;  %v7904_v24 = vld [vmem:[#allocation14 + $0xf4] ss:$28 sps:$4 sm:$0xff]  }
 0x443   :  { %v7902_v26 = vld [vmem:[#allocation14 + $0xf0] ss:$28 sps:$4 sm:$0xff]  }
 0x445   :  { %5818 = vmatpush1.bf16.msra.mxu1 %v7834_v27  ;;  %5990 = vmatpush1.bf16.msra.mxu0 %v7837_v43  ;;  %v7906_v27 = vld [vmem:[#allocation14 + $0xf8] ss:$28 sps:$4 sm:$0xff]   ;;  %v7909_v43 = vld [vmem:[#allocation14 + $0x12c] ss:$28 sps:$4 sm:$0xff]  }
 0x446   :  { %5819 = vmatprep.subr.bf16.mxu1 %v7842_v44  ;;  %5991 = vmatprep.subr.bf16.mxu0 %v7845_v47  ;;  %v7910_v44 = vld [vmem:[#allocation14 + $0x2f0] ss:$28 sps:$4 sm:$0xff]   ;;  %v7907_v47 = vld [vmem:[#allocation14 + $0x128] ss:$28 sps:$4 sm:$0xff]  }
 0x449   :  { %5820 = vmatpush1.bf16.msra.mxu1 %v7840_v49  ;;  %5992 = vmatpush1.bf16.msra.mxu0 %v7843_v50  ;;  %v7911_v49 = vld [vmem:[#allocation14 + $0x130] ss:$28 sps:$4 sm:$0xff]   ;;  %v7914_v50 = vld [vmem:[#allocation14 + $0x164] ss:$28 sps:$4 sm:$0xff]  }
 0x44a   :  { %5821 = vmatprep.subr.bf16.mxu1 %v7848_v51  ;;  %5993 = vmatprep.subr.bf16.mxu0 %v7851_v52  ;;  %v7915_v51 = vld [vmem:[#allocation14 + $0x328] ss:$28 sps:$4 sm:$0xff]   ;;  %v7912_v52 = vld [vmem:[#allocation14 + $0x160] ss:$28 sps:$4 sm:$0xff]  }
 0x44d   :  { %5822 = vmatpush1.bf16.msra.mxu1 %v7846_v57  ;;  %5994 = vmatpush1.bf16.msra.mxu0 %v7849_v58  ;;  %v7916_v57 = vld [vmem:[#allocation14 + $0x168] ss:$28 sps:$4 sm:$0xff]   ;;  %v7919_v58 = vld [vmem:[#allocation14 + $0x19c] ss:$28 sps:$4 sm:$0xff]  }
 0x44e   :  { %5823 = vmatprep.subr.bf16.mxu1 %v7854_v63  ;;  %5995 = vmatprep.subr.bf16.mxu0 %v7857_v0  ;;  %v7920_v63 = vld [vmem:[#allocation14 + $0x360] ss:$28 sps:$4 sm:$0xff]   ;;  %v7917_v0 = vld [vmem:[#allocation14 + $0x198] ss:$28 sps:$4 sm:$0xff]  }
 0x451   :  { %5824 = vmatpush1.bf16.msra.mxu1 %v7852_v2  ;;  %5996 = vmatpush1.bf16.msra.mxu0 %v7855_v7  ;;  %v7921_v2 = vld [vmem:[#allocation14 + $0x1a0] ss:$28 sps:$4 sm:$0xff]   ;;  %v7924_v7 = vld [vmem:[#allocation14 + $0x1d4] ss:$28 sps:$4 sm:$0xff]  }
 0x452   :  { %5825 = vmatprep.subr.bf16.mxu1 %v7860_v8  ;;  %5997 = vmatprep.subr.bf16.mxu0 %v7863_v10  ;;  %v7925_v8 = vld [vmem:[#allocation14 + $0x558] ss:$28 sps:$4 sm:$0xff]   ;;  %v7922_v10 = vld [vmem:[#allocation14 + $0x1d0] ss:$28 sps:$4 sm:$0xff]  }
 0x455   :  { %5826 = vmatpush1.bf16.msra.mxu1 %v7858_v11  ;;  %5998 = vmatpush1.bf16.msra.mxu0 %v7861_v12  ;;  %v7926_v11 = vld [vmem:[#allocation14 + $0x398] ss:$28 sps:$4 sm:$0xff]   ;;  %v7929_v12 = vld [vmem:[#allocation14 + $0x20c] ss:$28 sps:$4 sm:$0xff]  }
 0x456   :  { %5827 = vmatprep.subr.bf16.mxu1 %v7866_v14  ;;  %5999 = vmatprep.subr.bf16.mxu0 %v7869_v17  ;;  %v7930_v14 = vld [vmem:[#allocation14 + $0x590] ss:$28 sps:$4 sm:$0xff]   ;;  %v7927_v17 = vld [vmem:[#allocation14 + $0x208] ss:$28 sps:$4 sm:$0xff]  }
 0x459   :  { %5828 = vmatpush1.bf16.msra.mxu1 %v7864_v15  ;;  %6000 = vmatpush1.bf16.msra.mxu0 %v7867_v45  ;;  %v7931_v15 = vld [vmem:[#allocation14 + $0x3d0] ss:$28 sps:$4 sm:$0xff]   ;;  %v7934_v45 = vld [vmem:[#allocation14 + $0x244] ss:$28 sps:$4 sm:$0xff]  }
 0x45a   :  { %5829 = vmatprep.subr.bf16.mxu1 %v7872_v18  ;;  %6001 = vmatprep.subr.bf16.mxu0 %v7875_v22  ;;  %v7935_v18 = vld [vmem:[#allocation14 + $0x5c8] ss:$28 sps:$4 sm:$0xff]   ;;  %v7932_v22 = vld [vmem:[#allocation14 + $0x240] ss:$28 sps:$4 sm:$0xff]  }
 0x45d   :  { %5830 = vmatpush1.bf16.msra.mxu1 %v7870_v23  ;;  %6002 = vmatpush1.bf16.msra.mxu0 %v7873_v25  ;;  %v7936_v23 = vld [vmem:[#allocation14 + $0x408] ss:$28 sps:$4 sm:$0xff]   ;;  %v7939_v25 = vld [vmem:[#allocation14 + $0x27c] ss:$28 sps:$4 sm:$0xff]  }
 0x45e   :  { %5831 = vmatprep.subr.bf16.mxu1 %v7878_v28  ;;  %6003 = vmatprep.subr.bf16.mxu0 %v7881_v29  ;;  %v7940_v28 = vld [vmem:[#allocation14 + $0x600] ss:$28 sps:$4 sm:$0xff]   ;;  %v7937_v29 = vld [vmem:[#allocation14 + $0x278] ss:$28 sps:$4 sm:$0xff]  }
 0x461   :  { %5832 = vmatpush1.bf16.msra.mxu1 %v7876_v30  ;;  %6004 = vmatpush1.bf16.msra.mxu0 %v7879_v48  ;;  %v7941_v30 = vld [vmem:[#allocation14 + $0x440] ss:$28 sps:$4 sm:$0xff]   ;;  %v7944_v48 = vld [vmem:[#allocation14 + $0x2b4] ss:$28 sps:$4 sm:$0xff]  }
 0x462   :  { %6016 = vmatprep.subr.bf16.mxu1 %v7884_v46  ;;  %7186 = vmatprep.subr.bf16.mxu0 %v7885_v59  ;;  %v7945_v46 = vld [vmem:[#allocation14 + $0x638] ss:$28 sps:$4 sm:$0xff]   ;;  %v7942_v59 = vld [vmem:[#allocation14 + $0x2b0] ss:$28 sps:$4 sm:$0xff]  }
 0x464   :  { %5834 = vmatmul.mubr.bf16.vlgmr.msra.gmra.mrb[8].mxu1 %v8711_v3  ;;  %6006 = vmatmul.mubr.bf16.vlgmr.msra.gmra.mrb[20].mxu0 %v8711_v3 }
 0x465   :  { %6017 = vmatpush1.bf16.msra.mxu1 %v7882_v31  ;;  %6048 = vmatprep.mubr.bf16.mxu1 %v8680_v60  ;;  %v7946_v31 = vld [vmem:[#allocation14 + $0x478] ss:$28 sps:$4 sm:$0xff]  }
 0x466   :  { %7187 = vmatpush3.bf16.msra.mxu0 %v7886_v33  ;;  %6220 = vmatprep.mubr.bf16.mxu0 %v8680_v60  ;;  %v7905_v60 = vld [vmem:[#allocation14 + $0x2b8] ss:$28 sps:$4 sm:$0xff]   ;;  %v7949_v33 = vld [vmem:[#allocation14 + $0x2ec] ss:$28 sps:$4 sm:$0xff]  }
 0x467   :  { %6018 = vmatprep.subr.bf16.mxu1 %v7889_v34  ;;  %7188 = vmatprep.subr.bf16.mxu0 %v7890_v35  ;;  %v7950_v34 = vld [vmem:[#allocation14 + $0x670] ss:$28 sps:$4 sm:$0xff]   ;;  %v7947_v35 = vld [vmem:[#allocation14 + $0x2e8] ss:$28 sps:$4 sm:$0xff]  }
 0x469   :  { %6019 = vmatpush1.bf16.msra.mxu1 %v7887_v36  ;;  %v7951_v36 = vld [vmem:[#allocation14 + $0x4b0] ss:$28 sps:$4 sm:$0xff]  }
 0x46a   :  { %7189 = vmatpush3.bf16.msra.mxu0 %v7891_v16  ;;  %6020 = vmatprep.subr.bf16.mxu1 %v7894_v53  ;;  %v7954_v16 = vld [vmem:[#allocation14 + $0x324] ss:$28 sps:$4 sm:$0xff]  }
 0x46b   :  { %7190 = vmatprep.subr.bf16.mxu0 %v7895_v38  ;;  %v7955_v53 = vld [vmem:[#allocation14 + $0x6a8] ss:$28 sps:$4 sm:$0xff]   ;;  %v7952_v38 = vld [vmem:[#allocation14 + $0x320] ss:$28 sps:$4 sm:$0xff]  }
 0x46d   :  { %6021 = vmatpush1.bf16.msra.mxu1 %v7892_v39  ;;  %v7956_v39 = vld [vmem:[#allocation14 + $0x4e8] ss:$28 sps:$4 sm:$0xff]  }
 0x46e   :  { %7191 = vmatpush3.bf16.msra.mxu0 %v7896_v40  ;;  %6022 = vmatprep.subr.bf16.mxu1 %v7899_v42  ;;  %v7959_v40 = vld [vmem:[#allocation14 + $0x35c] ss:$28 sps:$4 sm:$0xff]  }
 0x46f   :  { %7192 = vmatprep.subr.bf16.mxu0 %v7900_v19  ;;  %v7960_v42 = vld [vmem:[#allocation14 + $0x6e0] ss:$28 sps:$4 sm:$0xff]   ;;  %v7957_v19 = vld [vmem:[#allocation14 + $0x358] ss:$28 sps:$4 sm:$0xff]  }
 0x471   :  { %6023 = vmatpush1.bf16.msra.mxu1 %v7897_v20  ;;  %v7961_v20 = vld [vmem:[#allocation14 + $0x520] ss:$28 sps:$4 sm:$0xff]  }
 0x472   :  { %7193 = vmatpush3.bf16.msra.mxu0 %v7901_v21  ;;  %6024 = vmatprep.subr.bf16.mxu1 %v7904_v24  ;;  %v7964_v21 = vld [vmem:[#allocation14 + $0x394] ss:$28 sps:$4 sm:$0xff]  }
 0x473   :  { %7194 = vmatprep.subr.bf16.mxu0 %v7905_v60  ;;  %v7965_v24 = vld [vmem:[#allocation14 + $0x8d8] ss:$28 sps:$4 sm:$0xff]   ;;  %v7962_v60 = vld [vmem:[#allocation14 + $0x390] ss:$28 sps:$4 sm:$0xff]  }
 0x475   :  { %6025 = vmatpush1.bf16.msra.mxu1 %v7902_v26  ;;  %v7966_v26 = vld [vmem:[#allocation14 + $0x718] ss:$28 sps:$4 sm:$0xff]  }
 0x476   :  { %7195 = vmatpush3.bf16.msra.mxu0 %v7906_v27  ;;  %6026 = vmatprep.subr.bf16.mxu1 %v7909_v43  ;;  %v7969_v27 = vld [vmem:[#allocation14 + $0x3cc] ss:$28 sps:$4 sm:$0xff]  }
 0x477   :  { %7196 = vmatprep.subr.bf16.mxu0 %v7910_v44  ;;  %v7970_v43 = vld [vmem:[#allocation14 + $0x910] ss:$28 sps:$4 sm:$0xff]   ;;  %v7967_v44 = vld [vmem:[#allocation14 + $0x3c8] ss:$28 sps:$4 sm:$0xff]  }
 0x479   :  { %6027 = vmatpush1.bf16.msra.mxu1 %v7907_v47  ;;  %v7971_v47 = vld [vmem:[#allocation14 + $0x750] ss:$28 sps:$4 sm:$0xff]  }
 0x47a   :  { %7197 = vmatpush3.bf16.msra.mxu0 %v7911_v49  ;;  %6028 = vmatprep.subr.bf16.mxu1 %v7914_v50  ;;  %v7974_v49 = vld [vmem:[#allocation14 + $0x404] ss:$28 sps:$4 sm:$0xff]  }
 0x47b   :  { %7198 = vmatprep.subr.bf16.mxu0 %v7915_v51  ;;  %v7975_v50 = vld [vmem:[#allocation14 + $0x948] ss:$28 sps:$4 sm:$0xff]   ;;  %v7972_v51 = vld [vmem:[#allocation14 + $0x400] ss:$28 sps:$4 sm:$0xff]  }
 0x47d   :  { %6029 = vmatpush1.bf16.msra.mxu1 %v7912_v52  ;;  %v7979_v52 = vld [vmem:[#allocation14 + $0x43c] ss:$28 sps:$4 sm:$0xff]  }
 0x47e   :  { %7199 = vmatpush3.bf16.msra.mxu0 %v7916_v57  ;;  %6030 = vmatprep.subr.bf16.mxu1 %v7919_v58  ;;  %v7980_v57 = vld [vmem:[#allocation14 + $0x980] ss:$28 sps:$4 sm:$0xff]   ;;  %v7977_v58 = vld [vmem:[#allocation14 + $0x438] ss:$28 sps:$4 sm:$0xff]  }
 0x47f   :  { %7200 = vmatprep.subr.bf16.mxu0 %v7920_v63  ;;  %v7984_v63 = vld [vmem:[#allocation14 + $0x474] ss:$28 sps:$4 sm:$0xff]  }
 0x481   :  { %6031 = vmatpush1.bf16.msra.mxu1 %v7917_v0  ;;  %v7985_v0 = vld [vmem:[#allocation14 + $0x9b8] ss:$28 sps:$4 sm:$0xff]  }
 0x482   :  { %7201 = vmatpush3.bf16.msra.mxu0 %v7921_v2  ;;  %6032 = vmatprep.subr.bf16.mxu1 %v7924_v7  ;;  %v7982_v2 = vld [vmem:[#allocation14 + $0x470] ss:$28 sps:$4 sm:$0xff]   ;;  %v7986_v7 = vld [vmem:[#allocation14 + $0x7f8] ss:$28 sps:$4 sm:$0xff]  }
 0x483   :  { %7208 = vmatprep.subr.bf16.mxu0 %v7925_v8  ;;  %v7989_v8 = vld [vmem:[#allocation14 + $0x4ac] ss:$28 sps:$4 sm:$0xff]  }
 0x485   :  { %6221 = vmatmul.mubr.bf16.vlgmr.msra.gmra.mrb[24].mxu0 %v8676_v55  ;;  %6033 = vmatpush1.bf16.msra.mxu1 %v7922_v10  ;;  %v7990_v10 = vld [vmem:[#allocation14 + $0x9f0] ss:$28 sps:$4 sm:$0xff]  }
 0x486   :  { %7209 = vmatpush3.bf16.msra.mxu0 %v7926_v11  ;;  %6261 = vmatprep.mubr.bf16.mxu0 %v8682_v61  ;;  %v7987_v11 = vld [vmem:[#allocation14 + $0x4a8] ss:$28 sps:$4 sm:$0xff]  }
 0x487   :  { %6034 = vmatprep.subr.bf16.mxu1 %v7929_v12  ;;  %7210 = vmatprep.subr.bf16.mxu0 %v7930_v14  ;;  %v7991_v12 = vld [vmem:[#allocation14 + $0x830] ss:$28 sps:$4 sm:$0xff]   ;;  %v7994_v14 = vld [vmem:[#allocation14 + $0x4e4] ss:$28 sps:$4 sm:$0xff]  }
 0x489   :  { %6035 = vmatpush1.bf16.msra.mxu1 %v7927_v17  ;;  %v7995_v17 = vld [vmem:[#allocation14 + $0xa28] ss:$28 sps:$4 sm:$0xff]  }
 0x48a   :  { %7211 = vmatpush3.bf16.msra.mxu0 %v7931_v15  ;;  %6036 = vmatprep.subr.bf16.mxu1 %v7934_v45  ;;  %v7992_v15 = vld [vmem:[#allocation14 + $0x4e0] ss:$28 sps:$4 sm:$0xff]   ;;  %v7996_v45 = vld [vmem:[#allocation14 + $0x868] ss:$28 sps:$4 sm:$0xff]  }
 0x48b   :  { %7212 = vmatprep.subr.bf16.mxu0 %v7935_v18  ;;  %v7999_v18 = vld [vmem:[#allocation14 + $0x51c] ss:$28 sps:$4 sm:$0xff]  }
 0x48d   :  { %6037 = vmatpush1.bf16.msra.mxu1 %v7932_v22  ;;  %v8000_v22 = vld [vmem:[#allocation14 + $0xa60] ss:$28 sps:$4 sm:$0xff]  }
 0x48e   :  { %7213 = vmatpush3.bf16.msra.mxu0 %v7936_v23  ;;  %6038 = vmatprep.subr.bf16.mxu1 %v7939_v25  ;;  %v7997_v23 = vld [vmem:[#allocation14 + $0x518] ss:$28 sps:$4 sm:$0xff]   ;;  %v8001_v25 = vld [vmem:[#allocation14 + $0x8a0] ss:$28 sps:$4 sm:$0xff]  }
 0x48f   :  { %7214 = vmatprep.subr.bf16.mxu0 %v7940_v28  ;;  %v8004_v28 = vld [vmem:[#allocation14 + $0x554] ss:$28 sps:$4 sm:$0xff]  }
 0x491   :  { %6039 = vmatpush1.bf16.msra.mxu1 %v7937_v29  ;;  %v8005_v29 = vld [vmem:[#allocation14 + $0xc58] ss:$28 sps:$4 sm:$0xff]  }
 0x492   :  { %7215 = vmatpush3.bf16.msra.mxu0 %v7941_v30  ;;  %6040 = vmatprep.subr.bf16.mxu1 %v7944_v48  ;;  %v8002_v30 = vld [vmem:[#allocation14 + $0x550] ss:$28 sps:$4 sm:$0xff]   ;;  %v8006_v48 = vld [vmem:[#allocation14 + $0xa98] ss:$28 sps:$4 sm:$0xff]  }
 0x493   :  { %7216 = vmatprep.subr.bf16.mxu0 %v7945_v46  ;;  %v8009_v46 = vld [vmem:[#allocation14 + $0x58c] ss:$28 sps:$4 sm:$0xff]  }
 0x495   :  { %6041 = vmatpush1.bf16.msra.mxu1 %v7942_v59  ;;  %v8010_v59 = vld [vmem:[#allocation14 + $0xc90] ss:$28 sps:$4 sm:$0xff]  }
 0x496   :  { %7217 = vmatpush3.bf16.msra.mxu0 %v7946_v31  ;;  %6042 = vmatprep.subr.bf16.mxu1 %v7949_v33  ;;  %v8007_v31 = vld [vmem:[#allocation14 + $0x588] ss:$28 sps:$4 sm:$0xff]   ;;  %v8011_v33 = vld [vmem:[#allocation14 + $0xad0] ss:$28 sps:$4 sm:$0xff]  }
 0x497   :  { %7218 = vmatprep.subr.bf16.mxu0 %v7950_v34  ;;  %v8014_v34 = vld [vmem:[#allocation14 + $0x5c4] ss:$28 sps:$4 sm:$0xff]  }
 0x499   :  { %6043 = vmatpush1.bf16.msra.mxu1 %v7947_v35  ;;  %v8015_v35 = vld [vmem:[#allocation14 + $0xcc8] ss:$28 sps:$4 sm:$0xff]  }
 0x49a   :  { %7219 = vmatpush3.bf16.msra.mxu0 %v7951_v36  ;;  %6044 = vmatprep.subr.bf16.mxu1 %v7954_v16  ;;  %v8012_v36 = vld [vmem:[#allocation14 + $0x5c0] ss:$28 sps:$4 sm:$0xff]   ;;  %v8016_v16 = vld [vmem:[#allocation14 + $0xb08] ss:$28 sps:$4 sm:$0xff]  }
 0x49b   :  { %7220 = vmatprep.subr.bf16.mxu0 %v7955_v53  ;;  %v8019_v53 = vld [vmem:[#allocation14 + $0x5fc] ss:$28 sps:$4 sm:$0xff]  }
 0x49d   :  { %6045 = vmatpush1.bf16.msra.mxu1 %v7952_v38  ;;  %v8020_v38 = vld [vmem:[#allocation14 + $0xd00] ss:$28 sps:$4 sm:$0xff]  }
 0x49e   :  { %7221 = vmatpush3.bf16.msra.mxu0 %v7956_v39  ;;  %6046 = vmatprep.subr.bf16.mxu1 %v7959_v40  ;;  %v8017_v39 = vld [vmem:[#allocation14 + $0x5f8] ss:$28 sps:$4 sm:$0xff]   ;;  %v8021_v40 = vld [vmem:[#allocation14 + $0xb40] ss:$28 sps:$4 sm:$0xff]  }
 0x49f   :  { %7222 = vmatprep.subr.bf16.mxu0 %v7960_v42  ;;  %v8024_v42 = vld [vmem:[#allocation14 + $0x634] ss:$28 sps:$4 sm:$0xff]  }
 0x4a1   :  { %6047 = vmatpush1.bf16.msra.mxu1 %v7957_v19  ;;  %v8025_v19 = vld [vmem:[#allocation14 + $0xd38] ss:$28 sps:$4 sm:$0xff]  }
 0x4a2   :  { %7223 = vmatpush3.bf16.msra.mxu0 %v7961_v20  ;;  %6059 = vmatprep.subr.bf16.mxu1 %v7964_v21  ;;  %v8022_v20 = vld [vmem:[#allocation14 + $0x630] ss:$28 sps:$4 sm:$0xff]   ;;  %v8026_v21 = vld [vmem:[#allocation14 + $0xb78] ss:$28 sps:$4 sm:$0xff]  }
 0x4a3   :  { %7230 = vmatprep.subr.bf16.mxu0 %v7965_v24  ;;  %v8029_v24 = vld [vmem:[#allocation14 + $0x66c] ss:$28 sps:$4 sm:$0xff]  }
 0x4a4   :  { %6049 = vmatmul.mubr.bf16.vlgmr.msra.gmra.mrb[12].mxu1 %v8676_v55  ;;  %v7976_v55 = vld [vmem:[#allocation14 + $0x788] ss:$28 sps:$4 sm:$0xff]  }
 0x4a5   :  { %6262 = vmatmul.mubr.bf16.vlgmr.msra.gmra.mrb[28].mxu0 %v8678_v56  ;;  %6060 = vmatpush1.bf16.msra.mxu1 %v7962_v60  ;;  %v8030_v60 = vld [vmem:[#allocation14 + $0xd70] ss:$28 sps:$4 sm:$0xff]  }
 0x4a6   :  { %6091 = vmatprep.mubr.bf16.mxu1 %v8682_v61  ;;  %7231 = vmatpush3.bf16.msra.mxu0 %v7966_v26  ;;  %v7981_v61 = vld [vmem:[#allocation14 + $0x7c0] ss:$28 sps:$4 sm:$0xff]   ;;  %v8027_v26 = vld [vmem:[#allocation14 + $0x668] ss:$28 sps:$4 sm:$0xff]  }
 0x4a7   :  { %6302 = vmatprep.mubr.bf16.mxu0 %v8714_v9  ;;  %6061 = vmatprep.subr.bf16.mxu1 %v7969_v27  ;;  %v8031_v27 = vld [vmem:[#allocation14 + $0xbb0] ss:$28 sps:$4 sm:$0xff]  }
 0x4a8   :  { %7232 = vmatprep.subr.bf16.mxu0 %v7970_v43  ;;  %v8034_v43 = vld [vmem:[#allocation14 + $0x6a4] ss:$28 sps:$4 sm:$0xff]  }
 0x4a9   :  { %6062 = vmatpush1.bf16.msra.mxu1 %v7967_v44  ;;  %v8035_v44 = vld [vmem:[#allocation14 + $0xda8] ss:$28 sps:$4 sm:$0xff]  }
 0x4aa   :  { %7233 = vmatpush3.bf16.msra.mxu0 %v7971_v47  ;;  %6063 = vmatprep.subr.bf16.mxu1 %v7974_v49  ;;  %v8032_v47 = vld [vmem:[#allocation14 + $0x6a0] ss:$28 sps:$4 sm:$0xff]   ;;  %v8036_v49 = vld [vmem:[#allocation14 + $0xbe8] ss:$28 sps:$4 sm:$0xff]  }
 0x4ab   :  { %7234 = vmatprep.subr.bf16.mxu0 %v7975_v50  ;;  %v8039_v50 = vld [vmem:[#allocation14 + $0x6dc] ss:$28 sps:$4 sm:$0xff]  }
 0x4ad   :  { %6064 = vmatpush1.bf16.msra.mxu1 %v7972_v51  ;;  %v8040_v51 = vld [vmem:[#allocation14 + $0xde0] ss:$28 sps:$4 sm:$0xff]  }
 0x4ae   :  { %7235 = vmatpush3.bf16.msra.mxu0 %v7976_v55  ;;  %6065 = vmatprep.subr.bf16.mxu1 %v7979_v52  ;;  %v8037_v55 = vld [vmem:[#allocation14 + $0x6d8] ss:$28 sps:$4 sm:$0xff]   ;;  %v8041_v52 = vld [vmem:[#allocation14 + $0xc20] ss:$28 sps:$4 sm:$0xff]  }
 0x4af   :  { %7236 = vmatprep.subr.bf16.mxu0 %v7980_v57  ;;  %v8044_v57 = vld [vmem:[#allocation14 + $0x714] ss:$28 sps:$4 sm:$0xff]  }
 0x4b1   :  { %6066 = vmatpush1.bf16.msra.mxu1 %v7977_v58  ;;  %v8042_v58 = vld [vmem:[#allocation14 + $0x710] ss:$28 sps:$4 sm:$0xff]  }
 0x4b2   :  { %7237 = vmatpush3.bf16.msra.mxu0 %v7981_v61  ;;  %6067 = vmatprep.subr.bf16.mxu1 %v7984_v63  ;;  %v8047_v61 = vld [vmem:[#allocation14 + $0x74c] ss:$28 sps:$4 sm:$0xff]  }
 0x4b3   :  { %7238 = vmatprep.subr.bf16.mxu0 %v7985_v0  ;;  %v8045_v63 = vld [vmem:[#allocation14 + $0x748] ss:$28 sps:$4 sm:$0xff]  }
 0x4b4   :  { %v8050_v0 = vld [vmem:[#allocation14 + $0x784] ss:$28 sps:$4 sm:$0xff]  }
 0x4b5   :  { %6068 = vmatpush1.bf16.msra.mxu1 %v7982_v2  ;;  %v8048_v2 = vld [vmem:[#allocation14 + $0x780] ss:$28 sps:$4 sm:$0xff]  }
 0x4b6   :  { %7239 = vmatpush3.bf16.msra.mxu0 %v7986_v7  ;;  %6069 = vmatprep.subr.bf16.mxu1 %v7989_v8  ;;  %v8053_v7 = vld [vmem:[#allocation14 + $0x7bc] ss:$28 sps:$4 sm:$0xff]  }
 0x4b7   :  { %7240 = vmatprep.subr.bf16.mxu0 %v7990_v10  ;;  %v8051_v8 = vld [vmem:[#allocation14 + $0x7b8] ss:$28 sps:$4 sm:$0xff]  }
 0x4b8   :  { %v8056_v10 = vld [vmem:[#allocation14 + $0x7f4] ss:$28 sps:$4 sm:$0xff]  }
 0x4b9   :  { %6070 = vmatpush1.bf16.msra.mxu1 %v7987_v11  ;;  %v8054_v11 = vld [vmem:[#allocation14 + $0x7f0] ss:$28 sps:$4 sm:$0xff]  }
 0x4ba   :  { %7241 = vmatpush3.bf16.msra.mxu0 %v7991_v12  ;;  %6071 = vmatprep.subr.bf16.mxu1 %v7994_v14  ;;  %v8057_v12 = vld [vmem:[#allocation14 + $0x828] ss:$28 sps:$4 sm:$0xff]  }
 0x4bb   :  { %7242 = vmatprep.subr.bf16.mxu0 %v7995_v17  ;;  %v8062_v14 = vld [vmem:[#allocation14 + $0x864] ss:$28 sps:$4 sm:$0xff]   ;;  %v8065_v17 = vld [vmem:[#allocation14 + $0x89c] ss:$28 sps:$4 sm:$0xff]  }
 0x4bd   :  { %6072 = vmatpush1.bf16.msra.mxu1 %v7992_v15  ;;  %v8063_v15 = vld [vmem:[#allocation14 + $0x898] ss:$28 sps:$4 sm:$0xff]  }
 0x4be   :  { %7243 = vmatpush3.bf16.msra.mxu0 %v7996_v45  ;;  %6073 = vmatprep.subr.bf16.mxu1 %v7999_v18  ;;  %v8068_v45 = vld [vmem:[#allocation14 + $0x8d4] ss:$28 sps:$4 sm:$0xff]  }
 0x4bf   :  { %7244 = vmatprep.subr.bf16.mxu0 %v8000_v22  ;;  %v8066_v18 = vld [vmem:[#allocation14 + $0x8d0] ss:$28 sps:$4 sm:$0xff]  }
 0x4c0   :  { %v8071_v22 = vld [vmem:[#allocation14 + $0x90c] ss:$28 sps:$4 sm:$0xff]  }
 0x4c1   :  { %6074 = vmatpush1.bf16.msra.mxu1 %v7997_v23  ;;  %v8069_v23 = vld [vmem:[#allocation14 + $0x908] ss:$28 sps:$4 sm:$0xff]  }
 0x4c2   :  { %7245 = vmatpush3.bf16.msra.mxu0 %v8001_v25  ;;  %6075 = vmatprep.subr.bf16.mxu1 %v8004_v28  ;;  %v8074_v25 = vld [vmem:[#allocation14 + $0x944] ss:$28 sps:$4 sm:$0xff]  }
 0x4c3   :  { %7252 = vmatprep.subr.bf16.mxu0 %v8005_v29  ;;  %v8072_v28 = vld [vmem:[#allocation14 + $0x940] ss:$28 sps:$4 sm:$0xff]  }
 0x4c4   :  { %v8077_v29 = vld [vmem:[#allocation14 + $0x97c] ss:$28 sps:$4 sm:$0xff]  }
 0x4c5   :  { %6303 = vmatmul.mubr.bf16.vlgmr.msra.gmra.mrb[32].mxu0 %v8707_v54  ;;  %6076 = vmatpush1.bf16.msra.mxu1 %v8002_v30  ;;  %v8075_v30 = vld [vmem:[#allocation14 + $0x978] ss:$28 sps:$4 sm:$0xff]  }
 0x4c6   :  { %7253 = vmatpush3.bf16.msra.mxu0 %v8006_v48  ;;  %6343 = vmatprep.mubr.bf16.mxu0 %v8716_v13  ;;  %v8080_v48 = vld [vmem:[#allocation14 + $0x9b4] ss:$28 sps:$4 sm:$0xff]  }
 0x4c7   :  { %6077 = vmatprep.subr.bf16.mxu1 %v8009_v46  ;;  %7254 = vmatprep.subr.bf16.mxu0 %v8010_v59  ;;  %v8078_v46 = vld [vmem:[#allocation14 + $0x9b0] ss:$28 sps:$4 sm:$0xff]  }
 0x4c8   :  { %v8083_v59 = vld [vmem:[#allocation14 + $0x9ec] ss:$28 sps:$4 sm:$0xff]  }
 0x4c9   :  { %6078 = vmatpush1.bf16.msra.mxu1 %v8007_v31  ;;  %v8081_v31 = vld [vmem:[#allocation14 + $0x9e8] ss:$28 sps:$4 sm:$0xff]  }
 0x4ca   :  { %7255 = vmatpush3.bf16.msra.mxu0 %v8011_v33  ;;  %6079 = vmatprep.subr.bf16.mxu1 %v8014_v34  ;;  %v8086_v33 = vld [vmem:[#allocation14 + $0xa24] ss:$28 sps:$4 sm:$0xff]  }
 0x4cb   :  { %7256 = vmatprep.subr.bf16.mxu0 %v8015_v35  ;;  %v8084_v34 = vld [vmem:[#allocation14 + $0xa20] ss:$28 sps:$4 sm:$0xff]  }
 0x4cc   :  { %v8089_v35 = vld [vmem:[#allocation14 + $0xa5c] ss:$28 sps:$4 sm:$0xff]  }
 0x4cd   :  { %6080 = vmatpush1.bf16.msra.mxu1 %v8012_v36  ;;  %v8087_v36 = vld [vmem:[#allocation14 + $0xa58] ss:$28 sps:$4 sm:$0xff]  }
 0x4ce   :  { %7257 = vmatpush3.bf16.msra.mxu0 %v8016_v16  ;;  %6081 = vmatprep.subr.bf16.mxu1 %v8019_v53  ;;  %v8092_v16 = vld [vmem:[#allocation14 + $0xa94] ss:$28 sps:$4 sm:$0xff]  }
 0x4cf   :  { %7258 = vmatprep.subr.bf16.mxu0 %v8020_v38  ;;  %v8090_v53 = vld [vmem:[#allocation14 + $0xa90] ss:$28 sps:$4 sm:$0xff]  }
 0x4d0   :  { %v8095_v38 = vld [vmem:[#allocation14 + $0xacc] ss:$28 sps:$4 sm:$0xff]  }
 0x4d1   :  { %6082 = vmatpush1.bf16.msra.mxu1 %v8017_v39  ;;  %v8093_v39 = vld [vmem:[#allocation14 + $0xac8] ss:$28 sps:$4 sm:$0xff]  }
 0x4d2   :  { %7259 = vmatpush3.bf16.msra.mxu0 %v8021_v40  ;;  %6083 = vmatprep.subr.bf16.mxu1 %v8024_v42  ;;  %v8098_v40 = vld [vmem:[#allocation14 + $0xb04] ss:$28 sps:$4 sm:$0xff]  }
 0x4d3   :  { %7260 = vmatprep.subr.bf16.mxu0 %v8025_v19  ;;  %v8096_v42 = vld [vmem:[#allocation14 + $0xb00] ss:$28 sps:$4 sm:$0xff]  }
 0x4d4   :  { %v8101_v19 = vld [vmem:[#allocation14 + $0xb3c] ss:$28 sps:$4 sm:$0xff]  }
 0x4d5   :  { %6084 = vmatpush1.bf16.msra.mxu1 %v8022_v20  ;;  %v8099_v20 = vld [vmem:[#allocation14 + $0xb38] ss:$28 sps:$4 sm:$0xff]  }
 0x4d6   :  { %7261 = vmatpush3.bf16.msra.mxu0 %v8026_v21  ;;  %6085 = vmatprep.subr.bf16.mxu1 %v8029_v24  ;;  %v8104_v21 = vld [vmem:[#allocation14 + $0xb74] ss:$28 sps:$4 sm:$0xff]  }
 0x4d7   :  { %7262 = vmatprep.subr.bf16.mxu0 %v8030_v60  ;;  %v8102_v24 = vld [vmem:[#allocation14 + $0xb70] ss:$28 sps:$4 sm:$0xff]   ;;  %v8741_v60 = vld [vmem:[#allocation16] sm:$0xff] }
 0x4d9   :  { %6086 = vmatpush1.bf16.msra.mxu1 %v8027_v26  ;;  %v3344_v26 = vrot.slane %v8741_v60, %v8638_v62 }
 0x4da   :  { %7263 = vmatpush3.bf16.msra.mxu0 %v8031_v27  ;;  %6087 = vmatprep.subr.bf16.mxu1 %v8034_v43  ;;  %v3340_v27 = vrot.slane %v8741_v60, %v8585_v41  ;;  %v3348_v43 = vrot.slane %v8741_v60, %v8641_v1  ;;  %v8113_v1 = vld [vmem:[#allocation14 + $0xc1c] ss:$28 sps:$4 sm:$0xff]  }
 0x4db   :  { %7264 = vmatprep.subr.bf16.mxu0 %v8035_v44  ;;  %v8105_v44 = vld [vmem:[#allocation14 + $0xba8] ss:$28 sps:$4 sm:$0xff]  }
 0x4dd   :  { %6088 = vmatpush1.bf16.msra.mxu1 %v8032_v47  ;;  %v8110_v47 = vld [vmem:[#allocation14 + $0xbe4] ss:$28 sps:$4 sm:$0xff]  }
 0x4de   :  { %7265 = vmatpush3.bf16.msra.mxu0 %v8036_v49  ;;  %6089 = vmatprep.subr.bf16.mxu1 %v8039_v50 }
 0x4df   :  { %7266 = vmatprep.subr.bf16.mxu0 %v8040_v51 }
 0x4e1   :  { %6090 = vmatpush1.bf16.msra.mxu1 %v8037_v55 }
 0x4e2   :  { %7267 = vmatpush3.bf16.msra.mxu0 %v8041_v52  ;;  %6102 = vmatprep.subr.bf16.mxu1 %v8044_v57 }
 0x4e4   :  { %6092 = vmatmul.mubr.bf16.vlgmr.msra.gmra.mrb[12].mxu1 %v8678_v56  ;;  %v8059_v56 = vld [vmem:[#allocation14 + $0x82c] ss:$28 sps:$4 sm:$0xff]  }
 0x4e5   :  { %6344 = vmatmul.mubr.bf16.vlgmr.msra.gmra.mrb[36].mxu0 %v8711_v3  ;;  %6103 = vmatpush1.bf16.msra.mxu1 %v8042_v58 }
 0x4e6   :  { %6134 = vmatprep.mubr.bf16.mxu1 %v8714_v9  ;;  %6104 = vmatprep.subr.bf16.mxu1 %v8047_v61  ;;  %v8060_v9 = vld [vmem:[#allocation14 + $0x860] ss:$28 sps:$4 sm:$0xff]  }
 0x4e9   :  { %6105 = vmatpush1.bf16.msra.mxu1 %v8045_v63  ;;  %v8108_v63 = vld [vmem:[#allocation14 + $0xbe0] ss:$28 sps:$4 sm:$0xff]  }
 0x4ea   :  { %6106 = vmatprep.subr.bf16.mxu1 %v8050_v0 }
 0x4ed   :  { %6107 = vmatpush1.bf16.msra.mxu1 %v8048_v2 }
 0x4ee   :  { %6108 = vmatprep.subr.bf16.mxu1 %v8053_v7 }
 0x4f1   :  { %6109 = vmatpush1.bf16.msra.mxu1 %v8051_v8 }
 0x4f2   :  { %6110 = vmatprep.subr.bf16.mxu1 %v8056_v10 }
 0x4f5   :  { %6111 = vmatpush1.bf16.msra.mxu1 %v8054_v11  ;;  %v8111_v11 = vld [vmem:[#allocation14 + $0xc18] ss:$28 sps:$4 sm:$0xff]  }
 0x4f6   :  { %6112 = vmatprep.subr.bf16.mxu1 %v8059_v56  ;;  %v8116_v56 = vld [vmem:[#allocation14 + $0xc54] ss:$28 sps:$4 sm:$0xff]  }
 0x4f9   :  { %6113 = vmatpush1.bf16.msra.mxu1 %v8057_v12  ;;  %v8114_v12 = vld [vmem:[#allocation14 + $0xc50] ss:$28 sps:$4 sm:$0xff]  }
 0x4fa   :  { %6114 = vmatprep.subr.bf16.mxu1 %v8062_v14  ;;  %v8119_v14 = vld [vmem:[#allocation14 + $0xc8c] ss:$28 sps:$4 sm:$0xff]  }
 0x4fd   :  { %6115 = vmatpush1.bf16.msra.mxu1 %v8060_v9 }
 0x4fe   :  { %6116 = vmatprep.subr.bf16.mxu1 %v8065_v17 }
 0x501   :  { %6117 = vmatpush1.bf16.msra.mxu1 %v8063_v15  ;;  %v8117_v15 = vld [vmem:[#allocation14 + $0xc88] ss:$28 sps:$4 sm:$0xff]  }
 0x502   :  { %6118 = vmatprep.subr.bf16.mxu1 %v8068_v45 }
 0x505   :  { %6119 = vmatpush1.bf16.msra.mxu1 %v8066_v18  ;;  %v8122_v18 = vld [vmem:[#allocation14 + $0xcc4] ss:$28 sps:$4 sm:$0xff]  }
 0x506   :  { %6120 = vmatprep.subr.bf16.mxu1 %v8071_v22 }
 0x509   :  { %6121 = vmatpush1.bf16.msra.mxu1 %v8069_v23 }
 0x50a   :  { %6122 = vmatprep.subr.bf16.mxu1 %v8074_v25 }
 0x50d   :  { %6123 = vmatpush1.bf16.msra.mxu1 %v8072_v28  ;;  %v8120_v28 = vld [vmem:[#allocation14 + $0xcc0] ss:$28 sps:$4 sm:$0xff]  }
 0x50e   :  { %6124 = vmatprep.subr.bf16.mxu1 %v8077_v29 }
 0x511   :  { %6125 = vmatpush1.bf16.msra.mxu1 %v8075_v30  ;;  %v8125_v30 = vld [vmem:[#allocation14 + $0xcfc] ss:$28 sps:$4 sm:$0xff]  }
 0x512   :  { %6126 = vmatprep.subr.bf16.mxu1 %v8080_v48 }
 0x515   :  { %6127 = vmatpush1.bf16.msra.mxu1 %v8078_v46  ;;  %v8123_v46 = vld [vmem:[#allocation14 + $0xcf8] ss:$28 sps:$4 sm:$0xff]  }
 0x516   :  { %6128 = vmatprep.subr.bf16.mxu1 %v8083_v59  ;;  %v8128_v59 = vld [vmem:[#allocation14 + $0xd34] ss:$28 sps:$4 sm:$0xff]  }
 0x519   :  { %6129 = vmatpush1.bf16.msra.mxu1 %v8081_v31  ;;  %v8126_v31 = vld [vmem:[#allocation14 + $0xd30] ss:$28 sps:$4 sm:$0xff]  }
 0x51a   :  { %6130 = vmatprep.subr.bf16.mxu1 %v8086_v33  ;;  %v8131_v33 = vld [vmem:[#allocation14 + $0xd6c] ss:$28 sps:$4 sm:$0xff]  }
 0x51d   :  { %6131 = vmatpush1.bf16.msra.mxu1 %v8084_v34  ;;  %v8129_v34 = vld [vmem:[#allocation14 + $0xd68] ss:$28 sps:$4 sm:$0xff]  }
 0x51e   :  { %6132 = vmatprep.subr.bf16.mxu1 %v8089_v35  ;;  %v8134_v35 = vld [vmem:[#allocation14 + $0xda4] ss:$28 sps:$4 sm:$0xff]  }
 0x521   :  { %6133 = vmatpush1.bf16.msra.mxu1 %v8087_v36 }
 0x522   :  { %6145 = vmatprep.subr.bf16.mxu1 %v8092_v16 }
 0x524   :  { %6135 = vmatmul.mubr.bf16.vlgmr.msra.gmra.mrb[12].mxu1 %v8707_v54  ;;  %v8107_v54 = vld [vmem:[#allocation14 + $0xbac] ss:$28 sps:$4 sm:$0xff]  }
 0x525   :  { %6146 = vmatpush1.bf16.msra.mxu1 %v8090_v53  ;;  %6177 = vmatprep.mubr.bf16.mxu1 %v8716_v13  ;;  %v3336_v13 = vrot.slane %v8741_v60, %v8582_v37  ;;  %v8132_v53 = vld [vmem:[#allocation14 + $0xda0] ss:$28 sps:$4 sm:$0xff]  }
 0x526   :  { %6147 = vmatprep.subr.bf16.mxu1 %v8095_v38 }
 0x529   :  { %6148 = vmatpush1.bf16.msra.mxu1 %v8093_v39 }
 0x52a   :  { %6149 = vmatprep.subr.bf16.mxu1 %v8098_v40  ;;  %v8137_v40 = vld [vmem:[#allocation14 + $0xddc] ss:$28 sps:$4 sm:$0xff]  }
 0x52d   :  { %6150 = vmatpush1.bf16.msra.mxu1 %v8096_v42 }
 0x52e   :  { %6151 = vmatprep.subr.bf16.mxu1 %v8101_v19 }
 0x531   :  { %6152 = vmatpush1.bf16.msra.mxu1 %v8099_v20  ;;  %v8135_v20 = vld [vmem:[#allocation14 + $0xdd8] ss:$28 sps:$4 sm:$0xff]  }
 0x532   :  { %6153 = vmatprep.subr.bf16.mxu1 %v8104_v21  ;;  %v3360_v21 = vrot.slane %v8741_v60, %v1125_v5 }
 0x535   :  { %6154 = vmatpush1.bf16.msra.mxu1 %v8102_v24 }
 0x536   :  { %6155 = vmatprep.subr.bf16.mxu1 %v8107_v54 }
 0x537   :  { %v5835_v49 = vpop.f32.mrb[8].mxu1  ;;  %v6007_v50 = vpop.f32.mrb[20].mxu0 }
 0x538   :  { %v7290_v51 = vadd.f32 %v5835_v49, %v3336_v13  ;;  %v7294_v55 = vadd.f32 %v6007_v50, %v3344_v26  ;;  %v5837_v52 = vpop.f32.mrb[9].mxu1  ;;  %v6009_v57 = vpop.f32.mrb[21].mxu0 }
 0x539   :  { %v7291_v37 = vadd.f32 %v5837_v52, %v3340_v27  ;;  %v7295_v58 = vadd.f32 %v6009_v57, %v3348_v43  ;;  %v5839_v61 = vpop.f32.mrb[10].mxu1  ;;  %v6011_v62 = vpop.f32.mrb[22].mxu0  ;;  %6156 = vmatpush1.bf16.msra.mxu1 %v8105_v44 }
 0x53a   :  { %8138 = vtanh.f32 %v7290_v51  ;;  %v7292_v41 = vadd.f32 %v5839_v61, %v3336_v13  ;;  %v5841_v0 = vpop.f32.mrb[11].mxu1  ;;  %v6013_v2 = vpop.f32.mrb[23].mxu0  ;;  %6157 = vmatprep.subr.bf16.mxu1 %v8110_v47  ;;  %v7296_v7 = vadd.f32 %v6011_v62, %v3344_v26 }
 0x53b   :  { %8140 = vtanh.f32 %v7294_v55  ;;  %v7293_v8 = vadd.f32 %v5841_v0, %v3340_v27  ;;  %v7297_v10 = vadd.f32 %v6013_v2, %v3348_v43 }
 0x53c   :  { %8142 = vtanh.f32 %v7291_v37 }
 0x53d   :  { %8144 = vtanh.f32 %v7295_v58  ;;  %6158 = vmatpush1.bf16.msra.mxu1 %v8108_v63 }
 0x53e   :  { %8146 = vtanh.f32 %v7292_v41  ;;  %6159 = vmatprep.subr.bf16.mxu1 %v8113_v1 }
 0x53f   :  { %8148 = vtanh.f32 %v7296_v7 }
 0x540   :  { %8150 = vtanh.f32 %v7293_v8 }
 0x541   :  { %8152 = vtanh.f32 %v7297_v10  ;;  %6160 = vmatpush1.bf16.msra.mxu1 %v8111_v11  ;;  %v3352_v11 = vrot.slane %v8741_v60, %v1117_v4 }
 0x542   :  { %6161 = vmatprep.subr.bf16.mxu1 %v8116_v56  ;;  %v3356_v56 = vrot.slane %v8741_v60, %v1121_v6 }
 0x544   :  { %v8139_v9 = vpop.eup %8138 }
 0x545   :  { %v8141_v17 = vpop.eup %8140  ;;  %6366 = vst [vmem:[#allocation17] sm:$0xff] %v8139_v9  ;;  %6162 = vmatpush1.bf16.msra.mxu1 %v8114_v12 }
 0x546   :  { %v8143_v45 = vpop.eup %8142  ;;  %6368 = vst [vmem:[#allocation17 + $0x10] sm:$0xff] %v8141_v17  ;;  %6163 = vmatprep.subr.bf16.mxu1 %v8119_v14 }
 0x547   :  { %v8145_v22 = vpop.eup %8144  ;;  %6367 = vst [vmem:[#allocation17 + $0x8] sm:$0xff] %v8143_v45 }
 0x548   :  { %v8147_v23 = vpop.eup %8146  ;;  %6369 = vst [vmem:[#allocation17 + $0x18] sm:$0xff] %v8145_v22 }
 0x549   :  { %v8149_v25 = vpop.eup %8148  ;;  %6373 = vst [vmem:[#allocation17 + $0x38] sm:$0xff] %v8147_v23  ;;  %6164 = vmatpush1.bf16.msra.mxu1 %v8117_v15 }
 0x54a   :  { %v8151_v29 = vpop.eup %8150  ;;  %6375 = vst [vmem:[#allocation17 + $0x48] sm:$0xff] %v8149_v25  ;;  %6165 = vmatprep.subr.bf16.mxu1 %v8122_v18 }
 0x54b   :  { %v8153_v48 = vpop.eup %8152  ;;  %6374 = vst [vmem:[#allocation17 + $0x40] sm:$0xff] %v8151_v29 }
 0x54c   :  { %6376 = vst [vmem:[#allocation17 + $0x50] sm:$0xff] %v8153_v48 }
 0x54d   :  { %6166 = vmatpush1.bf16.msra.mxu1 %v8120_v28 }
 0x54e   :  { %6167 = vmatprep.subr.bf16.mxu1 %v8125_v30 }
 0x551   :  { %6168 = vmatpush1.bf16.msra.mxu1 %v8123_v46 }
 0x552   :  { %6169 = vmatprep.subr.bf16.mxu1 %v8128_v59 }
 0x555   :  { %6170 = vmatpush1.bf16.msra.mxu1 %v8126_v31 }
 0x556   :  { %6171 = vmatprep.subr.bf16.mxu1 %v8131_v33 }
 0x558   :  { %v7202_v36 = vpop.f32.mrb[24].mxu0 }
 0x559   :  { %v7203_v16 = vpop.f32.mrb[25].mxu0  ;;  %6172 = vmatpush1.bf16.msra.mxu1 %v8129_v34 }
 0x55a   :  { %v7204_v38 = vadd.f32 %v7203_v16, %v7202_v36  ;;  %v7205_v39 = vpop.f32.mrb[26].mxu0  ;;  %6173 = vmatprep.subr.bf16.mxu1 %v8134_v35 }
 0x55b   :  { %v7206_v42 = vpop.f32.mrb[27].mxu0 }
 0x55c   :  { %v7207_v19 = vadd.f32 %v7206_v42, %v7205_v39  ;;  %v6223_v13 = vadd.f32 %v7204_v38, %v3360_v21 }
 0x55d   :  { %6174 = vmatpush1.bf16.msra.mxu1 %v8132_v53 }
 0x55e   :  { %6175 = vmatprep.subr.bf16.mxu1 %v8137_v40  ;;  %v6226_v44 = vadd.f32 %v7207_v19, %v3360_v21 }
 0x561   :  { %6176 = vmatpush1.bf16.msra.mxu1 %v8135_v20 }
 0x564   :  { %6178 = vmatmul.mubr.bf16.vlgmr.msra.gmra.mrb[12].mxu1 %v8711_v3 }
 0x578   :  { %v7224_v24 = vpop.f32.mrb[28].mxu0 }
 0x579   :  { %v7225_v54 = vpop.f32.mrb[29].mxu0 }
 0x57a   :  { %v7226_v26 = vadd.f32 %v7225_v54, %v7224_v24  ;;  %v7227_v27 = vpop.f32.mrb[30].mxu0 }
 0x57b   :  { %v7228_v43 = vpop.f32.mrb[31].mxu0 }
 0x57c   :  { %v6264_v47 = vadd.f32 %v7226_v26, %v6223_v13  ;;  %v7229_v49 = vadd.f32 %v7228_v43, %v7227_v27 }
 0x57e   :  { %v6267_v50 = vadd.f32 %v7229_v49, %v6226_v44 }
 0x598   :  { %v7246_v51 = vpop.f32.mrb[32].mxu0 }
 0x599   :  { %v7247_v55 = vpop.f32.mrb[33].mxu0 }
 0x59a   :  { %v7248_v52 = vadd.f32 %v7247_v55, %v7246_v51  ;;  %v7249_v57 = vpop.f32.mrb[34].mxu0 }
 0x59b   :  { %v7250_v37 = vpop.f32.mrb[35].mxu0 }
 0x59c   :  { %v6305_v3 = vadd.f32 %v7248_v52, %v6264_v47  ;;  %v7251_v58 = vadd.f32 %v7250_v37, %v7249_v57 }
 0x59e   :  { %v6308_v61 = vadd.f32 %v7251_v58, %v6267_v50 }
 0x5b8   :  { %v7268_v62 = vpop.f32.mrb[36].mxu0 }
 0x5b9   :  { %v7269_v5 = vpop.f32.mrb[37].mxu0 }
 0x5ba   :  { %v7270_v63 = vadd.f32 %v7269_v5, %v7268_v62  ;;  %v7271_v41 = vpop.f32.mrb[38].mxu0 }
 0x5bb   :  { %v7272_v0 = vpop.f32.mrb[39].mxu0 }
 0x5bc   :  { %v6346_v2 = vadd.f32 %v7270_v63, %v6305_v3  ;;  %v7273_v1 = vadd.f32 %v7272_v0, %v7271_v41 }
 0x5be   :  { %8154 = vtanh.f32 %v6346_v2  ;;  %v6349_v7 = vadd.f32 %v7273_v1, %v6308_v61 }
 0x5c0   :  { %8156 = vtanh.f32 %v6349_v7 }
 0x5c8   :  { %v8155_v8 = vpop.eup %8154 }
 0x5c9   :  { %6372 = vst [vmem:[#allocation17 + $0x30] sm:$0xff] %v8155_v8 }
 0x5ca   :  { %v8157_v10 = vpop.eup %8156 }
 0x5cb   :  { %6379 = vst [vmem:[#allocation17 + $0x68] sm:$0xff] %v8157_v10 }
 0x637   :  { %v6179_v12 = vpop.f32.mrb[12].mxu1 }
 0x638   :  { %v7298_v14 = vadd.f32 %v6179_v12, %v3352_v11  ;;  %v6181_v9 = vpop.f32.mrb[13].mxu1 }
 0x639   :  { %v7299_v17 = vadd.f32 %v6181_v9, %v3356_v56  ;;  %v6183_v15 = vpop.f32.mrb[14].mxu1 }
 0x63a   :  { %8158 = vtanh.f32 %v7298_v14  ;;  %v7300_v45 = vadd.f32 %v6183_v15, %v3352_v11  ;;  %v6185_v18 = vpop.f32.mrb[15].mxu1 }
 0x63b   :  { %8160 = vtanh.f32 %v7299_v17  ;;  %v7301_v22 = vadd.f32 %v6185_v18, %v3356_v56 }
 0x63c   :  { %8162 = vtanh.f32 %v7300_v45 }
 0x63d   :  { %8164 = vtanh.f32 %v7301_v22 }
 0x644   :  { %v8159_v23 = vpop.eup %8158 }
 0x645   :  { %v8161_v4 = vpop.eup %8160  ;;  %6370 = vst [vmem:[#allocation17 + $0x20] sm:$0xff] %v8159_v23 }
 0x646   :  { %v8163_v32 = vpop.eup %8162  ;;  %6371 = vst [vmem:[#allocation17 + $0x28] sm:$0xff] %v8161_v4 }
 0x647   :  { %v8165_v6 = vpop.eup %8164  ;;  %6377 = vst [vmem:[#allocation17 + $0x58] sm:$0xff] %v8163_v32 }
 0x648   :  { %6378 = vst [vmem:[#allocation17 + $0x60] sm:$0xff] %v8165_v6 }
 0x649   :  { %8375 = shalt.err (!%p8372_p6)
}
 0x64a   :  { %s8376_s28 = scalar_lea.hbm %s8782_s9, 1792 }
 0x64b   :  { %p8377_p7 = scmp.ne.s32.totalorder %s8782_s9, %s8376_s28  ;;  %p8380_p8 = scmp.lt.u32.totalorder %s8376_s28, %s8782_s9 }
 0x64d   :  { %p8382_p9 = pnand %p8380_p8, %p8377_p7 }
 0x64f   :  { %8385 = shalt.err (!%p8382_p9)
}
 0x650   :  { %s8419_s1 = smov 896   ;;  %s8420_s13 = smov 56  }
 0x651   :  { %6391 = dma.vmem_to_hbm [thread:$0]  %s6386_s26, 1792, %s8782_s9, [#allocation4], %s8419_s1, %s8419_s1, %s8420_s13  }
 0x652   :  { %8396 = dma.done.wait [#allocation4], 1792  }
 0x653   :  { %8397 = vsyncadd [#allocation4], 4294965504 }
 0x654   :  { %6395 = vsyncpa [#allocation3], 1 }
 0x655   :  { %6396 = vsyncpa [#allocation6], 1 }
 0x656   :  { %6397 = vsyncpa [#allocation9], 1 }
 0x657   :  { %6398 = vsyncpa [#allocation12], 1 }
 0x658   :  { %6399 = vsyncpa [#allocation15], 1 }
 0x659   :  { %6400 = vsyncpa [#allocation4], 1 }

// kernel: tpu_custom_call.1
= control target key start
LH: loop header
LB: loop body
LE: loop exit
PB: predicated region body
PF: predicated region fallthrough
CT: control target
= control target key end

     0   :  { %14 = vsyncpa [#allocation3], 0  ;;  %s8773_s0 = inlined_call_operand.hbm [shape: bf16[16,128], index: 0, kind: input, shape index: {}]   ;;  %s8774_s1 = inlined_call_operand.hbm [shape: bf16[128,256], index: 1, kind: input, shape index: {}]   ;;  %s8775_s2 = inlined_call_operand.hbm [shape: f32[1,256], index: 2, kind: input, shape index: {}]   ;;  %s8776_s3 = inlined_call_operand.hbm [shape: bf16[256,512], index: 3, kind: input, shape index: {}]   ;;  %s8777_s4 = inlined_call_operand.hbm [shape: f32[1,512], index: 4, kind: input, shape index: {}]   ;;  %s8778_s5 = inlined_call_operand.hbm [shape: bf16[512,1024], index: 5, kind: input, shape index: {}]   ;;  %s8779_s6 = inlined_call_operand.hbm [shape: f32[1,1024], index: 6, kind: input, shape index: {}]   ;;  %s8780_s7 = inlined_call_operand.hbm [shape: bf16[1024,896], index: 7, kind: input, shape index: {}]   ;;  %s8781_s8 = inlined_call_operand.hbm [shape: f32[1,896], index: 8, kind: input, shape index: {}]   ;;  %s8782_s9 = inlined_call_operand.hbm [shape: f32[16,896], index: 9, kind: output, shape index: {}]  }
   0x1   :  { %15 = vsyncpa [#allocation6], 0 }
   0x2   :  { %16 = vsyncpa [#allocation9], 0 }
   0x3   :  { %17 = vsyncpa [#allocation12], 0 }
   0x4   :  { %18 = vsyncpa [#allocation15], 0 }
   0x5   :  { %19 = vsyncpa [#allocation4], 0  ;;  %s8398_s30 = smov [#allocation5]   ;;  %s8166_s13 = scalar_lea.hbm %s8774_s1, 2048 }
   0x6   :  { %s37_s10 = sshll.u32 %s8398_s30, 4  ;;  %p8167_p0 = scmp.ne.s32.totalorder %s8774_s1, %s8166_s13  ;;  %s38_s10 = int_to_ptr.vmem [resolvable:$true] %s37_s10 }
   0x7   :  { %p8170_p1 = scmp.lt.u32.totalorder %s8166_s13, %s8774_s1 }
   0x9   :  { %p8172_p2 = pnand %p8170_p1, %p8167_p0 }
   0xb   :  { %8175 = shalt.err (!%p8172_p2)
}
   0xc   :  { %s8176_s18 = scalar_lea.vmem %s38_s10, 2048  ;;  %p8181_p4 = scmp.lt.s32.totalorder %s38_s10, %s38_s10 }
   0xd   :  { %p8177_p3 = scmp.ne.s32.totalorder %s38_s10, %s8176_s18  ;;  %p8182_p5 = scmp.lt.s32.totalorder %s8176_s18, %s8176_s18 }
   0xf   :  { %p8183_p6 = por %p8182_p5, %p8181_p4 }
  0x11   :  { %p8184_p7 = pnand %p8183_p6, %p8177_p3 }
  0x13   :  { %8187 = shalt.err (!%p8184_p7)
}
  0x14   :  { %s8399_s19 = smov 128   ;;  %s8400_s20 = smov 8  }
  0x15   :  { %43 = dma.hbm_to_vmem [thread:$0]  %s8774_s1, 2048, %s38_s10, [#allocation6], %s8399_s19, %s8399_s19, %s8400_s20  }
  0x16   :  { %s8401_s23 = smov [#allocation8]   ;;  %s8188_s27 = scalar_lea.hbm %s8776_s3, 8192 }
  0x17   :  { %s59_s24 = sshll.u32 %s8401_s23, 4  ;;  %p8189_p8 = scmp.ne.s32.totalorder %s8776_s3, %s8188_s27  ;;  %s60_s24 = int_to_ptr.vmem [resolvable:$true] %s59_s24 }
  0x18   :  { %p8192_p9 = scmp.lt.u32.totalorder %s8188_s27, %s8776_s3 }
  0x1a   :  { %p8194_p10 = pnand %p8192_p9, %p8189_p8 }
  0x1c   :  { %8197 = shalt.err (!%p8194_p10)
}
  0x1d   :  { %s8198_s12 = scalar_lea.vmem %s60_s24, 8192  ;;  %p8203_p12 = scmp.lt.s32.totalorder %s60_s24, %s60_s24 }
  0x1e   :  { %p8199_p11 = scmp.ne.s32.totalorder %s60_s24, %s8198_s12  ;;  %p8204_p13 = scmp.lt.s32.totalorder %s8198_s12, %s8198_s12 }
  0x20   :  { %p8205_p0 = por %p8204_p13, %p8203_p12 }
  0x22   :  { %p8206_p1 = pnand %p8205_p0, %p8199_p11 }
  0x24   :  { %8209 = shalt.err (!%p8206_p1)
}
  0x25   :  { %s8402_s1 = smov 256   ;;  %s8403_s10 = smov 16  }
  0x26   :  { %65 = dma.hbm_to_vmem [thread:$0]  %s8776_s3, 8192, %s60_s24, [#allocation9], %s8402_s1, %s8402_s1, %s8403_s10  }
  0x27   :  { %s8404_s15 = smov [#allocation11]   ;;  %s8210_s19 = scalar_lea.hbm %s8778_s5, 32768 }
  0x28   :  { %s81_s16 = sshll.u32 %s8404_s15, 4  ;;  %p8211_p2 = scmp.ne.s32.totalorder %s8778_s5, %s8210_s19  ;;  %s82_s16 = int_to_ptr.vmem [resolvable:$true] %s81_s16 }
  0x29   :  { %p8214_p3 = scmp.lt.u32.totalorder %s8210_s19, %s8778_s5 }
  0x2b   :  { %p8216_p4 = pnand %p8214_p3, %p8211_p2 }
  0x2d   :  { %8219 = shalt.err (!%p8216_p4)
}
  0x2e   :  { %s8220_s25 = scalar_lea.vmem %s82_s16, 32768  ;;  %p8225_p6 = scmp.lt.s32.totalorder %s82_s16, %s82_s16 }
  0x2f   :  { %p8221_p5 = scmp.ne.s32.totalorder %s82_s16, %s8220_s25  ;;  %p8226_p7 = scmp.lt.s32.totalorder %s8220_s25, %s8220_s25 }
  0x31   :  { %p8227_p8 = por %p8226_p7, %p8225_p6 }
  0x33   :  { %p8228_p9 = pnand %p8227_p8, %p8221_p5 }
  0x35   :  { %8231 = shalt.err (!%p8228_p9)
}
  0x36   :  { %s8405_s3 = smov 512   ;;  %s8406_s24 = smov 32  }
  0x37   :  { %87 = dma.hbm_to_vmem [thread:$0]  %s8778_s5, 32768, %s82_s16, [#allocation12], %s8405_s3, %s8405_s3, %s8406_s24  }
  0x38   :  { %s8407_s28 = smov [#allocation14]   ;;  %s8232_s12 = scalar_lea.hbm %s8780_s7, 57344 }
  0x39   :  { %s103_s29 = sshll.u32 %s8407_s28, 4  ;;  %p8233_p10 = scmp.ne.s32.totalorder %s8780_s7, %s8232_s12  ;;  %s104_s29 = int_to_ptr.vmem [resolvable:$true] %s103_s29 }
  0x3a   :  { %p8236_p11 = scmp.lt.u32.totalorder %s8232_s12, %s8780_s7 }
  0x3c   :  { %p8238_p12 = pnand %p8236_p11, %p8233_p10 }
  0x3e   :  { %8241 = shalt.err (!%p8238_p12)
}
  0x3f   :  { %s8242_s15 = scalar_lea.vmem %s104_s29, 57344  ;;  %p8247_p0 = scmp.lt.s32.totalorder %s104_s29, %s104_s29 }
  0x40   :  { %p8243_p13 = scmp.ne.s32.totalorder %s104_s29, %s8242_s15  ;;  %p8248_p1 = scmp.lt.s32.totalorder %s8242_s15, %s8242_s15 }
  0x42   :  { %p8249_p2 = por %p8248_p1, %p8247_p0 }
  0x44   :  { %p8250_p3 = pnand %p8249_p2, %p8243_p13 }
  0x46   :  { %8253 = shalt.err (!%p8250_p3)
}
  0x47   :  { %s8408_s5 = smov 448   ;;  %s8409_s16 = smov 28  }
  0x48   :  { %109 = dma.hbm_to_vmem [thread:$0]  %s8780_s7, 57344, %s104_s29, [#allocation15], %s8408_s5, %s8408_s5, %s8409_s16  }
  0x49   :  { %s8410_s19 = smov [#allocation2]   ;;  %s8254_s23 = scalar_lea.hbm %s8773_s0, 128 }
  0x4a   :  { %s25_s20 = sshll.u32 %s8410_s19, 4  ;;  %p8255_p4 = scmp.ne.s32.totalorder %s8773_s0, %s8254_s23  ;;  %s26_s20 = int_to_ptr.vmem [resolvable:$true] %s25_s20 }
  0x4b   :  { %p8258_p5 = scmp.lt.u32.totalorder %s8254_s23, %s8773_s0 }
  0x4d   :  { %p8260_p6 = pnand %p8258_p5, %p8255_p4 }
  0x4f   :  { %8263 = shalt.err (!%p8260_p6)
}
  0x50   :  { %s8264_s27 = scalar_lea.vmem %s26_s20, 128  ;;  %p8269_p8 = scmp.lt.s32.totalorder %s26_s20, %s26_s20 }
  0x51   :  { %p8265_p7 = scmp.ne.s32.totalorder %s26_s20, %s8264_s27  ;;  %p8270_p9 = scmp.lt.s32.totalorder %s8264_s27, %s8264_s27 }
  0x53   :  { %p8271_p10 = por %p8270_p9, %p8269_p8 }
  0x55   :  { %p8272_p11 = pnand %p8271_p10, %p8265_p7 }
  0x57   :  { %8275 = shalt.err (!%p8272_p11)
}
  0x58   :  { %s8411_s7 = smov 64   ;;  %s8412_s28 = smov 4  }
  0x59   :  { %31 = dma.hbm_to_vmem [thread:$0]  %s8773_s0, 128, %s26_s20, [#allocation3], %s8411_s7, %s8411_s7, %s8412_s28  }
  0x5a   :  { %s8413_s11 = smov [#allocation7]   ;;  %s8414_s1 = smov [#allocation10]  }
  0x5b   :  { %s50_s12 = sshll.u32 %s8413_s11, 4  ;;  %s72_s10 = sshll.u32 %s8414_s1, 4  ;;  %s51_s12 = int_to_ptr.vmem [resolvable:$true] %s50_s12  ;;  %s73_s10 = int_to_ptr.vmem [resolvable:$true] %s72_s10 }
  0x5c   :  { %s8276_s15 = scalar_lea.hbm %s8775_s2, 32 }
  0x5d   :  { %p8277_p12 = scmp.ne.s32.totalorder %s8775_s2, %s8276_s15  ;;  %p8280_p13 = scmp.lt.u32.totalorder %s8276_s15, %s8775_s2 }
  0x5f   :  { %p8282_p0 = pnand %p8280_p13, %p8277_p12 }
  0x61   :  { %8285 = shalt.err (!%p8282_p0)
}
  0x62   :  { %s8286_s0 = scalar_lea.vmem %s51_s12, 32  ;;  %p8291_p2 = scmp.lt.s32.totalorder %s51_s12, %s51_s12 }
  0x63   :  { %p8287_p1 = scmp.ne.s32.totalorder %s51_s12, %s8286_s0  ;;  %p8292_p3 = scmp.lt.s32.totalorder %s8286_s0, %s8286_s0 }
  0x65   :  { %p8293_p4 = por %p8292_p3, %p8291_p2 }
  0x67   :  { %p8294_p5 = pnand %p8293_p4, %p8287_p1 }
  0x69   :  { %8297 = shalt.err (!%p8294_p5)
}
  0x6a   :  { %53 = dma.hbm_to_vmem [thread:$0]  %s8775_s2, 32, %s51_s12, [#allocation6]  }
  0x6b   :  { %s8298_s23 = scalar_lea.hbm %s8777_s4, 64 }
  0x6c   :  { %p8299_p6 = scmp.ne.s32.totalorder %s8777_s4, %s8298_s23  ;;  %p8302_p7 = scmp.lt.u32.totalorder %s8298_s23, %s8777_s4 }
  0x6e   :  { %p8304_p8 = pnand %p8302_p7, %p8299_p6 }
  0x70   :  { %8307 = shalt.err (!%p8304_p8)
}
  0x71   :  { %s8308_s27 = scalar_lea.vmem %s73_s10, 64  ;;  %p8313_p10 = scmp.lt.s32.totalorder %s73_s10, %s73_s10 }
  0x72   :  { %p8309_p9 = scmp.ne.s32.totalorder %s73_s10, %s8308_s27  ;;  %p8314_p11 = scmp.lt.s32.totalorder %s8308_s27, %s8308_s27 }
  0x74   :  { %p8315_p12 = por %p8314_p11, %p8313_p10 }
  0x76   :  { %p8316_p13 = pnand %p8315_p12, %p8309_p9 }
  0x78   :  { %8319 = shalt.err (!%p8316_p13)
}
  0x79   :  { %75 = dma.hbm_to_vmem [thread:$0]  %s8777_s4, 64, %s73_s10, [#allocation9]  }
  0x7a   :  { %s8415_s28 = smov [#allocation13]   ;;  %s8416_s30 = smov [#allocation16]  }
  0x7b   :  { %s94_s29 = sshll.u32 %s8415_s28, 4  ;;  %s116_s11 = sshll.u32 %s8416_s30, 4  ;;  %s95_s29 = int_to_ptr.vmem [resolvable:$true] %s94_s29  ;;  %s117_s11 = int_to_ptr.vmem [resolvable:$true] %s116_s11 }
  0x7c   :  { %s8320_s13 = scalar_lea.hbm %s8779_s6, 128 }
  0x7d   :  { %p8321_p0 = scmp.ne.s32.totalorder %s8779_s6, %s8320_s13  ;;  %p8324_p1 = scmp.lt.u32.totalorder %s8320_s13, %s8779_s6 }
  0x7f   :  { %p8326_p2 = pnand %p8324_p1, %p8321_p0 }
  0x81   :  { %8329 = shalt.err (!%p8326_p2)
}
  0x82   :  { %s8330_s4 = scalar_lea.vmem %s95_s29, 128  ;;  %p8335_p4 = scmp.lt.s32.totalorder %s95_s29, %s95_s29 }
  0x83   :  { %p8331_p3 = scmp.ne.s32.totalorder %s95_s29, %s8330_s4  ;;  %p8336_p5 = scmp.lt.s32.totalorder %s8330_s4, %s8330_s4 }
  0x85   :  { %p8337_p6 = por %p8336_p5, %p8335_p4 }
  0x87   :  { %p8338_p7 = pnand %p8337_p6, %p8331_p3 }
  0x89   :  { %8341 = shalt.err (!%p8338_p7)
}
  0x8a   :  { %97 = dma.hbm_to_vmem [thread:$0]  %s8779_s6, 128, %s95_s29, [#allocation12]  }
  0x8b   :  { %s8342_s19 = scalar_lea.hbm %s8781_s8, 112 }
  0x8c   :  { %p8343_p8 = scmp.ne.s32.totalorder %s8781_s8, %s8342_s19  ;;  %p8346_p9 = scmp.lt.u32.totalorder %s8342_s19, %s8781_s8 }
  0x8e   :  { %p8348_p10 = pnand %p8346_p9, %p8343_p8 }
  0x90   :  { %8351 = shalt.err (!%p8348_p10)
}
  0x91   :  { %s8352_s25 = scalar_lea.vmem %s117_s11, 112  ;;  %s8356_s3 = scalar_lea.vmem %s117_s11, 128 }
  0x92   :  { %p8353_p11 = scmp.ne.s32.totalorder %s117_s11, %s8352_s25  ;;  %p8357_p12 = scmp.lt.s32.totalorder %s117_s11, %s117_s11 }
  0x93   :  { %p8358_p13 = scmp.lt.s32.totalorder %s8356_s3, %s8352_s25 }
  0x95   :  { %p8359_p0 = por %p8358_p13, %p8357_p12 }
  0x97   :  { %p8360_p1 = pnand %p8359_p0, %p8353_p11 }
  0x99   :  { %8363 = shalt.err (!%p8360_p1)
}
  0x9a   :  { %119 = dma.hbm_to_vmem [thread:$0]  %s8781_s8, 112, %s117_s11, [#allocation15]  }
  0x9b   :  { %8386 = dma.done.wait [#allocation3], 128  }
  0x9c   :  { %8387 = vsyncadd [#allocation3], 4294967168 }
  0x9d   :  { %8388 = dma.done.wait [#allocation6], 2080  }
  0x9e   :  { %8389 = vsyncadd [#allocation6], 4294965216 }
  0x9f   :  { %8390 = dma.done.wait [#allocation9], 8256  }
  0xa0   :  { %8391 = vsyncadd [#allocation9], 4294959040 }
  0xa1   :  { %8392 = dma.done.wait [#allocation12], 32896  }
  0xa2   :  { %8393 = vsyncadd [#allocation12], 4294934400 }
  0xa3   :  { %8394 = dma.done.wait [#allocation15], 57456  }
  0xa4   :  { %8395 = vsyncadd [#allocation15], 4294909840  ;;  %v8417_v0 = vmov 0   ;;  %v7377_v1 = vld [vmem:[#allocation5 + $0x4] ss:$8 sps:$4 sm:$0xff]   ;;  %v7401_v18 = vld [vmem:[#allocation2] sm:$0xff]  }
  0xa5   :  { %296 = vmatprep.mubr.bf16.mxu0 %v8417_v0  ;;  %v7379_v2 = vld [vmem:[#allocation5] ss:$8 sps:$4 sm:$0xff]   ;;  %264 = vmatprep.subr.bf16.mxu0 %v7377_v1  ;;  %v7380_v3 = vld [vmem:[#allocation5 + $0x14] ss:$8 sps:$4 sm:$0xff]   ;;  %v7382_v4 = vld [vmem:[#allocation5 + $0x10] ss:$8 sps:$4 sm:$0xff]  }
  0xa6   :  { %265 = vmatpush1.bf16.msra.mxu0 %v7379_v2  ;;  %v7383_v5 = vld [vmem:[#allocation5 + $0x24] ss:$8 sps:$4 sm:$0xff]   ;;  %v7385_v6 = vld [vmem:[#allocation5 + $0x20] ss:$8 sps:$4 sm:$0xff]   ;;  %v7386_v7 = vld [vmem:[#allocation5 + $0x34] ss:$8 sps:$4 sm:$0xff]  }
  0xa7   :  { %266 = vmatprep.subr.bf16.mxu0 %v7380_v3  ;;  %v7388_v8 = vld [vmem:[#allocation5 + $0x30] ss:$8 sps:$4 sm:$0xff]   ;;  %v7389_v9 = vld [vmem:[#allocation5 + $0x44] ss:$8 sps:$4 sm:$0xff]   ;;  %v7391_v10 = vld [vmem:[#allocation5 + $0x40] ss:$8 sps:$4 sm:$0xff]  }
  0xa8   :  { %v7392_v11 = vld [vmem:[#allocation5 + $0x54] ss:$8 sps:$4 sm:$0xff]   ;;  %v7394_v12 = vld [vmem:[#allocation5 + $0x50] ss:$8 sps:$4 sm:$0xff]   ;;  %v7395_v13 = vld [vmem:[#allocation5 + $0x64] ss:$8 sps:$4 sm:$0xff]  }
  0xa9   :  { %v7397_v14 = vld [vmem:[#allocation5 + $0x60] ss:$8 sps:$4 sm:$0xff]   ;;  %v7398_v15 = vld [vmem:[#allocation5 + $0x74] ss:$8 sps:$4 sm:$0xff]   ;;  %v7400_v16 = vld [vmem:[#allocation5 + $0x70] ss:$8 sps:$4 sm:$0xff]  }
  0xaa   :  { %267 = vmatpush1.bf16.msra.mxu0 %v7382_v4  ;;  %v7404_v17 = vld [vmem:[#allocation8 + $0x4] ss:$16 sps:$4 sm:$0xff]   ;;  %v7402_v19 = vld [vmem:[#allocation8] ss:$16 sps:$4 sm:$0xff]   ;;  %v7452_v50 = vld [vmem:[#allocation8 + $0xc] ss:$16 sps:$4 sm:$0xff]  }
  0xab   :  { %268 = vmatprep.subr.bf16.mxu0 %v7383_v5  ;;  %v7407_v20 = vld [vmem:[#allocation8 + $0x24] ss:$16 sps:$4 sm:$0xff]   ;;  %v7405_v21 = vld [vmem:[#allocation8 + $0x20] ss:$16 sps:$4 sm:$0xff]   ;;  %s8418_s8 = smov [#allocation17]  }
  0xac   :  { %v7410_v22 = vld [vmem:[#allocation8 + $0x44] ss:$16 sps:$4 sm:$0xff]   ;;  %v7408_v23 = vld [vmem:[#allocation8 + $0x40] ss:$16 sps:$4 sm:$0xff]   ;;  %s6385_s26 = sshll.u32 %s8418_s8, 4  ;;  %s6386_s26 = int_to_ptr.vmem [resolvable:$true] %s6385_s26 }
  0xad   :  { %v7413_v24 = vld [vmem:[#allocation8 + $0x64] ss:$16 sps:$4 sm:$0xff]   ;;  %v7411_v25 = vld [vmem:[#allocation8 + $0x60] ss:$16 sps:$4 sm:$0xff]   ;;  %s8364_s27 = scalar_lea.vmem %s6386_s26, 1792  ;;  %p8369_p3 = scmp.lt.s32.totalorder %s6386_s26, %s6386_s26 }
  0xae   :  { %269 = vmatpush1.bf16.msra.mxu0 %v7385_v6  ;;  %v7416_v26 = vld [vmem:[#allocation8 + $0x84] ss:$16 sps:$4 sm:$0xff]   ;;  %v7414_v27 = vld [vmem:[#allocation8 + $0x80] ss:$16 sps:$4 sm:$0xff]   ;;  %p8365_p2 = scmp.ne.s32.totalorder %s6386_s26, %s8364_s27  ;;  %p8370_p4 = scmp.lt.s32.totalorder %s8364_s27, %s8364_s27 }
  0xaf   :  { %270 = vmatprep.subr.bf16.mxu0 %v7386_v7  ;;  %v7419_v28 = vld [vmem:[#allocation8 + $0xa4] ss:$16 sps:$4 sm:$0xff]   ;;  %v7417_v29 = vld [vmem:[#allocation8 + $0xa0] ss:$16 sps:$4 sm:$0xff]  }
  0xb0   :  { %v7422_v30 = vld [vmem:[#allocation8 + $0xc4] ss:$16 sps:$4 sm:$0xff]   ;;  %v7420_v31 = vld [vmem:[#allocation8 + $0xc0] ss:$16 sps:$4 sm:$0xff]   ;;  %p8371_p5 = por %p8370_p4, %p8369_p3 }
  0xb1   :  { %v7425_v32 = vld [vmem:[#allocation8 + $0xe4] ss:$16 sps:$4 sm:$0xff]   ;;  %v7423_v33 = vld [vmem:[#allocation8 + $0xe0] ss:$16 sps:$4 sm:$0xff]  }
  0xb2   :  { %271 = vmatpush1.bf16.msra.mxu0 %v7388_v8  ;;  %v7428_v34 = vld [vmem:[#allocation8 + $0x104] ss:$16 sps:$4 sm:$0xff]   ;;  %v7426_v35 = vld [vmem:[#allocation8 + $0x100] ss:$16 sps:$4 sm:$0xff]   ;;  %p8372_p6 = pnand %p8371_p5, %p8365_p2 }
  0xb3   :  { %272 = vmatprep.subr.bf16.mxu0 %v7389_v9  ;;  %v7431_v36 = vld [vmem:[#allocation8 + $0x124] ss:$16 sps:$4 sm:$0xff]   ;;  %v7429_v37 = vld [vmem:[#allocation8 + $0x120] ss:$16 sps:$4 sm:$0xff]  }
  0xb4   :  { %v7434_v38 = vld [vmem:[#allocation8 + $0x144] ss:$16 sps:$4 sm:$0xff]   ;;  %v7432_v39 = vld [vmem:[#allocation8 + $0x140] ss:$16 sps:$4 sm:$0xff]  }
  0xb5   :  { %v7437_v40 = vld [vmem:[#allocation8 + $0x164] ss:$16 sps:$4 sm:$0xff]   ;;  %v7435_v41 = vld [vmem:[#allocation8 + $0x160] ss:$16 sps:$4 sm:$0xff]  }
  0xb6   :  { %273 = vmatpush1.bf16.msra.mxu0 %v7391_v10  ;;  %v7440_v42 = vld [vmem:[#allocation8 + $0x184] ss:$16 sps:$4 sm:$0xff]   ;;  %v7438_v43 = vld [vmem:[#allocation8 + $0x180] ss:$16 sps:$4 sm:$0xff]  }
  0xb7   :  { %274 = vmatprep.subr.bf16.mxu0 %v7392_v11  ;;  %v7443_v44 = vld [vmem:[#allocation8 + $0x1a4] ss:$16 sps:$4 sm:$0xff]   ;;  %v7441_v45 = vld [vmem:[#allocation8 + $0x1a0] ss:$16 sps:$4 sm:$0xff]  }
  0xb8   :  { %v7446_v46 = vld [vmem:[#allocation8 + $0x1c4] ss:$16 sps:$4 sm:$0xff]   ;;  %v7444_v47 = vld [vmem:[#allocation8 + $0x1c0] ss:$16 sps:$4 sm:$0xff]  }
  0xb9   :  { %v7449_v48 = vld [vmem:[#allocation8 + $0x1e4] ss:$16 sps:$4 sm:$0xff]   ;;  %v7447_v49 = vld [vmem:[#allocation8 + $0x1e0] ss:$16 sps:$4 sm:$0xff]  }
  0xba   :  { %275 = vmatpush1.bf16.msra.mxu0 %v7394_v12  ;;  %v841_v51 = vld [vmem:[#allocation11] sm:$0xff] }
  0xbb   :  { %276 = vmatprep.subr.bf16.mxu0 %v7395_v13  ;;  %v845_v52 = vld [vmem:[#allocation11 + $0x20] sm:$0xff] }
  0xbc   :  { %v6483_v53 = vcombine.high %v841_v51, %v845_v52  ;;  %v6482_v54 = vcombine.low %v841_v51, %v845_v52  ;;  %v849_v55 = vld [vmem:[#allocation11 + $0x40] sm:$0xff] }
  0xbd   :  { %v853_v56 = vld [vmem:[#allocation11 + $0x60] sm:$0xff] }
  0xbe   :  { %277 = vmatpush1.bf16.msra.mxu0 %v7397_v14  ;;  %v6491_v57 = vcombine.high %v849_v55, %v853_v56  ;;  %2419 = vmatprep.subr.bf16.mxu1 %v6483_v53  ;;  %v6490_v58 = vcombine.low %v849_v55, %v853_v56  ;;  %v857_v59 = vld [vmem:[#allocation11 + $0x80] sm:$0xff] }
  0xbf   :  { %278 = vmatprep.subr.bf16.mxu0 %v7398_v15  ;;  %2420 = vmatpush1.bf16.msra.mxu1 %v6482_v54  ;;  %v861_v60 = vld [vmem:[#allocation11 + $0xa0] sm:$0xff] }
  0xc0   :  { %2421 = vmatprep.subr.bf16.mxu1 %v6491_v57  ;;  %v6499_v61 = vcombine.high %v857_v59, %v861_v60  ;;  %v6498_v62 = vcombine.low %v857_v59, %v861_v60  ;;  %v865_v63 = vld [vmem:[#allocation11 + $0xc0] sm:$0xff] }
  0xc1   :  { %v869_v0 = vld [vmem:[#allocation11 + $0xe0] sm:$0xff] }
  0xc2   :  { %279 = vmatpush1.bf16.msra.mxu0 %v7400_v16  ;;  %v6507_v1 = vcombine.high %v865_v63, %v869_v0  ;;  %v6506_v2 = vcombine.low %v865_v63, %v869_v0  ;;  %v873_v3 = vld [vmem:[#allocation11 + $0x100] sm:$0xff] }
  0xc3   :  { %727 = vmatprep.subr.bf16.mxu0 %v7404_v17  ;;  %2422 = vmatpush1.bf16.msra.mxu1 %v6490_v58  ;;  %v877_v4 = vld [vmem:[#allocation11 + $0x120] sm:$0xff] }
  0xc4   :  { %2423 = vmatprep.subr.bf16.mxu1 %v6499_v61  ;;  %v6515_v5 = vcombine.high %v873_v3, %v877_v4  ;;  %v6514_v6 = vcombine.low %v873_v3, %v877_v4  ;;  %v881_v7 = vld [vmem:[#allocation11 + $0x140] sm:$0xff]  ;;  %v7455_v4 = vld [vmem:[#allocation8 + $0x2c] ss:$16 sps:$4 sm:$0xff]  }
  0xc5   :  { %297 = vmatmul.mubr.bf16.vlgmr.msra.gmra.mrb[0].mxu0 %v7401_v18  ;;  %v885_v8 = vld [vmem:[#allocation11 + $0x160] sm:$0xff] }
  0xc6   :  { %728 = vmatpush1.bf16.msra.mxu0 %v7402_v19  ;;  %v6523_v9 = vcombine.high %v881_v7, %v885_v8  ;;  %v6522_v10 = vcombine.low %v881_v7, %v885_v8  ;;  %v889_v11 = vld [vmem:[#allocation11 + $0x180] sm:$0xff]  ;;  %v7461_v8 = vld [vmem:[#allocation8 + $0x6c] ss:$16 sps:$4 sm:$0xff]  }
  0xc7   :  { %729 = vmatprep.subr.bf16.mxu0 %v7407_v20  ;;  %2424 = vmatpush1.bf16.msra.mxu1 %v6498_v62  ;;  %v893_v12 = vld [vmem:[#allocation11 + $0x1a0] sm:$0xff] }
  0xc8   :  { %2425 = vmatprep.subr.bf16.mxu1 %v6507_v1  ;;  %v6531_v13 = vcombine.high %v889_v11, %v893_v12  ;;  %v6530_v14 = vcombine.low %v889_v11, %v893_v12  ;;  %v897_v15 = vld [vmem:[#allocation11 + $0x1c0] sm:$0xff]  ;;  %v7467_v12 = vld [vmem:[#allocation8 + $0xac] ss:$16 sps:$4 sm:$0xff]  }
  0xc9   :  { %v901_v16 = vld [vmem:[#allocation11 + $0x1e0] sm:$0xff] }
  0xca   :  { %730 = vmatpush1.bf16.msra.mxu0 %v7405_v21  ;;  %v6539_v17 = vcombine.high %v897_v15, %v901_v16  ;;  %v6538_v18 = vcombine.low %v897_v15, %v901_v16  ;;  %v905_v19 = vld [vmem:[#allocation11 + $0x200] sm:$0xff]  ;;  %v7473_v16 = vld [vmem:[#allocation8 + $0xec] ss:$16 sps:$4 sm:$0xff]  }
  0xcb   :  { %731 = vmatprep.subr.bf16.mxu0 %v7410_v22  ;;  %2426 = vmatpush1.bf16.msra.mxu1 %v6506_v2  ;;  %v909_v20 = vld [vmem:[#allocation11 + $0x220] sm:$0xff] }
  0xcc   :  { %2427 = vmatprep.subr.bf16.mxu1 %v6515_v5  ;;  %v6547_v21 = vcombine.high %v905_v19, %v909_v20  ;;  %v6546_v22 = vcombine.low %v905_v19, %v909_v20  ;;  %v7450_v3 = vld [vmem:[#allocation8 + $0x8] ss:$16 sps:$4 sm:$0xff]   ;;  %v7479_v20 = vld [vmem:[#allocation8 + $0x12c] ss:$16 sps:$4 sm:$0xff]  }
  0xcd   :  { %v7453_v5 = vld [vmem:[#allocation8 + $0x28] ss:$16 sps:$4 sm:$0xff]  }
  0xce   :  { %732 = vmatpush1.bf16.msra.mxu0 %v7408_v23  ;;  %v913_v23 = vld [vmem:[#allocation11 + $0x240] sm:$0xff] }
  0xcf   :  { %733 = vmatprep.subr.bf16.mxu0 %v7413_v24  ;;  %2428 = vmatpush1.bf16.msra.mxu1 %v6514_v6  ;;  %v917_v24 = vld [vmem:[#allocation11 + $0x260] sm:$0xff]  ;;  %v7458_v6 = vld [vmem:[#allocation8 + $0x4c] ss:$16 sps:$4 sm:$0xff]  }
  0xd0   :  { %2429 = vmatprep.subr.bf16.mxu1 %v6523_v9  ;;  %v7456_v7 = vld [vmem:[#allocation8 + $0x48] ss:$16 sps:$4 sm:$0xff]  }
  0xd1   :  { %v7459_v9 = vld [vmem:[#allocation8 + $0x68] ss:$16 sps:$4 sm:$0xff]  }
  0xd2   :  { %734 = vmatpush1.bf16.msra.mxu0 %v7411_v25  ;;  %v6555_v25 = vcombine.high %v913_v23, %v917_v24  ;;  %v7462_v11 = vld [vmem:[#allocation8 + $0x88] ss:$16 sps:$4 sm:$0xff]  }
  0xd3   :  { %735 = vmatprep.subr.bf16.mxu0 %v7416_v26  ;;  %2430 = vmatpush1.bf16.msra.mxu1 %v6522_v10  ;;  %v6554_v26 = vcombine.low %v913_v23, %v917_v24  ;;  %v7464_v10 = vld [vmem:[#allocation8 + $0x8c] ss:$16 sps:$4 sm:$0xff]   ;;  %v7468_v15 = vld [vmem:[#allocation8 + $0xc8] ss:$16 sps:$4 sm:$0xff]  }
  0xd4   :  { %2431 = vmatprep.subr.bf16.mxu1 %v6531_v13  ;;  %v7465_v13 = vld [vmem:[#allocation8 + $0xa8] ss:$16 sps:$4 sm:$0xff]   ;;  %v7485_v24 = vld [vmem:[#allocation8 + $0x16c] ss:$16 sps:$4 sm:$0xff]  }
  0xd5   :  { %v7474_v19 = vld [vmem:[#allocation8 + $0x108] ss:$16 sps:$4 sm:$0xff]  }
  0xd6   :  { %736 = vmatpush1.bf16.msra.mxu0 %v7414_v27  ;;  %v168_v27 = vlaneseq  ;;  %v7480_v23 = vld [vmem:[#allocation8 + $0x148] ss:$16 sps:$4 sm:$0xff]  }
  0xd7   :  { %737 = vmatprep.subr.bf16.mxu0 %v7419_v28  ;;  %2432 = vmatpush1.bf16.msra.mxu1 %v6530_v14  ;;  %v921_v28 = vld [vmem:[#allocation11 + $0x280] sm:$0xff]  ;;  %v7470_v14 = vld [vmem:[#allocation8 + $0xcc] ss:$16 sps:$4 sm:$0xff]  }
  0xd8   :  { %2433 = vmatprep.subr.bf16.mxu1 %v6539_v17  ;;  %v7471_v17 = vld [vmem:[#allocation8 + $0xe8] ss:$16 sps:$4 sm:$0xff]  }
  0xda   :  { %738 = vmatpush1.bf16.msra.mxu0 %v7417_v29  ;;  %v925_v29 = vld [vmem:[#allocation11 + $0x2a0] sm:$0xff] }
  0xdb   :  { %739 = vmatprep.subr.bf16.mxu0 %v7422_v30  ;;  %2434 = vmatpush1.bf16.msra.mxu1 %v6538_v18  ;;  %v6563_v30 = vcombine.high %v921_v28, %v925_v29  ;;  %v7476_v18 = vld [vmem:[#allocation8 + $0x10c] ss:$16 sps:$4 sm:$0xff]  }
  0xdc   :  { %2435 = vmatprep.subr.bf16.mxu1 %v6547_v21  ;;  %v7477_v21 = vld [vmem:[#allocation8 + $0x128] ss:$16 sps:$4 sm:$0xff]  }
  0xde   :  { %740 = vmatpush1.bf16.msra.mxu0 %v7420_v31  ;;  %v6562_v31 = vcombine.low %v921_v28, %v925_v29  ;;  %v7491_v28 = vld [vmem:[#allocation8 + $0x1ac] ss:$16 sps:$4 sm:$0xff]   ;;  %v7489_v29 = vld [vmem:[#allocation8 + $0x1a8] ss:$16 sps:$4 sm:$0xff]  }
  0xdf   :  { %741 = vmatprep.subr.bf16.mxu0 %v7425_v32  ;;  %2436 = vmatpush1.bf16.msra.mxu1 %v6546_v22  ;;  %v8579_v32 = vshrl.u32 %v168_v27, 7  ;;  %v7482_v22 = vld [vmem:[#allocation8 + $0x14c] ss:$16 sps:$4 sm:$0xff]   ;;  %v7486_v27 = vld [vmem:[#allocation8 + $0x188] ss:$16 sps:$4 sm:$0xff]  }
  0xe0   :  { %2437 = vmatprep.subr.bf16.mxu1 %v6555_v25  ;;  %v7483_v25 = vld [vmem:[#allocation8 + $0x168] ss:$16 sps:$4 sm:$0xff]  }
  0xe2   :  { %742 = vmatpush1.bf16.msra.mxu0 %v7423_v33  ;;  %v929_v33 = vld [vmem:[#allocation11 + $0x2c0] sm:$0xff] }
  0xe3   :  { %743 = vmatprep.subr.bf16.mxu0 %v7428_v34  ;;  %2438 = vmatpush1.bf16.msra.mxu1 %v6554_v26  ;;  %v933_v34 = vld [vmem:[#allocation11 + $0x2e0] sm:$0xff]  ;;  %v7488_v26 = vld [vmem:[#allocation8 + $0x18c] ss:$16 sps:$4 sm:$0xff]  }
  0xe4   :  { %2439 = vmatprep.subr.bf16.mxu1 %v6563_v30  ;;  %v7494_v30 = vld [vmem:[#allocation8 + $0x1cc] ss:$16 sps:$4 sm:$0xff]  }
  0xe6   :  { %744 = vmatpush1.bf16.msra.mxu0 %v7426_v35  ;;  %v6571_v35 = vcombine.high %v929_v33, %v933_v34 }
  0xe7   :  { %745 = vmatprep.subr.bf16.mxu0 %v7431_v36  ;;  %2440 = vmatpush1.bf16.msra.mxu1 %v6562_v31  ;;  %v6570_v36 = vcombine.low %v929_v33, %v933_v34  ;;  %v7492_v31 = vld [vmem:[#allocation8 + $0x1c8] ss:$16 sps:$4 sm:$0xff]   ;;  %v7497_v33 = vld [vmem:[#allocation8 + $0x1ec] ss:$16 sps:$4 sm:$0xff]  }
  0xe8   :  { %2441 = vmatprep.subr.bf16.mxu1 %v6571_v35  ;;  %v842_v34 = vld [vmem:[#allocation11 + $0x8] sm:$0xff] }
  0xe9   :  { %v846_v35 = vld [vmem:[#allocation11 + $0x28] sm:$0xff] }
  0xea   :  { %746 = vmatpush1.bf16.msra.mxu0 %v7429_v37  ;;  %v8582_v37 = vsub.s32 0, %v8579_v32 }
  0xeb   :  { %747 = vmatprep.subr.bf16.mxu0 %v7434_v38  ;;  %v937_v38 = vld [vmem:[#allocation11 + $0x300] sm:$0xff]  ;;  %2442 = vmatpush1.bf16.msra.mxu1 %v6570_v36 }
  0xec   :  { %v7495_v36 = vld [vmem:[#allocation8 + $0x1e8] ss:$16 sps:$4 sm:$0xff]  }
  0xee   :  { %748 = vmatpush1.bf16.msra.mxu0 %v7432_v39  ;;  %v941_v39 = vld [vmem:[#allocation11 + $0x320] sm:$0xff] }
  0xef   :  { %749 = vmatprep.subr.bf16.mxu0 %v7437_v40  ;;  %v166_v40 = vld [vmem:[#allocation7] sm:$0x3] }
  0xf2   :  { %750 = vmatpush1.bf16.msra.mxu0 %v7435_v41  ;;  %v8585_v41 = vsub.s32 1, %v8579_v32 }
  0xf3   :  { %751 = vmatprep.subr.bf16.mxu0 %v7440_v42  ;;  %v6579_v42 = vcombine.high %v937_v38, %v941_v39 }
  0xf5   :  { %2443 = vmatprep.subr.bf16.mxu1 %v6579_v42  ;;  %v6484_v42 = vcombine.low %v842_v34, %v846_v35 }
  0xf6   :  { %752 = vmatpush1.bf16.msra.mxu0 %v7438_v43  ;;  %v6578_v43 = vcombine.low %v937_v38, %v941_v39  ;;  %v6485_v38 = vcombine.high %v842_v34, %v846_v35  ;;  %v850_v39 = vld [vmem:[#allocation11 + $0x48] sm:$0xff] }
  0xf7   :  { %753 = vmatprep.subr.bf16.mxu0 %v7443_v44  ;;  %v171_v44 = vrot.slane %v166_v40, %v8582_v37  ;;  %v934_v34 = vld [vmem:[#allocation11 + $0x2e8] sm:$0xff] }
  0xf8   :  { %2444 = vmatpush1.bf16.msra.mxu1 %v6578_v43 }
  0xfa   :  { %754 = vmatpush1.bf16.msra.mxu0 %v7441_v45  ;;  %v8588_v45 = vld [vmem:[#allocation11 + $0x340] sm:$0xff] }
  0xfb   :  { %755 = vmatprep.subr.bf16.mxu0 %v7446_v46  ;;  %v8590_v46 = vld [vmem:[#allocation11 + $0x360] sm:$0xff] }
  0xfe   :  { %756 = vmatpush1.bf16.msra.mxu0 %v7444_v47  ;;  %v175_v47 = vrot.slane %v166_v40, %v8585_v41  ;;  %v854_v40 = vld [vmem:[#allocation11 + $0x68] sm:$0xff] }
  0xff   :  { %757 = vmatprep.subr.bf16.mxu0 %v7449_v48  ;;  %v6587_v48 = vcombine.high %v8588_v45, %v8590_v46  ;;  %v6493_v43 = vcombine.high %v850_v39, %v854_v40 }
 0x101   :  { %2445 = vmatprep.subr.bf16.mxu1 %v6587_v48  ;;  %v6492_v48 = vcombine.low %v850_v39, %v854_v40  ;;  %v942_v39 = vld [vmem:[#allocation11 + $0x328] sm:$0xff] }
 0x102   :  { %758 = vmatpush1.bf16.msra.mxu0 %v7447_v49 }
 0x103   :  { %770 = vmatprep.subr.bf16.mxu0 %v7452_v50 }
 0x198   :  { %v298_v49 = vpop.f32.mrb[0].mxu0 }
 0x199   :  { %v299_v50 = vadd.f32 %v298_v49, %v171_v44  ;;  %v300_v51 = vpop.f32.mrb[1].mxu0 }
 0x19a   :  { %v301_v52 = vadd.f32 %v300_v51, %v175_v47  ;;  %v302_v53 = vpop.f32.mrb[2].mxu0  ;;  %v870_v51 = vld [vmem:[#allocation11 + $0xe8] sm:$0xff] }
 0x19b   :  { %v311_v54 = vmul.f32 0.2, %v299_v50  ;;  %v303_v55 = vadd.f32 %v302_v53, %v171_v44  ;;  %v304_v56 = vpop.f32.mrb[3].mxu0  ;;  %vm307_vm0 = vcmp.gt.f32.partialorder %v299_v50, 0.0  ;;  %v858_v44 = vld [vmem:[#allocation11 + $0x88] sm:$0xff] }
 0x19c   :  { %v312_v57 = vmul.f32 0.2, %v301_v52  ;;  %v305_v58 = vadd.f32 %v304_v56, %v175_v47  ;;  %vm308_vm1 = vcmp.gt.f32.partialorder %v301_v52, 0.0  ;;  %v862_v47 = vld [vmem:[#allocation11 + $0xa8] sm:$0xff] }
 0x19d   :  { %vm309_vm2 = vcmp.gt.f32.partialorder %v303_v55, 0.0  ;;  %v313_v59 = vmul.f32 0.2, %v303_v55  ;;  %v315_v61 = vsel %vm307_vm0, %v299_v50, %v311_v54  ;;  %v6501_v49 = vcombine.high %v858_v44, %v862_v47  ;;  %v866_v50 = vld [vmem:[#allocation11 + $0xc8] sm:$0xff] }
 0x19e   :  { %vm310_vm3 = vcmp.gt.f32.partialorder %v305_v58, 0.0  ;;  %v314_v60 = vmul.f32 0.2, %v305_v58  ;;  %v316_v0 = vsel %vm308_vm1, %v301_v52, %v312_v57  ;;  %v6500_v52 = vcombine.low %v858_v44, %v862_v47  ;;  %v874_v54 = vld [vmem:[#allocation11 + $0x108] sm:$0xff] }
 0x19f   :  { %v317_v62 = vsel %vm309_vm2, %v303_v55, %v313_v59  ;;  %v6509_v53 = vcombine.high %v866_v50, %v870_v51  ;;  %v878_v55 = vld [vmem:[#allocation11 + $0x128] sm:$0xff]  ;;  %v6508_v56 = vcombine.low %v866_v50, %v870_v51 }
 0x1a0   :  { %v8595_v63 = vpack.c.bf16 %v317_v62, %v315_v61  ;;  %v318_v1 = vsel %vm310_vm3, %v305_v58, %v314_v60  ;;  %v6517_v57 = vcombine.high %v874_v54, %v878_v55  ;;  %v882_v58 = vld [vmem:[#allocation11 + $0x148] sm:$0xff]  ;;  %v6516_v60 = vcombine.low %v874_v54, %v878_v55 }
 0x1a1   :  { %v320_v2 = vpack.c.bf16 %v318_v1, %v316_v0  ;;  %v886_v59 = vld [vmem:[#allocation11 + $0x168] sm:$0xff] }
 0x1a2   :  { %v6525_v61 = vcombine.high %v882_v58, %v886_v59  ;;  %v890_v62 = vld [vmem:[#allocation11 + $0x188] sm:$0xff]  ;;  %v6524_v0 = vcombine.low %v882_v58, %v886_v59  ;;  %v8617_v59 = vld [vmem:[#allocation10] sm:$0xf] }
 0x1a3   :  { %759 = vmatprep.mubr.bf16.mxu0 %v320_v2  ;;  %v950_v44 = vld [vmem:[#allocation11 + $0x368] sm:$0xff] }
 0x1a4   :  { %760 = vmatmul.mubr.bf16.vlgmr.msra.gmra.mrb[4].mxu0 %v8595_v63  ;;  %v958_v50 = vld [vmem:[#allocation11 + $0x3a8] sm:$0xff] }
 0x1a5   :  { %771 = vmatpush1.bf16.msra.mxu0 %v7450_v3  ;;  %802 = vmatprep.mubr.bf16.mxu0 %v320_v2  ;;  %v6586_v2 = vcombine.low %v8588_v45, %v8590_v46  ;;  %v898_v3 = vld [vmem:[#allocation11 + $0x1c8] sm:$0xff] }
 0x1a6   :  { %772 = vmatprep.subr.bf16.mxu0 %v7455_v4  ;;  %v902_v4 = vld [vmem:[#allocation11 + $0x1e8] sm:$0xff] }
 0x1a7   :  { %2446 = vmatpush1.bf16.msra.mxu1 %v6586_v2  ;;  %v966_v54 = vld [vmem:[#allocation11 + $0x3e8] sm:$0xff] }
 0x1a9   :  { %773 = vmatpush1.bf16.msra.mxu0 %v7453_v5  ;;  %v953_v5 = vld [vmem:[#allocation11 + $0x380] sm:$0xff] }
 0x1aa   :  { %774 = vmatprep.subr.bf16.mxu0 %v7458_v6  ;;  %v957_v6 = vld [vmem:[#allocation11 + $0x3a0] sm:$0xff] }
 0x1ad   :  { %775 = vmatpush1.bf16.msra.mxu0 %v7456_v7 }
 0x1ae   :  { %776 = vmatprep.subr.bf16.mxu0 %v7461_v8  ;;  %v6595_v8 = vcombine.high %v953_v5, %v957_v6 }
 0x1b0   :  { %2447 = vmatprep.subr.bf16.mxu1 %v6595_v8 }
 0x1b1   :  { %777 = vmatpush1.bf16.msra.mxu0 %v7459_v9  ;;  %v6541_v9 = vcombine.high %v898_v3, %v902_v4 }
 0x1b2   :  { %778 = vmatprep.subr.bf16.mxu0 %v7464_v10  ;;  %v6594_v10 = vcombine.low %v953_v5, %v957_v6 }
 0x1b4   :  { %2448 = vmatpush1.bf16.msra.mxu1 %v6594_v10  ;;  %v977_v10 = vld [vmem:[#allocation11 + $0x440] sm:$0xff] }
 0x1b5   :  { %779 = vmatpush1.bf16.msra.mxu0 %v7462_v11  ;;  %v906_v11 = vld [vmem:[#allocation11 + $0x208] sm:$0xff] }
 0x1b6   :  { %780 = vmatprep.subr.bf16.mxu0 %v7467_v12  ;;  %v910_v12 = vld [vmem:[#allocation11 + $0x228] sm:$0xff] }
 0x1b7   :  { %v6549_v46 = vcombine.high %v906_v11, %v910_v12 }
 0x1b9   :  { %781 = vmatpush1.bf16.msra.mxu0 %v7465_v13  ;;  %v961_v13 = vld [vmem:[#allocation11 + $0x3c0] sm:$0xff] }
 0x1ba   :  { %782 = vmatprep.subr.bf16.mxu0 %v7470_v14  ;;  %v965_v14 = vld [vmem:[#allocation11 + $0x3e0] sm:$0xff] }
 0x1bb   :  { %v6603_v45 = vcombine.high %v961_v13, %v965_v14 }
 0x1bd   :  { %783 = vmatpush1.bf16.msra.mxu0 %v7468_v15  ;;  %v6540_v15 = vcombine.low %v898_v3, %v902_v4  ;;  %2449 = vmatprep.subr.bf16.mxu1 %v6603_v45 }
 0x1be   :  { %784 = vmatprep.subr.bf16.mxu0 %v7473_v16  ;;  %v6602_v16 = vcombine.low %v961_v13, %v965_v14  ;;  %v981_v13 = vld [vmem:[#allocation11 + $0x460] sm:$0xff]  ;;  %v978_v14 = vld [vmem:[#allocation11 + $0x448] sm:$0xff] }
 0x1c0   :  { %2450 = vmatpush1.bf16.msra.mxu1 %v6602_v16 }
 0x1c1   :  { %785 = vmatpush1.bf16.msra.mxu0 %v7471_v17  ;;  %v914_v17 = vld [vmem:[#allocation11 + $0x248] sm:$0xff] }
 0x1c2   :  { %786 = vmatprep.subr.bf16.mxu0 %v7476_v18  ;;  %v918_v18 = vld [vmem:[#allocation11 + $0x268] sm:$0xff] }
 0x1c5   :  { %787 = vmatpush1.bf16.msra.mxu0 %v7474_v19  ;;  %v8601_v19 = vld [vmem:[#allocation11 + $0x400] sm:$0xff] }
 0x1c6   :  { %788 = vmatprep.subr.bf16.mxu0 %v7479_v20  ;;  %v8603_v20 = vld [vmem:[#allocation11 + $0x420] sm:$0xff] }
 0x1c9   :  { %789 = vmatpush1.bf16.msra.mxu0 %v7477_v21  ;;  %v8605_v21 = vld [vmem:[#allocation11 + $0x408] sm:$0xff] }
 0x1ca   :  { %790 = vmatprep.subr.bf16.mxu0 %v7482_v22  ;;  %v6548_v22 = vcombine.low %v906_v11, %v910_v12 }
 0x1cd   :  { %791 = vmatpush1.bf16.msra.mxu0 %v7480_v23  ;;  %v6611_v23 = vcombine.high %v8601_v19, %v8603_v20 }
 0x1ce   :  { %792 = vmatprep.subr.bf16.mxu0 %v7485_v24  ;;  %v8609_v24 = vld [vmem:[#allocation11 + $0x428] sm:$0xff] }
 0x1cf   :  { %2462 = vmatprep.subr.bf16.mxu1 %v6611_v23  ;;  %v6613_v58 = vcombine.high %v8605_v21, %v8609_v24  ;;  %v985_v23 = vld [vmem:[#allocation11 + $0x480] sm:$0xff] }
 0x1d1   :  { %793 = vmatpush1.bf16.msra.mxu0 %v7483_v25  ;;  %v6557_v25 = vcombine.high %v914_v17, %v918_v18 }
 0x1d2   :  { %794 = vmatprep.subr.bf16.mxu0 %v7488_v26  ;;  %v6610_v26 = vcombine.low %v8601_v19, %v8603_v20 }
 0x1d5   :  { %795 = vmatpush1.bf16.msra.mxu0 %v7486_v27  ;;  %v6612_v27 = vcombine.low %v8605_v21, %v8609_v24  ;;  %v1001_v21 = vld [vmem:[#allocation11 + $0x500] sm:$0xff] }
 0x1d6   :  { %796 = vmatprep.subr.bf16.mxu0 %v7491_v28  ;;  %v922_v28 = vld [vmem:[#allocation11 + $0x288] sm:$0xff]  ;;  %v1005_v24 = vld [vmem:[#allocation11 + $0x520] sm:$0xff] }
 0x1d9   :  { %797 = vmatpush1.bf16.msra.mxu0 %v7489_v29  ;;  %v926_v29 = vld [vmem:[#allocation11 + $0x2a8] sm:$0xff] }
 0x1da   :  { %798 = vmatprep.subr.bf16.mxu0 %v7494_v30  ;;  %v6556_v30 = vcombine.low %v914_v17, %v918_v18  ;;  %v6564_v35 = vcombine.low %v922_v28, %v926_v29  ;;  %v6619_v18 = vcombine.high %v977_v10, %v981_v13 }
 0x1dd   :  { %799 = vmatpush1.bf16.msra.mxu0 %v7492_v31  ;;  %v6565_v31 = vcombine.high %v922_v28, %v926_v29  ;;  %v986_v28 = vld [vmem:[#allocation11 + $0x488] sm:$0xff] }
 0x1de   :  { %800 = vmatprep.subr.bf16.mxu0 %v7497_v33  ;;  %v930_v33 = vld [vmem:[#allocation11 + $0x2c8] sm:$0xff] }
 0x1df   :  { %v6572_v40 = vcombine.low %v930_v33, %v934_v34  ;;  %v990_v29 = vld [vmem:[#allocation11 + $0x4a8] sm:$0xff] }
 0x1e1   :  { %801 = vmatpush1.bf16.msra.mxu0 %v7495_v36  ;;  %v6573_v36 = vcombine.high %v930_v33, %v934_v34  ;;  %v6629_v34 = vcombine.high %v986_v28, %v990_v29 }
 0x1e2   :  { %2505 = vmatprep.subr.bf16.mxu0 %v6485_v38  ;;  %v938_v38 = vld [vmem:[#allocation11 + $0x308] sm:$0xff] }
 0x1e3   :  { %v6580_v47 = vcombine.low %v938_v38, %v942_v39 }
 0x1e4   :  { %803 = vmatmul.mubr.bf16.vlgmr.msra.gmra.mrb[8].mxu0 %v8595_v63  ;;  %v894_v63 = vld [vmem:[#allocation11 + $0x1a8] sm:$0xff] }
 0x1e5   :  { %2506 = vmatpush1.bf16.msra.mxu0 %v6484_v42  ;;  %v6533_v1 = vcombine.high %v890_v62, %v894_v63  ;;  %v6532_v7 = vcombine.low %v890_v62, %v894_v63  ;;  %v6581_v42 = vcombine.high %v938_v38, %v942_v39  ;;  %v994_v38 = vld [vmem:[#allocation11 + $0x4c8] sm:$0xff] }
 0x1e6   :  { %2507 = vmatprep.subr.bf16.mxu0 %v6493_v43  ;;  %v946_v43 = vld [vmem:[#allocation11 + $0x348] sm:$0xff] }
 0x1e7   :  { %v6588_v51 = vcombine.low %v946_v43, %v950_v44  ;;  %v998_v39 = vld [vmem:[#allocation11 + $0x4e8] sm:$0xff] }
 0x1e8   :  { %v6637_v20 = vcombine.high %v994_v38, %v998_v39 }
 0x1e9   :  { %2508 = vmatpush1.bf16.msra.mxu0 %v6492_v48  ;;  %v6589_v48 = vcombine.high %v946_v43, %v950_v44  ;;  %v6636_v44 = vcombine.low %v994_v38, %v998_v39 }
 0x1ea   :  { %2509 = vmatprep.subr.bf16.mxu0 %v6501_v49  ;;  %v954_v49 = vld [vmem:[#allocation11 + $0x388] sm:$0xff] }
 0x1eb   :  { %v6596_v55 = vcombine.low %v954_v49, %v958_v50 }
 0x1ed   :  { %2510 = vmatpush1.bf16.msra.mxu0 %v6500_v52  ;;  %v6597_v52 = vcombine.high %v954_v49, %v958_v50  ;;  %v1009_v49 = vld [vmem:[#allocation11 + $0x540] sm:$0xff] }
 0x1ee   :  { %2511 = vmatprep.subr.bf16.mxu0 %v6509_v53  ;;  %v962_v53 = vld [vmem:[#allocation11 + $0x3c8] sm:$0xff]  ;;  %v1013_v50 = vld [vmem:[#allocation11 + $0x560] sm:$0xff] }
 0x1f1   :  { %2512 = vmatpush1.bf16.msra.mxu0 %v6508_v56  ;;  %v6605_v56 = vcombine.high %v962_v53, %v966_v54 }
 0x1f2   :  { %2513 = vmatprep.subr.bf16.mxu0 %v6517_v57  ;;  %v6604_v57 = vcombine.low %v962_v53, %v966_v54  ;;  %v6642_v53 = vcombine.low %v1001_v21, %v1005_v24 }
 0x1f5   :  { %2514 = vmatpush1.bf16.msra.mxu0 %v6516_v60  ;;  %v390_v60 = vrot.slane %v8617_v59, %v8582_v37 }
 0x1f6   :  { %2515 = vmatprep.subr.bf16.mxu0 %v6525_v61  ;;  %v394_v61 = vrot.slane %v8617_v59, %v8585_v41 }
 0x1f9   :  { %2516 = vmatpush1.bf16.msra.mxu0 %v6524_v0 }
 0x1fa   :  { %2517 = vmatprep.subr.bf16.mxu0 %v6533_v1 }
 0x1fd   :  { %2518 = vmatpush1.bf16.msra.mxu0 %v6532_v7 }
 0x1fe   :  { %2519 = vmatprep.subr.bf16.mxu0 %v6541_v9 }
 0x201   :  { %2520 = vmatpush1.bf16.msra.mxu0 %v6540_v15  ;;  %v982_v15 = vld [vmem:[#allocation11 + $0x468] sm:$0xff] }
 0x202   :  { %2521 = vmatprep.subr.bf16.mxu0 %v6549_v46 }
 0x205   :  { %2522 = vmatpush1.bf16.msra.mxu0 %v6548_v22  ;;  %v6621_v22 = vcombine.high %v978_v14, %v982_v15 }
 0x206   :  { %2523 = vmatprep.subr.bf16.mxu0 %v6557_v25  ;;  %v989_v25 = vld [vmem:[#allocation11 + $0x4a0] sm:$0xff] }
 0x207   :  { %v6627_v33 = vcombine.high %v985_v23, %v989_v25 }
 0x209   :  { %2524 = vmatpush1.bf16.msra.mxu0 %v6556_v30  ;;  %v6618_v30 = vcombine.low %v977_v10, %v981_v13  ;;  %v1033_v10 = vld [vmem:[#allocation11 + $0x600] sm:$0xff]  ;;  %v1038_v13 = vld [vmem:[#allocation11 + $0x628] sm:$0xff] }
 0x20a   :  { %2525 = vmatprep.subr.bf16.mxu0 %v6565_v31  ;;  %v6620_v31 = vcombine.low %v978_v14, %v982_v15 }
 0x20d   :  { %2526 = vmatpush1.bf16.msra.mxu0 %v6564_v35  ;;  %v993_v35 = vld [vmem:[#allocation11 + $0x4c0] sm:$0xff] }
 0x20e   :  { %2527 = vmatprep.subr.bf16.mxu0 %v6573_v36  ;;  %v997_v36 = vld [vmem:[#allocation11 + $0x4e0] sm:$0xff] }
 0x20f   :  { %v6635_v19 = vcombine.high %v993_v35, %v997_v36  ;;  %v6634_v43 = vcombine.low %v993_v35, %v997_v36  ;;  %v1050_v35 = vld [vmem:[#allocation11 + $0x688] sm:$0xff] }
 0x210   :  { %v1054_v36 = vld [vmem:[#allocation11 + $0x6a8] sm:$0xff] }
 0x211   :  { %2528 = vmatpush1.bf16.msra.mxu0 %v6572_v40  ;;  %v6626_v40 = vcombine.low %v985_v23, %v989_v25  ;;  %v1042_v23 = vld [vmem:[#allocation11 + $0x648] sm:$0xff] }
 0x212   :  { %2529 = vmatprep.subr.bf16.mxu0 %v6581_v42  ;;  %v6628_v42 = vcombine.low %v986_v28, %v990_v29  ;;  %v1046_v25 = vld [vmem:[#allocation11 + $0x668] sm:$0xff] }
 0x213   :  { %v6684_v39 = vcombine.low %v1042_v23, %v1046_v25 }
 0x215   :  { %2530 = vmatpush1.bf16.msra.mxu0 %v6580_v47  ;;  %v6643_v47 = vcombine.high %v1001_v21, %v1005_v24  ;;  %v1058_v21 = vld [vmem:[#allocation11 + $0x6c8] sm:$0xff] }
 0x216   :  { %2531 = vmatprep.subr.bf16.mxu0 %v6589_v48  ;;  %v1062_v24 = vld [vmem:[#allocation11 + $0x6e8] sm:$0xff] }
 0x219   :  { %2532 = vmatpush1.bf16.msra.mxu0 %v6588_v51  ;;  %v1010_v51 = vld [vmem:[#allocation11 + $0x548] sm:$0xff] }
 0x21a   :  { %2533 = vmatprep.subr.bf16.mxu0 %v6597_v52  ;;  %v1014_v52 = vld [vmem:[#allocation11 + $0x568] sm:$0xff] }
 0x21d   :  { %2534 = vmatpush1.bf16.msra.mxu0 %v6596_v55  ;;  %v6651_v55 = vcombine.high %v1009_v49, %v1013_v50 }
 0x21e   :  { %2535 = vmatprep.subr.bf16.mxu0 %v6605_v56  ;;  %v6653_v56 = vcombine.high %v1010_v51, %v1014_v52 }
 0x221   :  { %2536 = vmatpush1.bf16.msra.mxu0 %v6604_v57  ;;  %v1017_v57 = vld [vmem:[#allocation11 + $0x580] sm:$0xff] }
 0x222   :  { %2548 = vmatprep.subr.bf16.mxu0 %v6613_v58  ;;  %v1021_v58 = vld [vmem:[#allocation11 + $0x5a0] sm:$0xff] }
 0x277   :  { %v761_v62 = vpop.f32.mrb[4].mxu0 }
 0x278   :  { %v762_v63 = vadd.f32 %v761_v62, %v390_v60  ;;  %v763_v0 = vpop.f32.mrb[5].mxu0  ;;  %v6650_v62 = vcombine.low %v1009_v49, %v1013_v50  ;;  %v1066_v49 = vld [vmem:[#allocation11 + $0x708] sm:$0xff] }
 0x279   :  { %v764_v1 = vadd.f32 %v763_v0, %v394_v61  ;;  %v765_v2 = vpop.f32.mrb[6].mxu0  ;;  %v6659_v0 = vcombine.high %v1017_v57, %v1021_v58  ;;  %v1070_v50 = vld [vmem:[#allocation11 + $0x728] sm:$0xff] }
 0x27a   :  { %v821_v3 = vmul.f32 0.2, %v762_v63  ;;  %v766_v4 = vadd.f32 %v765_v2, %v390_v60  ;;  %v767_v5 = vpop.f32.mrb[7].mxu0  ;;  %vm813_vm4 = vcmp.gt.f32.partialorder %v762_v63, 0.0  ;;  %v1018_v60 = vld [vmem:[#allocation11 + $0x588] sm:$0xff]  ;;  %v1025_v2 = vld [vmem:[#allocation11 + $0x5c0] sm:$0xff] }
 0x27b   :  { %v822_v6 = vmul.f32 0.2, %v764_v1  ;;  %v768_v7 = vadd.f32 %v767_v5, %v394_v61  ;;  %vm814_vm5 = vcmp.gt.f32.partialorder %v764_v1, 0.0  ;;  %v1022_v61 = vld [vmem:[#allocation11 + $0x5a8] sm:$0xff] }
 0x27c   :  { %vm817_vm6 = vcmp.gt.f32.partialorder %v766_v4, 0.0  ;;  %v825_v8 = vmul.f32 0.2, %v766_v4  ;;  %v829_v11 = vsel %vm813_vm4, %v762_v63, %v821_v3  ;;  %v6652_v63 = vcombine.low %v1010_v51, %v1014_v52  ;;  %v1029_v3 = vld [vmem:[#allocation11 + $0x5e0] sm:$0xff]  ;;  %v1030_v5 = vld [vmem:[#allocation11 + $0x5e8] sm:$0xff] }
 0x27d   :  { %vm818_vm7 = vcmp.gt.f32.partialorder %v768_v7, 0.0  ;;  %v826_v9 = vmul.f32 0.2, %v768_v7  ;;  %v830_v45 = vsel %vm814_vm5, %v764_v1, %v822_v6  ;;  %v6661_v1 = vcombine.high %v1018_v60, %v1022_v61 }
 0x27e   :  { %v833_v12 = vsel %vm817_vm6, %v766_v4, %v825_v8  ;;  %v1026_v4 = vld [vmem:[#allocation11 + $0x5c8] sm:$0xff]  ;;  %v6658_v6 = vcombine.low %v1017_v57, %v1021_v58  ;;  %v6667_v8 = vcombine.high %v1025_v2, %v1029_v3  ;;  %v6666_v14 = vcombine.low %v1025_v2, %v1029_v3  ;;  %v1081_v2 = vld [vmem:[#allocation11 + $0x780] sm:$0xff] }
 0x27f   :  { %v8623_v46 = vpack.c.bf16 %v833_v12, %v829_v11  ;;  %v834_v16 = vsel %vm818_vm7, %v768_v7, %v826_v9  ;;  %v6660_v7 = vcombine.low %v1018_v60, %v1022_v61  ;;  %v6669_v9 = vcombine.high %v1026_v4, %v1030_v5  ;;  %v1037_v11 = vld [vmem:[#allocation11 + $0x620] sm:$0xff]  ;;  %v1034_v12 = vld [vmem:[#allocation11 + $0x608] sm:$0xff] }
 0x280   :  { %v8625_v17 = vpack.c.bf16 %v834_v16, %v830_v45  ;;  %v6668_v15 = vcombine.low %v1026_v4, %v1030_v5  ;;  %v6675_v45 = vcombine.high %v1033_v10, %v1037_v11  ;;  %v6677_v16 = vcombine.high %v1034_v12, %v1038_v13  ;;  %v1074_v57 = vld [vmem:[#allocation11 + $0x748] sm:$0xff]  ;;  %v1085_v3 = vld [vmem:[#allocation11 + $0x7a0] sm:$0xff] }
 0x281   :  { %v6674_v28 = vcombine.low %v1033_v10, %v1037_v11  ;;  %v6676_v29 = vcombine.low %v1034_v12, %v1038_v13  ;;  %v6700_v52 = vcombine.low %v1058_v21, %v1062_v24  ;;  %v1078_v58 = vld [vmem:[#allocation11 + $0x768] sm:$0xff]  ;;  %v6708_v61 = vcombine.low %v1066_v49, %v1070_v50  ;;  %v1089_v12 = vld [vmem:[#allocation11 + $0x7c0] sm:$0xff] }
 0x282   :  { %2451 = vmatprep.mubr.bf16.mxu1 %v8625_v17  ;;  %2537 = vmatprep.mubr.bf16.mxu0 %v8625_v17  ;;  %v1082_v4 = vld [vmem:[#allocation11 + $0x788] sm:$0xff]  ;;  %v6723_v10 = vcombine.high %v1081_v2, %v1085_v3  ;;  %v1093_v13 = vld [vmem:[#allocation11 + $0x7e0] sm:$0xff] }
 0x283   :  { %2452 = vmatmul.mubr.bf16.vlgmr.msra.gmra.mrb[0].mxu1 %v8623_v46  ;;  %2538 = vmatmul.mubr.bf16.vlgmr.msra.gmra.mrb[12].mxu0 %v8623_v46  ;;  %v1086_v5 = vld [vmem:[#allocation11 + $0x7a8] sm:$0xff] }
 0x284   :  { %2463 = vmatpush1.bf16.msra.mxu1 %v6610_v26  ;;  %2549 = vmatpush1.bf16.msra.mxu0 %v6612_v27  ;;  %v1002_v26 = vld [vmem:[#allocation11 + $0x508] sm:$0xff]  ;;  %v6725_v11 = vcombine.high %v1082_v4, %v1086_v5 }
 0x285   :  { %2464 = vmatprep.subr.bf16.mxu1 %v6619_v18  ;;  %2550 = vmatprep.subr.bf16.mxu0 %v6621_v22  ;;  %v1006_v27 = vld [vmem:[#allocation11 + $0x528] sm:$0xff]  ;;  %v1041_v18 = vld [vmem:[#allocation11 + $0x640] sm:$0xff] }
 0x286   :  { %v6645_v48 = vcombine.high %v1002_v26, %v1006_v27  ;;  %v6644_v54 = vcombine.low %v1002_v26, %v1006_v27  ;;  %v1045_v22 = vld [vmem:[#allocation11 + $0x660] sm:$0xff]  ;;  %v6692_v27 = vcombine.low %v1050_v35, %v1054_v36 }
 0x287   :  { %v6682_v38 = vcombine.low %v1041_v18, %v1045_v22 }
 0x288   :  { %2465 = vmatpush1.bf16.msra.mxu1 %v6618_v30  ;;  %2551 = vmatpush1.bf16.msra.mxu0 %v6620_v31  ;;  %v6683_v30 = vcombine.high %v1041_v18, %v1045_v22  ;;  %v6685_v31 = vcombine.high %v1042_v23, %v1046_v25  ;;  %v6722_v22 = vcombine.low %v1081_v2, %v1085_v3 }
 0x289   :  { %2466 = vmatprep.subr.bf16.mxu1 %v6627_v33  ;;  %2552 = vmatprep.subr.bf16.mxu0 %v6629_v34  ;;  %v1049_v33 = vld [vmem:[#allocation11 + $0x680] sm:$0xff]  ;;  %v6724_v23 = vcombine.low %v1082_v4, %v1086_v5  ;;  %v867_v5 = vld [vmem:[#allocation11 + $0xd0] sm:$0xff] }
 0x28a   :  { %v1053_v34 = vld [vmem:[#allocation11 + $0x6a0] sm:$0xff] }
 0x28b   :  { %v6690_v26 = vcombine.low %v1049_v33, %v1053_v34 }
 0x28c   :  { %2467 = vmatpush1.bf16.msra.mxu1 %v6626_v40  ;;  %2553 = vmatpush1.bf16.msra.mxu0 %v6628_v42  ;;  %v6691_v40 = vcombine.high %v1049_v33, %v1053_v34  ;;  %v6693_v42 = vcombine.high %v1050_v35, %v1054_v36  ;;  %v847_v35 = vld [vmem:[#allocation11 + $0x30] sm:$0xff]  ;;  %v844_v36 = vld [vmem:[#allocation11 + $0x18] sm:$0xff] }
 0x28d   :  { %2468 = vmatprep.subr.bf16.mxu1 %v6635_v19  ;;  %2554 = vmatprep.subr.bf16.mxu0 %v6637_v20  ;;  %v1057_v19 = vld [vmem:[#allocation11 + $0x6c0] sm:$0xff] }
 0x28e   :  { %v1061_v20 = vld [vmem:[#allocation11 + $0x6e0] sm:$0xff] }
 0x28f   :  { %v6698_v51 = vcombine.low %v1057_v19, %v1061_v20 }
 0x290   :  { %2469 = vmatpush1.bf16.msra.mxu1 %v6634_v43  ;;  %2555 = vmatpush1.bf16.msra.mxu0 %v6636_v44  ;;  %v6699_v43 = vcombine.high %v1057_v19, %v1061_v20  ;;  %v6701_v44 = vcombine.high %v1058_v21, %v1062_v24 }
 0x291   :  { %2470 = vmatprep.subr.bf16.mxu1 %v6643_v47  ;;  %2556 = vmatprep.subr.bf16.mxu0 %v6645_v48  ;;  %v1065_v47 = vld [vmem:[#allocation11 + $0x700] sm:$0xff] }
 0x292   :  { %v1069_v48 = vld [vmem:[#allocation11 + $0x720] sm:$0xff] }
 0x293   :  { %v6706_v60 = vcombine.low %v1065_v47, %v1069_v48 }
 0x294   :  { %2471 = vmatpush1.bf16.msra.mxu1 %v6642_v53  ;;  %2557 = vmatpush1.bf16.msra.mxu0 %v6644_v54  ;;  %v6707_v53 = vcombine.high %v1065_v47, %v1069_v48  ;;  %v6709_v54 = vcombine.high %v1066_v49, %v1070_v50  ;;  %v855_v50 = vld [vmem:[#allocation11 + $0x70] sm:$0xff] }
 0x295   :  { %2472 = vmatprep.subr.bf16.mxu1 %v6651_v55  ;;  %2558 = vmatprep.subr.bf16.mxu0 %v6653_v56  ;;  %v1073_v55 = vld [vmem:[#allocation11 + $0x740] sm:$0xff] }
 0x296   :  { %v1077_v56 = vld [vmem:[#allocation11 + $0x760] sm:$0xff] }
 0x298   :  { %2473 = vmatpush1.bf16.msra.mxu1 %v6650_v62  ;;  %2559 = vmatpush1.bf16.msra.mxu0 %v6652_v63  ;;  %v8638_v62 = vsub.s32 2, %v8579_v32  ;;  %v6715_v63 = vcombine.high %v1073_v55, %v1077_v56 }
 0x299   :  { %2474 = vmatprep.subr.bf16.mxu1 %v6659_v0  ;;  %2560 = vmatprep.subr.bf16.mxu0 %v6661_v1  ;;  %v6717_v0 = vcombine.high %v1074_v57, %v1078_v58  ;;  %v8641_v1 = vsub.s32 3, %v8579_v32 }
 0x29c   :  { %2475 = vmatpush1.bf16.msra.mxu1 %v6658_v6  ;;  %2561 = vmatpush1.bf16.msra.mxu0 %v6660_v7  ;;  %v398_v6 = vrot.slane %v8617_v59, %v8638_v62  ;;  %v6714_v7 = vcombine.low %v1073_v55, %v1077_v56 }
 0x29d   :  { %2476 = vmatprep.subr.bf16.mxu1 %v6667_v8  ;;  %2562 = vmatprep.subr.bf16.mxu0 %v6669_v9  ;;  %v6716_v8 = vcombine.low %v1074_v57, %v1078_v58  ;;  %v402_v9 = vrot.slane %v8617_v59, %v8641_v1  ;;  %v843_v59 = vld [vmem:[#allocation11 + $0x10] sm:$0xff] }
 0x29e   :  { %v6487_v24 = vcombine.high %v843_v59, %v847_v35  ;;  %v859_v58 = vld [vmem:[#allocation11 + $0x90] sm:$0xff] }
 0x2a0   :  { %2477 = vmatpush1.bf16.msra.mxu1 %v6666_v14  ;;  %2563 = vmatpush1.bf16.msra.mxu0 %v6668_v15  ;;  %v1090_v14 = vld [vmem:[#allocation11 + $0x7c8] sm:$0xff] }
 0x2a1   :  { %2478 = vmatprep.subr.bf16.mxu1 %v6675_v45  ;;  %2564 = vmatprep.subr.bf16.mxu0 %v6677_v16  ;;  %v1094_v15 = vld [vmem:[#allocation11 + $0x7e8] sm:$0xff] }
 0x2a2   :  { %v6732_v20 = vcombine.low %v1090_v14, %v1094_v15 }
 0x2a4   :  { %2479 = vmatpush1.bf16.msra.mxu1 %v6674_v28  ;;  %2565 = vmatpush1.bf16.msra.mxu0 %v6676_v29  ;;  %v6731_v29 = vcombine.high %v1089_v12, %v1093_v13 }
 0x2a5   :  { %2480 = vmatprep.subr.bf16.mxu1 %v6683_v30  ;;  %2566 = vmatprep.subr.bf16.mxu0 %v6685_v31  ;;  %v6733_v30 = vcombine.high %v1090_v14, %v1094_v15  ;;  %v879_v14 = vld [vmem:[#allocation11 + $0x130] sm:$0xff]  ;;  %v880_v15 = vld [vmem:[#allocation11 + $0x138] sm:$0xff] }
 0x2a8   :  { %2481 = vmatpush1.bf16.msra.mxu1 %v6682_v38  ;;  %2567 = vmatpush1.bf16.msra.mxu0 %v6684_v39  ;;  %v848_v38 = vld [vmem:[#allocation11 + $0x38] sm:$0xff] }
 0x2a9   :  { %2482 = vmatprep.subr.bf16.mxu1 %v6691_v40  ;;  %2568 = vmatprep.subr.bf16.mxu0 %v6693_v42  ;;  %v6730_v42 = vcombine.low %v1089_v12, %v1093_v13  ;;  %v6488_v55 = vcombine.low %v844_v36, %v848_v38  ;;  %v875_v13 = vld [vmem:[#allocation11 + $0x110] sm:$0xff] }
 0x2ac   :  { %2483 = vmatpush1.bf16.msra.mxu1 %v6690_v26  ;;  %2569 = vmatpush1.bf16.msra.mxu0 %v6692_v27  ;;  %v6489_v26 = vcombine.high %v844_v36, %v848_v38  ;;  %v892_v36 = vld [vmem:[#allocation11 + $0x198] sm:$0xff] }
 0x2ad   :  { %2484 = vmatprep.subr.bf16.mxu1 %v6699_v43  ;;  %2570 = vmatprep.subr.bf16.mxu0 %v6701_v44  ;;  %v851_v44 = vld [vmem:[#allocation11 + $0x50] sm:$0xff]  ;;  %v896_v38 = vld [vmem:[#allocation11 + $0x1b8] sm:$0xff] }
 0x2ae   :  { %v6495_v56 = vcombine.high %v851_v44, %v855_v50 }
 0x2b0   :  { %2485 = vmatpush1.bf16.msra.mxu1 %v6698_v51  ;;  %2571 = vmatpush1.bf16.msra.mxu0 %v6700_v52  ;;  %v852_v51 = vld [vmem:[#allocation11 + $0x58] sm:$0xff] }
 0x2b1   :  { %2486 = vmatprep.subr.bf16.mxu1 %v6707_v53  ;;  %2572 = vmatprep.subr.bf16.mxu0 %v6709_v54  ;;  %v856_v52 = vld [vmem:[#allocation11 + $0x78] sm:$0xff]  ;;  %v6486_v54 = vcombine.low %v843_v59, %v847_v35  ;;  %v895_v35 = vld [vmem:[#allocation11 + $0x1b0] sm:$0xff] }
 0x2b2   :  { %v6497_v57 = vcombine.high %v852_v51, %v856_v52  ;;  %v6496_v2 = vcombine.low %v852_v51, %v856_v52  ;;  %v908_v51 = vld [vmem:[#allocation11 + $0x218] sm:$0xff] }
 0x2b3   :  { %v912_v52 = vld [vmem:[#allocation11 + $0x238] sm:$0xff] }
 0x2b4   :  { %2487 = vmatpush1.bf16.msra.mxu1 %v6706_v60  ;;  %2573 = vmatpush1.bf16.msra.mxu0 %v6708_v61  ;;  %v863_v60 = vld [vmem:[#allocation11 + $0xb0] sm:$0xff]  ;;  %v860_v61 = vld [vmem:[#allocation11 + $0x98] sm:$0xff] }
 0x2b5   :  { %2488 = vmatprep.subr.bf16.mxu1 %v6715_v63  ;;  %2574 = vmatprep.subr.bf16.mxu0 %v6717_v0  ;;  %v864_v63 = vld [vmem:[#allocation11 + $0xb8] sm:$0xff]  ;;  %v6494_v0 = vcombine.low %v851_v44, %v855_v50  ;;  %v6503_v3 = vcombine.high %v859_v58, %v863_v60  ;;  %v911_v50 = vld [vmem:[#allocation11 + $0x230] sm:$0xff] }
 0x2b6   :  { %v6505_v4 = vcombine.high %v860_v61, %v864_v63 }
 0x2b7   :  { %v804_v45 = vpop.f32.mrb[8].mxu0 }
 0x2b8   :  { %v805_v16 = vadd.f32 %v804_v45, %v398_v6  ;;  %v806_v18 = vpop.f32.mrb[9].mxu0  ;;  %2489 = vmatpush1.bf16.msra.mxu1 %v6714_v7  ;;  %2575 = vmatpush1.bf16.msra.mxu0 %v6716_v8  ;;  %v868_v7 = vld [vmem:[#allocation11 + $0xd8] sm:$0xff] }
 0x2b9   :  { %v807_v25 = vadd.f32 %v806_v18, %v402_v9  ;;  %v808_v28 = vpop.f32.mrb[10].mxu0  ;;  %2490 = vmatprep.subr.bf16.mxu1 %v6723_v10  ;;  %2576 = vmatprep.subr.bf16.mxu0 %v6725_v11  ;;  %v872_v8 = vld [vmem:[#allocation11 + $0xf8] sm:$0xff]  ;;  %v6504_v10 = vcombine.low %v860_v61, %v864_v63  ;;  %v6519_v18 = vcombine.high %v875_v13, %v879_v14 }
 0x2ba   :  { %v823_v31 = vmul.f32 0.2, %v805_v16  ;;  %v809_v33 = vadd.f32 %v808_v28, %v398_v6  ;;  %v810_v34 = vpop.f32.mrb[11].mxu0  ;;  %vm815_vm8 = vcmp.gt.f32.partialorder %v805_v16, 0.0  ;;  %v871_v6 = vld [vmem:[#allocation11 + $0xf0] sm:$0xff]  ;;  %v6513_v12 = vcombine.high %v868_v7, %v872_v8  ;;  %v884_v28 = vld [vmem:[#allocation11 + $0x158] sm:$0xff] }
 0x2bb   :  { %v824_v39 = vmul.f32 0.2, %v807_v25  ;;  %v811_v40 = vadd.f32 %v810_v34, %v402_v9  ;;  %vm816_vm9 = vcmp.gt.f32.partialorder %v807_v25, 0.0  ;;  %v6502_v9 = vcombine.low %v859_v58, %v863_v60  ;;  %v891_v34 = vld [vmem:[#allocation11 + $0x190] sm:$0xff]  ;;  %v916_v61 = vld [vmem:[#allocation11 + $0x258] sm:$0xff] }
 0x2bc   :  { %vm819_vm10 = vcmp.gt.f32.partialorder %v809_v33, 0.0  ;;  %v827_v19 = vmul.f32 0.2, %v809_v33  ;;  %2491 = vmatpush1.bf16.msra.mxu1 %v6722_v22  ;;  %2577 = vmatpush1.bf16.msra.mxu0 %v6724_v23  ;;  %v831_v27 = vsel %vm815_vm8, %v805_v16, %v823_v31  ;;  %v6511_v11 = vcombine.high %v867_v5, %v871_v6  ;;  %v883_v23 = vld [vmem:[#allocation11 + $0x150] sm:$0xff]  ;;  %v920_v63 = vld [vmem:[#allocation11 + $0x278] sm:$0xff] }
 0x2bd   :  { %vm820_vm11 = vcmp.gt.f32.partialorder %v811_v40, 0.0  ;;  %v828_v21 = vmul.f32 0.2, %v811_v40  ;;  %2492 = vmatprep.subr.bf16.mxu1 %v6731_v29  ;;  %2578 = vmatprep.subr.bf16.mxu0 %v6733_v30  ;;  %v832_v47 = vsel %vm816_vm9, %v807_v25, %v824_v39  ;;  %v6510_v45 = vcombine.low %v867_v5, %v871_v6  ;;  %v887_v25 = vld [vmem:[#allocation11 + $0x170] sm:$0xff]  ;;  %v888_v29 = vld [vmem:[#allocation11 + $0x178] sm:$0xff] }
 0x2be   :  { %v835_v43 = vsel %vm819_vm10, %v809_v33, %v827_v19  ;;  %v6512_v16 = vcombine.low %v868_v7, %v872_v8  ;;  %v6518_v30 = vcombine.low %v875_v13, %v879_v14  ;;  %v6527_v31 = vcombine.high %v883_v23, %v887_v25  ;;  %v915_v58 = vld [vmem:[#allocation11 + $0x250] sm:$0xff]  ;;  %v924_v7 = vld [vmem:[#allocation11 + $0x298] sm:$0xff] }
 0x2bf   :  { %v8648_v48 = vpack.c.bf16 %v835_v43, %v831_v27  ;;  %v836_v49 = vsel %vm820_vm11, %v811_v40, %v828_v21  ;;  %v6529_v33 = vcombine.high %v884_v28, %v888_v29  ;;  %v6526_v39 = vcombine.low %v883_v23, %v887_v25  ;;  %v903_v21 = vld [vmem:[#allocation11 + $0x1f0] sm:$0xff]  ;;  %v928_v8 = vld [vmem:[#allocation11 + $0x2b8] sm:$0xff] }
 0x2c0   :  { %v8650_v53 = vpack.c.bf16 %v836_v49, %v832_v47  ;;  %2493 = vmatpush1.bf16.msra.mxu1 %v6730_v42  ;;  %2579 = vmatpush1.bf16.msra.mxu0 %v6732_v20  ;;  %v6528_v40 = vcombine.low %v884_v28, %v888_v29  ;;  %v6535_v42 = vcombine.high %v891_v34, %v895_v35  ;;  %v899_v20 = vld [vmem:[#allocation11 + $0x1d0] sm:$0xff]  ;;  %v940_v28 = vld [vmem:[#allocation11 + $0x318] sm:$0xff] }
 0x2c1   :  { %2591 = vmatprep.subr.bf16.mxu1 %v6487_v24  ;;  %2677 = vmatprep.subr.bf16.mxu0 %v6489_v26  ;;  %v6537_v19 = vcombine.high %v892_v36, %v896_v38  ;;  %v900_v24 = vld [vmem:[#allocation11 + $0x1d8] sm:$0xff]  ;;  %v6534_v27 = vcombine.low %v891_v34, %v895_v35  ;;  %v6536_v43 = vcombine.low %v892_v36, %v896_v38  ;;  %v907_v49 = vld [vmem:[#allocation11 + $0x210] sm:$0xff] }
 0x2c2   :  { %2494 = vmatprep.mubr.bf16.mxu1 %v8650_v53  ;;  %2580 = vmatprep.mubr.bf16.mxu0 %v8650_v53  ;;  %v904_v26 = vld [vmem:[#allocation11 + $0x1f8] sm:$0xff]  ;;  %v6543_v44 = vcombine.high %v899_v20, %v903_v21  ;;  %v919_v60 = vld [vmem:[#allocation11 + $0x270] sm:$0xff] }
 0x2c3   :  { %2495 = vmatmul.mubr.bf16.vlgmr.msra.gmra.mrb[0].mxu1 %v8648_v48  ;;  %2581 = vmatmul.mubr.bf16.vlgmr.msra.gmra.mrb[12].mxu0 %v8648_v48  ;;  %v6545_v47 = vcombine.high %v900_v24, %v904_v26  ;;  %v923_v5 = vld [vmem:[#allocation11 + $0x290] sm:$0xff]  ;;  %v944_v29 = vld [vmem:[#allocation11 + $0x338] sm:$0xff] }
 0x2c4   :  { %2592 = vmatpush1.bf16.msra.mxu1 %v6486_v54  ;;  %2623 = vmatprep.mubr.bf16.mxu1 %v8625_v17  ;;  %v6542_v54 = vcombine.low %v899_v20, %v903_v21  ;;  %v927_v6 = vld [vmem:[#allocation11 + $0x2b0] sm:$0xff]  ;;  %v948_v36 = vld [vmem:[#allocation11 + $0x358] sm:$0xff] }
 0x2c5   :  { %2678 = vmatpush1.bf16.msra.mxu0 %v6488_v55  ;;  %2709 = vmatprep.mubr.bf16.mxu0 %v8625_v17  ;;  %v876_v17 = vld [vmem:[#allocation11 + $0x118] sm:$0xff]  ;;  %v6544_v55 = vcombine.low %v900_v24, %v904_v26  ;;  %v931_v13 = vld [vmem:[#allocation11 + $0x2d0] sm:$0xff] }
 0x2c6   :  { %2593 = vmatprep.subr.bf16.mxu1 %v6495_v56  ;;  %2679 = vmatprep.subr.bf16.mxu0 %v6497_v57  ;;  %v6521_v22 = vcombine.high %v876_v17, %v880_v15  ;;  %v6520_v59 = vcombine.low %v876_v17, %v880_v15  ;;  %v6551_v56 = vcombine.high %v907_v49, %v911_v50  ;;  %v935_v14 = vld [vmem:[#allocation11 + $0x2f0] sm:$0xff]  ;;  %v932_v17 = vld [vmem:[#allocation11 + $0x2d8] sm:$0xff] }
 0x2c7   :  { %v6553_v57 = vcombine.high %v908_v51, %v912_v52  ;;  %v936_v15 = vld [vmem:[#allocation11 + $0x2f8] sm:$0xff]  ;;  %v939_v23 = vld [vmem:[#allocation11 + $0x310] sm:$0xff] }
 0x2c8   :  { %2594 = vmatpush1.bf16.msra.mxu1 %v6494_v0  ;;  %v6550_v0 = vcombine.low %v907_v49, %v911_v50  ;;  %v943_v25 = vld [vmem:[#allocation11 + $0x330] sm:$0xff]  ;;  %v952_v38 = vld [vmem:[#allocation11 + $0x378] sm:$0xff] }
 0x2c9   :  { %2680 = vmatpush1.bf16.msra.mxu0 %v6496_v2  ;;  %2595 = vmatprep.subr.bf16.mxu1 %v6503_v3  ;;  %v6552_v2 = vcombine.low %v908_v51, %v912_v52  ;;  %v6559_v3 = vcombine.high %v915_v58, %v919_v60  ;;  %v947_v34 = vld [vmem:[#allocation11 + $0x350] sm:$0xff]  ;;  %v956_v24 = vld [vmem:[#allocation11 + $0x398] sm:$0xff] }
 0x2ca   :  { %2681 = vmatprep.subr.bf16.mxu0 %v6505_v4  ;;  %v6561_v4 = vcombine.high %v916_v61, %v920_v63  ;;  %v951_v35 = vld [vmem:[#allocation11 + $0x370] sm:$0xff]  ;;  %v960_v26 = vld [vmem:[#allocation11 + $0x3b8] sm:$0xff] }
 0x2cb   :  { %v955_v20 = vld [vmem:[#allocation11 + $0x390] sm:$0xff]  ;;  %v964_v51 = vld [vmem:[#allocation11 + $0x3d8] sm:$0xff] }
 0x2cc   :  { %2596 = vmatpush1.bf16.msra.mxu1 %v6502_v9  ;;  %v6558_v9 = vcombine.low %v915_v58, %v919_v60  ;;  %v959_v21 = vld [vmem:[#allocation11 + $0x3b0] sm:$0xff]  ;;  %v968_v52 = vld [vmem:[#allocation11 + $0x3f8] sm:$0xff] }
 0x2cd   :  { %2682 = vmatpush1.bf16.msra.mxu0 %v6504_v10  ;;  %2597 = vmatprep.subr.bf16.mxu1 %v6511_v11  ;;  %v6560_v10 = vcombine.low %v916_v61, %v920_v63  ;;  %v6567_v11 = vcombine.high %v923_v5, %v927_v6  ;;  %v963_v49 = vld [vmem:[#allocation11 + $0x3d0] sm:$0xff]  ;;  %v972_v61 = vld [vmem:[#allocation11 + $0x418] sm:$0xff] }
 0x2ce   :  { %2683 = vmatprep.subr.bf16.mxu0 %v6513_v12  ;;  %v6569_v12 = vcombine.high %v924_v7, %v928_v8  ;;  %v967_v50 = vld [vmem:[#allocation11 + $0x3f0] sm:$0xff]  ;;  %v976_v63 = vld [vmem:[#allocation11 + $0x438] sm:$0xff] }
 0x2cf   :  { %v971_v58 = vld [vmem:[#allocation11 + $0x410] sm:$0xff] }
 0x2d0   :  { %2598 = vmatpush1.bf16.msra.mxu1 %v6510_v45  ;;  %v6566_v45 = vcombine.low %v923_v5, %v927_v6  ;;  %v975_v60 = vld [vmem:[#allocation11 + $0x430] sm:$0xff] }
 0x2d1   :  { %2684 = vmatpush1.bf16.msra.mxu0 %v6512_v16  ;;  %2599 = vmatprep.subr.bf16.mxu1 %v6519_v18  ;;  %v6568_v16 = vcombine.low %v924_v7, %v928_v8  ;;  %v6575_v18 = vcombine.high %v931_v13, %v935_v14  ;;  %v979_v5 = vld [vmem:[#allocation11 + $0x450] sm:$0xff]  ;;  %v6614_v7 = vcombine.low %v971_v58, %v975_v60  ;;  %v980_v8 = vld [vmem:[#allocation11 + $0x458] sm:$0xff] }
 0x2d2   :  { %2685 = vmatprep.subr.bf16.mxu0 %v6521_v22  ;;  %v6577_v22 = vcombine.high %v932_v17, %v936_v15  ;;  %v983_v6 = vld [vmem:[#allocation11 + $0x470] sm:$0xff] }
 0x2d4   :  { %2600 = vmatpush1.bf16.msra.mxu1 %v6518_v30  ;;  %v6574_v30 = vcombine.low %v931_v13, %v935_v14  ;;  %v991_v13 = vld [vmem:[#allocation11 + $0x4b0] sm:$0xff] }
 0x2d5   :  { %2686 = vmatpush1.bf16.msra.mxu0 %v6520_v59  ;;  %2601 = vmatprep.subr.bf16.mxu1 %v6527_v31  ;;  %v6576_v59 = vcombine.low %v932_v17, %v936_v15  ;;  %v6583_v31 = vcombine.high %v939_v23, %v943_v25  ;;  %v988_v17 = vld [vmem:[#allocation11 + $0x498] sm:$0xff] }
 0x2d6   :  { %2687 = vmatprep.subr.bf16.mxu0 %v6529_v33  ;;  %v6585_v33 = vcombine.high %v940_v28, %v944_v29  ;;  %v992_v15 = vld [vmem:[#allocation11 + $0x4b8] sm:$0xff] }
 0x2d8   :  { %2602 = vmatpush1.bf16.msra.mxu1 %v6526_v39  ;;  %v6582_v39 = vcombine.low %v939_v23, %v943_v25  ;;  %v995_v23 = vld [vmem:[#allocation11 + $0x4d0] sm:$0xff] }
 0x2d9   :  { %2688 = vmatpush1.bf16.msra.mxu0 %v6528_v40  ;;  %2603 = vmatprep.subr.bf16.mxu1 %v6535_v42  ;;  %v6584_v40 = vcombine.low %v940_v28, %v944_v29  ;;  %v6591_v42 = vcombine.high %v947_v34, %v951_v35  ;;  %v999_v25 = vld [vmem:[#allocation11 + $0x4f0] sm:$0xff]  ;;  %v996_v28 = vld [vmem:[#allocation11 + $0x4d8] sm:$0xff] }
 0x2da   :  { %2689 = vmatprep.subr.bf16.mxu0 %v6537_v19  ;;  %v6593_v19 = vcombine.high %v948_v36, %v952_v38  ;;  %v1000_v29 = vld [vmem:[#allocation11 + $0x4f8] sm:$0xff] }
 0x2dc   :  { %2604 = vmatpush1.bf16.msra.mxu1 %v6534_v27  ;;  %v6590_v27 = vcombine.low %v947_v34, %v951_v35  ;;  %v1007_v34 = vld [vmem:[#allocation11 + $0x530] sm:$0xff]  ;;  %v1004_v35 = vld [vmem:[#allocation11 + $0x518] sm:$0xff] }
 0x2dd   :  { %2690 = vmatpush1.bf16.msra.mxu0 %v6536_v43  ;;  %2605 = vmatprep.subr.bf16.mxu1 %v6543_v44  ;;  %v6592_v43 = vcombine.low %v948_v36, %v952_v38  ;;  %v6599_v44 = vcombine.high %v955_v20, %v959_v21  ;;  %v1008_v36 = vld [vmem:[#allocation11 + $0x538] sm:$0xff]  ;;  %v6640_v38 = vcombine.low %v996_v28, %v1000_v29 }
 0x2de   :  { %2691 = vmatprep.subr.bf16.mxu0 %v6545_v47  ;;  %v6601_v47 = vcombine.high %v956_v24, %v960_v26 }
 0x2e0   :  { %2606 = vmatpush1.bf16.msra.mxu1 %v6542_v54  ;;  %v6598_v54 = vcombine.low %v955_v20, %v959_v21  ;;  %v1012_v20 = vld [vmem:[#allocation11 + $0x558] sm:$0xff] }
 0x2e1   :  { %2692 = vmatpush1.bf16.msra.mxu0 %v6544_v55  ;;  %2607 = vmatprep.subr.bf16.mxu1 %v6551_v56  ;;  %v6600_v55 = vcombine.low %v956_v24, %v960_v26  ;;  %v6607_v56 = vcombine.high %v963_v49, %v967_v50  ;;  %v1016_v21 = vld [vmem:[#allocation11 + $0x578] sm:$0xff]  ;;  %v6648_v26 = vcombine.low %v1004_v35, %v1008_v36 }
 0x2e2   :  { %2693 = vmatprep.subr.bf16.mxu0 %v6553_v57  ;;  %v6609_v57 = vcombine.high %v964_v51, %v968_v52 }
 0x2e4   :  { %2608 = vmatpush1.bf16.msra.mxu1 %v6550_v0  ;;  %v6606_v0 = vcombine.low %v963_v49, %v967_v50  ;;  %v1020_v49 = vld [vmem:[#allocation11 + $0x598] sm:$0xff] }
 0x2e5   :  { %2694 = vmatpush1.bf16.msra.mxu0 %v6552_v2  ;;  %2609 = vmatprep.subr.bf16.mxu1 %v6559_v3  ;;  %v6608_v2 = vcombine.low %v964_v51, %v968_v52  ;;  %v6615_v3 = vcombine.high %v971_v58, %v975_v60  ;;  %v1024_v50 = vld [vmem:[#allocation11 + $0x5b8] sm:$0xff]  ;;  %v6656_v52 = vcombine.low %v1012_v20, %v1016_v21 }
 0x2e6   :  { %2695 = vmatprep.subr.bf16.mxu0 %v6561_v4  ;;  %v6617_v4 = vcombine.high %v972_v61, %v976_v63  ;;  %v1028_v58 = vld [vmem:[#allocation11 + $0x5d8] sm:$0xff] }
 0x2e7   :  { %v1032_v60 = vld [vmem:[#allocation11 + $0x5f8] sm:$0xff] }
 0x2e8   :  { %2610 = vmatpush1.bf16.msra.mxu1 %v6558_v9  ;;  %v984_v9 = vld [vmem:[#allocation11 + $0x478] sm:$0xff] }
 0x2e9   :  { %2696 = vmatpush1.bf16.msra.mxu0 %v6560_v10  ;;  %2611 = vmatprep.subr.bf16.mxu1 %v6567_v11  ;;  %v6616_v10 = vcombine.low %v972_v61, %v976_v63  ;;  %v6623_v11 = vcombine.high %v979_v5, %v983_v6  ;;  %v6625_v14 = vcombine.high %v980_v8, %v984_v9 }
 0x2ea   :  { %2697 = vmatprep.subr.bf16.mxu0 %v6569_v12  ;;  %v987_v12 = vld [vmem:[#allocation11 + $0x490] sm:$0xff]  ;;  %v6664_v63 = vcombine.low %v1020_v49, %v1024_v50 }
 0x2ec   :  { %2612 = vmatpush1.bf16.msra.mxu1 %v6566_v45  ;;  %v6622_v45 = vcombine.low %v979_v5, %v983_v6  ;;  %v1036_v5 = vld [vmem:[#allocation11 + $0x618] sm:$0xff] }
 0x2ed   :  { %2698 = vmatpush1.bf16.msra.mxu0 %v6568_v16  ;;  %2613 = vmatprep.subr.bf16.mxu1 %v6575_v18  ;;  %v6624_v16 = vcombine.low %v980_v8, %v984_v9  ;;  %v6631_v18 = vcombine.high %v987_v12, %v991_v13  ;;  %v1040_v6 = vld [vmem:[#allocation11 + $0x638] sm:$0xff]  ;;  %v6672_v8 = vcombine.low %v1028_v58, %v1032_v60 }
 0x2ee   :  { %2699 = vmatprep.subr.bf16.mxu0 %v6577_v22  ;;  %v6633_v22 = vcombine.high %v988_v17, %v992_v15 }
 0x2f0   :  { %2614 = vmatpush1.bf16.msra.mxu1 %v6574_v30  ;;  %v6630_v30 = vcombine.low %v987_v12, %v991_v13  ;;  %v1047_v12 = vld [vmem:[#allocation11 + $0x670] sm:$0xff]  ;;  %v1044_v13 = vld [vmem:[#allocation11 + $0x658] sm:$0xff] }
 0x2f1   :  { %2700 = vmatpush1.bf16.msra.mxu0 %v6576_v59  ;;  %2615 = vmatprep.subr.bf16.mxu1 %v6583_v31  ;;  %v6639_v59 = vcombine.high %v995_v23, %v999_v25  ;;  %v6641_v31 = vcombine.high %v996_v28, %v1000_v29 }
 0x2f2   :  { %2701 = vmatprep.subr.bf16.mxu0 %v6585_v33  ;;  %v1003_v33 = vld [vmem:[#allocation11 + $0x510] sm:$0xff] }
 0x2f3   :  { %v6646_v24 = vcombine.low %v1003_v33, %v1007_v34 }
 0x2f4   :  { %2616 = vmatpush1.bf16.msra.mxu1 %v6582_v39  ;;  %v6647_v39 = vcombine.high %v1003_v33, %v1007_v34  ;;  %v1060_v33 = vld [vmem:[#allocation11 + $0x6d8] sm:$0xff] }
 0x2f5   :  { %2702 = vmatpush1.bf16.msra.mxu0 %v6584_v40  ;;  %2617 = vmatprep.subr.bf16.mxu1 %v6591_v42  ;;  %v6649_v40 = vcombine.high %v1004_v35, %v1008_v36  ;;  %v1011_v42 = vld [vmem:[#allocation11 + $0x550] sm:$0xff]  ;;  %v1064_v34 = vld [vmem:[#allocation11 + $0x6f8] sm:$0xff] }
 0x2f6   :  { %2703 = vmatprep.subr.bf16.mxu0 %v6593_v19  ;;  %v1015_v19 = vld [vmem:[#allocation11 + $0x570] sm:$0xff] }
 0x2f7   :  { %v6654_v51 = vcombine.low %v1011_v42, %v1015_v19 }
 0x2f8   :  { %2618 = vmatpush1.bf16.msra.mxu1 %v6590_v27  ;;  %v6655_v27 = vcombine.high %v1011_v42, %v1015_v19  ;;  %v1068_v42 = vld [vmem:[#allocation11 + $0x718] sm:$0xff] }
 0x2f9   :  { %2704 = vmatpush1.bf16.msra.mxu0 %v6592_v43  ;;  %2619 = vmatprep.subr.bf16.mxu1 %v6599_v44  ;;  %v6657_v43 = vcombine.high %v1012_v20, %v1016_v21  ;;  %v1019_v44 = vld [vmem:[#allocation11 + $0x590] sm:$0xff]  ;;  %v1072_v19 = vld [vmem:[#allocation11 + $0x738] sm:$0xff]  ;;  %v6704_v21 = vcombine.low %v1060_v33, %v1064_v34 }
 0x2fa   :  { %2705 = vmatprep.subr.bf16.mxu0 %v6601_v47  ;;  %v1023_v47 = vld [vmem:[#allocation11 + $0x5b0] sm:$0xff] }
 0x2fb   :  { %v6662_v61 = vcombine.low %v1019_v44, %v1023_v47 }
 0x2fc   :  { %2620 = vmatpush1.bf16.msra.mxu1 %v6598_v54  ;;  %v6663_v54 = vcombine.high %v1019_v44, %v1023_v47  ;;  %v1076_v44 = vld [vmem:[#allocation11 + $0x758] sm:$0xff] }
 0x2fd   :  { %2706 = vmatpush1.bf16.msra.mxu0 %v6600_v55  ;;  %2621 = vmatprep.subr.bf16.mxu1 %v6607_v56  ;;  %v6665_v55 = vcombine.high %v1020_v49, %v1024_v50  ;;  %v1027_v56 = vld [vmem:[#allocation11 + $0x5d0] sm:$0xff]  ;;  %v1080_v47 = vld [vmem:[#allocation11 + $0x778] sm:$0xff]  ;;  %v6712_v50 = vcombine.low %v1068_v42, %v1072_v19 }
 0x2fe   :  { %2707 = vmatprep.subr.bf16.mxu0 %v6609_v57  ;;  %v1031_v57 = vld [vmem:[#allocation11 + $0x5f0] sm:$0xff] }
 0x300   :  { %2622 = vmatpush1.bf16.msra.mxu1 %v6606_v0  ;;  %v6671_v0 = vcombine.high %v1027_v56, %v1031_v57 }
 0x301   :  { %2708 = vmatpush1.bf16.msra.mxu0 %v6608_v2  ;;  %2634 = vmatprep.subr.bf16.mxu1 %v6615_v3  ;;  %v6673_v2 = vcombine.high %v1028_v58, %v1032_v60  ;;  %v1035_v3 = vld [vmem:[#allocation11 + $0x610] sm:$0xff]  ;;  %v6720_v60 = vcombine.low %v1076_v44, %v1080_v47 }
 0x302   :  { %2720 = vmatprep.subr.bf16.mxu0 %v6617_v4  ;;  %v1039_v4 = vld [vmem:[#allocation11 + $0x630] sm:$0xff] }
 0x303   :  { %2624 = vmatmul.mubr.bf16.vlgmr.msra.gmra.mrb[4].mxu1 %v8623_v46  ;;  %v6679_v9 = vcombine.high %v1035_v3, %v1039_v4 }
 0x304   :  { %2710 = vmatmul.mubr.bf16.vlgmr.msra.gmra.mrb[16].mxu0 %v8623_v46  ;;  %2635 = vmatpush1.bf16.msra.mxu1 %v6614_v7  ;;  %v6632_v46 = vcombine.low %v988_v17, %v992_v15  ;;  %v6670_v7 = vcombine.low %v1027_v56, %v1031_v57  ;;  %v6678_v17 = vcombine.low %v1035_v3, %v1039_v4  ;;  %v1084_v56 = vld [vmem:[#allocation11 + $0x798] sm:$0xff] }
 0x305   :  { %2666 = vmatprep.mubr.bf16.mxu1 %v8650_v53  ;;  %2721 = vmatpush1.bf16.msra.mxu0 %v6616_v10  ;;  %v6681_v10 = vcombine.high %v1036_v5, %v1040_v6  ;;  %v6680_v15 = vcombine.low %v1036_v5, %v1040_v6  ;;  %v1088_v57 = vld [vmem:[#allocation11 + $0x7b8] sm:$0xff] }
 0x306   :  { %2752 = vmatprep.mubr.bf16.mxu0 %v8650_v53  ;;  %2636 = vmatprep.subr.bf16.mxu1 %v6623_v11  ;;  %v6638_v53 = vcombine.low %v995_v23, %v999_v25  ;;  %v1043_v11 = vld [vmem:[#allocation11 + $0x650] sm:$0xff]  ;;  %v1052_v23 = vld [vmem:[#allocation11 + $0x698] sm:$0xff]  ;;  %v6728_v6 = vcombine.low %v1084_v56, %v1088_v57 }
 0x307   :  { %2722 = vmatprep.subr.bf16.mxu0 %v6625_v14  ;;  %v1048_v14 = vld [vmem:[#allocation11 + $0x678] sm:$0xff]  ;;  %v6686_v28 = vcombine.low %v1043_v11, %v1047_v12 }
 0x308   :  { %2637 = vmatpush1.bf16.msra.mxu1 %v6622_v45  ;;  %v6687_v45 = vcombine.high %v1043_v11, %v1047_v12  ;;  %v1056_v25 = vld [vmem:[#allocation11 + $0x6b8] sm:$0xff]  ;;  %v6688_v29 = vcombine.low %v1044_v13, %v1048_v14  ;;  %v7500_v11 = vld [vmem:[#allocation14 + $0x4] ss:$28 sps:$4 sm:$0xff]   ;;  %v7503_v12 = vld [vmem:[#allocation14 + $0xc] ss:$28 sps:$4 sm:$0xff]  }
 0x309   :  { %2723 = vmatpush1.bf16.msra.mxu0 %v6624_v16  ;;  %2638 = vmatprep.subr.bf16.mxu1 %v6631_v18  ;;  %v6689_v16 = vcombine.high %v1044_v13, %v1048_v14  ;;  %v1051_v18 = vld [vmem:[#allocation11 + $0x690] sm:$0xff]  ;;  %v6696_v36 = vcombine.low %v1052_v23, %v1056_v25  ;;  %v1092_v3 = vld [vmem:[#allocation11 + $0x7d8] sm:$0xff]  ;;  %v7498_v13 = vld [vmem:[#allocation14] ss:$28 sps:$4 sm:$0xff]  }
 0x30a   :  { %2724 = vmatprep.subr.bf16.mxu0 %v6633_v22  ;;  %v1055_v22 = vld [vmem:[#allocation11 + $0x6b0] sm:$0xff]  ;;  %v1096_v4 = vld [vmem:[#allocation11 + $0x7f8] sm:$0xff] }
 0x30b   :  { %v6694_v35 = vcombine.low %v1051_v18, %v1055_v22  ;;  %v7501_v14 = vld [vmem:[#allocation14 + $0x8] ss:$28 sps:$4 sm:$0xff]  }
 0x30c   :  { %2639 = vmatpush1.bf16.msra.mxu1 %v6630_v30  ;;  %v6695_v30 = vcombine.high %v1051_v18, %v1055_v22  ;;  %v7512_v18 = vld [vmem:[#allocation14 + $0x74] ss:$28 sps:$4 sm:$0xff]   ;;  %v7515_v22 = vld [vmem:[#allocation14 + $0x7c] ss:$28 sps:$4 sm:$0xff]  }
 0x30d   :  { %2725 = vmatpush1.bf16.msra.mxu0 %v6632_v46  ;;  %2640 = vmatprep.subr.bf16.mxu1 %v6639_v59  ;;  %v6697_v46 = vcombine.high %v1052_v23, %v1056_v25  ;;  %v1059_v59 = vld [vmem:[#allocation11 + $0x6d0] sm:$0xff]  ;;  %v7513_v25 = vld [vmem:[#allocation14 + $0x78] ss:$28 sps:$4 sm:$0xff]  }
 0x30e   :  { %2726 = vmatprep.subr.bf16.mxu0 %v6641_v31  ;;  %v1063_v31 = vld [vmem:[#allocation11 + $0x6f0] sm:$0xff] }
 0x30f   :  { %v6702_v20 = vcombine.low %v1059_v59, %v1063_v31  ;;  %v7510_v23 = vld [vmem:[#allocation14 + $0x70] ss:$28 sps:$4 sm:$0xff]  }
 0x310   :  { %2641 = vmatpush1.bf16.msra.mxu1 %v6638_v53  ;;  %v6703_v53 = vcombine.high %v1059_v59, %v1063_v31  ;;  %v7527_v59 = vld [vmem:[#allocation14 + $0xec] ss:$28 sps:$4 sm:$0xff]   ;;  %v7522_v31 = vld [vmem:[#allocation14 + $0xe0] ss:$28 sps:$4 sm:$0xff]  }
 0x311   :  { %2727 = vmatpush1.bf16.msra.mxu0 %v6640_v38  ;;  %2642 = vmatprep.subr.bf16.mxu1 %v6647_v39  ;;  %v6705_v38 = vcombine.high %v1060_v33, %v1064_v34  ;;  %v1067_v39 = vld [vmem:[#allocation11 + $0x710] sm:$0xff]  ;;  %v7530_v34 = vld [vmem:[#allocation14 + $0x11c] ss:$28 sps:$4 sm:$0xff]  }
 0x312   :  { %2728 = vmatprep.subr.bf16.mxu0 %v6649_v40  ;;  %v1071_v40 = vld [vmem:[#allocation11 + $0x730] sm:$0xff] }
 0x313   :  { %v6710_v49 = vcombine.low %v1067_v39, %v1071_v40  ;;  %v7525_v33 = vld [vmem:[#allocation14 + $0xe8] ss:$28 sps:$4 sm:$0xff]  }
 0x314   :  { %2643 = vmatpush1.bf16.msra.mxu1 %v6646_v24  ;;  %v6711_v24 = vcombine.high %v1067_v39, %v1071_v40  ;;  %v7539_v39 = vld [vmem:[#allocation14 + $0x15c] ss:$28 sps:$4 sm:$0xff]   ;;  %v7534_v40 = vld [vmem:[#allocation14 + $0x150] ss:$28 sps:$4 sm:$0xff]  }
 0x315   :  { %2729 = vmatpush1.bf16.msra.mxu0 %v6648_v26  ;;  %2644 = vmatprep.subr.bf16.mxu1 %v6655_v27  ;;  %v6713_v26 = vcombine.high %v1068_v42, %v1072_v19  ;;  %v1075_v27 = vld [vmem:[#allocation11 + $0x750] sm:$0xff]  ;;  %v7537_v42 = vld [vmem:[#allocation14 + $0x158] ss:$28 sps:$4 sm:$0xff]  }
 0x316   :  { %2730 = vmatprep.subr.bf16.mxu0 %v6657_v43  ;;  %v1079_v43 = vld [vmem:[#allocation11 + $0x770] sm:$0xff] }
 0x317   :  { %v6718_v58 = vcombine.low %v1075_v27, %v1079_v43  ;;  %v7542_v19 = vld [vmem:[#allocation14 + $0x18c] ss:$28 sps:$4 sm:$0xff]  }
 0x318   :  { %2645 = vmatpush1.bf16.msra.mxu1 %v6654_v51  ;;  %v6719_v51 = vcombine.high %v1075_v27, %v1079_v43  ;;  %v7551_v27 = vld [vmem:[#allocation14 + $0x1cc] ss:$28 sps:$4 sm:$0xff]   ;;  %v7546_v43 = vld [vmem:[#allocation14 + $0x1c0] ss:$28 sps:$4 sm:$0xff]  }
 0x319   :  { %2731 = vmatpush1.bf16.msra.mxu0 %v6656_v52  ;;  %2646 = vmatprep.subr.bf16.mxu1 %v6663_v54  ;;  %v6721_v52 = vcombine.high %v1076_v44, %v1080_v47  ;;  %v1083_v54 = vld [vmem:[#allocation11 + $0x790] sm:$0xff]  ;;  %v7554_v47 = vld [vmem:[#allocation14 + $0x1fc] ss:$28 sps:$4 sm:$0xff]  }
 0x31a   :  { %2732 = vmatprep.subr.bf16.mxu0 %v6665_v55  ;;  %v1087_v55 = vld [vmem:[#allocation11 + $0x7b0] sm:$0xff] }
 0x31b   :  { %v6726_v5 = vcombine.low %v1083_v54, %v1087_v55  ;;  %v7549_v44 = vld [vmem:[#allocation14 + $0x1c8] ss:$28 sps:$4 sm:$0xff]  }
 0x31c   :  { %2647 = vmatpush1.bf16.msra.mxu1 %v6662_v61  ;;  %v6727_v61 = vcombine.high %v1083_v54, %v1087_v55  ;;  %v7563_v54 = vld [vmem:[#allocation14 + $0x23c] ss:$28 sps:$4 sm:$0xff]   ;;  %v7558_v55 = vld [vmem:[#allocation14 + $0x230] ss:$28 sps:$4 sm:$0xff]  }
 0x31d   :  { %2733 = vmatpush1.bf16.msra.mxu0 %v6664_v63  ;;  %2648 = vmatprep.subr.bf16.mxu1 %v6671_v0  ;;  %v6729_v63 = vcombine.high %v1084_v56, %v1088_v57  ;;  %v1091_v0 = vld [vmem:[#allocation11 + $0x7d0] sm:$0xff]  ;;  %v7561_v56 = vld [vmem:[#allocation14 + $0x238] ss:$28 sps:$4 sm:$0xff]  }
 0x31e   :  { %2734 = vmatprep.subr.bf16.mxu0 %v6673_v2  ;;  %v1095_v2 = vld [vmem:[#allocation11 + $0x7f0] sm:$0xff] }
 0x31f   :  { %v7566_v57 = vld [vmem:[#allocation14 + $0x26c] ss:$28 sps:$4 sm:$0xff]  }
 0x320   :  { %2649 = vmatpush1.bf16.msra.mxu1 %v6670_v7  ;;  %v6735_v7 = vcombine.high %v1091_v0, %v1095_v2 }
 0x321   :  { %2735 = vmatpush1.bf16.msra.mxu0 %v6672_v8  ;;  %2650 = vmatprep.subr.bf16.mxu1 %v6679_v9  ;;  %v6737_v8 = vcombine.high %v1092_v3, %v1096_v4  ;;  %v6734_v9 = vcombine.low %v1091_v0, %v1095_v2  ;;  %v7575_v0 = vld [vmem:[#allocation14 + $0x2ac] ss:$28 sps:$4 sm:$0xff]   ;;  %v7570_v2 = vld [vmem:[#allocation14 + $0x2a0] ss:$28 sps:$4 sm:$0xff]  }
 0x322   :  { %2736 = vmatprep.subr.bf16.mxu0 %v6681_v10  ;;  %v6736_v10 = vcombine.low %v1092_v3, %v1096_v4  ;;  %v7573_v3 = vld [vmem:[#allocation14 + $0x2a8] ss:$28 sps:$4 sm:$0xff]   ;;  %v7578_v4 = vld [vmem:[#allocation14 + $0x2dc] ss:$28 sps:$4 sm:$0xff]  }
 0x324   :  { %2651 = vmatpush1.bf16.msra.mxu1 %v6678_v17  ;;  %v7506_v17 = vld [vmem:[#allocation14 + $0x3c] ss:$28 sps:$4 sm:$0xff]  }
 0x325   :  { %2737 = vmatpush1.bf16.msra.mxu0 %v6680_v15  ;;  %2652 = vmatprep.subr.bf16.mxu1 %v6687_v45  ;;  %v7509_v15 = vld [vmem:[#allocation14 + $0x44] ss:$28 sps:$4 sm:$0xff]   ;;  %v7504_v45 = vld [vmem:[#allocation14 + $0x38] ss:$28 sps:$4 sm:$0xff]  }
 0x326   :  { %2738 = vmatprep.subr.bf16.mxu0 %v6689_v16  ;;  %v7507_v16 = vld [vmem:[#allocation14 + $0x40] ss:$28 sps:$4 sm:$0xff]  }
 0x328   :  { %2653 = vmatpush1.bf16.msra.mxu1 %v6686_v28  ;;  %v7518_v28 = vld [vmem:[#allocation14 + $0xac] ss:$28 sps:$4 sm:$0xff]  }
 0x329   :  { %2739 = vmatpush1.bf16.msra.mxu0 %v6688_v29  ;;  %2654 = vmatprep.subr.bf16.mxu1 %v6695_v30  ;;  %v7521_v29 = vld [vmem:[#allocation14 + $0xb4] ss:$28 sps:$4 sm:$0xff]   ;;  %v7516_v30 = vld [vmem:[#allocation14 + $0xa8] ss:$28 sps:$4 sm:$0xff]  }
 0x32a   :  { %2740 = vmatprep.subr.bf16.mxu0 %v6697_v46  ;;  %v7524_v46 = vld [vmem:[#allocation14 + $0xe4] ss:$28 sps:$4 sm:$0xff]  }
 0x32c   :  { %2655 = vmatpush1.bf16.msra.mxu1 %v6694_v35  ;;  %v7533_v35 = vld [vmem:[#allocation14 + $0x124] ss:$28 sps:$4 sm:$0xff]  }
 0x32d   :  { %2741 = vmatpush1.bf16.msra.mxu0 %v6696_v36  ;;  %2656 = vmatprep.subr.bf16.mxu1 %v6703_v53  ;;  %v7528_v36 = vld [vmem:[#allocation14 + $0x118] ss:$28 sps:$4 sm:$0xff]   ;;  %v7531_v53 = vld [vmem:[#allocation14 + $0x120] ss:$28 sps:$4 sm:$0xff]  }
 0x32e   :  { %2742 = vmatprep.subr.bf16.mxu0 %v6705_v38  ;;  %v7536_v38 = vld [vmem:[#allocation14 + $0x154] ss:$28 sps:$4 sm:$0xff]  }
 0x330   :  { %2657 = vmatpush1.bf16.msra.mxu1 %v6702_v20  ;;  %v7545_v20 = vld [vmem:[#allocation14 + $0x194] ss:$28 sps:$4 sm:$0xff]  }
 0x331   :  { %2743 = vmatpush1.bf16.msra.mxu0 %v6704_v21  ;;  %2658 = vmatprep.subr.bf16.mxu1 %v6711_v24  ;;  %v7540_v21 = vld [vmem:[#allocation14 + $0x188] ss:$28 sps:$4 sm:$0xff]   ;;  %v7543_v24 = vld [vmem:[#allocation14 + $0x190] ss:$28 sps:$4 sm:$0xff]  }
 0x332   :  { %2744 = vmatprep.subr.bf16.mxu0 %v6713_v26  ;;  %v7548_v26 = vld [vmem:[#allocation14 + $0x1c4] ss:$28 sps:$4 sm:$0xff]  }
 0x334   :  { %2659 = vmatpush1.bf16.msra.mxu1 %v6710_v49  ;;  %v7557_v49 = vld [vmem:[#allocation14 + $0x204] ss:$28 sps:$4 sm:$0xff]  }
 0x335   :  { %2745 = vmatpush1.bf16.msra.mxu0 %v6712_v50  ;;  %2660 = vmatprep.subr.bf16.mxu1 %v6719_v51  ;;  %v7552_v50 = vld [vmem:[#allocation14 + $0x1f8] ss:$28 sps:$4 sm:$0xff]   ;;  %v7555_v51 = vld [vmem:[#allocation14 + $0x200] ss:$28 sps:$4 sm:$0xff]  }
 0x336   :  { %2746 = vmatprep.subr.bf16.mxu0 %v6721_v52  ;;  %v7560_v52 = vld [vmem:[#allocation14 + $0x234] ss:$28 sps:$4 sm:$0xff]  }
 0x338   :  { %2661 = vmatpush1.bf16.msra.mxu1 %v6718_v58  ;;  %v7569_v58 = vld [vmem:[#allocation14 + $0x274] ss:$28 sps:$4 sm:$0xff]  }
 0x339   :  { %2747 = vmatpush1.bf16.msra.mxu0 %v6720_v60  ;;  %2662 = vmatprep.subr.bf16.mxu1 %v6727_v61  ;;  %v7564_v60 = vld [vmem:[#allocation14 + $0x268] ss:$28 sps:$4 sm:$0xff]   ;;  %v7567_v61 = vld [vmem:[#allocation14 + $0x270] ss:$28 sps:$4 sm:$0xff]  }
 0x33a   :  { %2748 = vmatprep.subr.bf16.mxu0 %v6729_v63  ;;  %v7572_v63 = vld [vmem:[#allocation14 + $0x2a4] ss:$28 sps:$4 sm:$0xff]  }
 0x33c   :  { %2663 = vmatpush1.bf16.msra.mxu1 %v6726_v5  ;;  %v7581_v5 = vld [vmem:[#allocation14 + $0x2e4] ss:$28 sps:$4 sm:$0xff]  }
 0x33d   :  { %2749 = vmatpush1.bf16.msra.mxu0 %v6728_v6  ;;  %2664 = vmatprep.subr.bf16.mxu1 %v6735_v7  ;;  %v7576_v6 = vld [vmem:[#allocation14 + $0x2d8] ss:$28 sps:$4 sm:$0xff]   ;;  %v7579_v7 = vld [vmem:[#allocation14 + $0x2e0] ss:$28 sps:$4 sm:$0xff]  }
 0x33e   :  { %2750 = vmatprep.subr.bf16.mxu0 %v6737_v8  ;;  %v7584_v8 = vld [vmem:[#allocation14 + $0x314] ss:$28 sps:$4 sm:$0xff]  }
 0x340   :  { %2665 = vmatpush1.bf16.msra.mxu1 %v6734_v9  ;;  %v7587_v9 = vld [vmem:[#allocation14 + $0x31c] ss:$28 sps:$4 sm:$0xff]  }
 0x341   :  { %2751 = vmatpush1.bf16.msra.mxu0 %v6736_v10  ;;  %5672 = vmatprep.subr.bf16.mxu1 %v7500_v11  ;;  %v7582_v10 = vld [vmem:[#allocation14 + $0x310] ss:$28 sps:$4 sm:$0xff]   ;;  %v7585_v11 = vld [vmem:[#allocation14 + $0x318] ss:$28 sps:$4 sm:$0xff]  }
 0x342   :  { %5844 = vmatprep.subr.bf16.mxu0 %v7503_v12  ;;  %v7590_v12 = vld [vmem:[#allocation14 + $0x34c] ss:$28 sps:$4 sm:$0xff]  }
 0x343   :  { %2667 = vmatmul.mubr.bf16.vlgmr.msra.gmra.mrb[4].mxu1 %v8648_v48 }
 0x344   :  { %2753 = vmatmul.mubr.bf16.vlgmr.msra.gmra.mrb[16].mxu0 %v8648_v48  ;;  %5673 = vmatpush1.bf16.msra.mxu1 %v7498_v13  ;;  %v7519_v48 = vld [vmem:[#allocation14 + $0xb0] ss:$28 sps:$4 sm:$0xff]  }
 0x345   :  { %5845 = vmatpush1.bf16.msra.mxu0 %v7501_v14  ;;  %5674 = vmatprep.subr.bf16.mxu1 %v7506_v17  ;;  %v7593_v13 = vld [vmem:[#allocation14 + $0x354] ss:$28 sps:$4 sm:$0xff]   ;;  %v7588_v14 = vld [vmem:[#allocation14 + $0x348] ss:$28 sps:$4 sm:$0xff]  }
 0x346   :  { %5846 = vmatprep.subr.bf16.mxu0 %v7509_v15  ;;  %v7591_v17 = vld [vmem:[#allocation14 + $0x350] ss:$28 sps:$4 sm:$0xff]   ;;  %v7596_v15 = vld [vmem:[#allocation14 + $0x384] ss:$28 sps:$4 sm:$0xff]  }
 0x348   :  { %5675 = vmatpush1.bf16.msra.mxu1 %v7504_v45  ;;  %v7599_v45 = vld [vmem:[#allocation14 + $0x38c] ss:$28 sps:$4 sm:$0xff]  }
 0x349   :  { %5847 = vmatpush1.bf16.msra.mxu0 %v7507_v16  ;;  %5676 = vmatprep.subr.bf16.mxu1 %v7512_v18  ;;  %v8664_v16 = vld [vmem:[#allocation13] sm:$0xff] }
 0x34a   :  { %5848 = vmatprep.subr.bf16.mxu0 %v7515_v22  ;;  %v1102_v18 = vrot.slane %v8664_v16, %v8582_v37  ;;  %v1110_v22 = vrot.slane %v8664_v16, %v8638_v62 }
 0x34c   :  { %5677 = vmatpush1.bf16.msra.mxu1 %v7510_v23  ;;  %v1106_v23 = vrot.slane %v8664_v16, %v8585_v41 }
 0x34d   :  { %5849 = vmatpush1.bf16.msra.mxu0 %v7513_v25  ;;  %5678 = vmatprep.subr.bf16.mxu1 %v7518_v28  ;;  %v1114_v25 = vrot.slane %v8664_v16, %v8641_v1 }
 0x34e   :  { %5850 = vmatprep.subr.bf16.mxu0 %v7521_v29 }
 0x350   :  { %5679 = vmatpush1.bf16.msra.mxu1 %v7516_v30 }
 0x351   :  { %5851 = vmatpush1.bf16.msra.mxu0 %v7519_v48  ;;  %5680 = vmatprep.subr.bf16.mxu1 %v7524_v46 }
 0x352   :  { %5852 = vmatprep.subr.bf16.mxu0 %v7527_v59 }
 0x354   :  { %5681 = vmatpush1.bf16.msra.mxu1 %v7522_v31 }
 0x355   :  { %5853 = vmatpush1.bf16.msra.mxu0 %v7525_v33  ;;  %5682 = vmatprep.subr.bf16.mxu1 %v7530_v34 }
 0x356   :  { %5854 = vmatprep.subr.bf16.mxu0 %v7533_v35 }
 0x358   :  { %5683 = vmatpush1.bf16.msra.mxu1 %v7528_v36 }
 0x359   :  { %5855 = vmatpush1.bf16.msra.mxu0 %v7531_v53  ;;  %5684 = vmatprep.subr.bf16.mxu1 %v7536_v38 }
 0x35a   :  { %5856 = vmatprep.subr.bf16.mxu0 %v7539_v39 }
 0x35c   :  { %5685 = vmatpush1.bf16.msra.mxu1 %v7534_v40 }
 0x35d   :  { %5857 = vmatpush1.bf16.msra.mxu0 %v7537_v42  ;;  %5686 = vmatprep.subr.bf16.mxu1 %v7542_v19 }
 0x35e   :  { %5858 = vmatprep.subr.bf16.mxu0 %v7545_v20 }
 0x360   :  { %5687 = vmatpush1.bf16.msra.mxu1 %v7540_v21 }
 0x361   :  { %5859 = vmatpush1.bf16.msra.mxu0 %v7543_v24  ;;  %5688 = vmatprep.subr.bf16.mxu1 %v7548_v26 }
 0x362   :  { %5860 = vmatprep.subr.bf16.mxu0 %v7551_v27 }
 0x364   :  { %5689 = vmatpush1.bf16.msra.mxu1 %v7546_v43 }
 0x365   :  { %5861 = vmatpush1.bf16.msra.mxu0 %v7549_v44  ;;  %5690 = vmatprep.subr.bf16.mxu1 %v7554_v47 }
 0x366   :  { %5862 = vmatprep.subr.bf16.mxu0 %v7557_v49 }
 0x368   :  { %5691 = vmatpush1.bf16.msra.mxu1 %v7552_v50 }
 0x369   :  { %5863 = vmatpush1.bf16.msra.mxu0 %v7555_v51  ;;  %5692 = vmatprep.subr.bf16.mxu1 %v7560_v52 }
 0x36a   :  { %5864 = vmatprep.subr.bf16.mxu0 %v7563_v54 }
 0x36c   :  { %5693 = vmatpush1.bf16.msra.mxu1 %v7558_v55 }
 0x36d   :  { %5865 = vmatpush1.bf16.msra.mxu0 %v7561_v56  ;;  %5694 = vmatprep.subr.bf16.mxu1 %v7566_v57 }
 0x36e   :  { %5866 = vmatprep.subr.bf16.mxu0 %v7569_v58 }
 0x370   :  { %5695 = vmatpush1.bf16.msra.mxu1 %v7564_v60 }
 0x371   :  { %5867 = vmatpush1.bf16.msra.mxu0 %v7567_v61  ;;  %5696 = vmatprep.subr.bf16.mxu1 %v7572_v63  ;;  %v7594_v63 = vld [vmem:[#allocation14 + $0x380] ss:$28 sps:$4 sm:$0xff]  }
 0x372   :  { %5868 = vmatprep.subr.bf16.mxu0 %v7575_v0  ;;  %v7597_v0 = vld [vmem:[#allocation14 + $0x388] ss:$28 sps:$4 sm:$0xff]  }
 0x374   :  { %5697 = vmatpush1.bf16.msra.mxu1 %v7570_v2  ;;  %v7602_v2 = vld [vmem:[#allocation14 + $0x3bc] ss:$28 sps:$4 sm:$0xff]  }
 0x375   :  { %5869 = vmatpush1.bf16.msra.mxu0 %v7573_v3  ;;  %5698 = vmatprep.subr.bf16.mxu1 %v7578_v4  ;;  %v7605_v3 = vld [vmem:[#allocation14 + $0x3c4] ss:$28 sps:$4 sm:$0xff]   ;;  %v7600_v4 = vld [vmem:[#allocation14 + $0x3b8] ss:$28 sps:$4 sm:$0xff]  }
 0x376   :  { %5870 = vmatprep.subr.bf16.mxu0 %v7581_v5  ;;  %v7603_v5 = vld [vmem:[#allocation14 + $0x3c0] ss:$28 sps:$4 sm:$0xff]  }
 0x378   :  { %5699 = vmatpush1.bf16.msra.mxu1 %v7576_v6  ;;  %v7608_v6 = vld [vmem:[#allocation14 + $0x3f4] ss:$28 sps:$4 sm:$0xff]  }
 0x379   :  { %5871 = vmatpush1.bf16.msra.mxu0 %v7579_v7  ;;  %5700 = vmatprep.subr.bf16.mxu1 %v7584_v8  ;;  %v7611_v7 = vld [vmem:[#allocation14 + $0x3fc] ss:$28 sps:$4 sm:$0xff]   ;;  %v7606_v8 = vld [vmem:[#allocation14 + $0x3f0] ss:$28 sps:$4 sm:$0xff]  }
 0x37a   :  { %5872 = vmatprep.subr.bf16.mxu0 %v7587_v9  ;;  %v7609_v9 = vld [vmem:[#allocation14 + $0x3f8] ss:$28 sps:$4 sm:$0xff]  }
 0x37c   :  { %5701 = vmatpush1.bf16.msra.mxu1 %v7582_v10  ;;  %v7614_v10 = vld [vmem:[#allocation14 + $0x42c] ss:$28 sps:$4 sm:$0xff]  }
 0x37d   :  { %5873 = vmatpush1.bf16.msra.mxu0 %v7585_v11  ;;  %5702 = vmatprep.subr.bf16.mxu1 %v7590_v12  ;;  %v7617_v11 = vld [vmem:[#allocation14 + $0x434] ss:$28 sps:$4 sm:$0xff]   ;;  %v7612_v12 = vld [vmem:[#allocation14 + $0x428] ss:$28 sps:$4 sm:$0xff]  }
 0x37e   :  { %5874 = vmatprep.subr.bf16.mxu0 %v7593_v13  ;;  %v7615_v13 = vld [vmem:[#allocation14 + $0x430] ss:$28 sps:$4 sm:$0xff]  }
 0x380   :  { %5703 = vmatpush1.bf16.msra.mxu1 %v7588_v14  ;;  %v7620_v14 = vld [vmem:[#allocation14 + $0x464] ss:$28 sps:$4 sm:$0xff]  }
 0x381   :  { %5875 = vmatpush1.bf16.msra.mxu0 %v7591_v17  ;;  %5715 = vmatprep.subr.bf16.mxu1 %v7596_v15  ;;  %v7623_v17 = vld [vmem:[#allocation14 + $0x46c] ss:$28 sps:$4 sm:$0xff]   ;;  %v7618_v15 = vld [vmem:[#allocation14 + $0x460] ss:$28 sps:$4 sm:$0xff]  }
 0x382   :  { %5887 = vmatprep.subr.bf16.mxu0 %v7599_v45  ;;  %v7621_v45 = vld [vmem:[#allocation14 + $0x468] ss:$28 sps:$4 sm:$0xff]  }
 0x396   :  { %v2496_v28 = vpop.f32.mrb[0].mxu1  ;;  %v2582_v29 = vpop.f32.mrb[12].mxu0 }
 0x397   :  { %v7274_v30 = vadd.f32 %v2496_v28, %v1102_v18  ;;  %v7278_v48 = vadd.f32 %v2582_v29, %v1110_v22  ;;  %v2498_v46 = vpop.f32.mrb[1].mxu1  ;;  %v2584_v59 = vpop.f32.mrb[13].mxu0  ;;  %v7632_v28 = vld [vmem:[#allocation14 + $0x4d4] ss:$28 sps:$4 sm:$0xff]   ;;  %v7635_v29 = vld [vmem:[#allocation14 + $0x4dc] ss:$28 sps:$4 sm:$0xff]  }
 0x398   :  { %v7275_v31 = vadd.f32 %v2498_v46, %v1106_v23  ;;  %v7279_v33 = vadd.f32 %v2584_v59, %v1114_v25  ;;  %v2500_v34 = vpop.f32.mrb[2].mxu1  ;;  %v2586_v35 = vpop.f32.mrb[14].mxu0  ;;  %v7638_v46 = vld [vmem:[#allocation14 + $0x50c] ss:$28 sps:$4 sm:$0xff]   ;;  %v7641_v59 = vld [vmem:[#allocation14 + $0x514] ss:$28 sps:$4 sm:$0xff]  }
 0x399   :  { %vm2763_vm12 = vcmp.gt.f32.partialorder %v7274_v30, 0.0  ;;  %v2779_v36 = vmul.f32 0.2, %v7274_v30  ;;  %vm2765_vm13 = vcmp.gt.f32.partialorder %v7278_v48, 0.0  ;;  %v2781_v53 = vmul.f32 0.2, %v7278_v48 }
 0x39a   :  { %vm2764_vm14 = vcmp.gt.f32.partialorder %v7275_v31, 0.0  ;;  %v2780_v38 = vmul.f32 0.2, %v7275_v31  ;;  %vm2766_vm15 = vcmp.gt.f32.partialorder %v7279_v33, 0.0  ;;  %v2782_v39 = vmul.f32 0.2, %v7279_v33 }
 0x39b   :  { %v7276_v40 = vadd.f32 %v2500_v34, %v1102_v18  ;;  %v7280_v42 = vadd.f32 %v2586_v35, %v1110_v22  ;;  %v2502_v19 = vpop.f32.mrb[3].mxu1  ;;  %v2588_v20 = vpop.f32.mrb[15].mxu0  ;;  %v2795_v21 = vsel %vm2763_vm12, %v7274_v30, %v2779_v36  ;;  %v2797_v24 = vsel %vm2765_vm13, %v7278_v48, %v2781_v53  ;;  %v7626_v18 = vld [vmem:[#allocation14 + $0x49c] ss:$28 sps:$4 sm:$0xff]   ;;  %v7629_v22 = vld [vmem:[#allocation14 + $0x4a4] ss:$28 sps:$4 sm:$0xff]  }
 0x39c   :  { %v7277_v26 = vadd.f32 %v2502_v19, %v1106_v23  ;;  %v7281_v27 = vadd.f32 %v2588_v20, %v1114_v25  ;;  %v2796_v50 = vsel %vm2764_vm14, %v7275_v31, %v2780_v38  ;;  %v2798_v51 = vsel %vm2766_vm15, %v7279_v33, %v2782_v39  ;;  %v7624_v23 = vld [vmem:[#allocation14 + $0x498] ss:$28 sps:$4 sm:$0xff]   ;;  %v7627_v25 = vld [vmem:[#allocation14 + $0x4a0] ss:$28 sps:$4 sm:$0xff]   ;;  %v7630_v30 = vld [vmem:[#allocation14 + $0x4d0] ss:$28 sps:$4 sm:$0xff]  }
 0x39d   :  { %vm2771_vm0 = vcmp.gt.f32.partialorder %v7276_v40, 0.0  ;;  %v2787_v43 = vmul.f32 0.2, %v7276_v40  ;;  %vm2773_vm1 = vcmp.gt.f32.partialorder %v7280_v42, 0.0  ;;  %v2789_v44 = vmul.f32 0.2, %v7280_v42 }
 0x39e   :  { %vm2772_vm2 = vcmp.gt.f32.partialorder %v7277_v26, 0.0  ;;  %v2788_v47 = vmul.f32 0.2, %v7277_v26  ;;  %vm2774_vm3 = vcmp.gt.f32.partialorder %v7281_v27, 0.0  ;;  %v2790_v49 = vmul.f32 0.2, %v7281_v27 }
 0x39f   :  { %v2803_v52 = vsel %vm2771_vm0, %v7276_v40, %v2787_v43  ;;  %v2805_v54 = vsel %vm2773_vm1, %v7280_v42, %v2789_v44  ;;  %v7633_v48 = vld [vmem:[#allocation14 + $0x4d8] ss:$28 sps:$4 sm:$0xff]   ;;  %v7636_v31 = vld [vmem:[#allocation14 + $0x508] ss:$28 sps:$4 sm:$0xff]   ;;  %v7639_v33 = vld [vmem:[#allocation14 + $0x510] ss:$28 sps:$4 sm:$0xff]  }
 0x3a0   :  { %v8676_v55 = vpack.c.bf16 %v2803_v52, %v2795_v21  ;;  %v8678_v56 = vpack.c.bf16 %v2805_v54, %v2797_v24  ;;  %v2804_v57 = vsel %vm2772_vm2, %v7277_v26, %v2788_v47  ;;  %v2806_v58 = vsel %vm2774_vm3, %v7281_v27, %v2790_v49  ;;  %v7644_v34 = vld [vmem:[#allocation14 + $0x544] ss:$28 sps:$4 sm:$0xff]   ;;  %v7647_v35 = vld [vmem:[#allocation14 + $0x54c] ss:$28 sps:$4 sm:$0xff]   ;;  %v7650_v38 = vld [vmem:[#allocation14 + $0x57c] ss:$28 sps:$4 sm:$0xff]  }
 0x3a1   :  { %v8680_v60 = vpack.c.bf16 %v2804_v57, %v2796_v50  ;;  %v8682_v61 = vpack.c.bf16 %v2806_v58, %v2798_v51  ;;  %v7642_v36 = vld [vmem:[#allocation14 + $0x540] ss:$28 sps:$4 sm:$0xff]   ;;  %v7645_v53 = vld [vmem:[#allocation14 + $0x548] ss:$28 sps:$4 sm:$0xff]   ;;  %v7648_v40 = vld [vmem:[#allocation14 + $0x578] ss:$28 sps:$4 sm:$0xff]  }
 0x3a2   :  { %v7653_v39 = vld [vmem:[#allocation14 + $0x584] ss:$28 sps:$4 sm:$0xff]   ;;  %v7656_v19 = vld [vmem:[#allocation14 + $0x5b4] ss:$28 sps:$4 sm:$0xff]   ;;  %v7659_v20 = vld [vmem:[#allocation14 + $0x5bc] ss:$28 sps:$4 sm:$0xff]  }
 0x3a3   :  { %5704 = vmatprep.mubr.bf16.mxu1 %v8680_v60  ;;  %5876 = vmatprep.mubr.bf16.mxu0 %v8680_v60  ;;  %v7651_v42 = vld [vmem:[#allocation14 + $0x580] ss:$28 sps:$4 sm:$0xff]   ;;  %v7654_v21 = vld [vmem:[#allocation14 + $0x5b0] ss:$28 sps:$4 sm:$0xff]   ;;  %v7657_v24 = vld [vmem:[#allocation14 + $0x5b8] ss:$28 sps:$4 sm:$0xff]  }
 0x3a4   :  { %5705 = vmatmul.mubr.bf16.vlgmr.msra.gmra.mrb[8].mxu1 %v8676_v55  ;;  %5877 = vmatmul.mubr.bf16.vlgmr.msra.gmra.mrb[20].mxu0 %v8676_v55  ;;  %v7662_v26 = vld [vmem:[#allocation14 + $0x5ec] ss:$28 sps:$4 sm:$0xff]   ;;  %v7665_v27 = vld [vmem:[#allocation14 + $0x5f4] ss:$28 sps:$4 sm:$0xff]   ;;  %v7668_v47 = vld [vmem:[#allocation14 + $0x624] ss:$28 sps:$4 sm:$0xff]  }
 0x3a5   :  { %5716 = vmatpush1.bf16.msra.mxu1 %v7594_v63  ;;  %5888 = vmatpush1.bf16.msra.mxu0 %v7597_v0  ;;  %v7660_v43 = vld [vmem:[#allocation14 + $0x5e8] ss:$28 sps:$4 sm:$0xff]   ;;  %v7663_v44 = vld [vmem:[#allocation14 + $0x5f0] ss:$28 sps:$4 sm:$0xff]   ;;  %v7666_v50 = vld [vmem:[#allocation14 + $0x620] ss:$28 sps:$4 sm:$0xff]  }
 0x3a6   :  { %5747 = vmatprep.mubr.bf16.mxu1 %v8682_v61  ;;  %5919 = vmatprep.mubr.bf16.mxu0 %v8682_v61  ;;  %v7671_v49 = vld [vmem:[#allocation14 + $0x62c] ss:$28 sps:$4 sm:$0xff]   ;;  %v7674_v52 = vld [vmem:[#allocation14 + $0x65c] ss:$28 sps:$4 sm:$0xff]   ;;  %v7677_v54 = vld [vmem:[#allocation14 + $0x664] ss:$28 sps:$4 sm:$0xff]  }
 0x3a7   :  { %5717 = vmatprep.subr.bf16.mxu1 %v7602_v2  ;;  %5889 = vmatprep.subr.bf16.mxu0 %v7605_v3  ;;  %v7669_v51 = vld [vmem:[#allocation14 + $0x628] ss:$28 sps:$4 sm:$0xff]   ;;  %v7672_v57 = vld [vmem:[#allocation14 + $0x658] ss:$28 sps:$4 sm:$0xff]   ;;  %v7675_v58 = vld [vmem:[#allocation14 + $0x660] ss:$28 sps:$4 sm:$0xff]  }
 0x3a8   :  { %v7680_v63 = vld [vmem:[#allocation14 + $0x694] ss:$28 sps:$4 sm:$0xff]   ;;  %v7683_v0 = vld [vmem:[#allocation14 + $0x69c] ss:$28 sps:$4 sm:$0xff]  }
 0x3a9   :  { %5718 = vmatpush1.bf16.msra.mxu1 %v7600_v4  ;;  %5890 = vmatpush1.bf16.msra.mxu0 %v7603_v5  ;;  %v7678_v2 = vld [vmem:[#allocation14 + $0x690] ss:$28 sps:$4 sm:$0xff]   ;;  %v7681_v3 = vld [vmem:[#allocation14 + $0x698] ss:$28 sps:$4 sm:$0xff]  }
 0x3aa   :  { %5719 = vmatprep.subr.bf16.mxu1 %v7608_v6  ;;  %5891 = vmatprep.subr.bf16.mxu0 %v7611_v7  ;;  %v7686_v4 = vld [vmem:[#allocation14 + $0x6cc] ss:$28 sps:$4 sm:$0xff]   ;;  %v7689_v5 = vld [vmem:[#allocation14 + $0x6d4] ss:$28 sps:$4 sm:$0xff]  }
 0x3ab   :  { %v7684_v6 = vld [vmem:[#allocation14 + $0x6c8] ss:$28 sps:$4 sm:$0xff]   ;;  %v7687_v7 = vld [vmem:[#allocation14 + $0x6d0] ss:$28 sps:$4 sm:$0xff]  }
 0x3ad   :  { %5720 = vmatpush1.bf16.msra.mxu1 %v7606_v8  ;;  %5892 = vmatpush1.bf16.msra.mxu0 %v7609_v9  ;;  %v7692_v8 = vld [vmem:[#allocation14 + $0x704] ss:$28 sps:$4 sm:$0xff]   ;;  %v7695_v9 = vld [vmem:[#allocation14 + $0x70c] ss:$28 sps:$4 sm:$0xff]  }
 0x3ae   :  { %5721 = vmatprep.subr.bf16.mxu1 %v7614_v10  ;;  %5893 = vmatprep.subr.bf16.mxu0 %v7617_v11  ;;  %v7690_v10 = vld [vmem:[#allocation14 + $0x700] ss:$28 sps:$4 sm:$0xff]   ;;  %v7693_v11 = vld [vmem:[#allocation14 + $0x708] ss:$28 sps:$4 sm:$0xff]  }
 0x3b1   :  { %5722 = vmatpush1.bf16.msra.mxu1 %v7612_v12  ;;  %5894 = vmatpush1.bf16.msra.mxu0 %v7615_v13  ;;  %v7698_v12 = vld [vmem:[#allocation14 + $0x73c] ss:$28 sps:$4 sm:$0xff]   ;;  %v7701_v13 = vld [vmem:[#allocation14 + $0x744] ss:$28 sps:$4 sm:$0xff]  }
 0x3b2   :  { %5723 = vmatprep.subr.bf16.mxu1 %v7620_v14  ;;  %5895 = vmatprep.subr.bf16.mxu0 %v7623_v17  ;;  %v7696_v14 = vld [vmem:[#allocation14 + $0x738] ss:$28 sps:$4 sm:$0xff]   ;;  %v7699_v17 = vld [vmem:[#allocation14 + $0x740] ss:$28 sps:$4 sm:$0xff]  }
 0x3b5   :  { %5724 = vmatpush1.bf16.msra.mxu1 %v7618_v15  ;;  %5896 = vmatpush1.bf16.msra.mxu0 %v7621_v45  ;;  %v7704_v15 = vld [vmem:[#allocation14 + $0x774] ss:$28 sps:$4 sm:$0xff]   ;;  %v7707_v45 = vld [vmem:[#allocation14 + $0x77c] ss:$28 sps:$4 sm:$0xff]  }
 0x3b6   :  { %5725 = vmatprep.subr.bf16.mxu1 %v7626_v18  ;;  %5897 = vmatprep.subr.bf16.mxu0 %v7629_v22  ;;  %v7702_v18 = vld [vmem:[#allocation14 + $0x770] ss:$28 sps:$4 sm:$0xff]   ;;  %v7705_v22 = vld [vmem:[#allocation14 + $0x778] ss:$28 sps:$4 sm:$0xff]  }
 0x3b9   :  { %5726 = vmatpush1.bf16.msra.mxu1 %v7624_v23  ;;  %5898 = vmatpush1.bf16.msra.mxu0 %v7627_v25  ;;  %v7710_v23 = vld [vmem:[#allocation14 + $0x7ac] ss:$28 sps:$4 sm:$0xff]   ;;  %v7713_v25 = vld [vmem:[#allocation14 + $0x7b4] ss:$28 sps:$4 sm:$0xff]  }
 0x3ba   :  { %5727 = vmatprep.subr.bf16.mxu1 %v7632_v28  ;;  %5899 = vmatprep.subr.bf16.mxu0 %v7635_v29  ;;  %v7708_v28 = vld [vmem:[#allocation14 + $0x7a8] ss:$28 sps:$4 sm:$0xff]   ;;  %v7711_v29 = vld [vmem:[#allocation14 + $0x7b0] ss:$28 sps:$4 sm:$0xff]  }
 0x3bd   :  { %5728 = vmatpush1.bf16.msra.mxu1 %v7630_v30  ;;  %5900 = vmatpush1.bf16.msra.mxu0 %v7633_v48  ;;  %v7716_v30 = vld [vmem:[#allocation14 + $0x7e4] ss:$28 sps:$4 sm:$0xff]   ;;  %v7719_v48 = vld [vmem:[#allocation14 + $0x7ec] ss:$28 sps:$4 sm:$0xff]  }
 0x3be   :  { %5729 = vmatprep.subr.bf16.mxu1 %v7638_v46  ;;  %5901 = vmatprep.subr.bf16.mxu0 %v7641_v59  ;;  %v7714_v46 = vld [vmem:[#allocation14 + $0x7e0] ss:$28 sps:$4 sm:$0xff]   ;;  %v7717_v59 = vld [vmem:[#allocation14 + $0x7e8] ss:$28 sps:$4 sm:$0xff]  }
 0x3c1   :  { %5730 = vmatpush1.bf16.msra.mxu1 %v7636_v31  ;;  %5902 = vmatpush1.bf16.msra.mxu0 %v7639_v33  ;;  %v7722_v31 = vld [vmem:[#allocation14 + $0x81c] ss:$28 sps:$4 sm:$0xff]   ;;  %v7725_v33 = vld [vmem:[#allocation14 + $0x824] ss:$28 sps:$4 sm:$0xff]  }
 0x3c2   :  { %5731 = vmatprep.subr.bf16.mxu1 %v7644_v34  ;;  %5903 = vmatprep.subr.bf16.mxu0 %v7647_v35  ;;  %v7720_v34 = vld [vmem:[#allocation14 + $0x818] ss:$28 sps:$4 sm:$0xff]   ;;  %v7723_v35 = vld [vmem:[#allocation14 + $0x820] ss:$28 sps:$4 sm:$0xff]  }
 0x3c5   :  { %5732 = vmatpush1.bf16.msra.mxu1 %v7642_v36  ;;  %5904 = vmatpush1.bf16.msra.mxu0 %v7645_v53  ;;  %v7728_v36 = vld [vmem:[#allocation14 + $0x854] ss:$28 sps:$4 sm:$0xff]   ;;  %v7731_v53 = vld [vmem:[#allocation14 + $0x85c] ss:$28 sps:$4 sm:$0xff]  }
 0x3c6   :  { %5733 = vmatprep.subr.bf16.mxu1 %v7650_v38  ;;  %5905 = vmatprep.subr.bf16.mxu0 %v7653_v39  ;;  %v7726_v38 = vld [vmem:[#allocation14 + $0x850] ss:$28 sps:$4 sm:$0xff]   ;;  %v7729_v39 = vld [vmem:[#allocation14 + $0x858] ss:$28 sps:$4 sm:$0xff]  }
 0x3c9   :  { %5734 = vmatpush1.bf16.msra.mxu1 %v7648_v40  ;;  %5906 = vmatpush1.bf16.msra.mxu0 %v7651_v42  ;;  %v7734_v40 = vld [vmem:[#allocation14 + $0x88c] ss:$28 sps:$4 sm:$0xff]   ;;  %v7737_v42 = vld [vmem:[#allocation14 + $0x894] ss:$28 sps:$4 sm:$0xff]  }
 0x3ca   :  { %5735 = vmatprep.subr.bf16.mxu1 %v7656_v19  ;;  %5907 = vmatprep.subr.bf16.mxu0 %v7659_v20  ;;  %v7732_v19 = vld [vmem:[#allocation14 + $0x888] ss:$28 sps:$4 sm:$0xff]   ;;  %v7735_v20 = vld [vmem:[#allocation14 + $0x890] ss:$28 sps:$4 sm:$0xff]  }
 0x3cd   :  { %5736 = vmatpush1.bf16.msra.mxu1 %v7654_v21  ;;  %5908 = vmatpush1.bf16.msra.mxu0 %v7657_v24  ;;  %v7740_v21 = vld [vmem:[#allocation14 + $0x8c4] ss:$28 sps:$4 sm:$0xff]   ;;  %v7743_v24 = vld [vmem:[#allocation14 + $0x8cc] ss:$28 sps:$4 sm:$0xff]  }
 0x3ce   :  { %5737 = vmatprep.subr.bf16.mxu1 %v7662_v26  ;;  %5909 = vmatprep.subr.bf16.mxu0 %v7665_v27  ;;  %v7738_v26 = vld [vmem:[#allocation14 + $0x8c0] ss:$28 sps:$4 sm:$0xff]   ;;  %v7741_v27 = vld [vmem:[#allocation14 + $0x8c8] ss:$28 sps:$4 sm:$0xff]  }
 0x3d1   :  { %5738 = vmatpush1.bf16.msra.mxu1 %v7660_v43  ;;  %5910 = vmatpush1.bf16.msra.mxu0 %v7663_v44  ;;  %v7746_v43 = vld [vmem:[#allocation14 + $0x8fc] ss:$28 sps:$4 sm:$0xff]   ;;  %v7749_v44 = vld [vmem:[#allocation14 + $0x904] ss:$28 sps:$4 sm:$0xff]  }
 0x3d2   :  { %5739 = vmatprep.subr.bf16.mxu1 %v7668_v47  ;;  %5911 = vmatprep.subr.bf16.mxu0 %v7671_v49  ;;  %v7744_v47 = vld [vmem:[#allocation14 + $0x8f8] ss:$28 sps:$4 sm:$0xff]   ;;  %v7747_v49 = vld [vmem:[#allocation14 + $0x900] ss:$28 sps:$4 sm:$0xff]  }
 0x3d5   :  { %5740 = vmatpush1.bf16.msra.mxu1 %v7666_v50  ;;  %5912 = vmatpush1.bf16.msra.mxu0 %v7669_v51  ;;  %v7752_v50 = vld [vmem:[#allocation14 + $0x934] ss:$28 sps:$4 sm:$0xff]   ;;  %v7755_v51 = vld [vmem:[#allocation14 + $0x93c] ss:$28 sps:$4 sm:$0xff]  }
 0x3d6   :  { %5741 = vmatprep.subr.bf16.mxu1 %v7674_v52  ;;  %5913 = vmatprep.subr.bf16.mxu0 %v7677_v54  ;;  %v7750_v52 = vld [vmem:[#allocation14 + $0x930] ss:$28 sps:$4 sm:$0xff]   ;;  %v7753_v54 = vld [vmem:[#allocation14 + $0x938] ss:$28 sps:$4 sm:$0xff]  }
 0x3d9   :  { %5742 = vmatpush1.bf16.msra.mxu1 %v7672_v57  ;;  %5914 = vmatpush1.bf16.msra.mxu0 %v7675_v58  ;;  %v7758_v57 = vld [vmem:[#allocation14 + $0x96c] ss:$28 sps:$4 sm:$0xff]   ;;  %v7761_v58 = vld [vmem:[#allocation14 + $0x974] ss:$28 sps:$4 sm:$0xff]  }
 0x3da   :  { %5743 = vmatprep.subr.bf16.mxu1 %v7680_v63  ;;  %5915 = vmatprep.subr.bf16.mxu0 %v7683_v0  ;;  %v7756_v63 = vld [vmem:[#allocation14 + $0x968] ss:$28 sps:$4 sm:$0xff]   ;;  %v7759_v0 = vld [vmem:[#allocation14 + $0x970] ss:$28 sps:$4 sm:$0xff]  }
 0x3dd   :  { %5744 = vmatpush1.bf16.msra.mxu1 %v7678_v2  ;;  %5916 = vmatpush1.bf16.msra.mxu0 %v7681_v3  ;;  %v7764_v2 = vld [vmem:[#allocation14 + $0x9a4] ss:$28 sps:$4 sm:$0xff]   ;;  %v7767_v3 = vld [vmem:[#allocation14 + $0x9ac] ss:$28 sps:$4 sm:$0xff]  }
 0x3de   :  { %5745 = vmatprep.subr.bf16.mxu1 %v7686_v4  ;;  %5917 = vmatprep.subr.bf16.mxu0 %v7689_v5  ;;  %v1117_v4 = vsub.s32 4, %v8579_v32  ;;  %v1125_v5 = vsub.s32 6, %v8579_v32 }
 0x3e1   :  { %5746 = vmatpush1.bf16.msra.mxu1 %v7684_v6  ;;  %5918 = vmatpush1.bf16.msra.mxu0 %v7687_v7  ;;  %v1121_v6 = vsub.s32 5, %v8579_v32  ;;  %v7762_v7 = vld [vmem:[#allocation14 + $0x9a0] ss:$28 sps:$4 sm:$0xff]  }
 0x3e2   :  { %5758 = vmatprep.subr.bf16.mxu1 %v7692_v8  ;;  %5930 = vmatprep.subr.bf16.mxu0 %v7695_v9  ;;  %v7765_v8 = vld [vmem:[#allocation14 + $0x9a8] ss:$28 sps:$4 sm:$0xff]   ;;  %v1129_v9 = vsub.s32 7, %v8579_v32 }
 0x3e4   :  { %5748 = vmatmul.mubr.bf16.vlgmr.msra.gmra.mrb[8].mxu1 %v8678_v56  ;;  %5920 = vmatmul.mubr.bf16.vlgmr.msra.gmra.mrb[20].mxu0 %v8678_v56 }
 0x3e5   :  { %5759 = vmatpush1.bf16.msra.mxu1 %v7690_v10  ;;  %5931 = vmatpush1.bf16.msra.mxu0 %v7693_v11  ;;  %v7770_v10 = vld [vmem:[#allocation14 + $0x9dc] ss:$28 sps:$4 sm:$0xff]   ;;  %v7773_v11 = vld [vmem:[#allocation14 + $0x9e4] ss:$28 sps:$4 sm:$0xff]  }
 0x3e6   :  { %5760 = vmatprep.subr.bf16.mxu1 %v7698_v12  ;;  %5932 = vmatprep.subr.bf16.mxu0 %v7701_v13  ;;  %v1118_v12 = vrot.slane %v8664_v16, %v1117_v4  ;;  %v1126_v13 = vrot.slane %v8664_v16, %v1125_v5 }
 0x3e9   :  { %5761 = vmatpush1.bf16.msra.mxu1 %v7696_v14  ;;  %5933 = vmatpush1.bf16.msra.mxu0 %v7699_v17  ;;  %v1122_v14 = vrot.slane %v8664_v16, %v1121_v6  ;;  %v7768_v17 = vld [vmem:[#allocation14 + $0x9d8] ss:$28 sps:$4 sm:$0xff]  }
 0x3ea   :  { %5762 = vmatprep.subr.bf16.mxu1 %v7704_v15  ;;  %5934 = vmatprep.subr.bf16.mxu0 %v7707_v45  ;;  %v7771_v15 = vld [vmem:[#allocation14 + $0x9e0] ss:$28 sps:$4 sm:$0xff]   ;;  %v1130_v45 = vrot.slane %v8664_v16, %v1129_v9 }
 0x3ed   :  { %5763 = vmatpush1.bf16.msra.mxu1 %v7702_v18  ;;  %5935 = vmatpush1.bf16.msra.mxu0 %v7705_v22  ;;  %v7776_v22 = vld [vmem:[#allocation14 + $0xa14] ss:$28 sps:$4 sm:$0xff]  }
 0x3ee   :  { %5764 = vmatprep.subr.bf16.mxu1 %v7710_v23  ;;  %5936 = vmatprep.subr.bf16.mxu0 %v7713_v25  ;;  %v7779_v23 = vld [vmem:[#allocation14 + $0xa1c] ss:$28 sps:$4 sm:$0xff]  }
 0x3f1   :  { %5765 = vmatpush1.bf16.msra.mxu1 %v7708_v28  ;;  %5937 = vmatpush1.bf16.msra.mxu0 %v7711_v29 }
 0x3f2   :  { %5766 = vmatprep.subr.bf16.mxu1 %v7716_v30  ;;  %5938 = vmatprep.subr.bf16.mxu0 %v7719_v48 }
 0x3f5   :  { %5767 = vmatpush1.bf16.msra.mxu1 %v7714_v46  ;;  %5939 = vmatpush1.bf16.msra.mxu0 %v7717_v59 }
 0x3f6   :  { %5768 = vmatprep.subr.bf16.mxu1 %v7722_v31  ;;  %5940 = vmatprep.subr.bf16.mxu0 %v7725_v33  ;;  %v7774_v31 = vld [vmem:[#allocation14 + $0xa10] ss:$28 sps:$4 sm:$0xff]  }
 0x3f9   :  { %5769 = vmatpush1.bf16.msra.mxu1 %v7720_v34  ;;  %5941 = vmatpush1.bf16.msra.mxu0 %v7723_v35 }
 0x3fa   :  { %5770 = vmatprep.subr.bf16.mxu1 %v7728_v36  ;;  %5942 = vmatprep.subr.bf16.mxu0 %v7731_v53  ;;  %v7777_v53 = vld [vmem:[#allocation14 + $0xa18] ss:$28 sps:$4 sm:$0xff]  }
 0x3fd   :  { %5771 = vmatpush1.bf16.msra.mxu1 %v7726_v38  ;;  %5943 = vmatpush1.bf16.msra.mxu0 %v7729_v39  ;;  %v7782_v38 = vld [vmem:[#allocation14 + $0xa4c] ss:$28 sps:$4 sm:$0xff]   ;;  %v7785_v39 = vld [vmem:[#allocation14 + $0xa54] ss:$28 sps:$4 sm:$0xff]  }
 0x3fe   :  { %5772 = vmatprep.subr.bf16.mxu1 %v7734_v40  ;;  %5944 = vmatprep.subr.bf16.mxu0 %v7737_v42 }
 0x401   :  { %5773 = vmatpush1.bf16.msra.mxu1 %v7732_v19  ;;  %5945 = vmatpush1.bf16.msra.mxu0 %v7735_v20  ;;  %v7780_v19 = vld [vmem:[#allocation14 + $0xa48] ss:$28 sps:$4 sm:$0xff]   ;;  %v7783_v20 = vld [vmem:[#allocation14 + $0xa50] ss:$28 sps:$4 sm:$0xff]  }
 0x402   :  { %5774 = vmatprep.subr.bf16.mxu1 %v7740_v21  ;;  %5946 = vmatprep.subr.bf16.mxu0 %v7743_v24 }
 0x405   :  { %5775 = vmatpush1.bf16.msra.mxu1 %v7738_v26  ;;  %5947 = vmatpush1.bf16.msra.mxu0 %v7741_v27 }
 0x406   :  { %5776 = vmatprep.subr.bf16.mxu1 %v7746_v43  ;;  %5948 = vmatprep.subr.bf16.mxu0 %v7749_v44 }
 0x409   :  { %5777 = vmatpush1.bf16.msra.mxu1 %v7744_v47  ;;  %5949 = vmatpush1.bf16.msra.mxu0 %v7747_v49  ;;  %v7788_v47 = vld [vmem:[#allocation14 + $0xa84] ss:$28 sps:$4 sm:$0xff]   ;;  %v7791_v49 = vld [vmem:[#allocation14 + $0xa8c] ss:$28 sps:$4 sm:$0xff]  }
 0x40a   :  { %5778 = vmatprep.subr.bf16.mxu1 %v7752_v50  ;;  %5950 = vmatprep.subr.bf16.mxu0 %v7755_v51 }
 0x40d   :  { %5779 = vmatpush1.bf16.msra.mxu1 %v7750_v52  ;;  %5951 = vmatpush1.bf16.msra.mxu0 %v7753_v54 }
 0x40e   :  { %5780 = vmatprep.subr.bf16.mxu1 %v7758_v57  ;;  %5952 = vmatprep.subr.bf16.mxu0 %v7761_v58 }
 0x411   :  { %5781 = vmatpush1.bf16.msra.mxu1 %v7756_v63  ;;  %5953 = vmatpush1.bf16.msra.mxu0 %v7759_v0 }
 0x412   :  { %5782 = vmatprep.subr.bf16.mxu1 %v7764_v2  ;;  %5954 = vmatprep.subr.bf16.mxu0 %v7767_v3 }
 0x415   :  { %5783 = vmatpush1.bf16.msra.mxu1 %v7762_v7  ;;  %5955 = vmatpush1.bf16.msra.mxu0 %v7765_v8 }
 0x416   :  { %5784 = vmatprep.subr.bf16.mxu1 %v7770_v10  ;;  %5956 = vmatprep.subr.bf16.mxu0 %v7773_v11  ;;  %v2668_v18 = vpop.f32.mrb[4].mxu1  ;;  %v7786_v11 = vld [vmem:[#allocation14 + $0xa80] ss:$28 sps:$4 sm:$0xff]  }
 0x417   :  { %v7282_v25 = vadd.f32 %v2668_v18, %v1118_v12  ;;  %v2754_v28 = vpop.f32.mrb[16].mxu0  ;;  %v2670_v29 = vpop.f32.mrb[5].mxu1  ;;  %v7800_v18 = vld [vmem:[#allocation14 + $0xaf4] ss:$28 sps:$4 sm:$0xff]  }
 0x418   :  { %v7286_v30 = vadd.f32 %v2754_v28, %v1126_v13  ;;  %v7283_v48 = vadd.f32 %v2670_v29, %v1122_v14  ;;  %v2756_v46 = vpop.f32.mrb[17].mxu0  ;;  %v2672_v59 = vpop.f32.mrb[6].mxu1  ;;  %v7806_v28 = vld [vmem:[#allocation14 + $0xb2c] ss:$28 sps:$4 sm:$0xff]   ;;  %v7809_v29 = vld [vmem:[#allocation14 + $0xb34] ss:$28 sps:$4 sm:$0xff]  }
 0x419   :  { %v2783_v33 = vmul.f32 0.2, %v7282_v25  ;;  %5785 = vmatpush1.bf16.msra.mxu1 %v7768_v17  ;;  %5957 = vmatpush1.bf16.msra.mxu0 %v7771_v15  ;;  %v7287_v34 = vadd.f32 %v2756_v46, %v1130_v45  ;;  %v7284_v35 = vadd.f32 %v2672_v59, %v1118_v12  ;;  %v2758_v36 = vpop.f32.mrb[18].mxu0  ;;  %v2674_v16 = vpop.f32.mrb[7].mxu1  ;;  %vm2767_vm4 = vcmp.gt.f32.partialorder %v7282_v25, 0.0 }
 0x41a   :  { %5786 = vmatprep.subr.bf16.mxu1 %v7776_v22  ;;  %5958 = vmatprep.subr.bf16.mxu0 %v7779_v23  ;;  %vm2769_vm5 = vcmp.gt.f32.partialorder %v7286_v30, 0.0  ;;  %v2785_v40 = vmul.f32 0.2, %v7286_v30  ;;  %v2760_v42 = vpop.f32.mrb[19].mxu0  ;;  %vm2768_vm7 = vcmp.gt.f32.partialorder %v7283_v48, 0.0  ;;  %v7288_v26 = vadd.f32 %v2758_v36, %v1126_v13 }
 0x41b   :  { %vm2775_vm6 = vcmp.gt.f32.partialorder %v7284_v35, 0.0  ;;  %v2784_v21 = vmul.f32 0.2, %v7283_v48  ;;  %v2791_v24 = vmul.f32 0.2, %v7284_v35  ;;  %v2799_v27 = vsel %vm2767_vm4, %v7282_v25, %v2783_v33 }
 0x41c   :  { %vm2770_vm8 = vcmp.gt.f32.partialorder %v7287_v34, 0.0  ;;  %v7285_v43 = vadd.f32 %v2674_v16, %v1122_v14  ;;  %v7289_v44 = vadd.f32 %v2760_v42, %v1130_v45  ;;  %v2786_v50 = vmul.f32 0.2, %v7287_v34  ;;  %v7789_v12 = vld [vmem:[#allocation14 + $0xa88] ss:$28 sps:$4 sm:$0xff]  }
 0x41d   :  { %5787 = vmatpush1.bf16.msra.mxu1 %v7774_v31  ;;  %5959 = vmatpush1.bf16.msra.mxu0 %v7777_v53  ;;  %v2807_v51 = vsel %vm2775_vm6, %v7284_v35, %v2791_v24  ;;  %vm2777_vm9 = vcmp.gt.f32.partialorder %v7288_v26, 0.0  ;;  %v2793_v52 = vmul.f32 0.2, %v7288_v26  ;;  %v2801_v58 = vsel %vm2769_vm5, %v7286_v30, %v2785_v40  ;;  %v7794_v14 = vld [vmem:[#allocation14 + $0xabc] ss:$28 sps:$4 sm:$0xff]  }
 0x41e   :  { %5788 = vmatprep.subr.bf16.mxu1 %v7782_v38  ;;  %5960 = vmatprep.subr.bf16.mxu0 %v7785_v39  ;;  %v8707_v54 = vpack.c.bf16 %v2807_v51, %v2799_v27  ;;  %vm2776_vm10 = vcmp.gt.f32.partialorder %v7285_v43, 0.0  ;;  %v2792_v57 = vmul.f32 0.2, %v7285_v43  ;;  %vm2778_vm11 = vcmp.gt.f32.partialorder %v7289_v44, 0.0  ;;  %v7797_v17 = vld [vmem:[#allocation14 + $0xac4] ss:$28 sps:$4 sm:$0xff]  }
 0x41f   :  { %v2809_v63 = vsel %vm2777_vm9, %v7288_v26, %v2793_v52  ;;  %v2794_v0 = vmul.f32 0.2, %v7289_v44  ;;  %v2800_v2 = vsel %vm2768_vm7, %v7283_v48, %v2784_v21  ;;  %v2802_v8 = vsel %vm2770_vm8, %v7287_v34, %v2786_v50  ;;  %v7792_v15 = vld [vmem:[#allocation14 + $0xab8] ss:$28 sps:$4 sm:$0xff]   ;;  %v7795_v45 = vld [vmem:[#allocation14 + $0xac0] ss:$28 sps:$4 sm:$0xff]  }
 0x420   :  { %v8711_v3 = vpack.c.bf16 %v2809_v63, %v2801_v58  ;;  %v2808_v7 = vsel %vm2776_vm10, %v7285_v43, %v2792_v57  ;;  %v7803_v22 = vld [vmem:[#allocation14 + $0xafc] ss:$28 sps:$4 sm:$0xff]   ;;  %v7798_v23 = vld [vmem:[#allocation14 + $0xaf0] ss:$28 sps:$4 sm:$0xff]   ;;  %v7804_v30 = vld [vmem:[#allocation14 + $0xb28] ss:$28 sps:$4 sm:$0xff]  }
 0x421   :  { %5789 = vmatpush1.bf16.msra.mxu1 %v7780_v19  ;;  %5961 = vmatpush1.bf16.msra.mxu0 %v7783_v20  ;;  %v8714_v9 = vpack.c.bf16 %v2808_v7, %v2800_v2  ;;  %v2810_v10 = vsel %vm2778_vm11, %v7289_v44, %v2794_v0  ;;  %v7801_v25 = vld [vmem:[#allocation14 + $0xaf8] ss:$28 sps:$4 sm:$0xff]   ;;  %v7807_v48 = vld [vmem:[#allocation14 + $0xb30] ss:$28 sps:$4 sm:$0xff]   ;;  %v7812_v46 = vld [vmem:[#allocation14 + $0xb64] ss:$28 sps:$4 sm:$0xff]  }
 0x422   :  { %5801 = vmatprep.subr.bf16.mxu1 %v7788_v47  ;;  %5973 = vmatprep.subr.bf16.mxu0 %v7791_v49  ;;  %v8716_v13 = vpack.c.bf16 %v2810_v10, %v2802_v8  ;;  %v7815_v59 = vld [vmem:[#allocation14 + $0xb6c] ss:$28 sps:$4 sm:$0xff]   ;;  %v7810_v31 = vld [vmem:[#allocation14 + $0xb60] ss:$28 sps:$4 sm:$0xff]   ;;  %v7816_v36 = vld [vmem:[#allocation14 + $0xb98] ss:$28 sps:$4 sm:$0xff]  }
 0x423   :  { %5790 = vmatprep.mubr.bf16.mxu1 %v8714_v9  ;;  %5962 = vmatprep.mubr.bf16.mxu0 %v8714_v9  ;;  %v7813_v33 = vld [vmem:[#allocation14 + $0xb68] ss:$28 sps:$4 sm:$0xff]   ;;  %v7818_v34 = vld [vmem:[#allocation14 + $0xb9c] ss:$28 sps:$4 sm:$0xff]   ;;  %v7824_v53 = vld [vmem:[#allocation14 + $0xbd4] ss:$28 sps:$4 sm:$0xff]  }
 0x424   :  { %5791 = vmatmul.mubr.bf16.vlgmr.msra.gmra.mrb[8].mxu1 %v8707_v54  ;;  %5963 = vmatmul.mubr.bf16.vlgmr.msra.gmra.mrb[20].mxu0 %v8707_v54  ;;  %v7821_v35 = vld [vmem:[#allocation14 + $0xba4] ss:$28 sps:$4 sm:$0xff]   ;;  %v7827_v38 = vld [vmem:[#allocation14 + $0xbdc] ss:$28 sps:$4 sm:$0xff]   ;;  %v7822_v39 = vld [vmem:[#allocation14 + $0xbd0] ss:$28 sps:$4 sm:$0xff]  }
 0x425   :  { %5802 = vmatpush1.bf16.msra.mxu1 %v7786_v11  ;;  %5974 = vmatpush1.bf16.msra.mxu0 %v7789_v12  ;;  %v7819_v16 = vld [vmem:[#allocation14 + $0xba0] ss:$28 sps:$4 sm:$0xff]   ;;  %v7825_v40 = vld [vmem:[#allocation14 + $0xbd8] ss:$28 sps:$4 sm:$0xff]   ;;  %v7830_v42 = vld [vmem:[#allocation14 + $0xc0c] ss:$28 sps:$4 sm:$0xff]  }
 0x426   :  { %5833 = vmatprep.mubr.bf16.mxu1 %v8716_v13  ;;  %6005 = vmatprep.mubr.bf16.mxu0 %v8716_v13  ;;  %v7833_v19 = vld [vmem:[#allocation14 + $0xc14] ss:$28 sps:$4 sm:$0xff]   ;;  %v7828_v20 = vld [vmem:[#allocation14 + $0xc08] ss:$28 sps:$4 sm:$0xff]   ;;  %v7834_v27 = vld [vmem:[#allocation14 + $0xc40] ss:$28 sps:$4 sm:$0xff]  }
 0x427   :  { %5803 = vmatprep.subr.bf16.mxu1 %v7794_v14  ;;  %5975 = vmatprep.subr.bf16.mxu0 %v7797_v17  ;;  %v7831_v21 = vld [vmem:[#allocation14 + $0xc10] ss:$28 sps:$4 sm:$0xff]   ;;  %v7836_v24 = vld [vmem:[#allocation14 + $0xc44] ss:$28 sps:$4 sm:$0xff]   ;;  %v7842_v44 = vld [vmem:[#allocation14 + $0xc7c] ss:$28 sps:$4 sm:$0xff]  }
 0x428   :  { %v7839_v26 = vld [vmem:[#allocation14 + $0xc4c] ss:$28 sps:$4 sm:$0xff]   ;;  %v7845_v47 = vld [vmem:[#allocation14 + $0xc84] ss:$28 sps:$4 sm:$0xff]   ;;  %v7840_v49 = vld [vmem:[#allocation14 + $0xc78] ss:$28 sps:$4 sm:$0xff]  }
 0x429   :  { %5804 = vmatpush1.bf16.msra.mxu1 %v7792_v15  ;;  %5976 = vmatpush1.bf16.msra.mxu0 %v7795_v45  ;;  %v7837_v43 = vld [vmem:[#allocation14 + $0xc48] ss:$28 sps:$4 sm:$0xff]   ;;  %v7843_v50 = vld [vmem:[#allocation14 + $0xc80] ss:$28 sps:$4 sm:$0xff]   ;;  %v7848_v51 = vld [vmem:[#allocation14 + $0xcb4] ss:$28 sps:$4 sm:$0xff]  }
 0x42a   :  { %5805 = vmatprep.subr.bf16.mxu1 %v7800_v18  ;;  %5977 = vmatprep.subr.bf16.mxu0 %v7803_v22  ;;  %v7851_v52 = vld [vmem:[#allocation14 + $0xcbc] ss:$28 sps:$4 sm:$0xff]   ;;  %v7846_v57 = vld [vmem:[#allocation14 + $0xcb0] ss:$28 sps:$4 sm:$0xff]   ;;  %v7852_v2 = vld [vmem:[#allocation14 + $0xce8] ss:$28 sps:$4 sm:$0xff]  }
 0x42b   :  { %v7849_v58 = vld [vmem:[#allocation14 + $0xcb8] ss:$28 sps:$4 sm:$0xff]   ;;  %v7854_v63 = vld [vmem:[#allocation14 + $0xcec] ss:$28 sps:$4 sm:$0xff]   ;;  %v7860_v8 = vld [vmem:[#allocation14 + $0xd24] ss:$28 sps:$4 sm:$0xff]  }
 0x42c   :  { %v7857_v0 = vld [vmem:[#allocation14 + $0xcf4] ss:$28 sps:$4 sm:$0xff]   ;;  %v7863_v10 = vld [vmem:[#allocation14 + $0xd2c] ss:$28 sps:$4 sm:$0xff]   ;;  %v7858_v11 = vld [vmem:[#allocation14 + $0xd20] ss:$28 sps:$4 sm:$0xff]  }
 0x42d   :  { %5806 = vmatpush1.bf16.msra.mxu1 %v7798_v23  ;;  %5978 = vmatpush1.bf16.msra.mxu0 %v7801_v25  ;;  %v7855_v7 = vld [vmem:[#allocation14 + $0xcf0] ss:$28 sps:$4 sm:$0xff]   ;;  %v7861_v12 = vld [vmem:[#allocation14 + $0xd28] ss:$28 sps:$4 sm:$0xff]   ;;  %v7866_v14 = vld [vmem:[#allocation14 + $0xd5c] ss:$28 sps:$4 sm:$0xff]  }
 0x42e   :  { %5807 = vmatprep.subr.bf16.mxu1 %v7806_v28  ;;  %5979 = vmatprep.subr.bf16.mxu0 %v7809_v29  ;;  %v7869_v17 = vld [vmem:[#allocation14 + $0xd64] ss:$28 sps:$4 sm:$0xff]   ;;  %v7864_v15 = vld [vmem:[#allocation14 + $0xd58] ss:$28 sps:$4 sm:$0xff]   ;;  %v7870_v23 = vld [vmem:[#allocation14 + $0xd90] ss:$28 sps:$4 sm:$0xff]  }
 0x42f   :  { %v7867_v45 = vld [vmem:[#allocation14 + $0xd60] ss:$28 sps:$4 sm:$0xff]   ;;  %v7872_v18 = vld [vmem:[#allocation14 + $0xd94] ss:$28 sps:$4 sm:$0xff]   ;;  %v7878_v28 = vld [vmem:[#allocation14 + $0xdcc] ss:$28 sps:$4 sm:$0xff]  }
 0x430   :  { %v7875_v22 = vld [vmem:[#allocation14 + $0xd9c] ss:$28 sps:$4 sm:$0xff]   ;;  %v7881_v29 = vld [vmem:[#allocation14 + $0xdd4] ss:$28 sps:$4 sm:$0xff]  }
 0x431   :  { %5808 = vmatpush1.bf16.msra.mxu1 %v7804_v30  ;;  %5980 = vmatpush1.bf16.msra.mxu0 %v7807_v48  ;;  %v7873_v25 = vld [vmem:[#allocation14 + $0xd98] ss:$28 sps:$4 sm:$0xff]   ;;  %v7876_v30 = vld [vmem:[#allocation14 + $0xdc8] ss:$28 sps:$4 sm:$0xff]   ;;  %v7879_v48 = vld [vmem:[#allocation14 + $0xdd0] ss:$28 sps:$4 sm:$0xff]  }
 0x432   :  { %5809 = vmatprep.subr.bf16.mxu1 %v7812_v46  ;;  %5981 = vmatprep.subr.bf16.mxu0 %v7815_v59  ;;  %v7884_v46 = vld [vmem:[#allocation14 + $0x14] ss:$28 sps:$4 sm:$0xff]  }
 0x433   :  { %v7885_v59 = vld [vmem:[#allocation14 + $0x1d8] ss:$28 sps:$4 sm:$0xff]  }
 0x435   :  { %5810 = vmatpush1.bf16.msra.mxu1 %v7810_v31  ;;  %5982 = vmatpush1.bf16.msra.mxu0 %v7813_v33  ;;  %v7882_v31 = vld [vmem:[#allocation14 + $0x10] ss:$28 sps:$4 sm:$0xff]   ;;  %v7886_v33 = vld [vmem:[#allocation14 + $0x18] ss:$28 sps:$4 sm:$0xff]  }
 0x436   :  { %5811 = vmatprep.subr.bf16.mxu1 %v7818_v34  ;;  %5983 = vmatprep.subr.bf16.mxu0 %v7821_v35  ;;  %v7889_v34 = vld [vmem:[#allocation14 + $0x4c] ss:$28 sps:$4 sm:$0xff]  }
 0x437   :  { %v7890_v35 = vld [vmem:[#allocation14 + $0x210] ss:$28 sps:$4 sm:$0xff]  }
 0x439   :  { %5812 = vmatpush1.bf16.msra.mxu1 %v7816_v36  ;;  %5984 = vmatpush1.bf16.msra.mxu0 %v7819_v16  ;;  %v7887_v36 = vld [vmem:[#allocation14 + $0x48] ss:$28 sps:$4 sm:$0xff]   ;;  %v7891_v16 = vld [vmem:[#allocation14 + $0x50] ss:$28 sps:$4 sm:$0xff]  }
 0x43a   :  { %5813 = vmatprep.subr.bf16.mxu1 %v7824_v53  ;;  %5985 = vmatprep.subr.bf16.mxu0 %v7827_v38  ;;  %v7894_v53 = vld [vmem:[#allocation14 + $0x84] ss:$28 sps:$4 sm:$0xff]  }
 0x43b   :  { %v7895_v38 = vld [vmem:[#allocation14 + $0x248] ss:$28 sps:$4 sm:$0xff]  }
 0x43d   :  { %5814 = vmatpush1.bf16.msra.mxu1 %v7822_v39  ;;  %5986 = vmatpush1.bf16.msra.mxu0 %v7825_v40  ;;  %v7892_v39 = vld [vmem:[#allocation14 + $0x80] ss:$28 sps:$4 sm:$0xff]   ;;  %v7896_v40 = vld [vmem:[#allocation14 + $0x88] ss:$28 sps:$4 sm:$0xff]  }
 0x43e   :  { %5815 = vmatprep.subr.bf16.mxu1 %v7830_v42  ;;  %5987 = vmatprep.subr.bf16.mxu0 %v7833_v19  ;;  %v7899_v42 = vld [vmem:[#allocation14 + $0xbc] ss:$28 sps:$4 sm:$0xff]  }
 0x43f   :  { %v7900_v19 = vld [vmem:[#allocation14 + $0x280] ss:$28 sps:$4 sm:$0xff]  }
 0x441   :  { %5816 = vmatpush1.bf16.msra.mxu1 %v7828_v20  ;;  %5988 = vmatpush1.bf16.msra.mxu0 %v7831_v21  ;;  %v7897_v20 = vld [vmem:[#allocation14 + $0xb8] ss:$28 sps:$4 sm:$0xff]   ;;  %v7901_v21 = vld [vmem:[#allocation14 + $0xc0] ss:$28 sps:$4 sm:$0xff]  }
 0x442   :  { %5817 = vmatprep.subr.bf16.mxu1 %v7836_v24  ;;  %5989 = vmatprep.subr.bf16.mxu0 %v7839_v26  ;;  %v7904_v24 = vld [vmem:[#allocation14 + $0xf4] ss:$28 sps:$4 sm:$0xff]  }
 0x443   :  { %v7902_v26 = vld [vmem:[#allocation14 + $0xf0] ss:$28 sps:$4 sm:$0xff]  }
 0x445   :  { %5818 = vmatpush1.bf16.msra.mxu1 %v7834_v27  ;;  %5990 = vmatpush1.bf16.msra.mxu0 %v7837_v43  ;;  %v7906_v27 = vld [vmem:[#allocation14 + $0xf8] ss:$28 sps:$4 sm:$0xff]   ;;  %v7909_v43 = vld [vmem:[#allocation14 + $0x12c] ss:$28 sps:$4 sm:$0xff]  }
 0x446   :  { %5819 = vmatprep.subr.bf16.mxu1 %v7842_v44  ;;  %5991 = vmatprep.subr.bf16.mxu0 %v7845_v47  ;;  %v7910_v44 = vld [vmem:[#allocation14 + $0x2f0] ss:$28 sps:$4 sm:$0xff]   ;;  %v7907_v47 = vld [vmem:[#allocation14 + $0x128] ss:$28 sps:$4 sm:$0xff]  }
 0x449   :  { %5820 = vmatpush1.bf16.msra.mxu1 %v7840_v49  ;;  %5992 = vmatpush1.bf16.msra.mxu0 %v7843_v50  ;;  %v7911_v49 = vld [vmem:[#allocation14 + $0x130] ss:$28 sps:$4 sm:$0xff]   ;;  %v7914_v50 = vld [vmem:[#allocation14 + $0x164] ss:$28 sps:$4 sm:$0xff]  }
 0x44a   :  { %5821 = vmatprep.subr.bf16.mxu1 %v7848_v51  ;;  %5993 = vmatprep.subr.bf16.mxu0 %v7851_v52  ;;  %v7915_v51 = vld [vmem:[#allocation14 + $0x328] ss:$28 sps:$4 sm:$0xff]   ;;  %v7912_v52 = vld [vmem:[#allocation14 + $0x160] ss:$28 sps:$4 sm:$0xff]  }
 0x44d   :  { %5822 = vmatpush1.bf16.msra.mxu1 %v7846_v57  ;;  %5994 = vmatpush1.bf16.msra.mxu0 %v7849_v58  ;;  %v7916_v57 = vld [vmem:[#allocation14 + $0x168] ss:$28 sps:$4 sm:$0xff]   ;;  %v7919_v58 = vld [vmem:[#allocation14 + $0x19c] ss:$28 sps:$4 sm:$0xff]  }
 0x44e   :  { %5823 = vmatprep.subr.bf16.mxu1 %v7854_v63  ;;  %5995 = vmatprep.subr.bf16.mxu0 %v7857_v0  ;;  %v7920_v63 = vld [vmem:[#allocation14 + $0x360] ss:$28 sps:$4 sm:$0xff]   ;;  %v7917_v0 = vld [vmem:[#allocation14 + $0x198] ss:$28 sps:$4 sm:$0xff]  }
 0x451   :  { %5824 = vmatpush1.bf16.msra.mxu1 %v7852_v2  ;;  %5996 = vmatpush1.bf16.msra.mxu0 %v7855_v7  ;;  %v7921_v2 = vld [vmem:[#allocation14 + $0x1a0] ss:$28 sps:$4 sm:$0xff]   ;;  %v7924_v7 = vld [vmem:[#allocation14 + $0x1d4] ss:$28 sps:$4 sm:$0xff]  }
 0x452   :  { %5825 = vmatprep.subr.bf16.mxu1 %v7860_v8  ;;  %5997 = vmatprep.subr.bf16.mxu0 %v7863_v10  ;;  %v7925_v8 = vld [vmem:[#allocation14 + $0x558] ss:$28 sps:$4 sm:$0xff]   ;;  %v7922_v10 = vld [vmem:[#allocation14 + $0x1d0] ss:$28 sps:$4 sm:$0xff]  }
 0x455   :  { %5826 = vmatpush1.bf16.msra.mxu1 %v7858_v11  ;;  %5998 = vmatpush1.bf16.msra.mxu0 %v7861_v12  ;;  %v7926_v11 = vld [vmem:[#allocation14 + $0x398] ss:$28 sps:$4 sm:$0xff]   ;;  %v7929_v12 = vld [vmem:[#allocation14 + $0x20c] ss:$28 sps:$4 sm:$0xff]  }
 0x456   :  { %5827 = vmatprep.subr.bf16.mxu1 %v7866_v14  ;;  %5999 = vmatprep.subr.bf16.mxu0 %v7869_v17  ;;  %v7930_v14 = vld [vmem:[#allocation14 + $0x590] ss:$28 sps:$4 sm:$0xff]   ;;  %v7927_v17 = vld [vmem:[#allocation14 + $0x208] ss:$28 sps:$4 sm:$0xff]  }
 0x459   :  { %5828 = vmatpush1.bf16.msra.mxu1 %v7864_v15  ;;  %6000 = vmatpush1.bf16.msra.mxu0 %v7867_v45  ;;  %v7931_v15 = vld [vmem:[#allocation14 + $0x3d0] ss:$28 sps:$4 sm:$0xff]   ;;  %v7934_v45 = vld [vmem:[#allocation14 + $0x244] ss:$28 sps:$4 sm:$0xff]  }
 0x45a   :  { %5829 = vmatprep.subr.bf16.mxu1 %v7872_v18  ;;  %6001 = vmatprep.subr.bf16.mxu0 %v7875_v22  ;;  %v7935_v18 = vld [vmem:[#allocation14 + $0x5c8] ss:$28 sps:$4 sm:$0xff]   ;;  %v7932_v22 = vld [vmem:[#allocation14 + $0x240] ss:$28 sps:$4 sm:$0xff]  }
 0x45d   :  { %5830 = vmatpush1.bf16.msra.mxu1 %v7870_v23  ;;  %6002 = vmatpush1.bf16.msra.mxu0 %v7873_v25  ;;  %v7936_v23 = vld [vmem:[#allocation14 + $0x408] ss:$28 sps:$4 sm:$0xff]   ;;  %v7939_v25 = vld [vmem:[#allocation14 + $0x27c] ss:$28 sps:$4 sm:$0xff]  }
 0x45e   :  { %5831 = vmatprep.subr.bf16.mxu1 %v7878_v28  ;;  %6003 = vmatprep.subr.bf16.mxu0 %v7881_v29  ;;  %v7940_v28 = vld [vmem:[#allocation14 + $0x600] ss:$28 sps:$4 sm:$0xff]   ;;  %v7937_v29 = vld [vmem:[#allocation14 + $0x278] ss:$28 sps:$4 sm:$0xff]  }
 0x461   :  { %5832 = vmatpush1.bf16.msra.mxu1 %v7876_v30  ;;  %6004 = vmatpush1.bf16.msra.mxu0 %v7879_v48  ;;  %v7941_v30 = vld [vmem:[#allocation14 + $0x440] ss:$28 sps:$4 sm:$0xff]   ;;  %v7944_v48 = vld [vmem:[#allocation14 + $0x2b4] ss:$28 sps:$4 sm:$0xff]  }
 0x462   :  { %6016 = vmatprep.subr.bf16.mxu1 %v7884_v46  ;;  %7186 = vmatprep.subr.bf16.mxu0 %v7885_v59  ;;  %v7945_v46 = vld [vmem:[#allocation14 + $0x638] ss:$28 sps:$4 sm:$0xff]   ;;  %v7942_v59 = vld [vmem:[#allocation14 + $0x2b0] ss:$28 sps:$4 sm:$0xff]  }
 0x464   :  { %5834 = vmatmul.mubr.bf16.vlgmr.msra.gmra.mrb[8].mxu1 %v8711_v3  ;;  %6006 = vmatmul.mubr.bf16.vlgmr.msra.gmra.mrb[20].mxu0 %v8711_v3 }
 0x465   :  { %6017 = vmatpush1.bf16.msra.mxu1 %v7882_v31  ;;  %6048 = vmatprep.mubr.bf16.mxu1 %v8680_v60  ;;  %v7946_v31 = vld [vmem:[#allocation14 + $0x478] ss:$28 sps:$4 sm:$0xff]  }
 0x466   :  { %7187 = vmatpush3.bf16.msra.mxu0 %v7886_v33  ;;  %6220 = vmatprep.mubr.bf16.mxu0 %v8680_v60  ;;  %v7905_v60 = vld [vmem:[#allocation14 + $0x2b8] ss:$28 sps:$4 sm:$0xff]   ;;  %v7949_v33 = vld [vmem:[#allocation14 + $0x2ec] ss:$28 sps:$4 sm:$0xff]  }
 0x467   :  { %6018 = vmatprep.subr.bf16.mxu1 %v7889_v34  ;;  %7188 = vmatprep.subr.bf16.mxu0 %v7890_v35  ;;  %v7950_v34 = vld [vmem:[#allocation14 + $0x670] ss:$28 sps:$4 sm:$0xff]   ;;  %v7947_v35 = vld [vmem:[#allocation14 + $0x2e8] ss:$28 sps:$4 sm:$0xff]  }
 0x469   :  { %6019 = vmatpush1.bf16.msra.mxu1 %v7887_v36  ;;  %v7951_v36 = vld [vmem:[#allocation14 + $0x4b0] ss:$28 sps:$4 sm:$0xff]  }
 0x46a   :  { %7189 = vmatpush3.bf16.msra.mxu0 %v7891_v16  ;;  %6020 = vmatprep.subr.bf16.mxu1 %v7894_v53  ;;  %v7954_v16 = vld [vmem:[#allocation14 + $0x324] ss:$28 sps:$4 sm:$0xff]  }
 0x46b   :  { %7190 = vmatprep.subr.bf16.mxu0 %v7895_v38  ;;  %v7955_v53 = vld [vmem:[#allocation14 + $0x6a8] ss:$28 sps:$4 sm:$0xff]   ;;  %v7952_v38 = vld [vmem:[#allocation14 + $0x320] ss:$28 sps:$4 sm:$0xff]  }
 0x46d   :  { %6021 = vmatpush1.bf16.msra.mxu1 %v7892_v39  ;;  %v7956_v39 = vld [vmem:[#allocation14 + $0x4e8] ss:$28 sps:$4 sm:$0xff]  }
 0x46e   :  { %7191 = vmatpush3.bf16.msra.mxu0 %v7896_v40  ;;  %6022 = vmatprep.subr.bf16.mxu1 %v7899_v42  ;;  %v7959_v40 = vld [vmem:[#allocation14 + $0x35c] ss:$28 sps:$4 sm:$0xff]  }
 0x46f   :  { %7192 = vmatprep.subr.bf16.mxu0 %v7900_v19  ;;  %v7960_v42 = vld [vmem:[#allocation14 + $0x6e0] ss:$28 sps:$4 sm:$0xff]   ;;  %v7957_v19 = vld [vmem:[#allocation14 + $0x358] ss:$28 sps:$4 sm:$0xff]  }
 0x471   :  { %6023 = vmatpush1.bf16.msra.mxu1 %v7897_v20  ;;  %v7961_v20 = vld [vmem:[#allocation14 + $0x520] ss:$28 sps:$4 sm:$0xff]  }
 0x472   :  { %7193 = vmatpush3.bf16.msra.mxu0 %v7901_v21  ;;  %6024 = vmatprep.subr.bf16.mxu1 %v7904_v24  ;;  %v7964_v21 = vld [vmem:[#allocation14 + $0x394] ss:$28 sps:$4 sm:$0xff]  }
 0x473   :  { %7194 = vmatprep.subr.bf16.mxu0 %v7905_v60  ;;  %v7965_v24 = vld [vmem:[#allocation14 + $0x8d8] ss:$28 sps:$4 sm:$0xff]   ;;  %v7962_v60 = vld [vmem:[#allocation14 + $0x390] ss:$28 sps:$4 sm:$0xff]  }
 0x475   :  { %6025 = vmatpush1.bf16.msra.mxu1 %v7902_v26  ;;  %v7966_v26 = vld [vmem:[#allocation14 + $0x718] ss:$28 sps:$4 sm:$0xff]  }
 0x476   :  { %7195 = vmatpush3.bf16.msra.mxu0 %v7906_v27  ;;  %6026 = vmatprep.subr.bf16.mxu1 %v7909_v43  ;;  %v7969_v27 = vld [vmem:[#allocation14 + $0x3cc] ss:$28 sps:$4 sm:$0xff]  }
 0x477   :  { %7196 = vmatprep.subr.bf16.mxu0 %v7910_v44  ;;  %v7970_v43 = vld [vmem:[#allocation14 + $0x910] ss:$28 sps:$4 sm:$0xff]   ;;  %v7967_v44 = vld [vmem:[#allocation14 + $0x3c8] ss:$28 sps:$4 sm:$0xff]  }
 0x479   :  { %6027 = vmatpush1.bf16.msra.mxu1 %v7907_v47  ;;  %v7971_v47 = vld [vmem:[#allocation14 + $0x750] ss:$28 sps:$4 sm:$0xff]  }
 0x47a   :  { %7197 = vmatpush3.bf16.msra.mxu0 %v7911_v49  ;;  %6028 = vmatprep.subr.bf16.mxu1 %v7914_v50  ;;  %v7974_v49 = vld [vmem:[#allocation14 + $0x404] ss:$28 sps:$4 sm:$0xff]  }
 0x47b   :  { %7198 = vmatprep.subr.bf16.mxu0 %v7915_v51  ;;  %v7975_v50 = vld [vmem:[#allocation14 + $0x948] ss:$28 sps:$4 sm:$0xff]   ;;  %v7972_v51 = vld [vmem:[#allocation14 + $0x400] ss:$28 sps:$4 sm:$0xff]  }
 0x47d   :  { %6029 = vmatpush1.bf16.msra.mxu1 %v7912_v52  ;;  %v7979_v52 = vld [vmem:[#allocation14 + $0x43c] ss:$28 sps:$4 sm:$0xff]  }
 0x47e   :  { %7199 = vmatpush3.bf16.msra.mxu0 %v7916_v57  ;;  %6030 = vmatprep.subr.bf16.mxu1 %v7919_v58  ;;  %v7980_v57 = vld [vmem:[#allocation14 + $0x980] ss:$28 sps:$4 sm:$0xff]   ;;  %v7977_v58 = vld [vmem:[#allocation14 + $0x438] ss:$28 sps:$4 sm:$0xff]  }
 0x47f   :  { %7200 = vmatprep.subr.bf16.mxu0 %v7920_v63  ;;  %v7984_v63 = vld [vmem:[#allocation14 + $0x474] ss:$28 sps:$4 sm:$0xff]  }
 0x481   :  { %6031 = vmatpush1.bf16.msra.mxu1 %v7917_v0  ;;  %v7985_v0 = vld [vmem:[#allocation14 + $0x9b8] ss:$28 sps:$4 sm:$0xff]  }
 0x482   :  { %7201 = vmatpush3.bf16.msra.mxu0 %v7921_v2  ;;  %6032 = vmatprep.subr.bf16.mxu1 %v7924_v7  ;;  %v7982_v2 = vld [vmem:[#allocation14 + $0x470] ss:$28 sps:$4 sm:$0xff]   ;;  %v7986_v7 = vld [vmem:[#allocation14 + $0x7f8] ss:$28 sps:$4 sm:$0xff]  }
 0x483   :  { %7208 = vmatprep.subr.bf16.mxu0 %v7925_v8  ;;  %v7989_v8 = vld [vmem:[#allocation14 + $0x4ac] ss:$28 sps:$4 sm:$0xff]  }
 0x485   :  { %6221 = vmatmul.mubr.bf16.vlgmr.msra.gmra.mrb[24].mxu0 %v8676_v55  ;;  %6033 = vmatpush1.bf16.msra.mxu1 %v7922_v10  ;;  %v7990_v10 = vld [vmem:[#allocation14 + $0x9f0] ss:$28 sps:$4 sm:$0xff]  }
 0x486   :  { %7209 = vmatpush3.bf16.msra.mxu0 %v7926_v11  ;;  %6261 = vmatprep.mubr.bf16.mxu0 %v8682_v61  ;;  %v7987_v11 = vld [vmem:[#allocation14 + $0x4a8] ss:$28 sps:$4 sm:$0xff]  }
 0x487   :  { %6034 = vmatprep.subr.bf16.mxu1 %v7929_v12  ;;  %7210 = vmatprep.subr.bf16.mxu0 %v7930_v14  ;;  %v7991_v12 = vld [vmem:[#allocation14 + $0x830] ss:$28 sps:$4 sm:$0xff]   ;;  %v7994_v14 = vld [vmem:[#allocation14 + $0x4e4] ss:$28 sps:$4 sm:$0xff]  }
 0x489   :  { %6035 = vmatpush1.bf16.msra.mxu1 %v7927_v17  ;;  %v7995_v17 = vld [vmem:[#allocation14 + $0xa28] ss:$28 sps:$4 sm:$0xff]  }
 0x48a   :  { %7211 = vmatpush3.bf16.msra.mxu0 %v7931_v15  ;;  %6036 = vmatprep.subr.bf16.mxu1 %v7934_v45  ;;  %v7992_v15 = vld [vmem:[#allocation14 + $0x4e0] ss:$28 sps:$4 sm:$0xff]   ;;  %v7996_v45 = vld [vmem:[#allocation14 + $0x868] ss:$28 sps:$4 sm:$0xff]  }
 0x48b   :  { %7212 = vmatprep.subr.bf16.mxu0 %v7935_v18  ;;  %v7999_v18 = vld [vmem:[#allocation14 + $0x51c] ss:$28 sps:$4 sm:$0xff]  }
 0x48d   :  { %6037 = vmatpush1.bf16.msra.mxu1 %v7932_v22  ;;  %v8000_v22 = vld [vmem:[#allocation14 + $0xa60] ss:$28 sps:$4 sm:$0xff]  }
 0x48e   :  { %7213 = vmatpush3.bf16.msra.mxu0 %v7936_v23  ;;  %6038 = vmatprep.subr.bf16.mxu1 %v7939_v25  ;;  %v7997_v23 = vld [vmem:[#allocation14 + $0x518] ss:$28 sps:$4 sm:$0xff]   ;;  %v8001_v25 = vld [vmem:[#allocation14 + $0x8a0] ss:$28 sps:$4 sm:$0xff]  }
 0x48f   :  { %7214 = vmatprep.subr.bf16.mxu0 %v7940_v28  ;;  %v8004_v28 = vld [vmem:[#allocation14 + $0x554] ss:$28 sps:$4 sm:$0xff]  }
 0x491   :  { %6039 = vmatpush1.bf16.msra.mxu1 %v7937_v29  ;;  %v8005_v29 = vld [vmem:[#allocation14 + $0xc58] ss:$28 sps:$4 sm:$0xff]  }
 0x492   :  { %7215 = vmatpush3.bf16.msra.mxu0 %v7941_v30  ;;  %6040 = vmatprep.subr.bf16.mxu1 %v7944_v48  ;;  %v8002_v30 = vld [vmem:[#allocation14 + $0x550] ss:$28 sps:$4 sm:$0xff]   ;;  %v8006_v48 = vld [vmem:[#allocation14 + $0xa98] ss:$28 sps:$4 sm:$0xff]  }
 0x493   :  { %7216 = vmatprep.subr.bf16.mxu0 %v7945_v46  ;;  %v8009_v46 = vld [vmem:[#allocation14 + $0x58c] ss:$28 sps:$4 sm:$0xff]  }
 0x495   :  { %6041 = vmatpush1.bf16.msra.mxu1 %v7942_v59  ;;  %v8010_v59 = vld [vmem:[#allocation14 + $0xc90] ss:$28 sps:$4 sm:$0xff]  }
 0x496   :  { %7217 = vmatpush3.bf16.msra.mxu0 %v7946_v31  ;;  %6042 = vmatprep.subr.bf16.mxu1 %v7949_v33  ;;  %v8007_v31 = vld [vmem:[#allocation14 + $0x588] ss:$28 sps:$4 sm:$0xff]   ;;  %v8011_v33 = vld [vmem:[#allocation14 + $0xad0] ss:$28 sps:$4 sm:$0xff]  }
 0x497   :  { %7218 = vmatprep.subr.bf16.mxu0 %v7950_v34  ;;  %v8014_v34 = vld [vmem:[#allocation14 + $0x5c4] ss:$28 sps:$4 sm:$0xff]  }
 0x499   :  { %6043 = vmatpush1.bf16.msra.mxu1 %v7947_v35  ;;  %v8015_v35 = vld [vmem:[#allocation14 + $0xcc8] ss:$28 sps:$4 sm:$0xff]  }
 0x49a   :  { %7219 = vmatpush3.bf16.msra.mxu0 %v7951_v36  ;;  %6044 = vmatprep.subr.bf16.mxu1 %v7954_v16  ;;  %v8012_v36 = vld [vmem:[#allocation14 + $0x5c0] ss:$28 sps:$4 sm:$0xff]   ;;  %v8016_v16 = vld [vmem:[#allocation14 + $0xb08] ss:$28 sps:$4 sm:$0xff]  }
 0x49b   :  { %7220 = vmatprep.subr.bf16.mxu0 %v7955_v53  ;;  %v8019_v53 = vld [vmem:[#allocation14 + $0x5fc] ss:$28 sps:$4 sm:$0xff]  }
 0x49d   :  { %6045 = vmatpush1.bf16.msra.mxu1 %v7952_v38  ;;  %v8020_v38 = vld [vmem:[#allocation14 + $0xd00] ss:$28 sps:$4 sm:$0xff]  }
 0x49e   :  { %7221 = vmatpush3.bf16.msra.mxu0 %v7956_v39  ;;  %6046 = vmatprep.subr.bf16.mxu1 %v7959_v40  ;;  %v8017_v39 = vld [vmem:[#allocation14 + $0x5f8] ss:$28 sps:$4 sm:$0xff]   ;;  %v8021_v40 = vld [vmem:[#allocation14 + $0xb40] ss:$28 sps:$4 sm:$0xff]  }
 0x49f   :  { %7222 = vmatprep.subr.bf16.mxu0 %v7960_v42  ;;  %v8024_v42 = vld [vmem:[#allocation14 + $0x634] ss:$28 sps:$4 sm:$0xff]  }
 0x4a1   :  { %6047 = vmatpush1.bf16.msra.mxu1 %v7957_v19  ;;  %v8025_v19 = vld [vmem:[#allocation14 + $0xd38] ss:$28 sps:$4 sm:$0xff]  }
 0x4a2   :  { %7223 = vmatpush3.bf16.msra.mxu0 %v7961_v20  ;;  %6059 = vmatprep.subr.bf16.mxu1 %v7964_v21  ;;  %v8022_v20 = vld [vmem:[#allocation14 + $0x630] ss:$28 sps:$4 sm:$0xff]   ;;  %v8026_v21 = vld [vmem:[#allocation14 + $0xb78] ss:$28 sps:$4 sm:$0xff]  }
 0x4a3   :  { %7230 = vmatprep.subr.bf16.mxu0 %v7965_v24  ;;  %v8029_v24 = vld [vmem:[#allocation14 + $0x66c] ss:$28 sps:$4 sm:$0xff]  }
 0x4a4   :  { %6049 = vmatmul.mubr.bf16.vlgmr.msra.gmra.mrb[12].mxu1 %v8676_v55  ;;  %v7976_v55 = vld [vmem:[#allocation14 + $0x788] ss:$28 sps:$4 sm:$0xff]  }
 0x4a5   :  { %6262 = vmatmul.mubr.bf16.vlgmr.msra.gmra.mrb[28].mxu0 %v8678_v56  ;;  %6060 = vmatpush1.bf16.msra.mxu1 %v7962_v60  ;;  %v8030_v60 = vld [vmem:[#allocation14 + $0xd70] ss:$28 sps:$4 sm:$0xff]  }
 0x4a6   :  { %6091 = vmatprep.mubr.bf16.mxu1 %v8682_v61  ;;  %7231 = vmatpush3.bf16.msra.mxu0 %v7966_v26  ;;  %v7981_v61 = vld [vmem:[#allocation14 + $0x7c0] ss:$28 sps:$4 sm:$0xff]   ;;  %v8027_v26 = vld [vmem:[#allocation14 + $0x668] ss:$28 sps:$4 sm:$0xff]  }
 0x4a7   :  { %6302 = vmatprep.mubr.bf16.mxu0 %v8714_v9  ;;  %6061 = vmatprep.subr.bf16.mxu1 %v7969_v27  ;;  %v8031_v27 = vld [vmem:[#allocation14 + $0xbb0] ss:$28 sps:$4 sm:$0xff]  }
 0x4a8   :  { %7232 = vmatprep.subr.bf16.mxu0 %v7970_v43  ;;  %v8034_v43 = vld [vmem:[#allocation14 + $0x6a4] ss:$28 sps:$4 sm:$0xff]  }
 0x4a9   :  { %6062 = vmatpush1.bf16.msra.mxu1 %v7967_v44  ;;  %v8035_v44 = vld [vmem:[#allocation14 + $0xda8] ss:$28 sps:$4 sm:$0xff]  }
 0x4aa   :  { %7233 = vmatpush3.bf16.msra.mxu0 %v7971_v47  ;;  %6063 = vmatprep.subr.bf16.mxu1 %v7974_v49  ;;  %v8032_v47 = vld [vmem:[#allocation14 + $0x6a0] ss:$28 sps:$4 sm:$0xff]   ;;  %v8036_v49 = vld [vmem:[#allocation14 + $0xbe8] ss:$28 sps:$4 sm:$0xff]  }
 0x4ab   :  { %7234 = vmatprep.subr.bf16.mxu0 %v7975_v50  ;;  %v8039_v50 = vld [vmem:[#allocation14 + $0x6dc] ss:$28 sps:$4 sm:$0xff]  }
 0x4ad   :  { %6064 = vmatpush1.bf16.msra.mxu1 %v7972_v51  ;;  %v8040_v51 = vld [vmem:[#allocation14 + $0xde0] ss:$28 sps:$4 sm:$0xff]  }
 0x4ae   :  { %7235 = vmatpush3.bf16.msra.mxu0 %v7976_v55  ;;  %6065 = vmatprep.subr.bf16.mxu1 %v7979_v52  ;;  %v8037_v55 = vld [vmem:[#allocation14 + $0x6d8] ss:$28 sps:$4 sm:$0xff]   ;;  %v8041_v52 = vld [vmem:[#allocation14 + $0xc20] ss:$28 sps:$4 sm:$0xff]  }
 0x4af   :  { %7236 = vmatprep.subr.bf16.mxu0 %v7980_v57  ;;  %v8044_v57 = vld [vmem:[#allocation14 + $0x714] ss:$28 sps:$4 sm:$0xff]  }
 0x4b1   :  { %6066 = vmatpush1.bf16.msra.mxu1 %v7977_v58  ;;  %v8042_v58 = vld [vmem:[#allocation14 + $0x710] ss:$28 sps:$4 sm:$0xff]  }
 0x4b2   :  { %7237 = vmatpush3.bf16.msra.mxu0 %v7981_v61  ;;  %6067 = vmatprep.subr.bf16.mxu1 %v7984_v63  ;;  %v8047_v61 = vld [vmem:[#allocation14 + $0x74c] ss:$28 sps:$4 sm:$0xff]  }
 0x4b3   :  { %7238 = vmatprep.subr.bf16.mxu0 %v7985_v0  ;;  %v8045_v63 = vld [vmem:[#allocation14 + $0x748] ss:$28 sps:$4 sm:$0xff]  }
 0x4b4   :  { %v8050_v0 = vld [vmem:[#allocation14 + $0x784] ss:$28 sps:$4 sm:$0xff]  }
 0x4b5   :  { %6068 = vmatpush1.bf16.msra.mxu1 %v7982_v2  ;;  %v8048_v2 = vld [vmem:[#allocation14 + $0x780] ss:$28 sps:$4 sm:$0xff]  }
 0x4b6   :  { %7239 = vmatpush3.bf16.msra.mxu0 %v7986_v7  ;;  %6069 = vmatprep.subr.bf16.mxu1 %v7989_v8  ;;  %v8053_v7 = vld [vmem:[#allocation14 + $0x7bc] ss:$28 sps:$4 sm:$0xff]  }
 0x4b7   :  { %7240 = vmatprep.subr.bf16.mxu0 %v7990_v10  ;;  %v8051_v8 = vld [vmem:[#allocation14 + $0x7b8] ss:$28 sps:$4 sm:$0xff]  }
 0x4b8   :  { %v8056_v10 = vld [vmem:[#allocation14 + $0x7f4] ss:$28 sps:$4 sm:$0xff]  }
 0x4b9   :  { %6070 = vmatpush1.bf16.msra.mxu1 %v7987_v11  ;;  %v8054_v11 = vld [vmem:[#allocation14 + $0x7f0] ss:$28 sps:$4 sm:$0xff]  }
 0x4ba   :  { %7241 = vmatpush3.bf16.msra.mxu0 %v7991_v12  ;;  %6071 = vmatprep.subr.bf16.mxu1 %v7994_v14  ;;  %v8057_v12 = vld [vmem:[#allocation14 + $0x828] ss:$28 sps:$4 sm:$0xff]  }
 0x4bb   :  { %7242 = vmatprep.subr.bf16.mxu0 %v7995_v17  ;;  %v8062_v14 = vld [vmem:[#allocation14 + $0x864] ss:$28 sps:$4 sm:$0xff]   ;;  %v8065_v17 = vld [vmem:[#allocation14 + $0x89c] ss:$28 sps:$4 sm:$0xff]  }
 0x4bd   :  { %6072 = vmatpush1.bf16.msra.mxu1 %v7992_v15  ;;  %v8063_v15 = vld [vmem:[#allocation14 + $0x898] ss:$28 sps:$4 sm:$0xff]  }
 0x4be   :  { %7243 = vmatpush3.bf16.msra.mxu0 %v7996_v45  ;;  %6073 = vmatprep.subr.bf16.mxu1 %v7999_v18  ;;  %v8068_v45 = vld [vmem:[#allocation14 + $0x8d4] ss:$28 sps:$4 sm:$0xff]  }
 0x4bf   :  { %7244 = vmatprep.subr.bf16.mxu0 %v8000_v22  ;;  %v8066_v18 = vld [vmem:[#allocation14 + $0x8d0] ss:$28 sps:$4 sm:$0xff]  }
 0x4c0   :  { %v8071_v22 = vld [vmem:[#allocation14 + $0x90c] ss:$28 sps:$4 sm:$0xff]  }
 0x4c1   :  { %6074 = vmatpush1.bf16.msra.mxu1 %v7997_v23  ;;  %v8069_v23 = vld [vmem:[#allocation14 + $0x908] ss:$28 sps:$4 sm:$0xff]  }
 0x4c2   :  { %7245 = vmatpush3.bf16.msra.mxu0 %v8001_v25  ;;  %6075 = vmatprep.subr.bf16.mxu1 %v8004_v28  ;;  %v8074_v25 = vld [vmem:[#allocation14 + $0x944] ss:$28 sps:$4 sm:$0xff]  }
 0x4c3   :  { %7252 = vmatprep.subr.bf16.mxu0 %v8005_v29  ;;  %v8072_v28 = vld [vmem:[#allocation14 + $0x940] ss:$28 sps:$4 sm:$0xff]  }
 0x4c4   :  { %v8077_v29 = vld [vmem:[#allocation14 + $0x97c] ss:$28 sps:$4 sm:$0xff]  }
 0x4c5   :  { %6303 = vmatmul.mubr.bf16.vlgmr.msra.gmra.mrb[32].mxu0 %v8707_v54  ;;  %6076 = vmatpush1.bf16.msra.mxu1 %v8002_v30  ;;  %v8075_v30 = vld [vmem:[#allocation14 + $0x978] ss:$28 sps:$4 sm:$0xff]  }
 0x4c6   :  { %7253 = vmatpush3.bf16.msra.mxu0 %v8006_v48  ;;  %6343 = vmatprep.mubr.bf16.mxu0 %v8716_v13  ;;  %v8080_v48 = vld [vmem:[#allocation14 + $0x9b4] ss:$28 sps:$4 sm:$0xff]  }
 0x4c7   :  { %6077 = vmatprep.subr.bf16.mxu1 %v8009_v46  ;;  %7254 = vmatprep.subr.bf16.mxu0 %v8010_v59  ;;  %v8078_v46 = vld [vmem:[#allocation14 + $0x9b0] ss:$28 sps:$4 sm:$0xff]  }
 0x4c8   :  { %v8083_v59 = vld [vmem:[#allocation14 + $0x9ec] ss:$28 sps:$4 sm:$0xff]  }
 0x4c9   :  { %6078 = vmatpush1.bf16.msra.mxu1 %v8007_v31  ;;  %v8081_v31 = vld [vmem:[#allocation14 + $0x9e8] ss:$28 sps:$4 sm:$0xff]  }
 0x4ca   :  { %7255 = vmatpush3.bf16.msra.mxu0 %v8011_v33  ;;  %6079 = vmatprep.subr.bf16.mxu1 %v8014_v34  ;;  %v8086_v33 = vld [vmem:[#allocation14 + $0xa24] ss:$28 sps:$4 sm:$0xff]  }
 0x4cb   :  { %7256 = vmatprep.subr.bf16.mxu0 %v8015_v35  ;;  %v8084_v34 = vld [vmem:[#allocation14 + $0xa20] ss:$28 sps:$4 sm:$0xff]  }
 0x4cc   :  { %v8089_v35 = vld [vmem:[#allocation14 + $0xa5c] ss:$28 sps:$4 sm:$0xff]  }
 0x4cd   :  { %6080 = vmatpush1.bf16.msra.mxu1 %v8012_v36  ;;  %v8087_v36 = vld [vmem:[#allocation14 + $0xa58] ss:$28 sps:$4 sm:$0xff]  }
 0x4ce   :  { %7257 = vmatpush3.bf16.msra.mxu0 %v8016_v16  ;;  %6081 = vmatprep.subr.bf16.mxu1 %v8019_v53  ;;  %v8092_v16 = vld [vmem:[#allocation14 + $0xa94] ss:$28 sps:$4 sm:$0xff]  }
 0x4cf   :  { %7258 = vmatprep.subr.bf16.mxu0 %v8020_v38  ;;  %v8090_v53 = vld [vmem:[#allocation14 + $0xa90] ss:$28 sps:$4 sm:$0xff]  }
 0x4d0   :  { %v8095_v38 = vld [vmem:[#allocation14 + $0xacc] ss:$28 sps:$4 sm:$0xff]  }
 0x4d1   :  { %6082 = vmatpush1.bf16.msra.mxu1 %v8017_v39  ;;  %v8093_v39 = vld [vmem:[#allocation14 + $0xac8] ss:$28 sps:$4 sm:$0xff]  }
 0x4d2   :  { %7259 = vmatpush3.bf16.msra.mxu0 %v8021_v40  ;;  %6083 = vmatprep.subr.bf16.mxu1 %v8024_v42  ;;  %v8098_v40 = vld [vmem:[#allocation14 + $0xb04] ss:$28 sps:$4 sm:$0xff]  }
 0x4d3   :  { %7260 = vmatprep.subr.bf16.mxu0 %v8025_v19  ;;  %v8096_v42 = vld [vmem:[#allocation14 + $0xb00] ss:$28 sps:$4 sm:$0xff]  }
 0x4d4   :  { %v8101_v19 = vld [vmem:[#allocation14 + $0xb3c] ss:$28 sps:$4 sm:$0xff]  }
 0x4d5   :  { %6084 = vmatpush1.bf16.msra.mxu1 %v8022_v20  ;;  %v8099_v20 = vld [vmem:[#allocation14 + $0xb38] ss:$28 sps:$4 sm:$0xff]  }
 0x4d6   :  { %7261 = vmatpush3.bf16.msra.mxu0 %v8026_v21  ;;  %6085 = vmatprep.subr.bf16.mxu1 %v8029_v24  ;;  %v8104_v21 = vld [vmem:[#allocation14 + $0xb74] ss:$28 sps:$4 sm:$0xff]  }
 0x4d7   :  { %7262 = vmatprep.subr.bf16.mxu0 %v8030_v60  ;;  %v8102_v24 = vld [vmem:[#allocation14 + $0xb70] ss:$28 sps:$4 sm:$0xff]   ;;  %v8741_v60 = vld [vmem:[#allocation16] sm:$0xff] }
 0x4d9   :  { %6086 = vmatpush1.bf16.msra.mxu1 %v8027_v26  ;;  %v3344_v26 = vrot.slane %v8741_v60, %v8638_v62 }
 0x4da   :  { %7263 = vmatpush3.bf16.msra.mxu0 %v8031_v27  ;;  %6087 = vmatprep.subr.bf16.mxu1 %v8034_v43  ;;  %v3340_v27 = vrot.slane %v8741_v60, %v8585_v41  ;;  %v3348_v43 = vrot.slane %v8741_v60, %v8641_v1  ;;  %v8113_v1 = vld [vmem:[#allocation14 + $0xc1c] ss:$28 sps:$4 sm:$0xff]  }
 0x4db   :  { %7264 = vmatprep.subr.bf16.mxu0 %v8035_v44  ;;  %v8105_v44 = vld [vmem:[#allocation14 + $0xba8] ss:$28 sps:$4 sm:$0xff]  }
 0x4dd   :  { %6088 = vmatpush1.bf16.msra.mxu1 %v8032_v47  ;;  %v8110_v47 = vld [vmem:[#allocation14 + $0xbe4] ss:$28 sps:$4 sm:$0xff]  }
 0x4de   :  { %7265 = vmatpush3.bf16.msra.mxu0 %v8036_v49  ;;  %6089 = vmatprep.subr.bf16.mxu1 %v8039_v50 }
 0x4df   :  { %7266 = vmatprep.subr.bf16.mxu0 %v8040_v51 }
 0x4e1   :  { %6090 = vmatpush1.bf16.msra.mxu1 %v8037_v55 }
 0x4e2   :  { %7267 = vmatpush3.bf16.msra.mxu0 %v8041_v52  ;;  %6102 = vmatprep.subr.bf16.mxu1 %v8044_v57 }
 0x4e4   :  { %6092 = vmatmul.mubr.bf16.vlgmr.msra.gmra.mrb[12].mxu1 %v8678_v56  ;;  %v8059_v56 = vld [vmem:[#allocation14 + $0x82c] ss:$28 sps:$4 sm:$0xff]  }
 0x4e5   :  { %6344 = vmatmul.mubr.bf16.vlgmr.msra.gmra.mrb[36].mxu0 %v8711_v3  ;;  %6103 = vmatpush1.bf16.msra.mxu1 %v8042_v58 }
 0x4e6   :  { %6134 = vmatprep.mubr.bf16.mxu1 %v8714_v9  ;;  %6104 = vmatprep.subr.bf16.mxu1 %v8047_v61  ;;  %v8060_v9 = vld [vmem:[#allocation14 + $0x860] ss:$28 sps:$4 sm:$0xff]  }
 0x4e9   :  { %6105 = vmatpush1.bf16.msra.mxu1 %v8045_v63  ;;  %v8108_v63 = vld [vmem:[#allocation14 + $0xbe0] ss:$28 sps:$4 sm:$0xff]  }
 0x4ea   :  { %6106 = vmatprep.subr.bf16.mxu1 %v8050_v0 }
 0x4ed   :  { %6107 = vmatpush1.bf16.msra.mxu1 %v8048_v2 }
 0x4ee   :  { %6108 = vmatprep.subr.bf16.mxu1 %v8053_v7 }
 0x4f1   :  { %6109 = vmatpush1.bf16.msra.mxu1 %v8051_v8 }
 0x4f2   :  { %6110 = vmatprep.subr.bf16.mxu1 %v8056_v10 }
 0x4f5   :  { %6111 = vmatpush1.bf16.msra.mxu1 %v8054_v11  ;;  %v8111_v11 = vld [vmem:[#allocation14 + $0xc18] ss:$28 sps:$4 sm:$0xff]  }
 0x4f6   :  { %6112 = vmatprep.subr.bf16.mxu1 %v8059_v56  ;;  %v8116_v56 = vld [vmem:[#allocation14 + $0xc54] ss:$28 sps:$4 sm:$0xff]  }
 0x4f9   :  { %6113 = vmatpush1.bf16.msra.mxu1 %v8057_v12  ;;  %v8114_v12 = vld [vmem:[#allocation14 + $0xc50] ss:$28 sps:$4 sm:$0xff]  }
 0x4fa   :  { %6114 = vmatprep.subr.bf16.mxu1 %v8062_v14  ;;  %v8119_v14 = vld [vmem:[#allocation14 + $0xc8c] ss:$28 sps:$4 sm:$0xff]  }
 0x4fd   :  { %6115 = vmatpush1.bf16.msra.mxu1 %v8060_v9 }
 0x4fe   :  { %6116 = vmatprep.subr.bf16.mxu1 %v8065_v17 }
 0x501   :  { %6117 = vmatpush1.bf16.msra.mxu1 %v8063_v15  ;;  %v8117_v15 = vld [vmem:[#allocation14 + $0xc88] ss:$28 sps:$4 sm:$0xff]  }
 0x502   :  { %6118 = vmatprep.subr.bf16.mxu1 %v8068_v45 }
 0x505   :  { %6119 = vmatpush1.bf16.msra.mxu1 %v8066_v18  ;;  %v8122_v18 = vld [vmem:[#allocation14 + $0xcc4] ss:$28 sps:$4 sm:$0xff]  }
 0x506   :  { %6120 = vmatprep.subr.bf16.mxu1 %v8071_v22 }
 0x509   :  { %6121 = vmatpush1.bf16.msra.mxu1 %v8069_v23 }
 0x50a   :  { %6122 = vmatprep.subr.bf16.mxu1 %v8074_v25 }
 0x50d   :  { %6123 = vmatpush1.bf16.msra.mxu1 %v8072_v28  ;;  %v8120_v28 = vld [vmem:[#allocation14 + $0xcc0] ss:$28 sps:$4 sm:$0xff]  }
 0x50e   :  { %6124 = vmatprep.subr.bf16.mxu1 %v8077_v29 }
 0x511   :  { %6125 = vmatpush1.bf16.msra.mxu1 %v8075_v30  ;;  %v8125_v30 = vld [vmem:[#allocation14 + $0xcfc] ss:$28 sps:$4 sm:$0xff]  }
 0x512   :  { %6126 = vmatprep.subr.bf16.mxu1 %v8080_v48 }
 0x515   :  { %6127 = vmatpush1.bf16.msra.mxu1 %v8078_v46  ;;  %v8123_v46 = vld [vmem:[#allocation14 + $0xcf8] ss:$28 sps:$4 sm:$0xff]  }
 0x516   :  { %6128 = vmatprep.subr.bf16.mxu1 %v8083_v59  ;;  %v8128_v59 = vld [vmem:[#allocation14 + $0xd34] ss:$28 sps:$4 sm:$0xff]  }
 0x519   :  { %6129 = vmatpush1.bf16.msra.mxu1 %v8081_v31  ;;  %v8126_v31 = vld [vmem:[#allocation14 + $0xd30] ss:$28 sps:$4 sm:$0xff]  }
 0x51a   :  { %6130 = vmatprep.subr.bf16.mxu1 %v8086_v33  ;;  %v8131_v33 = vld [vmem:[#allocation14 + $0xd6c] ss:$28 sps:$4 sm:$0xff]  }
 0x51d   :  { %6131 = vmatpush1.bf16.msra.mxu1 %v8084_v34  ;;  %v8129_v34 = vld [vmem:[#allocation14 + $0xd68] ss:$28 sps:$4 sm:$0xff]  }
 0x51e   :  { %6132 = vmatprep.subr.bf16.mxu1 %v8089_v35  ;;  %v8134_v35 = vld [vmem:[#allocation14 + $0xda4] ss:$28 sps:$4 sm:$0xff]  }
 0x521   :  { %6133 = vmatpush1.bf16.msra.mxu1 %v8087_v36 }
 0x522   :  { %6145 = vmatprep.subr.bf16.mxu1 %v8092_v16 }
 0x524   :  { %6135 = vmatmul.mubr.bf16.vlgmr.msra.gmra.mrb[12].mxu1 %v8707_v54  ;;  %v8107_v54 = vld [vmem:[#allocation14 + $0xbac] ss:$28 sps:$4 sm:$0xff]  }
 0x525   :  { %6146 = vmatpush1.bf16.msra.mxu1 %v8090_v53  ;;  %6177 = vmatprep.mubr.bf16.mxu1 %v8716_v13  ;;  %v3336_v13 = vrot.slane %v8741_v60, %v8582_v37  ;;  %v8132_v53 = vld [vmem:[#allocation14 + $0xda0] ss:$28 sps:$4 sm:$0xff]  }
 0x526   :  { %6147 = vmatprep.subr.bf16.mxu1 %v8095_v38 }
 0x529   :  { %6148 = vmatpush1.bf16.msra.mxu1 %v8093_v39 }
 0x52a   :  { %6149 = vmatprep.subr.bf16.mxu1 %v8098_v40  ;;  %v8137_v40 = vld [vmem:[#allocation14 + $0xddc] ss:$28 sps:$4 sm:$0xff]  }
 0x52d   :  { %6150 = vmatpush1.bf16.msra.mxu1 %v8096_v42 }
 0x52e   :  { %6151 = vmatprep.subr.bf16.mxu1 %v8101_v19 }
 0x531   :  { %6152 = vmatpush1.bf16.msra.mxu1 %v8099_v20  ;;  %v8135_v20 = vld [vmem:[#allocation14 + $0xdd8] ss:$28 sps:$4 sm:$0xff]  }
 0x532   :  { %6153 = vmatprep.subr.bf16.mxu1 %v8104_v21  ;;  %v3360_v21 = vrot.slane %v8741_v60, %v1125_v5 }
 0x535   :  { %6154 = vmatpush1.bf16.msra.mxu1 %v8102_v24 }
 0x536   :  { %6155 = vmatprep.subr.bf16.mxu1 %v8107_v54 }
 0x537   :  { %v5835_v49 = vpop.f32.mrb[8].mxu1  ;;  %v6007_v50 = vpop.f32.mrb[20].mxu0 }
 0x538   :  { %v7290_v51 = vadd.f32 %v5835_v49, %v3336_v13  ;;  %v7294_v55 = vadd.f32 %v6007_v50, %v3344_v26  ;;  %v5837_v52 = vpop.f32.mrb[9].mxu1  ;;  %v6009_v57 = vpop.f32.mrb[21].mxu0 }
 0x539   :  { %v7291_v37 = vadd.f32 %v5837_v52, %v3340_v27  ;;  %v7295_v58 = vadd.f32 %v6009_v57, %v3348_v43  ;;  %v5839_v61 = vpop.f32.mrb[10].mxu1  ;;  %v6011_v62 = vpop.f32.mrb[22].mxu0  ;;  %6156 = vmatpush1.bf16.msra.mxu1 %v8105_v44 }
 0x53a   :  { %8138 = vtanh.f32 %v7290_v51  ;;  %v7292_v41 = vadd.f32 %v5839_v61, %v3336_v13  ;;  %v5841_v0 = vpop.f32.mrb[11].mxu1  ;;  %v6013_v2 = vpop.f32.mrb[23].mxu0  ;;  %6157 = vmatprep.subr.bf16.mxu1 %v8110_v47  ;;  %v7296_v7 = vadd.f32 %v6011_v62, %v3344_v26 }
 0x53b   :  { %8140 = vtanh.f32 %v7294_v55  ;;  %v7293_v8 = vadd.f32 %v5841_v0, %v3340_v27  ;;  %v7297_v10 = vadd.f32 %v6013_v2, %v3348_v43 }
 0x53c   :  { %8142 = vtanh.f32 %v7291_v37 }
 0x53d   :  { %8144 = vtanh.f32 %v7295_v58  ;;  %6158 = vmatpush1.bf16.msra.mxu1 %v8108_v63 }
 0x53e   :  { %8146 = vtanh.f32 %v7292_v41  ;;  %6159 = vmatprep.subr.bf16.mxu1 %v8113_v1 }
 0x53f   :  { %8148 = vtanh.f32 %v7296_v7 }
 0x540   :  { %8150 = vtanh.f32 %v7293_v8 }
 0x541   :  { %8152 = vtanh.f32 %v7297_v10  ;;  %6160 = vmatpush1.bf16.msra.mxu1 %v8111_v11  ;;  %v3352_v11 = vrot.slane %v8741_v60, %v1117_v4 }
 0x542   :  { %6161 = vmatprep.subr.bf16.mxu1 %v8116_v56  ;;  %v3356_v56 = vrot.slane %v8741_v60, %v1121_v6 }
 0x544   :  { %v8139_v9 = vpop.eup %8138 }
 0x545   :  { %v8141_v17 = vpop.eup %8140  ;;  %6366 = vst [vmem:[#allocation17] sm:$0xff] %v8139_v9  ;;  %6162 = vmatpush1.bf16.msra.mxu1 %v8114_v12 }
 0x546   :  { %v8143_v45 = vpop.eup %8142  ;;  %6368 = vst [vmem:[#allocation17 + $0x10] sm:$0xff] %v8141_v17  ;;  %6163 = vmatprep.subr.bf16.mxu1 %v8119_v14 }
 0x547   :  { %v8145_v22 = vpop.eup %8144  ;;  %6367 = vst [vmem:[#allocation17 + $0x8] sm:$0xff] %v8143_v45 }
 0x548   :  { %v8147_v23 = vpop.eup %8146  ;;  %6369 = vst [vmem:[#allocation17 + $0x18] sm:$0xff] %v8145_v22 }
 0x549   :  { %v8149_v25 = vpop.eup %8148  ;;  %6373 = vst [vmem:[#allocation17 + $0x38] sm:$0xff] %v8147_v23  ;;  %6164 = vmatpush1.bf16.msra.mxu1 %v8117_v15 }
 0x54a   :  { %v8151_v29 = vpop.eup %8150  ;;  %6375 = vst [vmem:[#allocation17 + $0x48] sm:$0xff] %v8149_v25  ;;  %6165 = vmatprep.subr.bf16.mxu1 %v8122_v18 }
 0x54b   :  { %v8153_v48 = vpop.eup %8152  ;;  %6374 = vst [vmem:[#allocation17 + $0x40] sm:$0xff] %v8151_v29 }
 0x54c   :  { %6376 = vst [vmem:[#allocation17 + $0x50] sm:$0xff] %v8153_v48 }
 0x54d   :  { %6166 = vmatpush1.bf16.msra.mxu1 %v8120_v28 }
 0x54e   :  { %6167 = vmatprep.subr.bf16.mxu1 %v8125_v30 }
 0x551   :  { %6168 = vmatpush1.bf16.msra.mxu1 %v8123_v46 }
 0x552   :  { %6169 = vmatprep.subr.bf16.mxu1 %v8128_v59 }
 0x555   :  { %6170 = vmatpush1.bf16.msra.mxu1 %v8126_v31 }
 0x556   :  { %6171 = vmatprep.subr.bf16.mxu1 %v8131_v33 }
 0x558   :  { %v7202_v36 = vpop.f32.mrb[24].mxu0 }
 0x559   :  { %v7203_v16 = vpop.f32.mrb[25].mxu0  ;;  %6172 = vmatpush1.bf16.msra.mxu1 %v8129_v34 }
 0x55a   :  { %v7204_v38 = vadd.f32 %v7203_v16, %v7202_v36  ;;  %v7205_v39 = vpop.f32.mrb[26].mxu0  ;;  %6173 = vmatprep.subr.bf16.mxu1 %v8134_v35 }
 0x55b   :  { %v7206_v42 = vpop.f32.mrb[27].mxu0 }
 0x55c   :  { %v7207_v19 = vadd.f32 %v7206_v42, %v7205_v39  ;;  %v6223_v13 = vadd.f32 %v7204_v38, %v3360_v21 }
 0x55d   :  { %6174 = vmatpush1.bf16.msra.mxu1 %v8132_v53 }
 0x55e   :  { %6175 = vmatprep.subr.bf16.mxu1 %v8137_v40  ;;  %v6226_v44 = vadd.f32 %v7207_v19, %v3360_v21 }
 0x561   :  { %6176 = vmatpush1.bf16.msra.mxu1 %v8135_v20 }
 0x564   :  { %6178 = vmatmul.mubr.bf16.vlgmr.msra.gmra.mrb[12].mxu1 %v8711_v3 }
 0x578   :  { %v7224_v24 = vpop.f32.mrb[28].mxu0 }
 0x579   :  { %v7225_v54 = vpop.f32.mrb[29].mxu0 }
 0x57a   :  { %v7226_v26 = vadd.f32 %v7225_v54, %v7224_v24  ;;  %v7227_v27 = vpop.f32.mrb[30].mxu0 }
 0x57b   :  { %v7228_v43 = vpop.f32.mrb[31].mxu0 }
 0x57c   :  { %v6264_v47 = vadd.f32 %v7226_v26, %v6223_v13  ;;  %v7229_v49 = vadd.f32 %v7228_v43, %v7227_v27 }
 0x57e   :  { %v6267_v50 = vadd.f32 %v7229_v49, %v6226_v44 }
 0x598   :  { %v7246_v51 = vpop.f32.mrb[32].mxu0 }
 0x599   :  { %v7247_v55 = vpop.f32.mrb[33].mxu0 }
 0x59a   :  { %v7248_v52 = vadd.f32 %v7247_v55, %v7246_v51  ;;  %v7249_v57 = vpop.f32.mrb[34].mxu0 }
 0x59b   :  { %v7250_v37 = vpop.f32.mrb[35].mxu0 }
 0x59c   :  { %v6305_v3 = vadd.f32 %v7248_v52, %v6264_v47  ;;  %v7251_v58 = vadd.f32 %v7250_v37, %v7249_v57 }
 0x59e   :  { %v6308_v61 = vadd.f32 %v7251_v58, %v6267_v50 }
 0x5b8   :  { %v7268_v62 = vpop.f32.mrb[36].mxu0 }
 0x5b9   :  { %v7269_v5 = vpop.f32.mrb[37].mxu0 }
 0x5ba   :  { %v7270_v63 = vadd.f32 %v7269_v5, %v7268_v62  ;;  %v7271_v41 = vpop.f32.mrb[38].mxu0 }
 0x5bb   :  { %v7272_v0 = vpop.f32.mrb[39].mxu0 }
 0x5bc   :  { %v6346_v2 = vadd.f32 %v7270_v63, %v6305_v3  ;;  %v7273_v1 = vadd.f32 %v7272_v0, %v7271_v41 }
 0x5be   :  { %8154 = vtanh.f32 %v6346_v2  ;;  %v6349_v7 = vadd.f32 %v7273_v1, %v6308_v61 }
 0x5c0   :  { %8156 = vtanh.f32 %v6349_v7 }
 0x5c8   :  { %v8155_v8 = vpop.eup %8154 }
 0x5c9   :  { %6372 = vst [vmem:[#allocation17 + $0x30] sm:$0xff] %v8155_v8 }
 0x5ca   :  { %v8157_v10 = vpop.eup %8156 }
 0x5cb   :  { %6379 = vst [vmem:[#allocation17 + $0x68] sm:$0xff] %v8157_v10 }
 0x637   :  { %v6179_v12 = vpop.f32.mrb[12].mxu1 }
 0x638   :  { %v7298_v14 = vadd.f32 %v6179_v12, %v3352_v11  ;;  %v6181_v9 = vpop.f32.mrb[13].mxu1 }
 0x639   :  { %v7299_v17 = vadd.f32 %v6181_v9, %v3356_v56  ;;  %v6183_v15 = vpop.f32.mrb[14].mxu1 }
 0x63a   :  { %8158 = vtanh.f32 %v7298_v14  ;;  %v7300_v45 = vadd.f32 %v6183_v15, %v3352_v11  ;;  %v6185_v18 = vpop.f32.mrb[15].mxu1 }
 0x63b   :  { %8160 = vtanh.f32 %v7299_v17  ;;  %v7301_v22 = vadd.f32 %v6185_v18, %v3356_v56 }
 0x63c   :  { %8162 = vtanh.f32 %v7300_v45 }
 0x63d   :  { %8164 = vtanh.f32 %v7301_v22 }
 0x644   :  { %v8159_v23 = vpop.eup %8158 }
 0x645   :  { %v8161_v4 = vpop.eup %8160  ;;  %6370 = vst [vmem:[#allocation17 + $0x20] sm:$0xff] %v8159_v23 }
 0x646   :  { %v8163_v32 = vpop.eup %8162  ;;  %6371 = vst [vmem:[#allocation17 + $0x28] sm:$0xff] %v8161_v4 }
 0x647   :  { %v8165_v6 = vpop.eup %8164  ;;  %6377 = vst [vmem:[#allocation17 + $0x58] sm:$0xff] %v8163_v32 }
 0x648   :  { %6378 = vst [vmem:[#allocation17 + $0x60] sm:$0xff] %v8165_v6 }
 0x649   :  { %8375 = shalt.err (!%p8372_p6)
}
 0x64a   :  { %s8376_s28 = scalar_lea.hbm %s8782_s9, 1792 }
 0x64b   :  { %p8377_p7 = scmp.ne.s32.totalorder %s8782_s9, %s8376_s28  ;;  %p8380_p8 = scmp.lt.u32.totalorder %s8376_s28, %s8782_s9 }
 0x64d   :  { %p8382_p9 = pnand %p8380_p8, %p8377_p7 }
 0x64f   :  { %8385 = shalt.err (!%p8382_p9)
}
 0x650   :  { %s8419_s1 = smov 896   ;;  %s8420_s13 = smov 56  }
 0x651   :  { %6391 = dma.vmem_to_hbm [thread:$0]  %s6386_s26, 1792, %s8782_s9, [#allocation4], %s8419_s1, %s8419_s1, %s8420_s13  }
 0x652   :  { %8396 = dma.done.wait [#allocation4], 1792  }
 0x653   :  { %8397 = vsyncadd [#allocation4], 4294965504 }
 0x654   :  { %6395 = vsyncpa [#allocation3], 1 }
 0x655   :  { %6396 = vsyncpa [#allocation6], 1 }
 0x656   :  { %6397 = vsyncpa [#allocation9], 1 }
 0x657   :  { %6398 = vsyncpa [#allocation12], 1 }
 0x658   :  { %6399 = vsyncpa [#allocation15], 1 }
 0x659   :  { %6400 = vsyncpa [#allocation4], 1 }

</bundles_post_ra>
